<compile_context>
chip_gen: v7x
topology: tpu7x:2x2x1
jax: 0.10.0
libtpu: 0.0.40
codegen_flags: <defaults>
</compile_context>

<pallas_src>
import math
import jax
import jax.numpy as jnp
from jax import lax
from jax.experimental import pallas as pl
from jax.experimental.pallas import tpu as pltpu

# ---- configuration (Relaxed_TS_SteerConv(first_layer=True, last_layer=False)) ----
B       = 2                 # batch
C_IN    = 4                 # in_channels
C_OUT   = 8                 # out_channels
KSIZE   = 3                 # kernel_size
EFF     = 3                 # effective_size
NUM_FUNCS = EFF * EFF       # basis functions (basis.size(0))
SCALES  = [1.0, 1.4]
NS      = len(SCALES)       # num_scales
R       = 3                 # num_banks
PAD     = 1                 # padding -> 64x64 output, as required by comb weights
HW      = 64                # spatial size, fixed by combination_weights (64, 64, R)
HP      = HW + 2 * PAD      # 66 (vertically padded rows)
OUT_S   = C_OUT * NS        # 16  per-bank conv output channels (order o*NS + s)
NTOT    = R * OUT_S         # 48  fused channels across banks (order r*OUT_S + o*NS + s)
HWFLAT  = HW * HW           # 4096
KK      = KSIZE * KSIZE     # 9 taps

TR      = 8                 # output rows per in-kernel tile
TILE    = TR * HW           # 512 output pixels per tile (lane axis)
NTILES  = HW // TR          # 8
XFLAT   = HP * HW + 2       # 4226 = padded rows flattened + 1-elem shift margin each side
XT_FLAT = 4352              # lane-padded to a multiple of 128


def ts_steerconv_kernel(x_ref, w_ref, bt_ref, comb_ref, o_ref, slab_ref):
    # x_ref:    [C_IN, XT_FLAT]   vertically-padded image rows, flattened (width HW),
    #                             with a 1-element shift margin at the front
    # w_ref:    [NTOT, KK*C_IN]   fused steerable kernels; col = (kh*3+kw)*C_IN + c
    # bt_ref:   [OUT_S, R]        per-bank bias (repeated over scales), transposed
    # comb_ref: [R, HWFLAT]       combination weights, lane-dense over pixels
    # o_ref:    [OUT_S, HWFLAT]   combined output for this batch (relu applied)
    # slab_ref: [KK*C_IN, TILE]   VMEM scratch holding the stacked tap slabs

    # Horizontal zero-pad masks, built once: lane position within an output row.
    col = lax.broadcasted_iota(jnp.int32, (1, TILE), 1) % HW
    left_ok = col != 0            # kw==0 reads column j-1 -> j==0 is the zero pad
    right_ok = col != (HW - 1)    # kw==2 reads column j+1 -> j==63 is the zero pad

    w = w_ref[...]                # [NTOT, KK*C_IN]
    bt = bt_ref[...]              # [OUT_S, R]

    for t in range(NTILES):                                   # static in-kernel tile loop
        base = t * TILE
        # Assemble the stacked source slab [KK*C_IN, TILE]: every tap is a static
        # lane slice of the flat buffer; masked where the read wraps across rows.
        for kh in range(KSIZE):
            for kw in range(KSIZE):
                start = base + kh * HW + kw                   # static lane offset
                slab = x_ref[:, start:start + TILE]           # [C_IN, TILE]
                if kw == 0:
                    slab = jnp.where(left_ok, slab, 0.0)
                elif kw == 2:
                    slab = jnp.where(right_ok, slab, 0.0)
                tap = kh * KSIZE + kw
                slab_ref[tap * C_IN:(tap + 1) * C_IN, :] = slab

        # One fused MXU matmul over all 9 taps x 4 channels (K = 36).
        acc = jnp.dot(w, slab_ref[...],
                      preferred_element_type=jnp.float32)     # [NTOT, TILE]

        comb = comb_ref[:, base:base + TILE]                  # [R, TILE]
        # bias term: sum_r comb[r, p] * bias[r, o]  ==  bias_t @ comb
        res = jnp.dot(bt, comb, preferred_element_type=jnp.float32)   # [OUT_S, TILE]
        for r in range(R):
            res = res + comb[r:r + 1, :] * acc[r * OUT_S:(r + 1) * OUT_S, :]

        o_ref[:, base:base + TILE] = jnp.maximum(res, 0.0)    # last_layer=False -> ReLU


def ts_steerconv(x_nchw, w_k, bias_t, comb_t):
    """x_nchw: [B, C_IN, HW, HW] (PyTorch layout). Returns [B, C_OUT, NS, HW, HW]."""
    # Vertical zero pad, flatten rows, add a 1-element shift margin (front) and
    # lane padding (back).  No per-tile window materialization.
    x = jnp.pad(x_nchw, ((0, 0), (0, 0), (PAD, PAD), (0, 0)))          # [B, C_IN, HP, HW]
    buf = x.reshape(B, C_IN, HP * HW)
    buf = jnp.pad(buf, ((0, 0), (0, 0), (1, XT_FLAT - HP * HW - 1)))   # [B, C_IN, XT_FLAT]

    out = pl.pallas_call(
        ts_steerconv_kernel,
        out_shape=jax.ShapeDtypeStruct((B, OUT_S, HWFLAT), jnp.float32),
        grid_spec=pltpu.PrefetchScalarGridSpec(
            num_scalar_prefetch=0,
            grid=(B,),
            in_specs=[
                pl.BlockSpec((None, C_IN, XT_FLAT), lambda b: (b, 0, 0)),
                pl.BlockSpec((NTOT, KK * C_IN), lambda b: (0, 0)),
                pl.BlockSpec((OUT_S, R), lambda b: (0, 0)),
                pl.BlockSpec((R, HWFLAT), lambda b: (0, 0)),
            ],
            out_specs=pl.BlockSpec((None, OUT_S, HWFLAT), lambda b: (b, 0, 0)),
            scratch_shapes=[pltpu.VMEM((KK * C_IN, TILE), jnp.float32)],
        ),
        compiler_params=pltpu.CompilerParams(
            dimension_semantics=("parallel",)),
    )(buf, w_k, bias_t, comb_t)

    # [B, OUT_S, HW*HW] -> [B, C_OUT, NS, HW, HW]   (pure reshape, no transpose)
    return out.reshape(B, C_OUT, NS, HW, HW)


def build_params(key):
    kb, kw_, kbi, kc = jax.random.split(key, 4)
    # TODO(synk): steerable_A / normalize_basis_by_min_scale (Hermite-Gaussian basis
    # generation) code was not provided; the basis buffer is synthesized
    # deterministically with the same shape — forward compute structure is unchanged.
    basis = jax.random.normal(kb, (NUM_FUNCS, NS, KSIZE, KSIZE), jnp.float32)

    stdv = math.sqrt(1.0 / (KSIZE * KSIZE * C_IN * NUM_FUNCS))
    weights = jax.random.uniform(kw_, (R, C_OUT, C_IN, NUM_FUNCS, KSIZE, KSIZE),
                                 jnp.float32, -stdv, stdv)
    biases = 0.01 * jax.random.normal(kbi, (R, C_OUT), jnp.float32)
    # module init is ones/num_banks; tiny deterministic perturbation so the
    # spatially-varying combination path is actually exercised.
    comb = jnp.ones((HW, HW, R), jnp.float32) / R \
        + 0.01 * jax.random.normal(kc, (HW, HW, R), jnp.float32)

    # Per-bank effective conv kernel (einsum('abcde,csde->absde') + permute + view):
    #   [R, O, I, F, kh, kw] x [F, S, kh, kw] -> [R, O, S, I, kh, kw]
    k_eff = jnp.einsum('roifhw,fshw->rosihw', weights, basis)
    # fused-kernel matrix [NTOT, KK*C_IN]; rows n = r*OUT_S + o*NS + s,
    # cols = (kh*3 + kw)*C_IN + c
    w_k = k_eff.reshape(NTOT, C_IN, KSIZE, KSIZE)
    w_k = jnp.transpose(w_k, (0, 2, 3, 1)).reshape(NTOT, KK * C_IN)

    # bias broadcast over scales (channel order o*NS + s), transposed to [OUT_S, R]
    bias_t = jnp.transpose(jnp.repeat(biases[:, :, None], NS, axis=2).reshape(R, OUT_S))
    # combination weights transposed to [R, HW*HW] (lane-dense in the kernel)
    comb_t = jnp.transpose(comb.reshape(HWFLAT, R))
    return w_k, bias_t, comb_t


def reference(x_nchw, w_k, bias_t, comb_t):
    """Plain-JAX reference of the same forward pass."""
    w_hwio = w_k.reshape(NTOT, KSIZE, KSIZE, C_IN).transpose(1, 2, 3, 0)   # HWIO
    x = jnp.transpose(x_nchw, (0, 2, 3, 1))
    y = lax.conv_general_dilated(
        x, w_hwio, window_strides=(1, 1), padding=[(PAD, PAD), (PAD, PAD)],
        dimension_numbers=('NHWC', 'HWIO', 'NHWC'))                        # [B,HW,HW,NTOT]
    y = y.reshape(B, HW, HW, R, OUT_S) + bias_t.T[None, None, None]
    comb = comb_t.T.reshape(HW, HW, R)
    out = jnp.einsum('bhwrn,hwr->bhwn', y, comb)
    out = jnp.maximum(out, 0.0)
    out = out.reshape(B, HW, HW, C_OUT, NS)
    return jnp.transpose(out, (0, 3, 4, 1, 2))


if __name__ == "__main__":
    key = jax.random.PRNGKey(0)
    kx, kp = jax.random.split(key)
    x = jax.random.normal(kx, (B, C_IN, HW, HW), jnp.float32)   # NCHW like PyTorch

    w_k, bias_t, comb_t = build_params(kp)

    run = jax.jit(ts_steerconv)
    out = jax.block_until_ready(run(x, w_k, bias_t, comb_t))
    assert out.shape == (B, C_OUT, NS, HW, HW), out.shape

    ref = jax.block_until_ready(reference(x, w_k, bias_t, comb_t))
    max_err = float(jnp.max(jnp.abs(out - ref)))
    assert max_err < 5e-3, f"max abs error {max_err}"

    print("KERNEL_OK")
</pallas_src>

<mosaic_0001>
module attributes {stable_mosaic.version = 11 : i64} {
  func.func @ts_steerconv_kernel(%arg0: i32, %arg1: memref<1x4x4352xf32, #tpu.memory_space<vmem>>, %arg2: memref<48x36xf32, #tpu.memory_space<vmem>>, %arg3: memref<16x3xf32, #tpu.memory_space<vmem>>, %arg4: memref<3x4096xf32, #tpu.memory_space<vmem>>, %arg5: memref<1x16x4096xf32, #tpu.memory_space<vmem>>, %arg6: memref<36x512xf32, #tpu.memory_space<vmem>>) attributes {dimension_semantics = [#tpu.dimension_semantics<parallel>], iteration_bounds = array<i64: 2>, scalar_prefetch = 0 : i64, scratch_operands = 1 : i64, tpu.core_type = #tpu.core_type<tc>, window_params = [{transform_indices = @transform_0, window_bounds = array<i64: 1, 4, 4352>}, {pipeline_mode = #tpu.pipeline_mode<synchronous>, transform_indices = @transform_1, window_bounds = array<i64: 48, 36>}, {pipeline_mode = #tpu.pipeline_mode<synchronous>, transform_indices = @transform_2, window_bounds = array<i64: 16, 3>}, {pipeline_mode = #tpu.pipeline_mode<synchronous>, transform_indices = @transform_3, window_bounds = array<i64: 3, 4096>}, {transform_indices = @transform_4, window_bounds = array<i64: 1, 16, 4096>}]} {
    %0 = tpu.iota {dimensions = array<i32: 1>} : vector<1x512xi32>
    %c64_i32 = arith.constant 64 : i32
    %c0_i32 = arith.constant 0 : i32
    %1 = arith.cmpi eq, %c64_i32, %c0_i32 : i32
    %c1_i32 = arith.constant 1 : i32
    %2 = arith.select %1, %c1_i32, %c64_i32 : i32
    %3 = vector.broadcast %2 : i32 to vector<1x512xi32>
    %4 = arith.remsi %0, %3 : vector<1x512xi32>
    %c0_i32_0 = arith.constant 0 : i32
    %5 = vector.broadcast %c0_i32_0 : i32 to vector<1x512xi32>
    %6 = arith.cmpi ne, %4, %5 : vector<1x512xi32>
    %c0_i32_1 = arith.constant 0 : i32
    %7 = vector.broadcast %c0_i32_1 : i32 to vector<1x512xi32>
    %8 = arith.cmpi slt, %4, %7 : vector<1x512xi32>
    %c0_i32_2 = arith.constant 0 : i32
    %9 = arith.cmpi slt, %2, %c0_i32_2 : i32
    %10 = vector.broadcast %9 : i1 to vector<1x512xi1>
    %11 = vector.broadcast %10 : vector<1x512xi1> to vector<1x512xi1>
    %12 = arith.xori %8, %11 : vector<1x512xi1>
    %13 = arith.andi %12, %6 : vector<1x512xi1>
    %14 = vector.broadcast %2 : i32 to vector<1x512xi32>
    %15 = arith.addi %4, %14 : vector<1x512xi32>
    %16 = arith.select %13, %15, %4 : vector<1x512xi1>, vector<1x512xi32>
    %c0_i32_3 = arith.constant 0 : i32
    %17 = vector.broadcast %c0_i32_3 : i32 to vector<1x512xi32>
    %18 = arith.cmpi ne, %16, %17 : vector<1x512xi32>
    %c63_i32 = arith.constant 63 : i32
    %19 = vector.broadcast %c63_i32 : i32 to vector<1x512xi32>
    %20 = arith.cmpi ne, %16, %19 : vector<1x512xi32>
    %c0 = arith.constant 0 : index
    %c0_4 = arith.constant 0 : index
    %21 = vector.load %arg2[%c0, %c0_4] : memref<48x36xf32, #tpu.memory_space<vmem>>, vector<48x36xf32>
    %c0_5 = arith.constant 0 : index
    %c0_6 = arith.constant 0 : index
    %22 = vector.load %arg3[%c0_5, %c0_6] : memref<16x3xf32, #tpu.memory_space<vmem>>, vector<16x3xf32>
    %c0_7 = arith.constant 0 : index
    %c0_8 = arith.constant 0 : index
    %c0_9 = arith.constant 0 : index
    %23 = vector.load %arg1[%c0_7, %c0_8, %c0_9] : memref<1x4x4352xf32, #tpu.memory_space<vmem>>, vector<1x4x512xf32>
    %24 = vector.shape_cast %23 : vector<1x4x512xf32> to vector<4x512xf32>
    %cst = arith.constant 0.000000e+00 : f32
    %25 = vector.shape_cast %18 : vector<1x512xi1> to vector<1x512xi1>
    %26 = vector.broadcast %25 : vector<1x512xi1> to vector<4x512xi1>
    %27 = vector.broadcast %cst : f32 to vector<4x512xf32>
    %28 = arith.select %26, %24, %27 : vector<4x512xi1>, vector<4x512xf32>
    %c0_10 = arith.constant 0 : index
    %c0_11 = arith.constant 0 : index
    %29 = vector.load %arg6[%c0_10, %c0_11] : memref<36x512xf32, #tpu.memory_space<vmem>>, vector<4x512xf32>
    tpu.vector_store %arg6[%c0_10, %c0_11], %28 {strides = array<i32>} : memref<36x512xf32, #tpu.memory_space<vmem>>, vector<4x512xf32>,
    %c0_12 = arith.constant 0 : index
    %c0_13 = arith.constant 0 : index
    %c1 = arith.constant 1 : index
    %30 = vector.load %arg1[%c0_12, %c0_13, %c1] : memref<1x4x4352xf32, #tpu.memory_space<vmem>>, vector<1x4x512xf32>
    %31 = vector.shape_cast %30 : vector<1x4x512xf32> to vector<4x512xf32>
    %c4 = arith.constant 4 : index
    %c0_14 = arith.constant 0 : index
    %32 = vector.load %arg6[%c4, %c0_14] : memref<36x512xf32, #tpu.memory_space<vmem>>, vector<4x512xf32>
    tpu.vector_store %arg6[%c4, %c0_14], %31 {strides = array<i32>} : memref<36x512xf32, #tpu.memory_space<vmem>>, vector<4x512xf32>,
    %c0_15 = arith.constant 0 : index
    %c0_16 = arith.constant 0 : index
    %c2 = arith.constant 2 : index
    %33 = vector.load %arg1[%c0_15, %c0_16, %c2] : memref<1x4x4352xf32, #tpu.memory_space<vmem>>, vector<1x4x512xf32>
    %34 = vector.shape_cast %33 : vector<1x4x512xf32> to vector<4x512xf32>
    %cst_17 = arith.constant 0.000000e+00 : f32
    %35 = vector.shape_cast %20 : vector<1x512xi1> to vector<1x512xi1>
    %36 = vector.broadcast %35 : vector<1x512xi1> to vector<4x512xi1>
    %37 = vector.broadcast %cst_17 : f32 to vector<4x512xf32>
    %38 = arith.select %36, %34, %37 : vector<4x512xi1>, vector<4x512xf32>
    %c8 = arith.constant 8 : index
    %c0_18 = arith.constant 0 : index
    %39 = vector.load %arg6[%c8, %c0_18] : memref<36x512xf32, #tpu.memory_space<vmem>>, vector<4x512xf32>
    tpu.vector_store %arg6[%c8, %c0_18], %38 {strides = array<i32>} : memref<36x512xf32, #tpu.memory_space<vmem>>, vector<4x512xf32>,
    %c0_19 = arith.constant 0 : index
    %c0_20 = arith.constant 0 : index
    %c64 = arith.constant 64 : index
    %40 = vector.load %arg1[%c0_19, %c0_20, %c64] : memref<1x4x4352xf32, #tpu.memory_space<vmem>>, vector<1x4x512xf32>
    %41 = vector.shape_cast %40 : vector<1x4x512xf32> to vector<4x512xf32>
    %cst_21 = arith.constant 0.000000e+00 : f32
    %42 = vector.shape_cast %18 : vector<1x512xi1> to vector<1x512xi1>
    %43 = vector.broadcast %42 : vector<1x512xi1> to vector<4x512xi1>
    %44 = vector.broadcast %cst_21 : f32 to vector<4x512xf32>
    %45 = arith.select %43, %41, %44 : vector<4x512xi1>, vector<4x512xf32>
    %c12 = arith.constant 12 : index
    %c0_22 = arith.constant 0 : index
    %46 = vector.load %arg6[%c12, %c0_22] : memref<36x512xf32, #tpu.memory_space<vmem>>, vector<4x512xf32>
    tpu.vector_store %arg6[%c12, %c0_22], %45 {strides = array<i32>} : memref<36x512xf32, #tpu.memory_space<vmem>>, vector<4x512xf32>,
    %c0_23 = arith.constant 0 : index
    %c0_24 = arith.constant 0 : index
    %c65 = arith.constant 65 : index
    %47 = vector.load %arg1[%c0_23, %c0_24, %c65] : memref<1x4x4352xf32, #tpu.memory_space<vmem>>, vector<1x4x512xf32>
    %48 = vector.shape_cast %47 : vector<1x4x512xf32> to vector<4x512xf32>
    %c16 = arith.constant 16 : index
    %c0_25 = arith.constant 0 : index
    %49 = vector.load %arg6[%c16, %c0_25] : memref<36x512xf32, #tpu.memory_space<vmem>>, vector<4x512xf32>
    tpu.vector_store %arg6[%c16, %c0_25], %48 {strides = array<i32>} : memref<36x512xf32, #tpu.memory_space<vmem>>, vector<4x512xf32>,
    %c0_26 = arith.constant 0 : index
    %c0_27 = arith.constant 0 : index
    %c66 = arith.constant 66 : index
    %50 = vector.load %arg1[%c0_26, %c0_27, %c66] : memref<1x4x4352xf32, #tpu.memory_space<vmem>>, vector<1x4x512xf32>
    %51 = vector.shape_cast %50 : vector<1x4x512xf32> to vector<4x512xf32>
    %cst_28 = arith.constant 0.000000e+00 : f32
    %52 = vector.shape_cast %20 : vector<1x512xi1> to vector<1x512xi1>
    %53 = vector.broadcast %52 : vector<1x512xi1> to vector<4x512xi1>
    %54 = vector.broadcast %cst_28 : f32 to vector<4x512xf32>
    %55 = arith.select %53, %51, %54 : vector<4x512xi1>, vector<4x512xf32>
    %c20 = arith.constant 20 : index
    %c0_29 = arith.constant 0 : index
    %56 = vector.load %arg6[%c20, %c0_29] : memref<36x512xf32, #tpu.memory_space<vmem>>, vector<4x512xf32>
    tpu.vector_store %arg6[%c20, %c0_29], %55 {strides = array<i32>} : memref<36x512xf32, #tpu.memory_space<vmem>>, vector<4x512xf32>,
    %c0_30 = arith.constant 0 : index
    %c0_31 = arith.constant 0 : index
    %c128 = arith.constant 128 : index
    %57 = vector.load %arg1[%c0_30, %c0_31, %c128] : memref<1x4x4352xf32, #tpu.memory_space<vmem>>, vector<1x4x512xf32>
    %58 = vector.shape_cast %57 : vector<1x4x512xf32> to vector<4x512xf32>
    %cst_32 = arith.constant 0.000000e+00 : f32
    %59 = vector.shape_cast %18 : vector<1x512xi1> to vector<1x512xi1>
    %60 = vector.broadcast %59 : vector<1x512xi1> to vector<4x512xi1>
    %61 = vector.broadcast %cst_32 : f32 to vector<4x512xf32>
    %62 = arith.select %60, %58, %61 : vector<4x512xi1>, vector<4x512xf32>
    %c24 = arith.constant 24 : index
    %c0_33 = arith.constant 0 : index
    %63 = vector.load %arg6[%c24, %c0_33] : memref<36x512xf32, #tpu.memory_space<vmem>>, vector<4x512xf32>
    tpu.vector_store %arg6[%c24, %c0_33], %62 {strides = array<i32>} : memref<36x512xf32, #tpu.memory_space<vmem>>, vector<4x512xf32>,
    %c0_34 = arith.constant 0 : index
    %c0_35 = arith.constant 0 : index
    %c129 = arith.constant 129 : index
    %64 = vector.load %arg1[%c0_34, %c0_35, %c129] : memref<1x4x4352xf32, #tpu.memory_space<vmem>>, vector<1x4x512xf32>
    %65 = vector.shape_cast %64 : vector<1x4x512xf32> to vector<4x512xf32>
    %c28 = arith.constant 28 : index
    %c0_36 = arith.constant 0 : index
    %66 = vector.load %arg6[%c28, %c0_36] : memref<36x512xf32, #tpu.memory_space<vmem>>, vector<4x512xf32>
    tpu.vector_store %arg6[%c28, %c0_36], %65 {strides = array<i32>} : memref<36x512xf32, #tpu.memory_space<vmem>>, vector<4x512xf32>,
    %c0_37 = arith.constant 0 : index
    %c0_38 = arith.constant 0 : index
    %c130 = arith.constant 130 : index
    %67 = vector.load %arg1[%c0_37, %c0_38, %c130] : memref<1x4x4352xf32, #tpu.memory_space<vmem>>, vector<1x4x512xf32>
    %68 = vector.shape_cast %67 : vector<1x4x512xf32> to vector<4x512xf32>
    %cst_39 = arith.constant 0.000000e+00 : f32
    %69 = vector.shape_cast %20 : vector<1x512xi1> to vector<1x512xi1>
    %70 = vector.broadcast %69 : vector<1x512xi1> to vector<4x512xi1>
    %71 = vector.broadcast %cst_39 : f32 to vector<4x512xf32>
    %72 = arith.select %70, %68, %71 : vector<4x512xi1>, vector<4x512xf32>
    %c32 = arith.constant 32 : index
    %c0_40 = arith.constant 0 : index
    %73 = vector.load %arg6[%c32, %c0_40] : memref<36x512xf32, #tpu.memory_space<vmem>>, vector<4x512xf32>
    tpu.vector_store %arg6[%c32, %c0_40], %72 {strides = array<i32>} : memref<36x512xf32, #tpu.memory_space<vmem>>, vector<4x512xf32>,
    %c0_41 = arith.constant 0 : index
    %c0_42 = arith.constant 0 : index
    %74 = vector.load %arg6[%c0_41, %c0_42] : memref<36x512xf32, #tpu.memory_space<vmem>>, vector<36x512xf32>
    %cst_43 = arith.constant dense<0.000000e+00> : vector<48x512xf32>
    %75 = tpu.matmul %21, %74, %cst_43 {dimension_numbers = #tpu.dot_dimension_numbers<[1], [0], [0], [1], [0, 0, 1, 1], [], []>} : vector<48x36xf32>, vector<36x512xf32>, vector<48x512xf32> -> vector<48x512xf32>
    %c0_44 = arith.constant 0 : index
    %c0_45 = arith.constant 0 : index
    %76 = vector.load %arg4[%c0_44, %c0_45] : memref<3x4096xf32, #tpu.memory_space<vmem>>, vector<3x512xf32>
    %cst_46 = arith.constant dense<0.000000e+00> : vector<16x512xf32>
    %77 = tpu.matmul %22, %76, %cst_46 {dimension_numbers = #tpu.dot_dimension_numbers<[1], [0], [0], [1], [0, 0, 1, 1], [], []>} : vector<16x3xf32>, vector<3x512xf32>, vector<16x512xf32> -> vector<16x512xf32>
    %78 = vector.extract_strided_slice %76 {offsets = [0, 0], sizes = [1, 512], strides = [1, 1]} : vector<3x512xf32> to vector<1x512xf32>
    %79 = vector.extract_strided_slice %75 {offsets = [0, 0], sizes = [16, 512], strides = [1, 1]} : vector<48x512xf32> to vector<16x512xf32>
    %80 = vector.broadcast %78 : vector<1x512xf32> to vector<16x512xf32>
    %81 = arith.mulf %80, %79 : vector<16x512xf32>
    %82 = arith.addf %77, %81 : vector<16x512xf32>
    %83 = vector.extract_strided_slice %76 {offsets = [1, 0], sizes = [1, 512], strides = [1, 1]} : vector<3x512xf32> to vector<1x512xf32>
    %84 = vector.extract_strided_slice %75 {offsets = [16, 0], sizes = [16, 512], strides = [1, 1]} : vector<48x512xf32> to vector<16x512xf32>
    %85 = vector.broadcast %83 : vector<1x512xf32> to vector<16x512xf32>
    %86 = arith.mulf %85, %84 : vector<16x512xf32>
    %87 = arith.addf %82, %86 : vector<16x512xf32>
    %88 = vector.extract_strided_slice %76 {offsets = [2, 0], sizes = [1, 512], strides = [1, 1]} : vector<3x512xf32> to vector<1x512xf32>
    %89 = vector.extract_strided_slice %75 {offsets = [32, 0], sizes = [16, 512], strides = [1, 1]} : vector<48x512xf32> to vector<16x512xf32>
    %90 = vector.broadcast %88 : vector<1x512xf32> to vector<16x512xf32>
    %91 = arith.mulf %90, %89 : vector<16x512xf32>
    %92 = arith.addf %87, %91 : vector<16x512xf32>
    %cst_47 = arith.constant 0.000000e+00 : f32
    %93 = vector.broadcast %cst_47 : f32 to vector<16x512xf32>
    %94 = arith.maximumf %92, %93 : vector<16x512xf32>
    %c0_48 = arith.constant 0 : index
    %c0_49 = arith.constant 0 : index
    %c0_50 = arith.constant 0 : index
    %95 = vector.load %arg5[%c0_48, %c0_49, %c0_50] : memref<1x16x4096xf32, #tpu.memory_space<vmem>>, vector<1x16x512xf32>
    %96 = vector.shape_cast %95 : vector<1x16x512xf32> to vector<16x512xf32>
    %97 = vector.shape_cast %94 : vector<16x512xf32> to vector<1x16x512xf32>
    tpu.vector_store %arg5[%c0_48, %c0_49, %c0_50], %97 {strides = array<i32>} : memref<1x16x4096xf32, #tpu.memory_space<vmem>>, vector<1x16x512xf32>,
    %c0_51 = arith.constant 0 : index
    %c0_52 = arith.constant 0 : index
    %c512 = arith.constant 512 : index
    %98 = vector.load %arg1[%c0_51, %c0_52, %c512] : memref<1x4x4352xf32, #tpu.memory_space<vmem>>, vector<1x4x512xf32>
    %99 = vector.shape_cast %98 : vector<1x4x512xf32> to vector<4x512xf32>
    %cst_53 = arith.constant 0.000000e+00 : f32
    %100 = vector.shape_cast %18 : vector<1x512xi1> to vector<1x512xi1>
    %101 = vector.broadcast %100 : vector<1x512xi1> to vector<4x512xi1>
    %102 = vector.broadcast %cst_53 : f32 to vector<4x512xf32>
    %103 = arith.select %101, %99, %102 : vector<4x512xi1>, vector<4x512xf32>
    %c0_54 = arith.constant 0 : index
    %c0_55 = arith.constant 0 : index
    %104 = vector.load %arg6[%c0_54, %c0_55] : memref<36x512xf32, #tpu.memory_space<vmem>>, vector<4x512xf32>
    tpu.vector_store %arg6[%c0_54, %c0_55], %103 {strides = array<i32>} : memref<36x512xf32, #tpu.memory_space<vmem>>, vector<4x512xf32>,
    %c0_56 = arith.constant 0 : index
    %c0_57 = arith.constant 0 : index
    %c513 = arith.constant 513 : index
    %105 = vector.load %arg1[%c0_56, %c0_57, %c513] : memref<1x4x4352xf32, #tpu.memory_space<vmem>>, vector<1x4x512xf32>
    %106 = vector.shape_cast %105 : vector<1x4x512xf32> to vector<4x512xf32>
    %c4_58 = arith.constant 4 : index
    %c0_59 = arith.constant 0 : index
    %107 = vector.load %arg6[%c4_58, %c0_59] : memref<36x512xf32, #tpu.memory_space<vmem>>, vector<4x512xf32>
    tpu.vector_store %arg6[%c4_58, %c0_59], %106 {strides = array<i32>} : memref<36x512xf32, #tpu.memory_space<vmem>>, vector<4x512xf32>,
    %c0_60 = arith.constant 0 : index
    %c0_61 = arith.constant 0 : index
    %c514 = arith.constant 514 : index
    %108 = vector.load %arg1[%c0_60, %c0_61, %c514] : memref<1x4x4352xf32, #tpu.memory_space<vmem>>, vector<1x4x512xf32>
    %109 = vector.shape_cast %108 : vector<1x4x512xf32> to vector<4x512xf32>
    %cst_62 = arith.constant 0.000000e+00 : f32
    %110 = vector.shape_cast %20 : vector<1x512xi1> to vector<1x512xi1>
    %111 = vector.broadcast %110 : vector<1x512xi1> to vector<4x512xi1>
    %112 = vector.broadcast %cst_62 : f32 to vector<4x512xf32>
    %113 = arith.select %111, %109, %112 : vector<4x512xi1>, vector<4x512xf32>
    %c8_63 = arith.constant 8 : index
    %c0_64 = arith.constant 0 : index
    %114 = vector.load %arg6[%c8_63, %c0_64] : memref<36x512xf32, #tpu.memory_space<vmem>>, vector<4x512xf32>
    tpu.vector_store %arg6[%c8_63, %c0_64], %113 {strides = array<i32>} : memref<36x512xf32, #tpu.memory_space<vmem>>, vector<4x512xf32>,
    %c0_65 = arith.constant 0 : index
    %c0_66 = arith.constant 0 : index
    %c576 = arith.constant 576 : index
    %115 = vector.load %arg1[%c0_65, %c0_66, %c576] : memref<1x4x4352xf32, #tpu.memory_space<vmem>>, vector<1x4x512xf32>
    %116 = vector.shape_cast %115 : vector<1x4x512xf32> to vector<4x512xf32>
    %cst_67 = arith.constant 0.000000e+00 : f32
    %117 = vector.shape_cast %18 : vector<1x512xi1> to vector<1x512xi1>
    %118 = vector.broadcast %117 : vector<1x512xi1> to vector<4x512xi1>
    %119 = vector.broadcast %cst_67 : f32 to vector<4x512xf32>
    %120 = arith.select %118, %116, %119 : vector<4x512xi1>, vector<4x512xf32>
    %c12_68 = arith.constant 12 : index
    %c0_69 = arith.constant 0 : index
    %121 = vector.load %arg6[%c12_68, %c0_69] : memref<36x512xf32, #tpu.memory_space<vmem>>, vector<4x512xf32>
    tpu.vector_store %arg6[%c12_68, %c0_69], %120 {strides = array<i32>} : memref<36x512xf32, #tpu.memory_space<vmem>>, vector<4x512xf32>,
    %c0_70 = arith.constant 0 : index
    %c0_71 = arith.constant 0 : index
    %c577 = arith.constant 577 : index
    %122 = vector.load %arg1[%c0_70, %c0_71, %c577] : memref<1x4x4352xf32, #tpu.memory_space<vmem>>, vector<1x4x512xf32>
    %123 = vector.shape_cast %122 : vector<1x4x512xf32> to vector<4x512xf32>
    %c16_72 = arith.constant 16 : index
    %c0_73 = arith.constant 0 : index
    %124 = vector.load %arg6[%c16_72, %c0_73] : memref<36x512xf32, #tpu.memory_space<vmem>>, vector<4x512xf32>
    tpu.vector_store %arg6[%c16_72, %c0_73], %123 {strides = array<i32>} : memref<36x512xf32, #tpu.memory_space<vmem>>, vector<4x512xf32>,
    %c0_74 = arith.constant 0 : index
    %c0_75 = arith.constant 0 : index
    %c578 = arith.constant 578 : index
    %125 = vector.load %arg1[%c0_74, %c0_75, %c578] : memref<1x4x4352xf32, #tpu.memory_space<vmem>>, vector<1x4x512xf32>
    %126 = vector.shape_cast %125 : vector<1x4x512xf32> to vector<4x512xf32>
    %cst_76 = arith.constant 0.000000e+00 : f32
    %127 = vector.shape_cast %20 : vector<1x512xi1> to vector<1x512xi1>
    %128 = vector.broadcast %127 : vector<1x512xi1> to vector<4x512xi1>
    %129 = vector.broadcast %cst_76 : f32 to vector<4x512xf32>
    %130 = arith.select %128, %126, %129 : vector<4x512xi1>, vector<4x512xf32>
    %c20_77 = arith.constant 20 : index
    %c0_78 = arith.constant 0 : index
    %131 = vector.load %arg6[%c20_77, %c0_78] : memref<36x512xf32, #tpu.memory_space<vmem>>, vector<4x512xf32>
    tpu.vector_store %arg6[%c20_77, %c0_78], %130 {strides = array<i32>} : memref<36x512xf32, #tpu.memory_space<vmem>>, vector<4x512xf32>,
    %c0_79 = arith.constant 0 : index
    %c0_80 = arith.constant 0 : index
    %c640 = arith.constant 640 : index
    %132 = vector.load %arg1[%c0_79, %c0_80, %c640] : memref<1x4x4352xf32, #tpu.memory_space<vmem>>, vector<1x4x512xf32>
    %133 = vector.shape_cast %132 : vector<1x4x512xf32> to vector<4x512xf32>
    %cst_81 = arith.constant 0.000000e+00 : f32
    %134 = vector.shape_cast %18 : vector<1x512xi1> to vector<1x512xi1>
    %135 = vector.broadcast %134 : vector<1x512xi1> to vector<4x512xi1>
    %136 = vector.broadcast %cst_81 : f32 to vector<4x512xf32>
    %137 = arith.select %135, %133, %136 : vector<4x512xi1>, vector<4x512xf32>
    %c24_82 = arith.constant 24 : index
    %c0_83 = arith.constant 0 : index
    %138 = vector.load %arg6[%c24_82, %c0_83] : memref<36x512xf32, #tpu.memory_space<vmem>>, vector<4x512xf32>
    tpu.vector_store %arg6[%c24_82, %c0_83], %137 {strides = array<i32>} : memref<36x512xf32, #tpu.memory_space<vmem>>, vector<4x512xf32>,
    %c0_84 = arith.constant 0 : index
    %c0_85 = arith.constant 0 : index
    %c641 = arith.constant 641 : index
    %139 = vector.load %arg1[%c0_84, %c0_85, %c641] : memref<1x4x4352xf32, #tpu.memory_space<vmem>>, vector<1x4x512xf32>
    %140 = vector.shape_cast %139 : vector<1x4x512xf32> to vector<4x512xf32>
    %c28_86 = arith.constant 28 : index
    %c0_87 = arith.constant 0 : index
    %141 = vector.load %arg6[%c28_86, %c0_87] : memref<36x512xf32, #tpu.memory_space<vmem>>, vector<4x512xf32>
    tpu.vector_store %arg6[%c28_86, %c0_87], %140 {strides = array<i32>} : memref<36x512xf32, #tpu.memory_space<vmem>>, vector<4x512xf32>,
    %c0_88 = arith.constant 0 : index
    %c0_89 = arith.constant 0 : index
    %c642 = arith.constant 642 : index
    %142 = vector.load %arg1[%c0_88, %c0_89, %c642] : memref<1x4x4352xf32, #tpu.memory_space<vmem>>, vector<1x4x512xf32>
    %143 = vector.shape_cast %142 : vector<1x4x512xf32> to vector<4x512xf32>
    %cst_90 = arith.constant 0.000000e+00 : f32
    %144 = vector.shape_cast %20 : vector<1x512xi1> to vector<1x512xi1>
    %145 = vector.broadcast %144 : vector<1x512xi1> to vector<4x512xi1>
    %146 = vector.broadcast %cst_90 : f32 to vector<4x512xf32>
    %147 = arith.select %145, %143, %146 : vector<4x512xi1>, vector<4x512xf32>
    %c32_91 = arith.constant 32 : index
    %c0_92 = arith.constant 0 : index
    %148 = vector.load %arg6[%c32_91, %c0_92] : memref<36x512xf32, #tpu.memory_space<vmem>>, vector<4x512xf32>
    tpu.vector_store %arg6[%c32_91, %c0_92], %147 {strides = array<i32>} : memref<36x512xf32, #tpu.memory_space<vmem>>, vector<4x512xf32>,
    %c0_93 = arith.constant 0 : index
    %c0_94 = arith.constant 0 : index
    %149 = vector.load %arg6[%c0_93, %c0_94] : memref<36x512xf32, #tpu.memory_space<vmem>>, vector<36x512xf32>
    %cst_95 = arith.constant dense<0.000000e+00> : vector<48x512xf32>
    %150 = tpu.matmul %21, %149, %cst_95 {dimension_numbers = #tpu.dot_dimension_numbers<[1], [0], [0], [1], [0, 0, 1, 1], [], []>} : vector<48x36xf32>, vector<36x512xf32>, vector<48x512xf32> -> vector<48x512xf32>
    %c0_96 = arith.constant 0 : index
    %c512_97 = arith.constant 512 : index
    %151 = vector.load %arg4[%c0_96, %c512_97] : memref<3x4096xf32, #tpu.memory_space<vmem>>, vector<3x512xf32>
    %cst_98 = arith.constant dense<0.000000e+00> : vector<16x512xf32>
    %152 = tpu.matmul %22, %151, %cst_98 {dimension_numbers = #tpu.dot_dimension_numbers<[1], [0], [0], [1], [0, 0, 1, 1], [], []>} : vector<16x3xf32>, vector<3x512xf32>, vector<16x512xf32> -> vector<16x512xf32>
    %153 = vector.extract_strided_slice %151 {offsets = [0, 0], sizes = [1, 512], strides = [1, 1]} : vector<3x512xf32> to vector<1x512xf32>
    %154 = vector.extract_strided_slice %150 {offsets = [0, 0], sizes = [16, 512], strides = [1, 1]} : vector<48x512xf32> to vector<16x512xf32>
    %155 = vector.broadcast %153 : vector<1x512xf32> to vector<16x512xf32>
    %156 = arith.mulf %155, %154 : vector<16x512xf32>
    %157 = arith.addf %152, %156 : vector<16x512xf32>
    %158 = vector.extract_strided_slice %151 {offsets = [1, 0], sizes = [1, 512], strides = [1, 1]} : vector<3x512xf32> to vector<1x512xf32>
    %159 = vector.extract_strided_slice %150 {offsets = [16, 0], sizes = [16, 512], strides = [1, 1]} : vector<48x512xf32> to vector<16x512xf32>
    %160 = vector.broadcast %158 : vector<1x512xf32> to vector<16x512xf32>
    %161 = arith.mulf %160, %159 : vector<16x512xf32>
    %162 = arith.addf %157, %161 : vector<16x512xf32>
    %163 = vector.extract_strided_slice %151 {offsets = [2, 0], sizes = [1, 512], strides = [1, 1]} : vector<3x512xf32> to vector<1x512xf32>
    %164 = vector.extract_strided_slice %150 {offsets = [32, 0], sizes = [16, 512], strides = [1, 1]} : vector<48x512xf32> to vector<16x512xf32>
    %165 = vector.broadcast %163 : vector<1x512xf32> to vector<16x512xf32>
    %166 = arith.mulf %165, %164 : vector<16x512xf32>
    %167 = arith.addf %162, %166 : vector<16x512xf32>
    %cst_99 = arith.constant 0.000000e+00 : f32
    %168 = vector.broadcast %cst_99 : f32 to vector<16x512xf32>
    %169 = arith.maximumf %167, %168 : vector<16x512xf32>
    %c0_100 = arith.constant 0 : index
    %c0_101 = arith.constant 0 : index
    %c512_102 = arith.constant 512 : index
    %170 = vector.load %arg5[%c0_100, %c0_101, %c512_102] : memref<1x16x4096xf32, #tpu.memory_space<vmem>>, vector<1x16x512xf32>
    %171 = vector.shape_cast %170 : vector<1x16x512xf32> to vector<16x512xf32>
    %172 = vector.shape_cast %169 : vector<16x512xf32> to vector<1x16x512xf32>
    tpu.vector_store %arg5[%c0_100, %c0_101, %c512_102], %172 {strides = array<i32>} : memref<1x16x4096xf32, #tpu.memory_space<vmem>>, vector<1x16x512xf32>,
    %c0_103 = arith.constant 0 : index
    %c0_104 = arith.constant 0 : index
    %c1024 = arith.constant 1024 : index
    %173 = vector.load %arg1[%c0_103, %c0_104, %c1024] : memref<1x4x4352xf32, #tpu.memory_space<vmem>>, vector<1x4x512xf32>
    %174 = vector.shape_cast %173 : vector<1x4x512xf32> to vector<4x512xf32>
    %cst_105 = arith.constant 0.000000e+00 : f32
    %175 = vector.shape_cast %18 : vector<1x512xi1> to vector<1x512xi1>
    %176 = vector.broadcast %175 : vector<1x512xi1> to vector<4x512xi1>
    %177 = vector.broadcast %cst_105 : f32 to vector<4x512xf32>
    %178 = arith.select %176, %174, %177 : vector<4x512xi1>, vector<4x512xf32>
    %c0_106 = arith.constant 0 : index
    %c0_107 = arith.constant 0 : index
    %179 = vector.load %arg6[%c0_106, %c0_107] : memref<36x512xf32, #tpu.memory_space<vmem>>, vector<4x512xf32>
    tpu.vector_store %arg6[%c0_106, %c0_107], %178 {strides = array<i32>} : memref<36x512xf32, #tpu.memory_space<vmem>>, vector<4x512xf32>,
    %c0_108 = arith.constant 0 : index
    %c0_109 = arith.constant 0 : index
    %c1025 = arith.constant 1025 : index
    %180 = vector.load %arg1[%c0_108, %c0_109, %c1025] : memref<1x4x4352xf32, #tpu.memory_space<vmem>>, vector<1x4x512xf32>
    %181 = vector.shape_cast %180 : vector<1x4x512xf32> to vector<4x512xf32>
    %c4_110 = arith.constant 4 : index
    %c0_111 = arith.constant 0 : index
    %182 = vector.load %arg6[%c4_110, %c0_111] : memref<36x512xf32, #tpu.memory_space<vmem>>, vector<4x512xf32>
    tpu.vector_store %arg6[%c4_110, %c0_111], %181 {strides = array<i32>} : memref<36x512xf32, #tpu.memory_space<vmem>>, vector<4x512xf32>,
    %c0_112 = arith.constant 0 : index
    %c0_113 = arith.constant 0 : index
    %c1026 = arith.constant 1026 : index
    %183 = vector.load %arg1[%c0_112, %c0_113, %c1026] : memref<1x4x4352xf32, #tpu.memory_space<vmem>>, vector<1x4x512xf32>
    %184 = vector.shape_cast %183 : vector<1x4x512xf32> to vector<4x512xf32>
    %cst_114 = arith.constant 0.000000e+00 : f32
    %185 = vector.shape_cast %20 : vector<1x512xi1> to vector<1x512xi1>
    %186 = vector.broadcast %185 : vector<1x512xi1> to vector<4x512xi1>
    %187 = vector.broadcast %cst_114 : f32 to vector<4x512xf32>
    %188 = arith.select %186, %184, %187 : vector<4x512xi1>, vector<4x512xf32>
    %c8_115 = arith.constant 8 : index
    %c0_116 = arith.constant 0 : index
    %189 = vector.load %arg6[%c8_115, %c0_116] : memref<36x512xf32, #tpu.memory_space<vmem>>, vector<4x512xf32>
    tpu.vector_store %arg6[%c8_115, %c0_116], %188 {strides = array<i32>} : memref<36x512xf32, #tpu.memory_space<vmem>>, vector<4x512xf32>,
    %c0_117 = arith.constant 0 : index
    %c0_118 = arith.constant 0 : index
    %c1088 = arith.constant 1088 : index
    %190 = vector.load %arg1[%c0_117, %c0_118, %c1088] : memref<1x4x4352xf32, #tpu.memory_space<vmem>>, vector<1x4x512xf32>
    %191 = vector.shape_cast %190 : vector<1x4x512xf32> to vector<4x512xf32>
    %cst_119 = arith.constant 0.000000e+00 : f32
    %192 = vector.shape_cast %18 : vector<1x512xi1> to vector<1x512xi1>
    %193 = vector.broadcast %192 : vector<1x512xi1> to vector<4x512xi1>
    %194 = vector.broadcast %cst_119 : f32 to vector<4x512xf32>
    %195 = arith.select %193, %191, %194 : vector<4x512xi1>, vector<4x512xf32>
    %c12_120 = arith.constant 12 : index
    %c0_121 = arith.constant 0 : index
    %196 = vector.load %arg6[%c12_120, %c0_121] : memref<36x512xf32, #tpu.memory_space<vmem>>, vector<4x512xf32>
    tpu.vector_store %arg6[%c12_120, %c0_121], %195 {strides = array<i32>} : memref<36x512xf32, #tpu.memory_space<vmem>>, vector<4x512xf32>,
    %c0_122 = arith.constant 0 : index
    %c0_123 = arith.constant 0 : index
    %c1089 = arith.constant 1089 : index
    %197 = vector.load %arg1[%c0_122, %c0_123, %c1089] : memref<1x4x4352xf32, #tpu.memory_space<vmem>>, vector<1x4x512xf32>
    %198 = vector.shape_cast %197 : vector<1x4x512xf32> to vector<4x512xf32>
    %c16_124 = arith.constant 16 : index
    %c0_125 = arith.constant 0 : index
    %199 = vector.load %arg6[%c16_124, %c0_125] : memref<36x512xf32, #tpu.memory_space<vmem>>, vector<4x512xf32>
    tpu.vector_store %arg6[%c16_124, %c0_125], %198 {strides = array<i32>} : memref<36x512xf32, #tpu.memory_space<vmem>>, vector<4x512xf32>,
    %c0_126 = arith.constant 0 : index
    %c0_127 = arith.constant 0 : index
    %c1090 = arith.constant 1090 : index
    %200 = vector.load %arg1[%c0_126, %c0_127, %c1090] : memref<1x4x4352xf32, #tpu.memory_space<vmem>>, vector<1x4x512xf32>
    %201 = vector.shape_cast %200 : vector<1x4x512xf32> to vector<4x512xf32>
    %cst_128 = arith.constant 0.000000e+00 : f32
    %202 = vector.shape_cast %20 : vector<1x512xi1> to vector<1x512xi1>
    %203 = vector.broadcast %202 : vector<1x512xi1> to vector<4x512xi1>
    %204 = vector.broadcast %cst_128 : f32 to vector<4x512xf32>
    %205 = arith.select %203, %201, %204 : vector<4x512xi1>, vector<4x512xf32>
    %c20_129 = arith.constant 20 : index
    %c0_130 = arith.constant 0 : index
    %206 = vector.load %arg6[%c20_129, %c0_130] : memref<36x512xf32, #tpu.memory_space<vmem>>, vector<4x512xf32>
    tpu.vector_store %arg6[%c20_129, %c0_130], %205 {strides = array<i32>} : memref<36x512xf32, #tpu.memory_space<vmem>>, vector<4x512xf32>,
    %c0_131 = arith.constant 0 : index
    %c0_132 = arith.constant 0 : index
    %c1152 = arith.constant 1152 : index
    %207 = vector.load %arg1[%c0_131, %c0_132, %c1152] : memref<1x4x4352xf32, #tpu.memory_space<vmem>>, vector<1x4x512xf32>
    %208 = vector.shape_cast %207 : vector<1x4x512xf32> to vector<4x512xf32>
    %cst_133 = arith.constant 0.000000e+00 : f32
    %209 = vector.shape_cast %18 : vector<1x512xi1> to vector<1x512xi1>
    %210 = vector.broadcast %209 : vector<1x512xi1> to vector<4x512xi1>
    %211 = vector.broadcast %cst_133 : f32 to vector<4x512xf32>
    %212 = arith.select %210, %208, %211 : vector<4x512xi1>, vector<4x512xf32>
    %c24_134 = arith.constant 24 : index
    %c0_135 = arith.constant 0 : index
    %213 = vector.load %arg6[%c24_134, %c0_135] : memref<36x512xf32, #tpu.memory_space<vmem>>, vector<4x512xf32>
    tpu.vector_store %arg6[%c24_134, %c0_135], %212 {strides = array<i32>} : memref<36x512xf32, #tpu.memory_space<vmem>>, vector<4x512xf32>,
    %c0_136 = arith.constant 0 : index
    %c0_137 = arith.constant 0 : index
    %c1153 = arith.constant 1153 : index
    %214 = vector.load %arg1[%c0_136, %c0_137, %c1153] : memref<1x4x4352xf32, #tpu.memory_space<vmem>>, vector<1x4x512xf32>
    %215 = vector.shape_cast %214 : vector<1x4x512xf32> to vector<4x512xf32>
    %c28_138 = arith.constant 28 : index
    %c0_139 = arith.constant 0 : index
    %216 = vector.load %arg6[%c28_138, %c0_139] : memref<36x512xf32, #tpu.memory_space<vmem>>, vector<4x512xf32>
    tpu.vector_store %arg6[%c28_138, %c0_139], %215 {strides = array<i32>} : memref<36x512xf32, #tpu.memory_space<vmem>>, vector<4x512xf32>,
    %c0_140 = arith.constant 0 : index
    %c0_141 = arith.constant 0 : index
    %c1154 = arith.constant 1154 : index
    %217 = vector.load %arg1[%c0_140, %c0_141, %c1154] : memref<1x4x4352xf32, #tpu.memory_space<vmem>>, vector<1x4x512xf32>
    %218 = vector.shape_cast %217 : vector<1x4x512xf32> to vector<4x512xf32>
    %cst_142 = arith.constant 0.000000e+00 : f32
    %219 = vector.shape_cast %20 : vector<1x512xi1> to vector<1x512xi1>
    %220 = vector.broadcast %219 : vector<1x512xi1> to vector<4x512xi1>
    %221 = vector.broadcast %cst_142 : f32 to vector<4x512xf32>
    %222 = arith.select %220, %218, %221 : vector<4x512xi1>, vector<4x512xf32>
    %c32_143 = arith.constant 32 : index
    %c0_144 = arith.constant 0 : index
    %223 = vector.load %arg6[%c32_143, %c0_144] : memref<36x512xf32, #tpu.memory_space<vmem>>, vector<4x512xf32>
    tpu.vector_store %arg6[%c32_143, %c0_144], %222 {strides = array<i32>} : memref<36x512xf32, #tpu.memory_space<vmem>>, vector<4x512xf32>,
    %c0_145 = arith.constant 0 : index
    %c0_146 = arith.constant 0 : index
    %224 = vector.load %arg6[%c0_145, %c0_146] : memref<36x512xf32, #tpu.memory_space<vmem>>, vector<36x512xf32>
    %cst_147 = arith.constant dense<0.000000e+00> : vector<48x512xf32>
    %225 = tpu.matmul %21, %224, %cst_147 {dimension_numbers = #tpu.dot_dimension_numbers<[1], [0], [0], [1], [0, 0, 1, 1], [], []>} : vector<48x36xf32>, vector<36x512xf32>, vector<48x512xf32> -> vector<48x512xf32>
    %c0_148 = arith.constant 0 : index
    %c1024_149 = arith.constant 1024 : index
    %226 = vector.load %arg4[%c0_148, %c1024_149] : memref<3x4096xf32, #tpu.memory_space<vmem>>, vector<3x512xf32>
    %cst_150 = arith.constant dense<0.000000e+00> : vector<16x512xf32>
    %227 = tpu.matmul %22, %226, %cst_150 {dimension_numbers = #tpu.dot_dimension_numbers<[1], [0], [0], [1], [0, 0, 1, 1], [], []>} : vector<16x3xf32>, vector<3x512xf32>, vector<16x512xf32> -> vector<16x512xf32>
    %228 = vector.extract_strided_slice %226 {offsets = [0, 0], sizes = [1, 512], strides = [1, 1]} : vector<3x512xf32> to vector<1x512xf32>
    %229 = vector.extract_strided_slice %225 {offsets = [0, 0], sizes = [16, 512], strides = [1, 1]} : vector<48x512xf32> to vector<16x512xf32>
    %230 = vector.broadcast %228 : vector<1x512xf32> to vector<16x512xf32>
    %231 = arith.mulf %230, %229 : vector<16x512xf32>
    %232 = arith.addf %227, %231 : vector<16x512xf32>
    %233 = vector.extract_strided_slice %226 {offsets = [1, 0], sizes = [1, 512], strides = [1, 1]} : vector<3x512xf32> to vector<1x512xf32>
    %234 = vector.extract_strided_slice %225 {offsets = [16, 0], sizes = [16, 512], strides = [1, 1]} : vector<48x512xf32> to vector<16x512xf32>
    %235 = vector.broadcast %233 : vector<1x512xf32> to vector<16x512xf32>
    %236 = arith.mulf %235, %234 : vector<16x512xf32>
    %237 = arith.addf %232, %236 : vector<16x512xf32>
    %238 = vector.extract_strided_slice %226 {offsets = [2, 0], sizes = [1, 512], strides = [1, 1]} : vector<3x512xf32> to vector<1x512xf32>
    %239 = vector.extract_strided_slice %225 {offsets = [32, 0], sizes = [16, 512], strides = [1, 1]} : vector<48x512xf32> to vector<16x512xf32>
    %240 = vector.broadcast %238 : vector<1x512xf32> to vector<16x512xf32>
    %241 = arith.mulf %240, %239 : vector<16x512xf32>
    %242 = arith.addf %237, %241 : vector<16x512xf32>
    %cst_151 = arith.constant 0.000000e+00 : f32
    %243 = vector.broadcast %cst_151 : f32 to vector<16x512xf32>
    %244 = arith.maximumf %242, %243 : vector<16x512xf32>
    %c0_152 = arith.constant 0 : index
    %c0_153 = arith.constant 0 : index
    %c1024_154 = arith.constant 1024 : index
    %245 = vector.load %arg5[%c0_152, %c0_153, %c1024_154] : memref<1x16x4096xf32, #tpu.memory_space<vmem>>, vector<1x16x512xf32>
    %246 = vector.shape_cast %245 : vector<1x16x512xf32> to vector<16x512xf32>
    %247 = vector.shape_cast %244 : vector<16x512xf32> to vector<1x16x512xf32>
    tpu.vector_store %arg5[%c0_152, %c0_153, %c1024_154], %247 {strides = array<i32>} : memref<1x16x4096xf32, #tpu.memory_space<vmem>>, vector<1x16x512xf32>,
    %c0_155 = arith.constant 0 : index
    %c0_156 = arith.constant 0 : index
    %c1536 = arith.constant 1536 : index
    %248 = vector.load %arg1[%c0_155, %c0_156, %c1536] : memref<1x4x4352xf32, #tpu.memory_space<vmem>>, vector<1x4x512xf32>
    %249 = vector.shape_cast %248 : vector<1x4x512xf32> to vector<4x512xf32>
    %cst_157 = arith.constant 0.000000e+00 : f32
    %250 = vector.shape_cast %18 : vector<1x512xi1> to vector<1x512xi1>
    %251 = vector.broadcast %250 : vector<1x512xi1> to vector<4x512xi1>
    %252 = vector.broadcast %cst_157 : f32 to vector<4x512xf32>
    %253 = arith.select %251, %249, %252 : vector<4x512xi1>, vector<4x512xf32>
    %c0_158 = arith.constant 0 : index
    %c0_159 = arith.constant 0 : index
    %254 = vector.load %arg6[%c0_158, %c0_159] : memref<36x512xf32, #tpu.memory_space<vmem>>, vector<4x512xf32>
    tpu.vector_store %arg6[%c0_158, %c0_159], %253 {strides = array<i32>} : memref<36x512xf32, #tpu.memory_space<vmem>>, vector<4x512xf32>,
    %c0_160 = arith.constant 0 : index
    %c0_161 = arith.constant 0 : index
    %c1537 = arith.constant 1537 : index
    %255 = vector.load %arg1[%c0_160, %c0_161, %c1537] : memref<1x4x4352xf32, #tpu.memory_space<vmem>>, vector<1x4x512xf32>
    %256 = vector.shape_cast %255 : vector<1x4x512xf32> to vector<4x512xf32>
    %c4_162 = arith.constant 4 : index
    %c0_163 = arith.constant 0 : index
    %257 = vector.load %arg6[%c4_162, %c0_163] : memref<36x512xf32, #tpu.memory_space<vmem>>, vector<4x512xf32>
    tpu.vector_store %arg6[%c4_162, %c0_163], %256 {strides = array<i32>} : memref<36x512xf32, #tpu.memory_space<vmem>>, vector<4x512xf32>,
    %c0_164 = arith.constant 0 : index
    %c0_165 = arith.constant 0 : index
    %c1538 = arith.constant 1538 : index
    %258 = vector.load %arg1[%c0_164, %c0_165, %c1538] : memref<1x4x4352xf32, #tpu.memory_space<vmem>>, vector<1x4x512xf32>
    %259 = vector.shape_cast %258 : vector<1x4x512xf32> to vector<4x512xf32>
    %cst_166 = arith.constant 0.000000e+00 : f32
    %260 = vector.shape_cast %20 : vector<1x512xi1> to vector<1x512xi1>
    %261 = vector.broadcast %260 : vector<1x512xi1> to vector<4x512xi1>
    %262 = vector.broadcast %cst_166 : f32 to vector<4x512xf32>
    %263 = arith.select %261, %259, %262 : vector<4x512xi1>, vector<4x512xf32>
    %c8_167 = arith.constant 8 : index
    %c0_168 = arith.constant 0 : index
    %264 = vector.load %arg6[%c8_167, %c0_168] : memref<36x512xf32, #tpu.memory_space<vmem>>, vector<4x512xf32>
    tpu.vector_store %arg6[%c8_167, %c0_168], %263 {strides = array<i32>} : memref<36x512xf32, #tpu.memory_space<vmem>>, vector<4x512xf32>,
    %c0_169 = arith.constant 0 : index
    %c0_170 = arith.constant 0 : index
    %c1600 = arith.constant 1600 : index
    %265 = vector.load %arg1[%c0_169, %c0_170, %c1600] : memref<1x4x4352xf32, #tpu.memory_space<vmem>>, vector<1x4x512xf32>
    %266 = vector.shape_cast %265 : vector<1x4x512xf32> to vector<4x512xf32>
    %cst_171 = arith.constant 0.000000e+00 : f32
    %267 = vector.shape_cast %18 : vector<1x512xi1> to vector<1x512xi1>
    %268 = vector.broadcast %267 : vector<1x512xi1> to vector<4x512xi1>
    %269 = vector.broadcast %cst_171 : f32 to vector<4x512xf32>
    %270 = arith.select %268, %266, %269 : vector<4x512xi1>, vector<4x512xf32>
    %c12_172 = arith.constant 12 : index
    %c0_173 = arith.constant 0 : index
    %271 = vector.load %arg6[%c12_172, %c0_173] : memref<36x512xf32, #tpu.memory_space<vmem>>, vector<4x512xf32>
    tpu.vector_store %arg6[%c12_172, %c0_173], %270 {strides = array<i32>} : memref<36x512xf32, #tpu.memory_space<vmem>>, vector<4x512xf32>,
    %c0_174 = arith.constant 0 : index
    %c0_175 = arith.constant 0 : index
    %c1601 = arith.constant 1601 : index
    %272 = vector.load %arg1[%c0_174, %c0_175, %c1601] : memref<1x4x4352xf32, #tpu.memory_space<vmem>>, vector<1x4x512xf32>
    %273 = vector.shape_cast %272 : vector<1x4x512xf32> to vector<4x512xf32>
    %c16_176 = arith.constant 16 : index
    %c0_177 = arith.constant 0 : index
    %274 = vector.load %arg6[%c16_176, %c0_177] : memref<36x512xf32, #tpu.memory_space<vmem>>, vector<4x512xf32>
    tpu.vector_store %arg6[%c16_176, %c0_177], %273 {strides = array<i32>} : memref<36x512xf32, #tpu.memory_space<vmem>>, vector<4x512xf32>,
    %c0_178 = arith.constant 0 : index
    %c0_179 = arith.constant 0 : index
    %c1602 = arith.constant 1602 : index
    %275 = vector.load %arg1[%c0_178, %c0_179, %c1602] : memref<1x4x4352xf32, #tpu.memory_space<vmem>>, vector<1x4x512xf32>
    %276 = vector.shape_cast %275 : vector<1x4x512xf32> to vector<4x512xf32>
    %cst_180 = arith.constant 0.000000e+00 : f32
    %277 = vector.shape_cast %20 : vector<1x512xi1> to vector<1x512xi1>
    %278 = vector.broadcast %277 : vector<1x512xi1> to vector<4x512xi1>
    %279 = vector.broadcast %cst_180 : f32 to vector<4x512xf32>
    %280 = arith.select %278, %276, %279 : vector<4x512xi1>, vector<4x512xf32>
    %c20_181 = arith.constant 20 : index
    %c0_182 = arith.constant 0 : index
    %281 = vector.load %arg6[%c20_181, %c0_182] : memref<36x512xf32, #tpu.memory_space<vmem>>, vector<4x512xf32>
    tpu.vector_store %arg6[%c20_181, %c0_182], %280 {strides = array<i32>} : memref<36x512xf32, #tpu.memory_space<vmem>>, vector<4x512xf32>,
    %c0_183 = arith.constant 0 : index
    %c0_184 = arith.constant 0 : index
    %c1664 = arith.constant 1664 : index
    %282 = vector.load %arg1[%c0_183, %c0_184, %c1664] : memref<1x4x4352xf32, #tpu.memory_space<vmem>>, vector<1x4x512xf32>
    %283 = vector.shape_cast %282 : vector<1x4x512xf32> to vector<4x512xf32>
    %cst_185 = arith.constant 0.000000e+00 : f32
    %284 = vector.shape_cast %18 : vector<1x512xi1> to vector<1x512xi1>
    %285 = vector.broadcast %284 : vector<1x512xi1> to vector<4x512xi1>
    %286 = vector.broadcast %cst_185 : f32 to vector<4x512xf32>
    %287 = arith.select %285, %283, %286 : vector<4x512xi1>, vector<4x512xf32>
    %c24_186 = arith.constant 24 : index
    %c0_187 = arith.constant 0 : index
    %288 = vector.load %arg6[%c24_186, %c0_187] : memref<36x512xf32, #tpu.memory_space<vmem>>, vector<4x512xf32>
    tpu.vector_store %arg6[%c24_186, %c0_187], %287 {strides = array<i32>} : memref<36x512xf32, #tpu.memory_space<vmem>>, vector<4x512xf32>,
    %c0_188 = arith.constant 0 : index
    %c0_189 = arith.constant 0 : index
    %c1665 = arith.constant 1665 : index
    %289 = vector.load %arg1[%c0_188, %c0_189, %c1665] : memref<1x4x4352xf32, #tpu.memory_space<vmem>>, vector<1x4x512xf32>
    %290 = vector.shape_cast %289 : vector<1x4x512xf32> to vector<4x512xf32>
    %c28_190 = arith.constant 28 : index
    %c0_191 = arith.constant 0 : index
    %291 = vector.load %arg6[%c28_190, %c0_191] : memref<36x512xf32, #tpu.memory_space<vmem>>, vector<4x512xf32>
    tpu.vector_store %arg6[%c28_190, %c0_191], %290 {strides = array<i32>} : memref<36x512xf32, #tpu.memory_space<vmem>>, vector<4x512xf32>,
    %c0_192 = arith.constant 0 : index
    %c0_193 = arith.constant 0 : index
    %c1666 = arith.constant 1666 : index
    %292 = vector.load %arg1[%c0_192, %c0_193, %c1666] : memref<1x4x4352xf32, #tpu.memory_space<vmem>>, vector<1x4x512xf32>
    %293 = vector.shape_cast %292 : vector<1x4x512xf32> to vector<4x512xf32>
    %cst_194 = arith.constant 0.000000e+00 : f32
    %294 = vector.shape_cast %20 : vector<1x512xi1> to vector<1x512xi1>
    %295 = vector.broadcast %294 : vector<1x512xi1> to vector<4x512xi1>
    %296 = vector.broadcast %cst_194 : f32 to vector<4x512xf32>
    %297 = arith.select %295, %293, %296 : vector<4x512xi1>, vector<4x512xf32>
    %c32_195 = arith.constant 32 : index
    %c0_196 = arith.constant 0 : index
    %298 = vector.load %arg6[%c32_195, %c0_196] : memref<36x512xf32, #tpu.memory_space<vmem>>, vector<4x512xf32>
    tpu.vector_store %arg6[%c32_195, %c0_196], %297 {strides = array<i32>} : memref<36x512xf32, #tpu.memory_space<vmem>>, vector<4x512xf32>,
    %c0_197 = arith.constant 0 : index
    %c0_198 = arith.constant 0 : index
    %299 = vector.load %arg6[%c0_197, %c0_198] : memref<36x512xf32, #tpu.memory_space<vmem>>, vector<36x512xf32>
    %cst_199 = arith.constant dense<0.000000e+00> : vector<48x512xf32>
    %300 = tpu.matmul %21, %299, %cst_199 {dimension_numbers = #tpu.dot_dimension_numbers<[1], [0], [0], [1], [0, 0, 1, 1], [], []>} : vector<48x36xf32>, vector<36x512xf32>, vector<48x512xf32> -> vector<48x512xf32>
    %c0_200 = arith.constant 0 : index
    %c1536_201 = arith.constant 1536 : index
    %301 = vector.load %arg4[%c0_200, %c1536_201] : memref<3x4096xf32, #tpu.memory_space<vmem>>, vector<3x512xf32>
    %cst_202 = arith.constant dense<0.000000e+00> : vector<16x512xf32>
    %302 = tpu.matmul %22, %301, %cst_202 {dimension_numbers = #tpu.dot_dimension_numbers<[1], [0], [0], [1], [0, 0, 1, 1], [], []>} : vector<16x3xf32>, vector<3x512xf32>, vector<16x512xf32> -> vector<16x512xf32>
    %303 = vector.extract_strided_slice %301 {offsets = [0, 0], sizes = [1, 512], strides = [1, 1]} : vector<3x512xf32> to vector<1x512xf32>
    %304 = vector.extract_strided_slice %300 {offsets = [0, 0], sizes = [16, 512], strides = [1, 1]} : vector<48x512xf32> to vector<16x512xf32>
    %305 = vector.broadcast %303 : vector<1x512xf32> to vector<16x512xf32>
    %306 = arith.mulf %305, %304 : vector<16x512xf32>
    %307 = arith.addf %302, %306 : vector<16x512xf32>
    %308 = vector.extract_strided_slice %301 {offsets = [1, 0], sizes = [1, 512], strides = [1, 1]} : vector<3x512xf32> to vector<1x512xf32>
    %309 = vector.extract_strided_slice %300 {offsets = [16, 0], sizes = [16, 512], strides = [1, 1]} : vector<48x512xf32> to vector<16x512xf32>
    %310 = vector.broadcast %308 : vector<1x512xf32> to vector<16x512xf32>
    %311 = arith.mulf %310, %309 : vector<16x512xf32>
    %312 = arith.addf %307, %311 : vector<16x512xf32>
    %313 = vector.extract_strided_slice %301 {offsets = [2, 0], sizes = [1, 512], strides = [1, 1]} : vector<3x512xf32> to vector<1x512xf32>
    %314 = vector.extract_strided_slice %300 {offsets = [32, 0], sizes = [16, 512], strides = [1, 1]} : vector<48x512xf32> to vector<16x512xf32>
    %315 = vector.broadcast %313 : vector<1x512xf32> to vector<16x512xf32>
    %316 = arith.mulf %315, %314 : vector<16x512xf32>
    %317 = arith.addf %312, %316 : vector<16x512xf32>
    %cst_203 = arith.constant 0.000000e+00 : f32
    %318 = vector.broadcast %cst_203 : f32 to vector<16x512xf32>
    %319 = arith.maximumf %317, %318 : vector<16x512xf32>
    %c0_204 = arith.constant 0 : index
    %c0_205 = arith.constant 0 : index
    %c1536_206 = arith.constant 1536 : index
    %320 = vector.load %arg5[%c0_204, %c0_205, %c1536_206] : memref<1x16x4096xf32, #tpu.memory_space<vmem>>, vector<1x16x512xf32>
    %321 = vector.shape_cast %320 : vector<1x16x512xf32> to vector<16x512xf32>
    %322 = vector.shape_cast %319 : vector<16x512xf32> to vector<1x16x512xf32>
    tpu.vector_store %arg5[%c0_204, %c0_205, %c1536_206], %322 {strides = array<i32>} : memref<1x16x4096xf32, #tpu.memory_space<vmem>>, vector<1x16x512xf32>,
    %c0_207 = arith.constant 0 : index
    %c0_208 = arith.constant 0 : index
    %c2048 = arith.constant 2048 : index
    %323 = vector.load %arg1[%c0_207, %c0_208, %c2048] : memref<1x4x4352xf32, #tpu.memory_space<vmem>>, vector<1x4x512xf32>
    %324 = vector.shape_cast %323 : vector<1x4x512xf32> to vector<4x512xf32>
    %cst_209 = arith.constant 0.000000e+00 : f32
    %325 = vector.shape_cast %18 : vector<1x512xi1> to vector<1x512xi1>
    %326 = vector.broadcast %325 : vector<1x512xi1> to vector<4x512xi1>
    %327 = vector.broadcast %cst_209 : f32 to vector<4x512xf32>
    %328 = arith.select %326, %324, %327 : vector<4x512xi1>, vector<4x512xf32>
    %c0_210 = arith.constant 0 : index
    %c0_211 = arith.constant 0 : index
    %329 = vector.load %arg6[%c0_210, %c0_211] : memref<36x512xf32, #tpu.memory_space<vmem>>, vector<4x512xf32>
    tpu.vector_store %arg6[%c0_210, %c0_211], %328 {strides = array<i32>} : memref<36x512xf32, #tpu.memory_space<vmem>>, vector<4x512xf32>,
    %c0_212 = arith.constant 0 : index
    %c0_213 = arith.constant 0 : index
    %c2049 = arith.constant 2049 : index
    %330 = vector.load %arg1[%c0_212, %c0_213, %c2049] : memref<1x4x4352xf32, #tpu.memory_space<vmem>>, vector<1x4x512xf32>
    %331 = vector.shape_cast %330 : vector<1x4x512xf32> to vector<4x512xf32>
    %c4_214 = arith.constant 4 : index
    %c0_215 = arith.constant 0 : index
    %332 = vector.load %arg6[%c4_214, %c0_215] : memref<36x512xf32, #tpu.memory_space<vmem>>, vector<4x512xf32>
    tpu.vector_store %arg6[%c4_214, %c0_215], %331 {strides = array<i32>} : memref<36x512xf32, #tpu.memory_space<vmem>>, vector<4x512xf32>,
    %c0_216 = arith.constant 0 : index
    %c0_217 = arith.constant 0 : index
    %c2050 = arith.constant 2050 : index
    %333 = vector.load %arg1[%c0_216, %c0_217, %c2050] : memref<1x4x4352xf32, #tpu.memory_space<vmem>>, vector<1x4x512xf32>
    %334 = vector.shape_cast %333 : vector<1x4x512xf32> to vector<4x512xf32>
    %cst_218 = arith.constant 0.000000e+00 : f32
    %335 = vector.shape_cast %20 : vector<1x512xi1> to vector<1x512xi1>
    %336 = vector.broadcast %335 : vector<1x512xi1> to vector<4x512xi1>
    %337 = vector.broadcast %cst_218 : f32 to vector<4x512xf32>
    %338 = arith.select %336, %334, %337 : vector<4x512xi1>, vector<4x512xf32>
    %c8_219 = arith.constant 8 : index
    %c0_220 = arith.constant 0 : index
    %339 = vector.load %arg6[%c8_219, %c0_220] : memref<36x512xf32, #tpu.memory_space<vmem>>, vector<4x512xf32>
    tpu.vector_store %arg6[%c8_219, %c0_220], %338 {strides = array<i32>} : memref<36x512xf32, #tpu.memory_space<vmem>>, vector<4x512xf32>,
    %c0_221 = arith.constant 0 : index
    %c0_222 = arith.constant 0 : index
    %c2112 = arith.constant 2112 : index
    %340 = vector.load %arg1[%c0_221, %c0_222, %c2112] : memref<1x4x4352xf32, #tpu.memory_space<vmem>>, vector<1x4x512xf32>
    %341 = vector.shape_cast %340 : vector<1x4x512xf32> to vector<4x512xf32>
    %cst_223 = arith.constant 0.000000e+00 : f32
    %342 = vector.shape_cast %18 : vector<1x512xi1> to vector<1x512xi1>
    %343 = vector.broadcast %342 : vector<1x512xi1> to vector<4x512xi1>
    %344 = vector.broadcast %cst_223 : f32 to vector<4x512xf32>
    %345 = arith.select %343, %341, %344 : vector<4x512xi1>, vector<4x512xf32>
    %c12_224 = arith.constant 12 : index
    %c0_225 = arith.constant 0 : index
    %346 = vector.load %arg6[%c12_224, %c0_225] : memref<36x512xf32, #tpu.memory_space<vmem>>, vector<4x512xf32>
    tpu.vector_store %arg6[%c12_224, %c0_225], %345 {strides = array<i32>} : memref<36x512xf32, #tpu.memory_space<vmem>>, vector<4x512xf32>,
    %c0_226 = arith.constant 0 : index
    %c0_227 = arith.constant 0 : index
    %c2113 = arith.constant 2113 : index
    %347 = vector.load %arg1[%c0_226, %c0_227, %c2113] : memref<1x4x4352xf32, #tpu.memory_space<vmem>>, vector<1x4x512xf32>
    %348 = vector.shape_cast %347 : vector<1x4x512xf32> to vector<4x512xf32>
    %c16_228 = arith.constant 16 : index
    %c0_229 = arith.constant 0 : index
    %349 = vector.load %arg6[%c16_228, %c0_229] : memref<36x512xf32, #tpu.memory_space<vmem>>, vector<4x512xf32>
    tpu.vector_store %arg6[%c16_228, %c0_229], %348 {strides = array<i32>} : memref<36x512xf32, #tpu.memory_space<vmem>>, vector<4x512xf32>,
    %c0_230 = arith.constant 0 : index
    %c0_231 = arith.constant 0 : index
    %c2114 = arith.constant 2114 : index
    %350 = vector.load %arg1[%c0_230, %c0_231, %c2114] : memref<1x4x4352xf32, #tpu.memory_space<vmem>>, vector<1x4x512xf32>
    %351 = vector.shape_cast %350 : vector<1x4x512xf32> to vector<4x512xf32>
    %cst_232 = arith.constant 0.000000e+00 : f32
    %352 = vector.shape_cast %20 : vector<1x512xi1> to vector<1x512xi1>
    %353 = vector.broadcast %352 : vector<1x512xi1> to vector<4x512xi1>
    %354 = vector.broadcast %cst_232 : f32 to vector<4x512xf32>
    %355 = arith.select %353, %351, %354 : vector<4x512xi1>, vector<4x512xf32>
    %c20_233 = arith.constant 20 : index
    %c0_234 = arith.constant 0 : index
    %356 = vector.load %arg6[%c20_233, %c0_234] : memref<36x512xf32, #tpu.memory_space<vmem>>, vector<4x512xf32>
    tpu.vector_store %arg6[%c20_233, %c0_234], %355 {strides = array<i32>} : memref<36x512xf32, #tpu.memory_space<vmem>>, vector<4x512xf32>,
    %c0_235 = arith.constant 0 : index
    %c0_236 = arith.constant 0 : index
    %c2176 = arith.constant 2176 : index
    %357 = vector.load %arg1[%c0_235, %c0_236, %c2176] : memref<1x4x4352xf32, #tpu.memory_space<vmem>>, vector<1x4x512xf32>
    %358 = vector.shape_cast %357 : vector<1x4x512xf32> to vector<4x512xf32>
    %cst_237 = arith.constant 0.000000e+00 : f32
    %359 = vector.shape_cast %18 : vector<1x512xi1> to vector<1x512xi1>
    %360 = vector.broadcast %359 : vector<1x512xi1> to vector<4x512xi1>
    %361 = vector.broadcast %cst_237 : f32 to vector<4x512xf32>
    %362 = arith.select %360, %358, %361 : vector<4x512xi1>, vector<4x512xf32>
    %c24_238 = arith.constant 24 : index
    %c0_239 = arith.constant 0 : index
    %363 = vector.load %arg6[%c24_238, %c0_239] : memref<36x512xf32, #tpu.memory_space<vmem>>, vector<4x512xf32>
    tpu.vector_store %arg6[%c24_238, %c0_239], %362 {strides = array<i32>} : memref<36x512xf32, #tpu.memory_space<vmem>>, vector<4x512xf32>,
    %c0_240 = arith.constant 0 : index
    %c0_241 = arith.constant 0 : index
    %c2177 = arith.constant 2177 : index
    %364 = vector.load %arg1[%c0_240, %c0_241, %c2177] : memref<1x4x4352xf32, #tpu.memory_space<vmem>>, vector<1x4x512xf32>
    %365 = vector.shape_cast %364 : vector<1x4x512xf32> to vector<4x512xf32>
    %c28_242 = arith.constant 28 : index
    %c0_243 = arith.constant 0 : index
    %366 = vector.load %arg6[%c28_242, %c0_243] : memref<36x512xf32, #tpu.memory_space<vmem>>, vector<4x512xf32>
    tpu.vector_store %arg6[%c28_242, %c0_243], %365 {strides = array<i32>} : memref<36x512xf32, #tpu.memory_space<vmem>>, vector<4x512xf32>,
    %c0_244 = arith.constant 0 : index
    %c0_245 = arith.constant 0 : index
    %c2178 = arith.constant 2178 : index
    %367 = vector.load %arg1[%c0_244, %c0_245, %c2178] : memref<1x4x4352xf32, #tpu.memory_space<vmem>>, vector<1x4x512xf32>
    %368 = vector.shape_cast %367 : vector<1x4x512xf32> to vector<4x512xf32>
    %cst_246 = arith.constant 0.000000e+00 : f32
    %369 = vector.shape_cast %20 : vector<1x512xi1> to vector<1x512xi1>
    %370 = vector.broadcast %369 : vector<1x512xi1> to vector<4x512xi1>
    %371 = vector.broadcast %cst_246 : f32 to vector<4x512xf32>
    %372 = arith.select %370, %368, %371 : vector<4x512xi1>, vector<4x512xf32>
    %c32_247 = arith.constant 32 : index
    %c0_248 = arith.constant 0 : index
    %373 = vector.load %arg6[%c32_247, %c0_248] : memref<36x512xf32, #tpu.memory_space<vmem>>, vector<4x512xf32>
    tpu.vector_store %arg6[%c32_247, %c0_248], %372 {strides = array<i32>} : memref<36x512xf32, #tpu.memory_space<vmem>>, vector<4x512xf32>,
    %c0_249 = arith.constant 0 : index
    %c0_250 = arith.constant 0 : index
    %374 = vector.load %arg6[%c0_249, %c0_250] : memref<36x512xf32, #tpu.memory_space<vmem>>, vector<36x512xf32>
    %cst_251 = arith.constant dense<0.000000e+00> : vector<48x512xf32>
    %375 = tpu.matmul %21, %374, %cst_251 {dimension_numbers = #tpu.dot_dimension_numbers<[1], [0], [0], [1], [0, 0, 1, 1], [], []>} : vector<48x36xf32>, vector<36x512xf32>, vector<48x512xf32> -> vector<48x512xf32>
    %c0_252 = arith.constant 0 : index
    %c2048_253 = arith.constant 2048 : index
    %376 = vector.load %arg4[%c0_252, %c2048_253] : memref<3x4096xf32, #tpu.memory_space<vmem>>, vector<3x512xf32>
    %cst_254 = arith.constant dense<0.000000e+00> : vector<16x512xf32>
    %377 = tpu.matmul %22, %376, %cst_254 {dimension_numbers = #tpu.dot_dimension_numbers<[1], [0], [0], [1], [0, 0, 1, 1], [], []>} : vector<16x3xf32>, vector<3x512xf32>, vector<16x512xf32> -> vector<16x512xf32>
    %378 = vector.extract_strided_slice %376 {offsets = [0, 0], sizes = [1, 512], strides = [1, 1]} : vector<3x512xf32> to vector<1x512xf32>
    %379 = vector.extract_strided_slice %375 {offsets = [0, 0], sizes = [16, 512], strides = [1, 1]} : vector<48x512xf32> to vector<16x512xf32>
    %380 = vector.broadcast %378 : vector<1x512xf32> to vector<16x512xf32>
    %381 = arith.mulf %380, %379 : vector<16x512xf32>
    %382 = arith.addf %377, %381 : vector<16x512xf32>
    %383 = vector.extract_strided_slice %376 {offsets = [1, 0], sizes = [1, 512], strides = [1, 1]} : vector<3x512xf32> to vector<1x512xf32>
    %384 = vector.extract_strided_slice %375 {offsets = [16, 0], sizes = [16, 512], strides = [1, 1]} : vector<48x512xf32> to vector<16x512xf32>
    %385 = vector.broadcast %383 : vector<1x512xf32> to vector<16x512xf32>
    %386 = arith.mulf %385, %384 : vector<16x512xf32>
    %387 = arith.addf %382, %386 : vector<16x512xf32>
    %388 = vector.extract_strided_slice %376 {offsets = [2, 0], sizes = [1, 512], strides = [1, 1]} : vector<3x512xf32> to vector<1x512xf32>
    %389 = vector.extract_strided_slice %375 {offsets = [32, 0], sizes = [16, 512], strides = [1, 1]} : vector<48x512xf32> to vector<16x512xf32>
    %390 = vector.broadcast %388 : vector<1x512xf32> to vector<16x512xf32>
    %391 = arith.mulf %390, %389 : vector<16x512xf32>
    %392 = arith.addf %387, %391 : vector<16x512xf32>
    %cst_255 = arith.constant 0.000000e+00 : f32
    %393 = vector.broadcast %cst_255 : f32 to vector<16x512xf32>
    %394 = arith.maximumf %392, %393 : vector<16x512xf32>
    %c0_256 = arith.constant 0 : index
    %c0_257 = arith.constant 0 : index
    %c2048_258 = arith.constant 2048 : index
    %395 = vector.load %arg5[%c0_256, %c0_257, %c2048_258] : memref<1x16x4096xf32, #tpu.memory_space<vmem>>, vector<1x16x512xf32>
    %396 = vector.shape_cast %395 : vector<1x16x512xf32> to vector<16x512xf32>
    %397 = vector.shape_cast %394 : vector<16x512xf32> to vector<1x16x512xf32>
    tpu.vector_store %arg5[%c0_256, %c0_257, %c2048_258], %397 {strides = array<i32>} : memref<1x16x4096xf32, #tpu.memory_space<vmem>>, vector<1x16x512xf32>,
    %c0_259 = arith.constant 0 : index
    %c0_260 = arith.constant 0 : index
    %c2560 = arith.constant 2560 : index
    %398 = vector.load %arg1[%c0_259, %c0_260, %c2560] : memref<1x4x4352xf32, #tpu.memory_space<vmem>>, vector<1x4x512xf32>
    %399 = vector.shape_cast %398 : vector<1x4x512xf32> to vector<4x512xf32>
    %cst_261 = arith.constant 0.000000e+00 : f32
    %400 = vector.shape_cast %18 : vector<1x512xi1> to vector<1x512xi1>
    %401 = vector.broadcast %400 : vector<1x512xi1> to vector<4x512xi1>
    %402 = vector.broadcast %cst_261 : f32 to vector<4x512xf32>
    %403 = arith.select %401, %399, %402 : vector<4x512xi1>, vector<4x512xf32>
    %c0_262 = arith.constant 0 : index
    %c0_263 = arith.constant 0 : index
    %404 = vector.load %arg6[%c0_262, %c0_263] : memref<36x512xf32, #tpu.memory_space<vmem>>, vector<4x512xf32>
    tpu.vector_store %arg6[%c0_262, %c0_263], %403 {strides = array<i32>} : memref<36x512xf32, #tpu.memory_space<vmem>>, vector<4x512xf32>,
    %c0_264 = arith.constant 0 : index
    %c0_265 = arith.constant 0 : index
    %c2561 = arith.constant 2561 : index
    %405 = vector.load %arg1[%c0_264, %c0_265, %c2561] : memref<1x4x4352xf32, #tpu.memory_space<vmem>>, vector<1x4x512xf32>
    %406 = vector.shape_cast %405 : vector<1x4x512xf32> to vector<4x512xf32>
    %c4_266 = arith.constant 4 : index
    %c0_267 = arith.constant 0 : index
    %407 = vector.load %arg6[%c4_266, %c0_267] : memref<36x512xf32, #tpu.memory_space<vmem>>, vector<4x512xf32>
    tpu.vector_store %arg6[%c4_266, %c0_267], %406 {strides = array<i32>} : memref<36x512xf32, #tpu.memory_space<vmem>>, vector<4x512xf32>,
    %c0_268 = arith.constant 0 : index
    %c0_269 = arith.constant 0 : index
    %c2562 = arith.constant 2562 : index
    %408 = vector.load %arg1[%c0_268, %c0_269, %c2562] : memref<1x4x4352xf32, #tpu.memory_space<vmem>>, vector<1x4x512xf32>
    %409 = vector.shape_cast %408 : vector<1x4x512xf32> to vector<4x512xf32>
    %cst_270 = arith.constant 0.000000e+00 : f32
    %410 = vector.shape_cast %20 : vector<1x512xi1> to vector<1x512xi1>
    %411 = vector.broadcast %410 : vector<1x512xi1> to vector<4x512xi1>
    %412 = vector.broadcast %cst_270 : f32 to vector<4x512xf32>
    %413 = arith.select %411, %409, %412 : vector<4x512xi1>, vector<4x512xf32>
    %c8_271 = arith.constant 8 : index
    %c0_272 = arith.constant 0 : index
    %414 = vector.load %arg6[%c8_271, %c0_272] : memref<36x512xf32, #tpu.memory_space<vmem>>, vector<4x512xf32>
    tpu.vector_store %arg6[%c8_271, %c0_272], %413 {strides = array<i32>} : memref<36x512xf32, #tpu.memory_space<vmem>>, vector<4x512xf32>,
    %c0_273 = arith.constant 0 : index
    %c0_274 = arith.constant 0 : index
    %c2624 = arith.constant 2624 : index
    %415 = vector.load %arg1[%c0_273, %c0_274, %c2624] : memref<1x4x4352xf32, #tpu.memory_space<vmem>>, vector<1x4x512xf32>
    %416 = vector.shape_cast %415 : vector<1x4x512xf32> to vector<4x512xf32>
    %cst_275 = arith.constant 0.000000e+00 : f32
    %417 = vector.shape_cast %18 : vector<1x512xi1> to vector<1x512xi1>
    %418 = vector.broadcast %417 : vector<1x512xi1> to vector<4x512xi1>
    %419 = vector.broadcast %cst_275 : f32 to vector<4x512xf32>
    %420 = arith.select %418, %416, %419 : vector<4x512xi1>, vector<4x512xf32>
    %c12_276 = arith.constant 12 : index
    %c0_277 = arith.constant 0 : index
    %421 = vector.load %arg6[%c12_276, %c0_277] : memref<36x512xf32, #tpu.memory_space<vmem>>, vector<4x512xf32>
    tpu.vector_store %arg6[%c12_276, %c0_277], %420 {strides = array<i32>} : memref<36x512xf32, #tpu.memory_space<vmem>>, vector<4x512xf32>,
    %c0_278 = arith.constant 0 : index
    %c0_279 = arith.constant 0 : index
    %c2625 = arith.constant 2625 : index
    %422 = vector.load %arg1[%c0_278, %c0_279, %c2625] : memref<1x4x4352xf32, #tpu.memory_space<vmem>>, vector<1x4x512xf32>
    %423 = vector.shape_cast %422 : vector<1x4x512xf32> to vector<4x512xf32>
    %c16_280 = arith.constant 16 : index
    %c0_281 = arith.constant 0 : index
    %424 = vector.load %arg6[%c16_280, %c0_281] : memref<36x512xf32, #tpu.memory_space<vmem>>, vector<4x512xf32>
    tpu.vector_store %arg6[%c16_280, %c0_281], %423 {strides = array<i32>} : memref<36x512xf32, #tpu.memory_space<vmem>>, vector<4x512xf32>,
    %c0_282 = arith.constant 0 : index
    %c0_283 = arith.constant 0 : index
    %c2626 = arith.constant 2626 : index
    %425 = vector.load %arg1[%c0_282, %c0_283, %c2626] : memref<1x4x4352xf32, #tpu.memory_space<vmem>>, vector<1x4x512xf32>
    %426 = vector.shape_cast %425 : vector<1x4x512xf32> to vector<4x512xf32>
    %cst_284 = arith.constant 0.000000e+00 : f32
    %427 = vector.shape_cast %20 : vector<1x512xi1> to vector<1x512xi1>
    %428 = vector.broadcast %427 : vector<1x512xi1> to vector<4x512xi1>
    %429 = vector.broadcast %cst_284 : f32 to vector<4x512xf32>
    %430 = arith.select %428, %426, %429 : vector<4x512xi1>, vector<4x512xf32>
    %c20_285 = arith.constant 20 : index
    %c0_286 = arith.constant 0 : index
    %431 = vector.load %arg6[%c20_285, %c0_286] : memref<36x512xf32, #tpu.memory_space<vmem>>, vector<4x512xf32>
    tpu.vector_store %arg6[%c20_285, %c0_286], %430 {strides = array<i32>} : memref<36x512xf32, #tpu.memory_space<vmem>>, vector<4x512xf32>,
    %c0_287 = arith.constant 0 : index
    %c0_288 = arith.constant 0 : index
    %c2688 = arith.constant 2688 : index
    %432 = vector.load %arg1[%c0_287, %c0_288, %c2688] : memref<1x4x4352xf32, #tpu.memory_space<vmem>>, vector<1x4x512xf32>
    %433 = vector.shape_cast %432 : vector<1x4x512xf32> to vector<4x512xf32>
    %cst_289 = arith.constant 0.000000e+00 : f32
    %434 = vector.shape_cast %18 : vector<1x512xi1> to vector<1x512xi1>
    %435 = vector.broadcast %434 : vector<1x512xi1> to vector<4x512xi1>
    %436 = vector.broadcast %cst_289 : f32 to vector<4x512xf32>
    %437 = arith.select %435, %433, %436 : vector<4x512xi1>, vector<4x512xf32>
    %c24_290 = arith.constant 24 : index
    %c0_291 = arith.constant 0 : index
    %438 = vector.load %arg6[%c24_290, %c0_291] : memref<36x512xf32, #tpu.memory_space<vmem>>, vector<4x512xf32>
    tpu.vector_store %arg6[%c24_290, %c0_291], %437 {strides = array<i32>} : memref<36x512xf32, #tpu.memory_space<vmem>>, vector<4x512xf32>,
    %c0_292 = arith.constant 0 : index
    %c0_293 = arith.constant 0 : index
    %c2689 = arith.constant 2689 : index
    %439 = vector.load %arg1[%c0_292, %c0_293, %c2689] : memref<1x4x4352xf32, #tpu.memory_space<vmem>>, vector<1x4x512xf32>
    %440 = vector.shape_cast %439 : vector<1x4x512xf32> to vector<4x512xf32>
    %c28_294 = arith.constant 28 : index
    %c0_295 = arith.constant 0 : index
    %441 = vector.load %arg6[%c28_294, %c0_295] : memref<36x512xf32, #tpu.memory_space<vmem>>, vector<4x512xf32>
    tpu.vector_store %arg6[%c28_294, %c0_295], %440 {strides = array<i32>} : memref<36x512xf32, #tpu.memory_space<vmem>>, vector<4x512xf32>,
    %c0_296 = arith.constant 0 : index
    %c0_297 = arith.constant 0 : index
    %c2690 = arith.constant 2690 : index
    %442 = vector.load %arg1[%c0_296, %c0_297, %c2690] : memref<1x4x4352xf32, #tpu.memory_space<vmem>>, vector<1x4x512xf32>
    %443 = vector.shape_cast %442 : vector<1x4x512xf32> to vector<4x512xf32>
    %cst_298 = arith.constant 0.000000e+00 : f32
    %444 = vector.shape_cast %20 : vector<1x512xi1> to vector<1x512xi1>
    %445 = vector.broadcast %444 : vector<1x512xi1> to vector<4x512xi1>
    %446 = vector.broadcast %cst_298 : f32 to vector<4x512xf32>
    %447 = arith.select %445, %443, %446 : vector<4x512xi1>, vector<4x512xf32>
    %c32_299 = arith.constant 32 : index
    %c0_300 = arith.constant 0 : index
    %448 = vector.load %arg6[%c32_299, %c0_300] : memref<36x512xf32, #tpu.memory_space<vmem>>, vector<4x512xf32>
    tpu.vector_store %arg6[%c32_299, %c0_300], %447 {strides = array<i32>} : memref<36x512xf32, #tpu.memory_space<vmem>>, vector<4x512xf32>,
    %c0_301 = arith.constant 0 : index
    %c0_302 = arith.constant 0 : index
    %449 = vector.load %arg6[%c0_301, %c0_302] : memref<36x512xf32, #tpu.memory_space<vmem>>, vector<36x512xf32>
    %cst_303 = arith.constant dense<0.000000e+00> : vector<48x512xf32>
    %450 = tpu.matmul %21, %449, %cst_303 {dimension_numbers = #tpu.dot_dimension_numbers<[1], [0], [0], [1], [0, 0, 1, 1], [], []>} : vector<48x36xf32>, vector<36x512xf32>, vector<48x512xf32> -> vector<48x512xf32>
    %c0_304 = arith.constant 0 : index
    %c2560_305 = arith.constant 2560 : index
    %451 = vector.load %arg4[%c0_304, %c2560_305] : memref<3x4096xf32, #tpu.memory_space<vmem>>, vector<3x512xf32>
    %cst_306 = arith.constant dense<0.000000e+00> : vector<16x512xf32>
    %452 = tpu.matmul %22, %451, %cst_306 {dimension_numbers = #tpu.dot_dimension_numbers<[1], [0], [0], [1], [0, 0, 1, 1], [], []>} : vector<16x3xf32>, vector<3x512xf32>, vector<16x512xf32> -> vector<16x512xf32>
    %453 = vector.extract_strided_slice %451 {offsets = [0, 0], sizes = [1, 512], strides = [1, 1]} : vector<3x512xf32> to vector<1x512xf32>
    %454 = vector.extract_strided_slice %450 {offsets = [0, 0], sizes = [16, 512], strides = [1, 1]} : vector<48x512xf32> to vector<16x512xf32>
    %455 = vector.broadcast %453 : vector<1x512xf32> to vector<16x512xf32>
    %456 = arith.mulf %455, %454 : vector<16x512xf32>
    %457 = arith.addf %452, %456 : vector<16x512xf32>
    %458 = vector.extract_strided_slice %451 {offsets = [1, 0], sizes = [1, 512], strides = [1, 1]} : vector<3x512xf32> to vector<1x512xf32>
    %459 = vector.extract_strided_slice %450 {offsets = [16, 0], sizes = [16, 512], strides = [1, 1]} : vector<48x512xf32> to vector<16x512xf32>
    %460 = vector.broadcast %458 : vector<1x512xf32> to vector<16x512xf32>
    %461 = arith.mulf %460, %459 : vector<16x512xf32>
    %462 = arith.addf %457, %461 : vector<16x512xf32>
    %463 = vector.extract_strided_slice %451 {offsets = [2, 0], sizes = [1, 512], strides = [1, 1]} : vector<3x512xf32> to vector<1x512xf32>
    %464 = vector.extract_strided_slice %450 {offsets = [32, 0], sizes = [16, 512], strides = [1, 1]} : vector<48x512xf32> to vector<16x512xf32>
    %465 = vector.broadcast %463 : vector<1x512xf32> to vector<16x512xf32>
    %466 = arith.mulf %465, %464 : vector<16x512xf32>
    %467 = arith.addf %462, %466 : vector<16x512xf32>
    %cst_307 = arith.constant 0.000000e+00 : f32
    %468 = vector.broadcast %cst_307 : f32 to vector<16x512xf32>
    %469 = arith.maximumf %467, %468 : vector<16x512xf32>
    %c0_308 = arith.constant 0 : index
    %c0_309 = arith.constant 0 : index
    %c2560_310 = arith.constant 2560 : index
    %470 = vector.load %arg5[%c0_308, %c0_309, %c2560_310] : memref<1x16x4096xf32, #tpu.memory_space<vmem>>, vector<1x16x512xf32>
    %471 = vector.shape_cast %470 : vector<1x16x512xf32> to vector<16x512xf32>
    %472 = vector.shape_cast %469 : vector<16x512xf32> to vector<1x16x512xf32>
    tpu.vector_store %arg5[%c0_308, %c0_309, %c2560_310], %472 {strides = array<i32>} : memref<1x16x4096xf32, #tpu.memory_space<vmem>>, vector<1x16x512xf32>,
    %c0_311 = arith.constant 0 : index
    %c0_312 = arith.constant 0 : index
    %c3072 = arith.constant 3072 : index
    %473 = vector.load %arg1[%c0_311, %c0_312, %c3072] : memref<1x4x4352xf32, #tpu.memory_space<vmem>>, vector<1x4x512xf32>
    %474 = vector.shape_cast %473 : vector<1x4x512xf32> to vector<4x512xf32>
    %cst_313 = arith.constant 0.000000e+00 : f32
    %475 = vector.shape_cast %18 : vector<1x512xi1> to vector<1x512xi1>
    %476 = vector.broadcast %475 : vector<1x512xi1> to vector<4x512xi1>
    %477 = vector.broadcast %cst_313 : f32 to vector<4x512xf32>
    %478 = arith.select %476, %474, %477 : vector<4x512xi1>, vector<4x512xf32>
    %c0_314 = arith.constant 0 : index
    %c0_315 = arith.constant 0 : index
    %479 = vector.load %arg6[%c0_314, %c0_315] : memref<36x512xf32, #tpu.memory_space<vmem>>, vector<4x512xf32>
    tpu.vector_store %arg6[%c0_314, %c0_315], %478 {strides = array<i32>} : memref<36x512xf32, #tpu.memory_space<vmem>>, vector<4x512xf32>,
    %c0_316 = arith.constant 0 : index
    %c0_317 = arith.constant 0 : index
    %c3073 = arith.constant 3073 : index
    %480 = vector.load %arg1[%c0_316, %c0_317, %c3073] : memref<1x4x4352xf32, #tpu.memory_space<vmem>>, vector<1x4x512xf32>
    %481 = vector.shape_cast %480 : vector<1x4x512xf32> to vector<4x512xf32>
    %c4_318 = arith.constant 4 : index
    %c0_319 = arith.constant 0 : index
    %482 = vector.load %arg6[%c4_318, %c0_319] : memref<36x512xf32, #tpu.memory_space<vmem>>, vector<4x512xf32>
    tpu.vector_store %arg6[%c4_318, %c0_319], %481 {strides = array<i32>} : memref<36x512xf32, #tpu.memory_space<vmem>>, vector<4x512xf32>,
    %c0_320 = arith.constant 0 : index
    %c0_321 = arith.constant 0 : index
    %c3074 = arith.constant 3074 : index
    %483 = vector.load %arg1[%c0_320, %c0_321, %c3074] : memref<1x4x4352xf32, #tpu.memory_space<vmem>>, vector<1x4x512xf32>
    %484 = vector.shape_cast %483 : vector<1x4x512xf32> to vector<4x512xf32>
    %cst_322 = arith.constant 0.000000e+00 : f32
    %485 = vector.shape_cast %20 : vector<1x512xi1> to vector<1x512xi1>
    %486 = vector.broadcast %485 : vector<1x512xi1> to vector<4x512xi1>
    %487 = vector.broadcast %cst_322 : f32 to vector<4x512xf32>
    %488 = arith.select %486, %484, %487 : vector<4x512xi1>, vector<4x512xf32>
    %c8_323 = arith.constant 8 : index
    %c0_324 = arith.constant 0 : index
    %489 = vector.load %arg6[%c8_323, %c0_324] : memref<36x512xf32, #tpu.memory_space<vmem>>, vector<4x512xf32>
    tpu.vector_store %arg6[%c8_323, %c0_324], %488 {strides = array<i32>} : memref<36x512xf32, #tpu.memory_space<vmem>>, vector<4x512xf32>,
    %c0_325 = arith.constant 0 : index
    %c0_326 = arith.constant 0 : index
    %c3136 = arith.constant 3136 : index
    %490 = vector.load %arg1[%c0_325, %c0_326, %c3136] : memref<1x4x4352xf32, #tpu.memory_space<vmem>>, vector<1x4x512xf32>
    %491 = vector.shape_cast %490 : vector<1x4x512xf32> to vector<4x512xf32>
    %cst_327 = arith.constant 0.000000e+00 : f32
    %492 = vector.shape_cast %18 : vector<1x512xi1> to vector<1x512xi1>
    %493 = vector.broadcast %492 : vector<1x512xi1> to vector<4x512xi1>
    %494 = vector.broadcast %cst_327 : f32 to vector<4x512xf32>
    %495 = arith.select %493, %491, %494 : vector<4x512xi1>, vector<4x512xf32>
    %c12_328 = arith.constant 12 : index
    %c0_329 = arith.constant 0 : index
    %496 = vector.load %arg6[%c12_328, %c0_329] : memref<36x512xf32, #tpu.memory_space<vmem>>, vector<4x512xf32>
    tpu.vector_store %arg6[%c12_328, %c0_329], %495 {strides = array<i32>} : memref<36x512xf32, #tpu.memory_space<vmem>>, vector<4x512xf32>,
    %c0_330 = arith.constant 0 : index
    %c0_331 = arith.constant 0 : index
    %c3137 = arith.constant 3137 : index
    %497 = vector.load %arg1[%c0_330, %c0_331, %c3137] : memref<1x4x4352xf32, #tpu.memory_space<vmem>>, vector<1x4x512xf32>
    %498 = vector.shape_cast %497 : vector<1x4x512xf32> to vector<4x512xf32>
    %c16_332 = arith.constant 16 : index
    %c0_333 = arith.constant 0 : index
    %499 = vector.load %arg6[%c16_332, %c0_333] : memref<36x512xf32, #tpu.memory_space<vmem>>, vector<4x512xf32>
    tpu.vector_store %arg6[%c16_332, %c0_333], %498 {strides = array<i32>} : memref<36x512xf32, #tpu.memory_space<vmem>>, vector<4x512xf32>,
    %c0_334 = arith.constant 0 : index
    %c0_335 = arith.constant 0 : index
    %c3138 = arith.constant 3138 : index
    %500 = vector.load %arg1[%c0_334, %c0_335, %c3138] : memref<1x4x4352xf32, #tpu.memory_space<vmem>>, vector<1x4x512xf32>
    %501 = vector.shape_cast %500 : vector<1x4x512xf32> to vector<4x512xf32>
    %cst_336 = arith.constant 0.000000e+00 : f32
    %502 = vector.shape_cast %20 : vector<1x512xi1> to vector<1x512xi1>
    %503 = vector.broadcast %502 : vector<1x512xi1> to vector<4x512xi1>
    %504 = vector.broadcast %cst_336 : f32 to vector<4x512xf32>
    %505 = arith.select %503, %501, %504 : vector<4x512xi1>, vector<4x512xf32>
    %c20_337 = arith.constant 20 : index
    %c0_338 = arith.constant 0 : index
    %506 = vector.load %arg6[%c20_337, %c0_338] : memref<36x512xf32, #tpu.memory_space<vmem>>, vector<4x512xf32>
    tpu.vector_store %arg6[%c20_337, %c0_338], %505 {strides = array<i32>} : memref<36x512xf32, #tpu.memory_space<vmem>>, vector<4x512xf32>,
    %c0_339 = arith.constant 0 : index
    %c0_340 = arith.constant 0 : index
    %c3200 = arith.constant 3200 : index
    %507 = vector.load %arg1[%c0_339, %c0_340, %c3200] : memref<1x4x4352xf32, #tpu.memory_space<vmem>>, vector<1x4x512xf32>
    %508 = vector.shape_cast %507 : vector<1x4x512xf32> to vector<4x512xf32>
    %cst_341 = arith.constant 0.000000e+00 : f32
    %509 = vector.shape_cast %18 : vector<1x512xi1> to vector<1x512xi1>
    %510 = vector.broadcast %509 : vector<1x512xi1> to vector<4x512xi1>
    %511 = vector.broadcast %cst_341 : f32 to vector<4x512xf32>
    %512 = arith.select %510, %508, %511 : vector<4x512xi1>, vector<4x512xf32>
    %c24_342 = arith.constant 24 : index
    %c0_343 = arith.constant 0 : index
    %513 = vector.load %arg6[%c24_342, %c0_343] : memref<36x512xf32, #tpu.memory_space<vmem>>, vector<4x512xf32>
    tpu.vector_store %arg6[%c24_342, %c0_343], %512 {strides = array<i32>} : memref<36x512xf32, #tpu.memory_space<vmem>>, vector<4x512xf32>,
    %c0_344 = arith.constant 0 : index
    %c0_345 = arith.constant 0 : index
    %c3201 = arith.constant 3201 : index
    %514 = vector.load %arg1[%c0_344, %c0_345, %c3201] : memref<1x4x4352xf32, #tpu.memory_space<vmem>>, vector<1x4x512xf32>
    %515 = vector.shape_cast %514 : vector<1x4x512xf32> to vector<4x512xf32>
    %c28_346 = arith.constant 28 : index
    %c0_347 = arith.constant 0 : index
    %516 = vector.load %arg6[%c28_346, %c0_347] : memref<36x512xf32, #tpu.memory_space<vmem>>, vector<4x512xf32>
    tpu.vector_store %arg6[%c28_346, %c0_347], %515 {strides = array<i32>} : memref<36x512xf32, #tpu.memory_space<vmem>>, vector<4x512xf32>,
    %c0_348 = arith.constant 0 : index
    %c0_349 = arith.constant 0 : index
    %c3202 = arith.constant 3202 : index
    %517 = vector.load %arg1[%c0_348, %c0_349, %c3202] : memref<1x4x4352xf32, #tpu.memory_space<vmem>>, vector<1x4x512xf32>
    %518 = vector.shape_cast %517 : vector<1x4x512xf32> to vector<4x512xf32>
    %cst_350 = arith.constant 0.000000e+00 : f32
    %519 = vector.shape_cast %20 : vector<1x512xi1> to vector<1x512xi1>
    %520 = vector.broadcast %519 : vector<1x512xi1> to vector<4x512xi1>
    %521 = vector.broadcast %cst_350 : f32 to vector<4x512xf32>
    %522 = arith.select %520, %518, %521 : vector<4x512xi1>, vector<4x512xf32>
    %c32_351 = arith.constant 32 : index
    %c0_352 = arith.constant 0 : index
    %523 = vector.load %arg6[%c32_351, %c0_352] : memref<36x512xf32, #tpu.memory_space<vmem>>, vector<4x512xf32>
    tpu.vector_store %arg6[%c32_351, %c0_352], %522 {strides = array<i32>} : memref<36x512xf32, #tpu.memory_space<vmem>>, vector<4x512xf32>,
    %c0_353 = arith.constant 0 : index
    %c0_354 = arith.constant 0 : index
    %524 = vector.load %arg6[%c0_353, %c0_354] : memref<36x512xf32, #tpu.memory_space<vmem>>, vector<36x512xf32>
    %cst_355 = arith.constant dense<0.000000e+00> : vector<48x512xf32>
    %525 = tpu.matmul %21, %524, %cst_355 {dimension_numbers = #tpu.dot_dimension_numbers<[1], [0], [0], [1], [0, 0, 1, 1], [], []>} : vector<48x36xf32>, vector<36x512xf32>, vector<48x512xf32> -> vector<48x512xf32>
    %c0_356 = arith.constant 0 : index
    %c3072_357 = arith.constant 3072 : index
    %526 = vector.load %arg4[%c0_356, %c3072_357] : memref<3x4096xf32, #tpu.memory_space<vmem>>, vector<3x512xf32>
    %cst_358 = arith.constant dense<0.000000e+00> : vector<16x512xf32>
    %527 = tpu.matmul %22, %526, %cst_358 {dimension_numbers = #tpu.dot_dimension_numbers<[1], [0], [0], [1], [0, 0, 1, 1], [], []>} : vector<16x3xf32>, vector<3x512xf32>, vector<16x512xf32> -> vector<16x512xf32>
    %528 = vector.extract_strided_slice %526 {offsets = [0, 0], sizes = [1, 512], strides = [1, 1]} : vector<3x512xf32> to vector<1x512xf32>
    %529 = vector.extract_strided_slice %525 {offsets = [0, 0], sizes = [16, 512], strides = [1, 1]} : vector<48x512xf32> to vector<16x512xf32>
    %530 = vector.broadcast %528 : vector<1x512xf32> to vector<16x512xf32>
    %531 = arith.mulf %530, %529 : vector<16x512xf32>
    %532 = arith.addf %527, %531 : vector<16x512xf32>
    %533 = vector.extract_strided_slice %526 {offsets = [1, 0], sizes = [1, 512], strides = [1, 1]} : vector<3x512xf32> to vector<1x512xf32>
    %534 = vector.extract_strided_slice %525 {offsets = [16, 0], sizes = [16, 512], strides = [1, 1]} : vector<48x512xf32> to vector<16x512xf32>
    %535 = vector.broadcast %533 : vector<1x512xf32> to vector<16x512xf32>
    %536 = arith.mulf %535, %534 : vector<16x512xf32>
    %537 = arith.addf %532, %536 : vector<16x512xf32>
    %538 = vector.extract_strided_slice %526 {offsets = [2, 0], sizes = [1, 512], strides = [1, 1]} : vector<3x512xf32> to vector<1x512xf32>
    %539 = vector.extract_strided_slice %525 {offsets = [32, 0], sizes = [16, 512], strides = [1, 1]} : vector<48x512xf32> to vector<16x512xf32>
    %540 = vector.broadcast %538 : vector<1x512xf32> to vector<16x512xf32>
    %541 = arith.mulf %540, %539 : vector<16x512xf32>
    %542 = arith.addf %537, %541 : vector<16x512xf32>
    %cst_359 = arith.constant 0.000000e+00 : f32
    %543 = vector.broadcast %cst_359 : f32 to vector<16x512xf32>
    %544 = arith.maximumf %542, %543 : vector<16x512xf32>
    %c0_360 = arith.constant 0 : index
    %c0_361 = arith.constant 0 : index
    %c3072_362 = arith.constant 3072 : index
    %545 = vector.load %arg5[%c0_360, %c0_361, %c3072_362] : memref<1x16x4096xf32, #tpu.memory_space<vmem>>, vector<1x16x512xf32>
    %546 = vector.shape_cast %545 : vector<1x16x512xf32> to vector<16x512xf32>
    %547 = vector.shape_cast %544 : vector<16x512xf32> to vector<1x16x512xf32>
    tpu.vector_store %arg5[%c0_360, %c0_361, %c3072_362], %547 {strides = array<i32>} : memref<1x16x4096xf32, #tpu.memory_space<vmem>>, vector<1x16x512xf32>,
    %c0_363 = arith.constant 0 : index
    %c0_364 = arith.constant 0 : index
    %c3584 = arith.constant 3584 : index
    %548 = vector.load %arg1[%c0_363, %c0_364, %c3584] : memref<1x4x4352xf32, #tpu.memory_space<vmem>>, vector<1x4x512xf32>
    %549 = vector.shape_cast %548 : vector<1x4x512xf32> to vector<4x512xf32>
    %cst_365 = arith.constant 0.000000e+00 : f32
    %550 = vector.shape_cast %18 : vector<1x512xi1> to vector<1x512xi1>
    %551 = vector.broadcast %550 : vector<1x512xi1> to vector<4x512xi1>
    %552 = vector.broadcast %cst_365 : f32 to vector<4x512xf32>
    %553 = arith.select %551, %549, %552 : vector<4x512xi1>, vector<4x512xf32>
    %c0_366 = arith.constant 0 : index
    %c0_367 = arith.constant 0 : index
    %554 = vector.load %arg6[%c0_366, %c0_367] : memref<36x512xf32, #tpu.memory_space<vmem>>, vector<4x512xf32>
    tpu.vector_store %arg6[%c0_366, %c0_367], %553 {strides = array<i32>} : memref<36x512xf32, #tpu.memory_space<vmem>>, vector<4x512xf32>,
    %c0_368 = arith.constant 0 : index
    %c0_369 = arith.constant 0 : index
    %c3585 = arith.constant 3585 : index
    %555 = vector.load %arg1[%c0_368, %c0_369, %c3585] : memref<1x4x4352xf32, #tpu.memory_space<vmem>>, vector<1x4x512xf32>
    %556 = vector.shape_cast %555 : vector<1x4x512xf32> to vector<4x512xf32>
    %c4_370 = arith.constant 4 : index
    %c0_371 = arith.constant 0 : index
    %557 = vector.load %arg6[%c4_370, %c0_371] : memref<36x512xf32, #tpu.memory_space<vmem>>, vector<4x512xf32>
    tpu.vector_store %arg6[%c4_370, %c0_371], %556 {strides = array<i32>} : memref<36x512xf32, #tpu.memory_space<vmem>>, vector<4x512xf32>,
    %c0_372 = arith.constant 0 : index
    %c0_373 = arith.constant 0 : index
    %c3586 = arith.constant 3586 : index
    %558 = vector.load %arg1[%c0_372, %c0_373, %c3586] : memref<1x4x4352xf32, #tpu.memory_space<vmem>>, vector<1x4x512xf32>
    %559 = vector.shape_cast %558 : vector<1x4x512xf32> to vector<4x512xf32>
    %cst_374 = arith.constant 0.000000e+00 : f32
    %560 = vector.shape_cast %20 : vector<1x512xi1> to vector<1x512xi1>
    %561 = vector.broadcast %560 : vector<1x512xi1> to vector<4x512xi1>
    %562 = vector.broadcast %cst_374 : f32 to vector<4x512xf32>
    %563 = arith.select %561, %559, %562 : vector<4x512xi1>, vector<4x512xf32>
    %c8_375 = arith.constant 8 : index
    %c0_376 = arith.constant 0 : index
    %564 = vector.load %arg6[%c8_375, %c0_376] : memref<36x512xf32, #tpu.memory_space<vmem>>, vector<4x512xf32>
    tpu.vector_store %arg6[%c8_375, %c0_376], %563 {strides = array<i32>} : memref<36x512xf32, #tpu.memory_space<vmem>>, vector<4x512xf32>,
    %c0_377 = arith.constant 0 : index
    %c0_378 = arith.constant 0 : index
    %c3648 = arith.constant 3648 : index
    %565 = vector.load %arg1[%c0_377, %c0_378, %c3648] : memref<1x4x4352xf32, #tpu.memory_space<vmem>>, vector<1x4x512xf32>
    %566 = vector.shape_cast %565 : vector<1x4x512xf32> to vector<4x512xf32>
    %cst_379 = arith.constant 0.000000e+00 : f32
    %567 = vector.shape_cast %18 : vector<1x512xi1> to vector<1x512xi1>
    %568 = vector.broadcast %567 : vector<1x512xi1> to vector<4x512xi1>
    %569 = vector.broadcast %cst_379 : f32 to vector<4x512xf32>
    %570 = arith.select %568, %566, %569 : vector<4x512xi1>, vector<4x512xf32>
    %c12_380 = arith.constant 12 : index
    %c0_381 = arith.constant 0 : index
    %571 = vector.load %arg6[%c12_380, %c0_381] : memref<36x512xf32, #tpu.memory_space<vmem>>, vector<4x512xf32>
    tpu.vector_store %arg6[%c12_380, %c0_381], %570 {strides = array<i32>} : memref<36x512xf32, #tpu.memory_space<vmem>>, vector<4x512xf32>,
    %c0_382 = arith.constant 0 : index
    %c0_383 = arith.constant 0 : index
    %c3649 = arith.constant 3649 : index
    %572 = vector.load %arg1[%c0_382, %c0_383, %c3649] : memref<1x4x4352xf32, #tpu.memory_space<vmem>>, vector<1x4x512xf32>
    %573 = vector.shape_cast %572 : vector<1x4x512xf32> to vector<4x512xf32>
    %c16_384 = arith.constant 16 : index
    %c0_385 = arith.constant 0 : index
    %574 = vector.load %arg6[%c16_384, %c0_385] : memref<36x512xf32, #tpu.memory_space<vmem>>, vector<4x512xf32>
    tpu.vector_store %arg6[%c16_384, %c0_385], %573 {strides = array<i32>} : memref<36x512xf32, #tpu.memory_space<vmem>>, vector<4x512xf32>,
    %c0_386 = arith.constant 0 : index
    %c0_387 = arith.constant 0 : index
    %c3650 = arith.constant 3650 : index
    %575 = vector.load %arg1[%c0_386, %c0_387, %c3650] : memref<1x4x4352xf32, #tpu.memory_space<vmem>>, vector<1x4x512xf32>
    %576 = vector.shape_cast %575 : vector<1x4x512xf32> to vector<4x512xf32>
    %cst_388 = arith.constant 0.000000e+00 : f32
    %577 = vector.shape_cast %20 : vector<1x512xi1> to vector<1x512xi1>
    %578 = vector.broadcast %577 : vector<1x512xi1> to vector<4x512xi1>
    %579 = vector.broadcast %cst_388 : f32 to vector<4x512xf32>
    %580 = arith.select %578, %576, %579 : vector<4x512xi1>, vector<4x512xf32>
    %c20_389 = arith.constant 20 : index
    %c0_390 = arith.constant 0 : index
    %581 = vector.load %arg6[%c20_389, %c0_390] : memref<36x512xf32, #tpu.memory_space<vmem>>, vector<4x512xf32>
    tpu.vector_store %arg6[%c20_389, %c0_390], %580 {strides = array<i32>} : memref<36x512xf32, #tpu.memory_space<vmem>>, vector<4x512xf32>,
    %c0_391 = arith.constant 0 : index
    %c0_392 = arith.constant 0 : index
    %c3712 = arith.constant 3712 : index
    %582 = vector.load %arg1[%c0_391, %c0_392, %c3712] : memref<1x4x4352xf32, #tpu.memory_space<vmem>>, vector<1x4x512xf32>
    %583 = vector.shape_cast %582 : vector<1x4x512xf32> to vector<4x512xf32>
    %cst_393 = arith.constant 0.000000e+00 : f32
    %584 = vector.shape_cast %18 : vector<1x512xi1> to vector<1x512xi1>
    %585 = vector.broadcast %584 : vector<1x512xi1> to vector<4x512xi1>
    %586 = vector.broadcast %cst_393 : f32 to vector<4x512xf32>
    %587 = arith.select %585, %583, %586 : vector<4x512xi1>, vector<4x512xf32>
    %c24_394 = arith.constant 24 : index
    %c0_395 = arith.constant 0 : index
    %588 = vector.load %arg6[%c24_394, %c0_395] : memref<36x512xf32, #tpu.memory_space<vmem>>, vector<4x512xf32>
    tpu.vector_store %arg6[%c24_394, %c0_395], %587 {strides = array<i32>} : memref<36x512xf32, #tpu.memory_space<vmem>>, vector<4x512xf32>,
    %c0_396 = arith.constant 0 : index
    %c0_397 = arith.constant 0 : index
    %c3713 = arith.constant 3713 : index
    %589 = vector.load %arg1[%c0_396, %c0_397, %c3713] : memref<1x4x4352xf32, #tpu.memory_space<vmem>>, vector<1x4x512xf32>
    %590 = vector.shape_cast %589 : vector<1x4x512xf32> to vector<4x512xf32>
    %c28_398 = arith.constant 28 : index
    %c0_399 = arith.constant 0 : index
    %591 = vector.load %arg6[%c28_398, %c0_399] : memref<36x512xf32, #tpu.memory_space<vmem>>, vector<4x512xf32>
    tpu.vector_store %arg6[%c28_398, %c0_399], %590 {strides = array<i32>} : memref<36x512xf32, #tpu.memory_space<vmem>>, vector<4x512xf32>,
    %c0_400 = arith.constant 0 : index
    %c0_401 = arith.constant 0 : index
    %c3714 = arith.constant 3714 : index
    %592 = vector.load %arg1[%c0_400, %c0_401, %c3714] : memref<1x4x4352xf32, #tpu.memory_space<vmem>>, vector<1x4x512xf32>
    %593 = vector.shape_cast %592 : vector<1x4x512xf32> to vector<4x512xf32>
    %cst_402 = arith.constant 0.000000e+00 : f32
    %594 = vector.shape_cast %20 : vector<1x512xi1> to vector<1x512xi1>
    %595 = vector.broadcast %594 : vector<1x512xi1> to vector<4x512xi1>
    %596 = vector.broadcast %cst_402 : f32 to vector<4x512xf32>
    %597 = arith.select %595, %593, %596 : vector<4x512xi1>, vector<4x512xf32>
    %c32_403 = arith.constant 32 : index
    %c0_404 = arith.constant 0 : index
    %598 = vector.load %arg6[%c32_403, %c0_404] : memref<36x512xf32, #tpu.memory_space<vmem>>, vector<4x512xf32>
    tpu.vector_store %arg6[%c32_403, %c0_404], %597 {strides = array<i32>} : memref<36x512xf32, #tpu.memory_space<vmem>>, vector<4x512xf32>,
    %c0_405 = arith.constant 0 : index
    %c0_406 = arith.constant 0 : index
    %599 = vector.load %arg6[%c0_405, %c0_406] : memref<36x512xf32, #tpu.memory_space<vmem>>, vector<36x512xf32>
    %cst_407 = arith.constant dense<0.000000e+00> : vector<48x512xf32>
    %600 = tpu.matmul %21, %599, %cst_407 {dimension_numbers = #tpu.dot_dimension_numbers<[1], [0], [0], [1], [0, 0, 1, 1], [], []>} : vector<48x36xf32>, vector<36x512xf32>, vector<48x512xf32> -> vector<48x512xf32>
    %c0_408 = arith.constant 0 : index
    %c3584_409 = arith.constant 3584 : index
    %601 = vector.load %arg4[%c0_408, %c3584_409] : memref<3x4096xf32, #tpu.memory_space<vmem>>, vector<3x512xf32>
    %cst_410 = arith.constant dense<0.000000e+00> : vector<16x512xf32>
    %602 = tpu.matmul %22, %601, %cst_410 {dimension_numbers = #tpu.dot_dimension_numbers<[1], [0], [0], [1], [0, 0, 1, 1], [], []>} : vector<16x3xf32>, vector<3x512xf32>, vector<16x512xf32> -> vector<16x512xf32>
    %603 = vector.extract_strided_slice %601 {offsets = [0, 0], sizes = [1, 512], strides = [1, 1]} : vector<3x512xf32> to vector<1x512xf32>
    %604 = vector.extract_strided_slice %600 {offsets = [0, 0], sizes = [16, 512], strides = [1, 1]} : vector<48x512xf32> to vector<16x512xf32>
    %605 = vector.broadcast %603 : vector<1x512xf32> to vector<16x512xf32>
    %606 = arith.mulf %605, %604 : vector<16x512xf32>
    %607 = arith.addf %602, %606 : vector<16x512xf32>
    %608 = vector.extract_strided_slice %601 {offsets = [1, 0], sizes = [1, 512], strides = [1, 1]} : vector<3x512xf32> to vector<1x512xf32>
    %609 = vector.extract_strided_slice %600 {offsets = [16, 0], sizes = [16, 512], strides = [1, 1]} : vector<48x512xf32> to vector<16x512xf32>
    %610 = vector.broadcast %608 : vector<1x512xf32> to vector<16x512xf32>
    %611 = arith.mulf %610, %609 : vector<16x512xf32>
    %612 = arith.addf %607, %611 : vector<16x512xf32>
    %613 = vector.extract_strided_slice %601 {offsets = [2, 0], sizes = [1, 512], strides = [1, 1]} : vector<3x512xf32> to vector<1x512xf32>
    %614 = vector.extract_strided_slice %600 {offsets = [32, 0], sizes = [16, 512], strides = [1, 1]} : vector<48x512xf32> to vector<16x512xf32>
    %615 = vector.broadcast %613 : vector<1x512xf32> to vector<16x512xf32>
    %616 = arith.mulf %615, %614 : vector<16x512xf32>
    %617 = arith.addf %612, %616 : vector<16x512xf32>
    %cst_411 = arith.constant 0.000000e+00 : f32
    %618 = vector.broadcast %cst_411 : f32 to vector<16x512xf32>
    %619 = arith.maximumf %617, %618 : vector<16x512xf32>
    %c0_412 = arith.constant 0 : index
    %c0_413 = arith.constant 0 : index
    %c3584_414 = arith.constant 3584 : index
    %620 = vector.load %arg5[%c0_412, %c0_413, %c3584_414] : memref<1x16x4096xf32, #tpu.memory_space<vmem>>, vector<1x16x512xf32>
    %621 = vector.shape_cast %620 : vector<1x16x512xf32> to vector<16x512xf32>
    %622 = vector.shape_cast %619 : vector<16x512xf32> to vector<1x16x512xf32>
    tpu.vector_store %arg5[%c0_412, %c0_413, %c3584_414], %622 {strides = array<i32>} : memref<1x16x4096xf32, #tpu.memory_space<vmem>>, vector<1x16x512xf32>,
    return
  }
  func.func @transform_0(%arg0: i32) -> (i32, i32, i32) {
    %c0_i32 = arith.constant 0 : i32
    %c0_i32_0 = arith.constant 0 : i32
    %c0_i32_1 = arith.constant 0 : i32
    return %arg0, %c0_i32, %c0_i32_0 : i32, i32, i32
  }
  func.func @transform_1(%arg0: i32) -> (i32, i32) {
    %c0_i32 = arith.constant 0 : i32
    %c0_i32_0 = arith.constant 0 : i32
    %c0_i32_1 = arith.constant 0 : i32
    return %c0_i32, %c0_i32_0 : i32, i32
  }
  func.func @transform_2(%arg0: i32) -> (i32, i32) {
    %c0_i32 = arith.constant 0 : i32
    %c0_i32_0 = arith.constant 0 : i32
    %c0_i32_1 = arith.constant 0 : i32
    return %c0_i32, %c0_i32_0 : i32, i32
  }
  func.func @transform_3(%arg0: i32) -> (i32, i32) {
    %c0_i32 = arith.constant 0 : i32
    %c0_i32_0 = arith.constant 0 : i32
    %c0_i32_1 = arith.constant 0 : i32
    return %c0_i32, %c0_i32_0 : i32, i32
  }
  func.func @transform_4(%arg0: i32) -> (i32, i32, i32) {
    %c0_i32 = arith.constant 0 : i32
    %c0_i32_0 = arith.constant 0 : i32
    %c0_i32_1 = arith.constant 0 : i32
    return %arg0, %c0_i32, %c0_i32_0 : i32, i32, i32
  }
}

</mosaic_0001>

<bundles_post_ra>
// kernel: ts_steerconv.1
= control target key start
LH: loop header
LB: loop body
LE: loop exit
PB: predicated region body
PF: predicated region fallthrough
CT: control target
= control target key end

     0   :  { %s7702_s15 = smov 0   ;;  %s10752_s0 = inlined_call_operand.vmem [shape: f32[2,4,4352], index: 0, kind: input, shape index: {}]   ;;  %s10753_s1 = inlined_call_operand.vmem [shape: f32[48,36], index: 1, kind: input, shape index: {}]   ;;  %s10754_s2 = inlined_call_operand.vmem [shape: f32[16,3], index: 2, kind: input, shape index: {}]   ;;  %s10755_s3 = inlined_call_operand.vmem [shape: f32[3,4096], index: 3, kind: input, shape index: {}]   ;;  %s10756_s4 = inlined_call_operand.vmem [shape: f32[2,16,4096], index: 4, kind: output, shape index: {}]  }
   0x1 LB: > { %s7171_s16 = sadd.s32 4294967295, %s7669_s15   ;;  %p7175_p0 = scmp.ge.s32.totalorder %s7669_s15, 1  ;;  %s7669_s15 = sphi %s7702_s15, %s14_s15  }
   0x2   : > { %p162_p1 = scmp.lt.s32.totalorder %s7669_s15, 3 }
   0x4   : > { %p163_p2 = pnand %p7175_p0, %p162_p1 }
   0x6   : > { %166 = sbr.rel (%p163_p2) target bundleno = 960 (0x3c0), region = 36 }
   0xd   : > { %p188_p3 = scmp.lt.s32.totalorder %s7171_s16, 1  ;;  %v198_v0 = vlaneseq  ;;  %s7671_s21 = smov 64   ;;  %v10798_v13 = vmov 0  ;;  %v10805_v21 = vmov 0  ;;  %v10762_v43 = vmov 0.0  }
   0xe   : > { %s7672_s22 = smov 126   ;;  %s7673_s23 = smov 127   ;;  %789 = vmatprep.mubr.f32.mxu1 %v10762_v43  ;;  %688 = vmatprep.mubr.f32.mxu0 %v10762_v43  ;;  %vm10758_vm4 = vcmask 523264   ;;  %vm349_vm5 = vcmask 1031168   ;;  %vm310_vm9 = vcmask 1039360   ;;  %vm462_vm11 = vcmask 506880  }
   0xf   : > { %s10969_s16 = smov (!%p188_p3, %s7171_s16), 1  ;;  %v7713_v1 = vand.u32 127, %v198_v0  ;;  %s7674_s24 = smov 62   ;;  %vm10760_vm12 = vcmask 515072   ;;  %vm10759_vm13 = vcmask 1043456   ;;  %vm592_vm14 = vcmask 293888  }
  0x10   : > { %s7502_s17 = smul.u32 136, %s10969_s16  ;;  %s7675_s25 = smov 63   ;;  %vm10757_vm15 = vcmask 1042432  }
  0x11   : > { %v7724_v4 = vadd.s32 256, %v7713_v1  ;;  %v7727_v5 = vadd.s32 128, %v7713_v1  ;;  %v7735_v8 = vadd.s32 384, %v7713_v1  ;;  %v207_v18 = vand.u32 63, %v7713_v1 }
  0x12   : > { %s7719_s20 = scalar_lea.vmem %s10752_s0, %s7502_s17 }
  0x13   : > { %v368_v2 = vld [vmem:[%s7719_s20 + $0x10] sm:$0xf]  ;;  %v367_v3 = vld [vmem:[%s7719_s20 + $0x8] sm:$0xff]  ;;  %v7732_v7 = vld [vmem:[%s7719_s20] sm:$0xff]  ;;  %v221_v9 = vand.u32 63, %v7724_v4  ;;  %v214_v10 = vand.u32 63, %v7727_v5 }
  0x14   : > { %382 = vrot.lane.b32.xlu1 %v368_v2, %s7671_s21  ;;  %378 = vrot.lane.b32.xlu0 %v367_v3, %s7671_s21  ;;  %v373_v6 = vcombine.high %v367_v3, %v367_v3  ;;  %v372_v11 = vcombine.high %v7732_v7, %v7732_v7  ;;  %v228_v12 = vand.u32 63, %v7735_v8  ;;  %v325_v19 = vld [vmem:[%s7719_s20 + $0x10] sm:$0xf]  ;;  %vm7777_vm3 = vcmp.ne.s32.totalorder %v207_v18, 0  ;;  %v507_v26 = vld [vmem:[%s7719_s20 + $0x4] sm:$0xff] }
  0x15   : > { %vm7747_vm0 = vcmp.ne.s32.totalorder %v221_v9, 0  ;;  %vm7753_vm1 = vcmp.ne.s32.totalorder %v214_v10, 0  ;;  %v10806_v21 = vsel %vm7777_vm3, 4294967295, %v10805_v21  ;;  %v283_v22 = vsel %vm7777_vm3, %v7732_v7, 0.0  ;;  %v7521_v24 = vld [vmem:[%s7719_s20 + $0x10] ss:$0 sps:$4 sm:$0xff]  }
  0x16   : > { %v10799_v13 = vsel %vm7747_vm0, 4294967295, %v10798_v13  ;;  %v284_v15 = vsel %vm7753_vm1, %v372_v11, 0.0  ;;  %v285_v16 = vsel %vm7747_vm0, %v367_v3, 0.0  ;;  %vm7765_vm2 = vcmp.ne.s32.totalorder %v228_v12, 0  ;;  %10807 = vst [vmem:[#allocation4_spill] sm:$0xff] %v10806_v21  ;;  %v508_v30 = vld [vmem:[%s7719_s20 + $0xc] sm:$0xff] }
  0x17   : > { %10800 = vst [vmem:[#allocation3_spill] sm:$0xff] %v10799_v13  ;;  %288 = vst [vmem:[#allocation2 + $0x8] sm:$0xf] %v284_v15  ;;  %v286_v20 = vsel %vm7765_vm2, %v373_v6, 0.0  ;;  %v298_v23 = vcombine.low %v367_v3, %v367_v3  ;;  %v297_v25 = vcombine.low %v7732_v7, %v7732_v7  ;;  %v446_v27 = vld [vmem:[%s7719_s20 + $0x10] sm:$0xf]  ;;  %v544_v28 = vcombine.high %v507_v26, %v507_v26 }
  0x18   : > { %380 = vrot.lane.b32.xlu1 %v373_v6, %s7671_s21  ;;  %374 = vrot.lane.b32.xlu0 %v7732_v7, %s7671_s21  ;;  %289 = vst [vmem:[#allocation2 + $0x10] sm:$0xf] %v285_v16  ;;  %290 = vst [vmem:[#allocation2 + $0x18] sm:$0xf] %v286_v20  ;;  %v545_v31 = vcombine.high %v508_v30, %v508_v30  ;;  %v501_v32 = vsel %vm7747_vm0, %v508_v30, 0.0  ;;  %v499_v35 = vsel %vm7777_vm3, %v507_v26, 0.0 }
  0x19   : > { %287 = vst [vmem:[#allocation2] sm:$0xf] %v283_v22  ;;  %v500_v29 = vsel %vm7753_vm1, %v544_v28, 0.0  ;;  %505 = vst [vmem:[#allocation2 + $0x70] sm:$0xf] %v501_v32  ;;  %v514_v36 = vcombine.low %v508_v30, %v508_v30  ;;  %v513_v38 = vcombine.low %v507_v26, %v507_v26  ;;  %v7830_v40 = vld [vmem:[%s7719_s20 + $0x10] sm:$0xff] }
  0x1a   : > { %504 = vst [vmem:[#allocation2 + $0x68] sm:$0xf] %v500_v29  ;;  %v502_v33 = vsel %vm7765_vm2, %v545_v31, 0.0  ;;  %v415_v34 = vld [vmem:[%s7719_s20 + $0x10] sm:$0xf]  ;;  %v7836_v41 = vcombine.high %v7830_v40, %v7830_v40  ;;  %v7839_v42 = vld [vmem:[%s7719_s20 + $0x18] sm:$0xff]  ;;  %v1188_v49 = vcombine.low %v7830_v40, %v7830_v40 }
  0x1b   : > { %506 = vst [vmem:[#allocation2 + $0x78] sm:$0xf] %v502_v33  ;;  %503 = vst [vmem:[#allocation2 + $0x60] sm:$0xf] %v499_v35  ;;  %v7524_v37 = vld [vmem:[%s7719_s20 + $0x14] ss:$0 sps:$4 sm:$0xff]   ;;  %v7848_v44 = vcombine.high %v7839_v42, %v7839_v42  ;;  %v1189_v47 = vcombine.low %v7839_v42, %v7839_v42 }
  0x1c   : > { %376 = vrot.lane.b32.xlu0 %v372_v11, %s7671_s21  ;;  %341 = vrot.lane.b32.xlu1 %v372_v11, %s7672_s22  ;;  %v540_v39 = vld [vmem:[%s7719_s20 + $0x14] sm:$0xf]  ;;  %v1249_v45 = vld [vmem:[%s7719_s20 + $0x20] sm:$0xf]  ;;  %vm7935_vm6 = vcmp.ne.s32.totalorder %v214_v10, 63  ;;  %vm7941_vm7 = vcmp.ne.s32.totalorder %v221_v9, 63 }
  0x1d   : > { %v1215_v46 = vld [vmem:[%s7719_s20 + $0x20] sm:$0xf]  ;;  %v7897_v51 = vld [vmem:[%s7719_s20 + $0x14] sm:$0xff]  ;;  %v7534_v63 = vld [vmem:[%s7719_s20 + $0x24] ss:$0 sps:$4 sm:$0xff]   ;;  %vm7960_vm8 = vcmp.ne.s32.totalorder %v228_v12, 63 }
  0x1e   : > { %v7531_v48 = vld [vmem:[%s7719_s20 + $0x20] ss:$0 sps:$4 sm:$0xff]   ;;  %v1391_v16 = vcombine.low %v7897_v51, %v7897_v51  ;;  %v7931_v22 = vcombine.high %v7897_v51, %v7897_v51  ;;  %v10812_v9 = vmov 0  ;;  %v1418_v8 = vld [vmem:[%s7719_s20 + $0x24] sm:$0xf]  ;;  %vm7986_vm10 = vcmp.ne.s32.totalorder %v207_v18, 63 }
  0x1f   : > { %v1325_v50 = vld [vmem:[%s7719_s20 + $0x20] sm:$0xf]  ;;  %v10813_v9 = vsel %vm7960_vm8, 4294967295, %v10812_v9  ;;  %v2099_v1 = vld [vmem:[%s7719_s20 + $0x30] sm:$0xf]  ;;  %v1175_v18 = vsel %vm7753_vm1, %v7836_v41, 0.0 }
  0x20   : > { %343 = vrot.lane.b32.xlu0 %v367_v3, %s7672_s22  ;;  %345 = vrot.lane.b32.xlu1 %v373_v6, %s7672_s22  ;;  %v1295_v52 = vld [vmem:[%s7719_s20 + $0x20] sm:$0xf]  ;;  %10814 = vst [vmem:[#allocation5_spill] sm:$0xff] %v10813_v9 }
  0x21   : > { %v7901_v53 = vld [vmem:[%s7719_s20 + $0x1c] sm:$0xff] }
  0x22   : > { %v1392_v56 = vcombine.low %v7901_v53, %v7901_v53  ;;  %v7956_v4 = vcombine.high %v7901_v53, %v7901_v53  ;;  %v7973_v12 = vld [vmem:[%s7719_s20 + $0x20] sm:$0xff] }
  0x24   : > { %347 = vrot.lane.b32.xlu0 %v325_v19, %s7672_s22  ;;  %302 = vrot.lane.b32.xlu1 %v7732_v7, %s7673_s23 }
  0x28   : > { %304 = vrot.lane.b32.xlu0 %v298_v23, %s7673_s23  ;;  %306 = vrot.lane.b32.xlu1 %v367_v3, %s7673_s23 }
  0x2c   : > { %308 = vrot.lane.b32.xlu0 %v7521_v24, %s7673_s23  ;;  %339 = vrot.lane.b32.xlu1 %v7732_v7, %s7672_s22 }
  0x30   : > { %454 = vrot.lane.b32.xlu1 %v372_v11, %s7674_s24  ;;  %300 = vrot.lane.b32.xlu0 %v297_v25, %s7673_s23 }
  0x34   : > { %458 = vrot.lane.b32.xlu1 %v373_v6, %s7674_s24  ;;  %456 = vrot.lane.b32.xlu0 %v367_v3, %s7674_s24 }
  0x38   : > { %452 = vrot.lane.b32.xlu1 %v7732_v7, %s7674_s24  ;;  %460 = vrot.lane.b32.xlu0 %v446_v27, %s7674_s24 }
  0x3c   : > { %425 = vrot.lane.b32.xlu1 %v367_v3, %s7675_s25  ;;  %423 = vrot.lane.b32.xlu0 %v372_v11, %s7675_s25 }
  0x40   : > { %429 = vrot.lane.b32.xlu1 %v415_v34, %s7675_s25  ;;  %427 = vrot.lane.b32.xlu0 %v373_v6, %s7675_s25 }
  0x44   : > { %520 = vrot.lane.b32.xlu1 %v514_v36, %s7673_s23  ;;  %518 = vrot.lane.b32.xlu0 %v507_v26, %s7673_s23 }
  0x48   : > { %524 = vrot.lane.b32.xlu1 %v7524_v37, %s7673_s23  ;;  %522 = vrot.lane.b32.xlu0 %v508_v30, %s7673_s23 }
  0x4c   : > { %516 = vrot.lane.b32.xlu1 %v513_v38, %s7673_s23  ;;  %421 = vrot.lane.b32.xlu0 %v7732_v7, %s7675_s25 }
  0x50   : > { %550 = vrot.lane.b32.xlu1 %v508_v30, %s7672_s22  ;;  %548 = vrot.lane.b32.xlu0 %v544_v28, %s7672_s22 }
  0x54   : > { %554 = vrot.lane.b32.xlu1 %v540_v39, %s7672_s22  ;;  %552 = vrot.lane.b32.xlu0 %v545_v31, %s7672_s22  ;;  %v7982_v39 = vcombine.high %v7973_v12, %v7973_v12 }
  0x58   : > { %1257 = vrot.lane.b32.xlu1 %v7836_v41, %s7671_s21  ;;  %546 = vrot.lane.b32.xlu0 %v507_v26, %s7672_s22 }
  0x5c   : > { %1261 = vrot.lane.b32.xlu1 %v7848_v44, %s7671_s21  ;;  %1259 = vrot.lane.b32.xlu0 %v7839_v42, %s7671_s21 }
  0x60   : > { %1255 = vrot.lane.b32.xlu1 %v7830_v40, %s7671_s21  ;;  %1263 = vrot.lane.b32.xlu0 %v1249_v45, %s7671_s21  ;;  %v10815_v45 = vmov 0 }
  0x61   : > { %v10816_v45 = vsel %vm7986_vm10, 4294967295, %v10815_v45 }
  0x62   : > { %10817 = vst [vmem:[#allocation6_spill] sm:$0xff] %v10816_v45 }
  0x64   : > { %1225 = vrot.lane.b32.xlu1 %v7839_v42, %s7672_s22  ;;  %1223 = vrot.lane.b32.xlu0 %v7836_v41, %s7672_s22 }
  0x68   : > { %1229 = vrot.lane.b32.xlu1 %v1215_v46, %s7672_s22  ;;  %1227 = vrot.lane.b32.xlu0 %v7848_v44, %s7672_s22  ;;  %v7991_v46 = vld [vmem:[%s7719_s20 + $0x28] sm:$0xff] }
  0x6c   : > { %1195 = vrot.lane.b32.xlu1 %v1189_v47, %s7673_s23  ;;  %1193 = vrot.lane.b32.xlu0 %v7830_v40, %s7673_s23 }
  0x70   : > { %1199 = vrot.lane.b32.xlu1 %v7531_v48, %s7673_s23  ;;  %1197 = vrot.lane.b32.xlu0 %v7839_v42, %s7673_s23 }
  0x74   : > { %1191 = vrot.lane.b32.xlu1 %v1188_v49, %s7673_s23  ;;  %1221 = vrot.lane.b32.xlu0 %v7830_v40, %s7672_s22 }
  0x78   : > { %1335 = vrot.lane.b32.xlu1 %v7839_v42, %s7674_s24  ;;  %1333 = vrot.lane.b32.xlu0 %v7836_v41, %s7674_s24 }
  0x7c   : > { %1339 = vrot.lane.b32.xlu1 %v1325_v50, %s7674_s24  ;;  %1337 = vrot.lane.b32.xlu0 %v7848_v44, %s7674_s24 }
  0x80   : > { %1303 = vrot.lane.b32.xlu1 %v7836_v41, %s7675_s25  ;;  %1331 = vrot.lane.b32.xlu0 %v7830_v40, %s7674_s24  ;;  %v1177_v41 = vsel %vm7765_vm2, %v7848_v44, 0.0 }
  0x84   : > { %1307 = vrot.lane.b32.xlu1 %v7848_v44, %s7675_s25  ;;  %1305 = vrot.lane.b32.xlu0 %v7839_v42, %s7675_s25 }
  0x86   : > { %v383_v54 = vpop.permute.xlu1 %382  ;;  %v379_v55 = vpop.permute.xlu0 %378 }
  0x88   : > { %1396 = vrot.lane.b32.xlu1 %v7897_v51, %s7673_s23  ;;  %1309 = vrot.lane.b32.xlu0 %v1295_v52, %s7675_s25 }
  0x8a   : > { %v381_v57 = vpop.permute.xlu1 %380  ;;  %v375_v58 = vpop.permute.xlu0 %374 }
  0x8b   : > { %v387_v59 = vsel %vm10758_vm4, %v379_v55, %v381_v57  ;;  %v388_v60 = vsel %vm10758_vm4, %v381_v57, %v383_v54  ;;  %v7999_v54 = vcombine.high %v7991_v46, %v7991_v46 }
  0x8c   : > { %v395_v61 = vsel %vm7747_vm0, %v387_v59, 0.0  ;;  %v396_v62 = vsel %vm7765_vm2, %v388_v60, 0.0  ;;  %1400 = vrot.lane.b32.xlu1 %v7901_v53, %s7673_s23  ;;  %1398 = vrot.lane.b32.xlu0 %v1392_v56, %s7673_s23 }
  0x8d   : > { %v403_v2 = vrot.slane %v395_v61, 4  ;;  %v404_v3 = vrot.slane %v396_v62, 4 }
  0x8e   : > { %v377_v6 = vpop.permute.xlu0 %376  ;;  %v342_v7 = vpop.permute.xlu1 %341 }
  0x8f   : > { %411 = vst [vmem:[#allocation2 + $0x30] sm:$0xf0] %v403_v2  ;;  %412 = vst [vmem:[#allocation2 + $0x38] sm:$0xf0] %v404_v3  ;;  %v385_v11 = vsel %vm10758_vm4, %v375_v58, %v377_v6  ;;  %v386_v15 = vsel %vm10758_vm4, %v377_v6, %v379_v55  ;;  %v1176_v55 = vsel %vm7747_vm0, %v7839_v42, 0.0 }
  0x90   : > { %v393_v19 = vsel %vm7777_vm3, %v385_v11, 0.0  ;;  %v394_v20 = vsel %vm7753_vm1, %v386_v15, 0.0  ;;  %1301 = vrot.lane.b32.xlu1 %v7830_v40, %s7675_s25  ;;  %1402 = vrot.lane.b32.xlu0 %v7534_v63, %s7673_s23 }
  0x91   : > { %v401_v23 = vrot.slane %v393_v19, 4  ;;  %v402_v24 = vrot.slane %v394_v20, 4 }
  0x92   : > { %v344_v27 = vpop.permute.xlu0 %343  ;;  %v346_v28 = vpop.permute.xlu1 %345 }
  0x93   : > { %409 = vst [vmem:[#allocation2 + $0x20] sm:$0xf0] %v401_v23  ;;  %410 = vst [vmem:[#allocation2 + $0x28] sm:$0xf0] %v402_v24  ;;  %v351_v29 = vsel %vm349_vm5, %v342_v7, %v344_v27  ;;  %v352_v30 = vsel %vm349_vm5, %v344_v27, %v346_v28  ;;  %v1174_v24 = vsel %vm7777_vm3, %v7830_v40, 0.0 }
  0x94   : > { %v359_v5 = vsel %vm7935_vm6, %v351_v29, 0.0  ;;  %v360_v10 = vsel %vm7941_vm7, %v352_v30, 0.0  ;;  %1426 = vrot.lane.b32.xlu1 %v7931_v22, %s7672_s22  ;;  %1394 = vrot.lane.b32.xlu0 %v1391_v16, %s7673_s23 }
  0x95   : > { %363 = vst [vmem:[#allocation2 + $0x28] sm:$0xf] %v359_v5  ;;  %364 = vst [vmem:[#allocation2 + $0x30] sm:$0xf] %v360_v10 }
  0x96   : > { %v348_v31 = vpop.permute.xlu0 %347  ;;  %v303_v32 = vpop.permute.xlu1 %302 }
  0x97   : > { %v353_v33 = vsel %vm349_vm5, %v346_v28, %v348_v31 }
  0x98   : > { %v361_v34 = vsel %vm7960_vm8, %v353_v33, 0.0  ;;  %1430 = vrot.lane.b32.xlu1 %v7956_v4, %s7672_s22  ;;  %1428 = vrot.lane.b32.xlu0 %v7901_v53, %s7672_s22 }
  0x99   : > { %365 = vst [vmem:[#allocation2 + $0x38] sm:$0xf] %v361_v34 }
  0x9a   : > { %v305_v35 = vpop.permute.xlu0 %304  ;;  %v307_v36 = vpop.permute.xlu1 %306 }
  0x9b   : > { %v312_v37 = vsel %vm310_vm9, %v303_v32, %v305_v35  ;;  %v313_v38 = vsel %vm310_vm9, %v305_v35, %v307_v36 }
  0x9c   : > { %320 = vst [vmem:[#allocation2 + $0x8] sm:$0xf0] %v312_v37  ;;  %321 = vst [vmem:[#allocation2 + $0x10] sm:$0xf0] %v313_v38  ;;  %1424 = vrot.lane.b32.xlu1 %v7897_v51, %s7672_s22  ;;  %1432 = vrot.lane.b32.xlu0 %v1418_v8, %s7672_s22  ;;  %v577_v58 = vld [vmem:[#allocation2 + $0x28] sm:$0xff]  ;;  %v578_v11 = vld [vmem:[#allocation2 + $0x30] sm:$0xff]  ;;  %v2039_v38 = vcombine.low %v7991_v46, %v7991_v46 }
  0x9d   : > { %v2065_v8 = vld [vmem:[%s7719_s20 + $0x30] sm:$0xf] }
  0x9e   : > { %v309_v47 = vpop.permute.xlu0 %308  ;;  %v340_v48 = vpop.permute.xlu1 %339 }
  0x9f   : > { %v314_v49 = vsel %vm310_vm9, %v307_v36, %v309_v47  ;;  %v350_v50 = vsel %vm349_vm5, %v340_v48, %v342_v7 }
  0xa0   : > { %322 = vst [vmem:[#allocation2 + $0x18] sm:$0xf0] %v314_v49  ;;  %v358_v52 = vsel %vm7986_vm10, %v350_v50, 0.0  ;;  %2109 = vrot.lane.b32.xlu1 %v7991_v46, %s7671_s21  ;;  %2107 = vrot.lane.b32.xlu0 %v7982_v39, %s7671_s21  ;;  %v579_v2 = vld [vmem:[#allocation2 + $0x38] sm:$0xff] }
  0xa1   : > { %362 = vst [vmem:[#allocation2 + $0x20] sm:$0xf] %v358_v52  ;;  %v7541_v52 = vld [vmem:[%s7719_s20 + $0x30] ss:$0 sps:$4 sm:$0xff]  }
  0xa2   : > { %v455_v56 = vpop.permute.xlu1 %454  ;;  %v301_v57 = vpop.permute.xlu0 %300 }
  0xa3   : > { %v573_v59 = vld [vmem:[#allocation2 + $0x8] sm:$0xff]  ;;  %v574_v60 = vld [vmem:[#allocation2 + $0x10] sm:$0xff]  ;;  %v311_v61 = vsel %vm310_vm9, %v301_v57, %v303_v32 }
  0xa4   : > { %319 = vst [vmem:[#allocation2] sm:$0xf0] %v311_v61  ;;  %2113 = vrot.lane.b32.xlu1 %v2099_v1, %s7671_s21  ;;  %2111 = vrot.lane.b32.xlu0 %v7999_v54, %s7671_s21  ;;  %v7374_v62 = vpack.c.bf16 %v577_v58, %v573_v59  ;;  %1179 = vst [vmem:[#allocation2 + $0x8] sm:$0xf] %v1175_v18  ;;  %v7384_v23 = vpack.c.bf16 %v578_v11, %v574_v60  ;;  %v1378_v61 = vsel %vm7753_vm1, %v7931_v22, 0.0 }
  0xa5   : > { %1180 = vst [vmem:[#allocation2 + $0x10] sm:$0xf] %v1176_v55  ;;  %v1379_v22 = vsel %vm7747_vm0, %v7901_v53, 0.0  ;;  %v1380_v11 = vsel %vm7765_vm2, %v7956_v4, 0.0  ;;  %v1377_v4 = vsel %vm7777_vm3, %v7897_v51, 0.0 }
  0xa6   : > { %v459_v42 = vpop.permute.xlu1 %458  ;;  %v457_v63 = vpop.permute.xlu0 %456  ;;  %7375 = vmatprep.subr.bf16.mxu0 %v7374_v62 }
  0xa7   : > { %v575_v3 = vld [vmem:[#allocation2 + $0x18] sm:$0xff]  ;;  %v464_v6 = vsel %vm462_vm11, %v455_v56, %v457_v63  ;;  %v465_v7 = vsel %vm462_vm11, %v457_v63, %v459_v42 }
  0xa8   : > { %1181 = vst [vmem:[#allocation2 + $0x18] sm:$0xf] %v1177_v41  ;;  %v472_v15 = vsel %vm7935_vm6, %v464_v6, 0.0  ;;  %v473_v16 = vsel %vm7941_vm7, %v465_v7, 0.0  ;;  %2073 = vrot.lane.b32.xlu1 %v7982_v39, %s7672_s22  ;;  %2105 = vrot.lane.b32.xlu0 %v7973_v12, %s7671_s21  ;;  %v7382_v44 = vpack.c.bf16 %v579_v2, %v575_v3  ;;  %v576_v29 = vld [vmem:[#allocation2 + $0x20] sm:$0xff] }
  0xa9   : > { %v480_v19 = vrot.slane %v472_v15, 4  ;;  %v481_v20 = vrot.slane %v473_v16, 4  ;;  %v2175_v7 = vld [vmem:[%s7719_s20 + $0x30] sm:$0xf] }
  0xaa   : > { %v453_v27 = vpop.permute.xlu1 %452  ;;  %v461_v28 = vpop.permute.xlu0 %460  ;;  %7383 = vmatprep.subr.bf16.mxu1 %v7382_v44 }
  0xab   : > { %v572_v30 = vld [vmem:[#allocation2] sm:$0xff]  ;;  %488 = vst [vmem:[#allocation2 + $0x48] sm:$0xf0] %v480_v19  ;;  %489 = vst [vmem:[#allocation2 + $0x50] sm:$0xf0] %v481_v20  ;;  %v463_v5 = vsel %vm462_vm11, %v453_v27, %v455_v56  ;;  %v466_v10 = vsel %vm462_vm11, %v459_v42, %v461_v28  ;;  %7385 = vmatpush1.bf16.msra.mxu1 %v7384_v23  ;;  %v2038_v56 = vcombine.low %v7973_v12, %v7973_v12 }
  0xac   : > { %v471_v31 = vsel %vm7986_vm10, %v463_v5, 0.0  ;;  %v474_v32 = vsel %vm7960_vm8, %v466_v10, 0.0  ;;  %2077 = vrot.lane.b32.xlu1 %v7999_v54, %s7672_s22  ;;  %2075 = vrot.lane.b32.xlu0 %v7991_v46, %s7672_s22  ;;  %v7376_v40 = vpack.c.bf16 %v576_v29, %v572_v30  ;;  %1178 = vst [vmem:[#allocation2] sm:$0xf] %v1174_v24 }
  0xad   : > { %v479_v33 = vrot.slane %v471_v31, 4  ;;  %v482_v34 = vrot.slane %v474_v32, 4 }
  0xae   : > { %v426_v35 = vpop.permute.xlu1 %425  ;;  %v424_v36 = vpop.permute.xlu0 %423  ;;  %7377 = vmatpush1.bf16.msra.mxu0 %v7376_v40 }
  0xaf   : > { %487 = vst [vmem:[#allocation2 + $0x40] sm:$0xf0] %v479_v33  ;;  %490 = vst [vmem:[#allocation2 + $0x58] sm:$0xf0] %v482_v34  ;;  %v433_v37 = vsel %vm10760_vm12, %v424_v36, %v426_v35  ;;  %v2145_v34 = vld [vmem:[%s7719_s20 + $0x30] sm:$0xf] }
  0xb0   : > { %441 = vst [vmem:[#allocation2 + $0x48] sm:$0xf] %v433_v37  ;;  %2043 = vrot.lane.b32.xlu1 %v7973_v12, %s7673_s23  ;;  %2079 = vrot.lane.b32.xlu0 %v2065_v8, %s7672_s22  ;;  %v8103_v8 = vld [vmem:[%s7719_s20 + $0x2c] sm:$0xff] }
  0xb2   : > { %v430_v47 = vpop.permute.xlu1 %429  ;;  %v428_v48 = vpop.permute.xlu0 %427 }
  0xb3   : > { %v434_v49 = vsel %vm10760_vm12, %v426_v35, %v428_v48  ;;  %v435_v50 = vsel %vm10760_vm12, %v428_v48, %v430_v47  ;;  %v8116_v47 = vld [vmem:[%s10755_s3 + $0x8] sm:$0x77] }
  0xb4   : > { %442 = vst [vmem:[#allocation2 + $0x50] sm:$0xf] %v434_v49  ;;  %443 = vst [vmem:[#allocation2 + $0x58] sm:$0xf] %v435_v50  ;;  %2047 = vrot.lane.b32.xlu1 %v7991_v46, %s7673_s23  ;;  %2045 = vrot.lane.b32.xlu0 %v2039_v38, %s7673_s23  ;;  %v2242_v38 = vcombine.low %v8103_v8, %v8103_v8  ;;  %v8120_v48 = vld [vmem:[%s7719_s20 + $0x24] sm:$0xff] }
  0xb6   : > { %v521_v1 = vpop.permute.xlu1 %520  ;;  %v519_v18 = vpop.permute.xlu0 %518 }
  0xb7   : > { %v527_v55 = vsel %vm310_vm9, %v519_v18, %v521_v1  ;;  %v581_v42 = vld [vmem:[#allocation2 + $0x48] sm:$0xff] }
  0xb8   : > { %535 = vst [vmem:[#allocation2 + $0x68] sm:$0xf0] %v527_v55  ;;  %2071 = vrot.lane.b32.xlu1 %v7973_v12, %s7672_s22  ;;  %2049 = vrot.lane.b32.xlu0 %v7541_v52, %s7673_s23  ;;  %v826_v55 = vld [vmem:[%s10755_s3] sm:$0x77] }
  0xba   : > { %v525_v57 = vpop.permute.xlu1 %524  ;;  %v523_v58 = vpop.permute.xlu0 %522 }
  0xbb   : > { %v528_v59 = vsel %vm310_vm9, %v521_v1, %v523_v58  ;;  %v529_v60 = vsel %vm310_vm9, %v523_v58, %v525_v57  ;;  %v582_v15 = vld [vmem:[#allocation2 + $0x50] sm:$0xff]  ;;  %v583_v19 = vld [vmem:[#allocation2 + $0x58] sm:$0xff] }
  0xbc   : > { %536 = vst [vmem:[#allocation2 + $0x70] sm:$0xf0] %v528_v59  ;;  %537 = vst [vmem:[#allocation2 + $0x78] sm:$0xf0] %v529_v60  ;;  %2183 = vrot.lane.b32.xlu1 %v7982_v39, %s7674_s24  ;;  %2041 = vrot.lane.b32.xlu0 %v2038_v56, %s7673_s23  ;;  %v7544_v1 = vld [vmem:[%s7719_s20 + $0x34] ss:$0 sps:$4 sm:$0xff]   ;;  %v875_v56 = vcombine.high %v8116_v47, %v8116_v47 }
  0xbe   : > { %v517_v62 = vpop.permute.xlu1 %516  ;;  %v422_v41 = vpop.permute.xlu0 %421 }
  0xbf   : > { %v585_v63 = vld [vmem:[#allocation2 + $0x68] sm:$0xff]  ;;  %v526_v2 = vsel %vm310_vm9, %v517_v62, %v519_v18  ;;  %v432_v3 = vsel %vm10760_vm12, %v422_v41, %v424_v36  ;;  %v8128_v18 = vld [vmem:[%s10753_s1] sm:$0xff] }
  0xc0   : > { %534 = vst [vmem:[#allocation2 + $0x60] sm:$0xf0] %v526_v2  ;;  %440 = vst [vmem:[#allocation2 + $0x40] sm:$0xf] %v432_v3  ;;  %2187 = vrot.lane.b32.xlu1 %v7999_v54, %s7674_s24  ;;  %2185 = vrot.lane.b32.xlu0 %v7991_v46, %s7674_s24  ;;  %v7378_v6 = vpack.c.bf16 %v585_v63, %v581_v42  ;;  %v874_v63 = vcombine.high %v826_v55, %v826_v55 }
  0xc1   : > { %1382 = vst [vmem:[#allocation2 + $0x68] sm:$0xf] %v1378_v61 }
  0xc2   : > { %v551_v16 = vpop.permute.xlu1 %550  ;;  %v549_v44 = vpop.permute.xlu0 %548  ;;  %7379 = vmatprep.subr.bf16.mxu0 %v7378_v6  ;;  %v2241_v6 = vcombine.low %v8120_v48, %v8120_v48 }
  0xc3   : > { %v586_v20 = vld [vmem:[#allocation2 + $0x70] sm:$0xff]  ;;  %v587_v23 = vld [vmem:[#allocation2 + $0x78] sm:$0xff]  ;;  %v557_v24 = vsel %vm349_vm5, %v549_v44, %v551_v16 }
  0xc4   : > { %v565_v27 = vsel %vm7935_vm6, %v557_v24, 0.0  ;;  %2181 = vrot.lane.b32.xlu1 %v7973_v12, %s7674_s24  ;;  %2189 = vrot.lane.b32.xlu0 %v2175_v7, %s7674_s24  ;;  %v7386_v53 = vpack.c.bf16 %v587_v23, %v583_v19  ;;  %v7388_v28 = vpack.c.bf16 %v586_v20, %v582_v15  ;;  %1383 = vst [vmem:[#allocation2 + $0x70] sm:$0xf] %v1379_v22  ;;  %1384 = vst [vmem:[#allocation2 + $0x78] sm:$0xf] %v1380_v11  ;;  %v8161_v15 = vld [vmem:[%s10753_s1 + $0x8] sm:$0xff] }
  0xc5   : > { %569 = vst [vmem:[#allocation2 + $0x88] sm:$0xf] %v565_v27  ;;  %v2272_v27 = vcombine.high %v8120_v48, %v8120_v48 }
  0xc6   : > { %v555_v29 = vpop.permute.xlu1 %554  ;;  %v553_v30 = vpop.permute.xlu0 %552  ;;  %7387 = vmatprep.subr.bf16.mxu1 %v7386_v53  ;;  %v8185_v53 = vld [vmem:[%s10753_s1 + $0x10] sm:$0xff] }
  0xc7   : > { %v584_v5 = vld [vmem:[#allocation2 + $0x60] sm:$0xff]  ;;  %v558_v31 = vsel %vm349_vm5, %v551_v16, %v553_v30  ;;  %v559_v32 = vsel %vm349_vm5, %v553_v30, %v555_v29  ;;  %7389 = vmatpush1.bf16.msra.mxu1 %v7388_v28 }
  0xc8   : > { %v580_v10 = vld [vmem:[#allocation2 + $0x40] sm:$0xff]  ;;  %v566_v40 = vsel %vm7941_vm7, %v558_v31, 0.0  ;;  %v567_v33 = vsel %vm7960_vm8, %v559_v32, 0.0  ;;  %2155 = vrot.lane.b32.xlu1 %v7991_v46, %s7675_s25  ;;  %2153 = vrot.lane.b32.xlu0 %v7982_v39, %s7675_s25  ;;  %1381 = vst [vmem:[#allocation2 + $0x60] sm:$0xf] %v1377_v4  ;;  %v8210_v31 = vld [vmem:[%s10753_s1 + $0x18] sm:$0xff] }
  0xc9   : > { %v7380_v51 = vpack.c.bf16 %v584_v5, %v580_v10  ;;  %570 = vst [vmem:[#allocation2 + $0x90] sm:$0xf] %v566_v40  ;;  %571 = vst [vmem:[#allocation2 + $0x98] sm:$0xf] %v567_v33  ;;  %v2273_v10 = vcombine.high %v8103_v8, %v8103_v8  ;;  %v2268_v32 = vld [vmem:[%s7719_s20 + $0x34] sm:$0xf] }
  0xca   : > { %v1258_v35 = vpop.permute.xlu1 %1257  ;;  %v547_v36 = vpop.permute.xlu0 %546  ;;  %v8215_v40 = vld [vmem:[%s7719_s20 + $0x30] sm:$0xff] }
  0xcb   : > { %7381 = vmatpush1.bf16.msra.mxu0 %v7380_v51  ;;  %v556_v37 = vsel %vm349_vm5, %v547_v36, %v549_v44  ;;  %v8235_v36 = vld [vmem:[%s10753_s1 + $0x20] sm:$0xff] }
  0xcc   : > { %v564_v46 = vsel %vm7986_vm10, %v556_v37, 0.0  ;;  %2159 = vrot.lane.b32.xlu1 %v2145_v34, %s7675_s25  ;;  %2157 = vrot.lane.b32.xlu0 %v7999_v54, %s7675_s25  ;;  %v589_v39 = vld [vmem:[#allocation2 + $0x88] sm:$0xf]  ;;  %v8220_v34 = vld [vmem:[%s7719_s20 + $0x20] sm:$0xff]  ;;  %v8239_v37 = vld [vmem:[%s7719_s20 + $0x38] sm:$0xff] }
  0xcd   : > { %568 = vst [vmem:[#allocation2 + $0x80] sm:$0xf] %v564_v46  ;;  %7179 = vmatprep.subr.msk.mxu0 %vm10759_vm13, %v589_v39  ;;  %v2020_v46 = vcombine.high %v8220_v34, %v8220_v34 }
  0xce   : > { %v1262_v49 = vpop.permute.xlu1 %1261  ;;  %v1260_v50 = vpop.permute.xlu0 %1259 }
  0xcf   : > { %v1266_v52 = vsel %vm10758_vm4, %v1258_v35, %v1260_v50  ;;  %v1267_v54 = vsel %vm10758_vm4, %v1260_v50, %v1262_v49  ;;  %v8256_v50 = vcombine.high %v8239_v37, %v8239_v37 }
  0xd0   : > { %v1274_v57 = vsel %vm7753_vm1, %v1266_v52, 0.0  ;;  %v1275_v58 = vsel %vm7747_vm0, %v1267_v54, 0.0  ;;  %2248 = vrot.lane.b32.xlu1 %v2242_v38, %s7673_s23  ;;  %2246 = vrot.lane.b32.xlu0 %v8120_v48, %s7673_s23  ;;  %v591_v59 = vld [vmem:[#allocation2 + $0x98] sm:$0xf]  ;;  %v590_v60 = vld [vmem:[#allocation2 + $0x90] sm:$0xf] }
  0xd1   : > { %v1282_v61 = vrot.slane %v1274_v57, 4  ;;  %v1283_v62 = vrot.slane %v1275_v58, 4  ;;  %7187 = vmatprep.subr.msk.mxu1 %vm10759_vm13, %v591_v59  ;;  %v8261_v52 = vld [vmem:[%s10753_s1 + $0x28] sm:$0xff] }
  0xd2   : > { %v1256_v41 = vpop.permute.xlu1 %1255  ;;  %v1264_v42 = vpop.permute.xlu0 %1263  ;;  %7188 = vmatpush1.msk.msra.mxu1 %vm10759_vm13, %v590_v60  ;;  %v2017_v54 = vld [vmem:[%s7719_s20 + $0x28] sm:$0xff] }
  0xd3   : > { %1290 = vst [vmem:[#allocation2 + $0x28] sm:$0xf0] %v1282_v61  ;;  %1291 = vst [vmem:[#allocation2 + $0x30] sm:$0xf0] %v1283_v62  ;;  %v1265_v2 = vsel %vm10758_vm4, %v1256_v41, %v1258_v35  ;;  %v1268_v3 = vsel %vm10758_vm4, %v1262_v49, %v1264_v42  ;;  %7189 = vmatmul.mubr.msk.f32.vlgmr.msra.gmra.mrb[0].mxu1 %vm592_vm14, %v8128_v18  ;;  %7199 = vmatprep.subr.msk.mxu1 %vm10757_vm15, %v875_v56  ;;  %v8284_v41 = vld [vmem:[%s10754_s2] sm:$0xff] }
  0xd4   : > { %v1273_v7 = vsel %vm7777_vm3, %v1265_v2, 0.0  ;;  %v1276_v22 = vsel %vm7765_vm2, %v1268_v3, 0.0  ;;  %2252 = vrot.lane.b32.xlu1 %v7544_v1, %s7673_s23  ;;  %2250 = vrot.lane.b32.xlu0 %v8103_v8, %s7673_s23  ;;  %v588_v11 = vld [vmem:[#allocation2 + $0x80] sm:$0xf]  ;;  %v8230_v35 = vcombine.high %v8215_v40, %v8215_v40  ;;  %v2025_v1 = vsel %vm7753_vm1, %v2020_v46, 0.0 }
  0xd5   : > { %v1281_v16 = vrot.slane %v1273_v7, 4  ;;  %v1284_v44 = vrot.slane %v1276_v22, 4  ;;  %7180 = vmatpush1.msk.msra.mxu0 %vm10759_vm13, %v588_v11  ;;  %795 = vmatprep.mubr.f32.mxu1 %v10762_v43  ;;  %v2949_v42 = vld [vmem:[%s7719_s20 + $0x40] sm:$0xf]  ;;  %v2026_v2 = vsel %vm7747_vm0, %v2017_v54, 0.0 }
  0xd6   : > { %v1226_v19 = vpop.permute.xlu1 %1225  ;;  %v8165_v20 = vpop.permute.xlu0 %1223  ;;  %7181 = vmatmul.mubr.msk.f32.vlgmr.msra.gmra.mrb[0].mxu0 %vm592_vm14, %v8128_v18  ;;  %7195 = vmatprep.subr.msk.mxu0 %vm10757_vm15, %v874_v63  ;;  %v2915_v46 = vld [vmem:[%s7719_s20 + $0x40] sm:$0xf] }
  0xd7   : > { %1289 = vst [vmem:[#allocation2 + $0x20] sm:$0xf0] %v1281_v16  ;;  %1292 = vst [vmem:[#allocation2 + $0x38] sm:$0xf0] %v1284_v44  ;;  %v1232_v23 = vsel %vm349_vm5, %v8165_v20, %v1226_v19  ;;  %7190 = vmatmul.mubr.msk.f32.gmra.mrb[2].mxu1 %vm592_vm14, %v8161_v15  ;;  %694 = vmatprep.mubr.f32.mxu0 %v10762_v43 }
  0xd8   : > { %v1240_v24 = vsel %vm7935_vm6, %v1232_v23, 0.0  ;;  %2244 = vrot.lane.b32.xlu1 %v2241_v6, %s7673_s23  ;;  %2151 = vrot.lane.b32.xlu0 %v7973_v12, %s7675_s25 }
  0xd9   : > { %1244 = vst [vmem:[#allocation2 + $0x28] sm:$0xf] %v1240_v24  ;;  %801 = vmatprep.mubr.f32.mxu1 %v10762_v43  ;;  %7196 = vmatpush1.msk.msra.mxu0 %vm10757_vm15, %v826_v55  ;;  %v2021_v55 = vcombine.high %v2017_v54, %v2017_v54  ;;  %v2889_v54 = vcombine.low %v8239_v37, %v8239_v37 }
  0xda   : > { %v1230_v28 = vpop.permute.xlu1 %1229  ;;  %v1228_v4 = vpop.permute.xlu0 %1227  ;;  %7182 = vmatmul.mubr.msk.f32.gmra.mrb[2].mxu0 %vm592_vm14, %v8161_v15  ;;  %7200 = vmatpush1.msk.msra.mxu1 %vm10757_vm15, %v8116_v47  ;;  %vm10761_vm15 = vcmask 23552  }
  0xdb   : > { %v1233_v12 = vsel %vm349_vm5, %v1226_v19, %v1228_v4  ;;  %v1234_v29 = vsel %vm349_vm5, %v1228_v4, %v1230_v28  ;;  %7191 = vmatmul.mubr.msk.f32.gmra.mrb[4].mxu1 %vm592_vm14, %v8185_v53  ;;  %700 = vmatprep.mubr.f32.mxu0 %v10762_v43  ;;  %v2027_v63 = vsel %vm7765_vm2, %v2021_v55, 0.0 }
  0xdc   : > { %v1241_v30 = vsel %vm7941_vm7, %v1233_v12, 0.0  ;;  %v1242_v5 = vsel %vm7960_vm8, %v1234_v29, 0.0  ;;  %2278 = vrot.lane.b32.xlu1 %v8103_v8, %s7672_s22  ;;  %2276 = vrot.lane.b32.xlu0 %v2272_v27, %s7672_s22  ;;  %v2024_v27 = vsel %vm7777_vm3, %v8220_v34, 0.0  ;;  %v8312_v12 = vld [vmem:[%s10754_s2 + $0x8] sm:$0xff] }
  0xdd   : > { %1245 = vst [vmem:[#allocation2 + $0x30] sm:$0xf] %v1241_v30  ;;  %1246 = vst [vmem:[#allocation2 + $0x38] sm:$0xf] %v1242_v5  ;;  %807 = vmatprep.mubr.f32.mxu1 %v10762_v43 }
  0xde   : > { %v1196_v33 = vpop.permute.xlu1 %1195  ;;  %v1194_v51 = vpop.permute.xlu0 %1193  ;;  %7183 = vmatmul.mubr.msk.f32.gmra.mrb[4].mxu0 %vm592_vm14, %v8185_v53 }
  0xdf   : > { %v1202_v8 = vsel %vm310_vm9, %v1194_v51, %v1196_v33  ;;  %7192 = vmatmul.mubr.msk.f32.gmra.mrb[6].mxu1 %vm592_vm14, %v8210_v31  ;;  %706 = vmatprep.mubr.f32.mxu0 %v10762_v43 }
  0xe0   : > { %1210 = vst [vmem:[#allocation2 + $0x8] sm:$0xf0] %v1202_v8  ;;  %2282 = vrot.lane.b32.xlu1 %v2268_v32, %s7672_s22  ;;  %2280 = vrot.lane.b32.xlu0 %v2273_v10, %s7672_s22 }
  0xe1   : > { %813 = vmatprep.mubr.f32.mxu1 %v10762_v43 }
  0xe2   : > { %v1200_v39 = vpop.permute.xlu1 %1199  ;;  %v1198_v38 = vpop.permute.xlu0 %1197  ;;  %7184 = vmatmul.mubr.msk.f32.gmra.mrb[6].mxu0 %vm592_vm14, %v8210_v31 }
  0xe3   : > { %v1203_v47 = vsel %vm310_vm9, %v1196_v33, %v1198_v38  ;;  %v1204_v49 = vsel %vm310_vm9, %v1198_v38, %v1200_v39  ;;  %7193 = vmatmul.mubr.msk.f32.gmra.mrb[8].mxu1 %vm592_vm14, %v8235_v36  ;;  %712 = vmatprep.mubr.f32.mxu0 %v10762_v43 }
  0xe4   : > { %1211 = vst [vmem:[#allocation2 + $0x10] sm:$0xf0] %v1203_v47  ;;  %1212 = vst [vmem:[#allocation2 + $0x18] sm:$0xf0] %v1204_v49  ;;  %2957 = vrot.lane.b32.xlu1 %v8230_v35, %s7671_s21  ;;  %2274 = vrot.lane.b32.xlu0 %v8120_v48, %s7672_s22  ;;  %v1455_v48 = vld [vmem:[#allocation2 + $0x28] sm:$0xff]  ;;  %v1456_v3 = vld [vmem:[#allocation2 + $0x30] sm:$0xff] }
  0xe5   : > { %819 = vmatprep.mubr.f32.mxu1 %v10762_v43  ;;  %v1457_v22 = vld [vmem:[#allocation2 + $0x38] sm:$0xff] }
  0xe6   : > { %v1192_v56 = vpop.permute.xlu1 %1191  ;;  %v1222_v57 = vpop.permute.xlu0 %1221  ;;  %7185 = vmatmul.mubr.msk.f32.gmra.mrb[8].mxu0 %vm592_vm14, %v8235_v36 }
  0xe7   : > { %v1451_v58 = vld [vmem:[#allocation2 + $0x8] sm:$0xff]  ;;  %v1201_v59 = vsel %vm310_vm9, %v1192_v56, %v1194_v51  ;;  %v1231_v60 = vsel %vm349_vm5, %v1222_v57, %v8165_v20  ;;  %7194 = vmatmul.mubr.msk.f32.gmra.mrb[10].mxu1 %vm592_vm14, %v8261_v52  ;;  %718 = vmatprep.mubr.f32.mxu0 %v10762_v43 }
  0xe8   : > { %1209 = vst [vmem:[#allocation2] sm:$0xf0] %v1201_v59  ;;  %v1239_v61 = vsel %vm7986_vm10, %v1231_v60, 0.0  ;;  %2961 = vrot.lane.b32.xlu1 %v8256_v50, %s7671_s21  ;;  %2959 = vrot.lane.b32.xlu0 %v8239_v37, %s7671_s21  ;;  %v7390_v62 = vpack.c.bf16 %v1455_v48, %v1451_v58  ;;  %2029 = vst [vmem:[#allocation2 + $0x8] sm:$0xf] %v2025_v1 }
  0xe9   : > { %1243 = vst [vmem:[#allocation2 + $0x20] sm:$0xf] %v1239_v61  ;;  %1033 = vmatprep.mubr.f32.mxu1 %v10762_v43  ;;  %v7553_v58 = vld [vmem:[%s7719_s20 + $0x40] ss:$0 sps:$4 sm:$0xff]  }
  0xea   : > { %v1336_v6 = vpop.permute.xlu1 %1335  ;;  %v1334_v7 = vpop.permute.xlu0 %1333  ;;  %7391 = vmatprep.subr.bf16.mxu0 %v7390_v62  ;;  %7186 = vmatmul.mubr.msk.f32.gmra.mrb[10].mxu0 %vm592_vm14, %v8261_v52  ;;  %v2888_v62 = vcombine.low %v8215_v40, %v8215_v40 }
  0xeb   : > { %v1452_v11 = vld [vmem:[#allocation2 + $0x10] sm:$0xff]  ;;  %v1453_v16 = vld [vmem:[#allocation2 + $0x18] sm:$0xff]  ;;  %v1342_v44 = vsel %vm462_vm11, %v1334_v7, %v1336_v6  ;;  %7201 = vmatmul.mubr.msk.f32.vlgmr.msra.gmra.mrb[12].mxu1 %vm10761_vm15, %v8284_v41  ;;  %956 = vmatprep.mubr.f32.mxu0 %v10762_v43 }
  0xec   : > { %v1350_v19 = vsel %vm7935_vm6, %v1342_v44, 0.0  ;;  %2955 = vrot.lane.b32.xlu1 %v8215_v40, %s7671_s21  ;;  %2963 = vrot.lane.b32.xlu0 %v2949_v42, %s7671_s21  ;;  %v7398_v20 = vpack.c.bf16 %v1457_v22, %v1453_v16  ;;  %v7400_v23 = vpack.c.bf16 %v1456_v3, %v1452_v11  ;;  %2031 = vst [vmem:[#allocation2 + $0x18] sm:$0xf] %v2027_v63  ;;  %2030 = vst [vmem:[#allocation2 + $0x10] sm:$0xf] %v2026_v2  ;;  %v8353_v2 = vld [vmem:[%s7719_s20 + $0x24] sm:$0xff] }
  0xed   : > { %v1358_v24 = vrot.slane %v1350_v19, 4  ;;  %1039 = vmatprep.mubr.f32.mxu1 %v10762_v43  ;;  %v2220_v16 = vld [vmem:[%s7719_s20 + $0x2c] sm:$0xff] }
  0xee   : > { %v1340_v28 = vpop.permute.xlu1 %1339  ;;  %v1338_v4 = vpop.permute.xlu0 %1337  ;;  %7399 = vmatprep.subr.bf16.mxu1 %v7398_v20  ;;  %7197 = vmatmul.mubr.msk.f32.vlgmr.msra.gmra.mrb[12].mxu0 %vm10761_vm15, %v8284_v41  ;;  %v3025_v20 = vld [vmem:[%s7719_s20 + $0x40] sm:$0xf] }
  0xef   : > { %v1450_v29 = vld [vmem:[#allocation2] sm:$0xff]  ;;  %1366 = vst [vmem:[#allocation2 + $0x48] sm:$0xf0] %v1358_v24  ;;  %v1343_v30 = vsel %vm462_vm11, %v1336_v6, %v1338_v4  ;;  %v1344_v5 = vsel %vm462_vm11, %v1338_v4, %v1340_v28  ;;  %7401 = vmatpush1.bf16.msra.mxu1 %v7400_v23  ;;  %962 = vmatprep.mubr.f32.mxu0 %v10762_v43 }
  0xf0   : > { %v1454_v10 = vld [vmem:[#allocation2 + $0x20] sm:$0xff]  ;;  %v1351_v32 = vsel %vm7941_vm7, %v1343_v30, 0.0  ;;  %v1352_v33 = vsel %vm7960_vm8, %v1344_v5, 0.0  ;;  %2925 = vrot.lane.b32.xlu1 %v8239_v37, %s7672_s22  ;;  %2923 = vrot.lane.b32.xlu0 %v8230_v35, %s7672_s22  ;;  %2028 = vst [vmem:[#allocation2] sm:$0xf] %v2024_v27  ;;  %v2224_v24 = vcombine.high %v2220_v16, %v2220_v16  ;;  %v2229_v27 = vsel %vm7747_vm0, %v2220_v16, 0.0 }
  0xf1   : > { %v1359_v51 = vrot.slane %v1351_v32, 4  ;;  %v1360_v34 = vrot.slane %v1352_v33, 4  ;;  %v7392_v8 = vpack.c.bf16 %v1454_v10, %v1450_v29  ;;  %7202 = vmatmul.mubr.msk.f32.gmra.mrb[14].mxu1 %vm10761_vm15, %v8312_v12 }
  0xf2   : > { %v1304_v39 = vpop.permute.xlu1 %1303  ;;  %v1332_v38 = vpop.permute.xlu0 %1331  ;;  %7198 = vmatmul.mubr.msk.f32.gmra.mrb[14].mxu0 %vm10761_vm15, %v8312_v12  ;;  %1647 = vmatprep.mubr.f32.mxu1 %v10762_v43  ;;  %v2230_v33 = vsel %vm7765_vm2, %v2224_v24, 0.0 }
  0xf3   : > { %1367 = vst [vmem:[#allocation2 + $0x50] sm:$0xf0] %v1359_v51  ;;  %1368 = vst [vmem:[#allocation2 + $0x58] sm:$0xf0] %v1360_v34  ;;  %v1341_v47 = vsel %vm462_vm11, %v1332_v38, %v1334_v7  ;;  %7393 = vmatpush1.bf16.msra.mxu0 %v7392_v8  ;;  %1546 = vmatprep.mubr.f32.mxu0 %v10762_v43  ;;  %v2223_v7 = vcombine.high %v8353_v2, %v8353_v2 }
  0xf4   : > { %v1349_v49 = vsel %vm7986_vm10, %v1341_v47, 0.0  ;;  %2929 = vrot.lane.b32.xlu1 %v2915_v46, %s7672_s22  ;;  %2927 = vrot.lane.b32.xlu0 %v8256_v50, %s7672_s22 }
  0xf5   : > { %v1357_v1 = vrot.slane %v1349_v49, 4  ;;  %v2228_v23 = vsel %vm7753_vm1, %v2223_v7, 0.0 }
  0xf6   : > { %v1308_v55 = vpop.permute.xlu1 %1307  ;;  %v1306_v56 = vpop.permute.xlu0 %1305 }
  0xf7   : > { %1365 = vst [vmem:[#allocation2 + $0x40] sm:$0xf0] %v1357_v1  ;;  %v1312_v57 = vsel %vm10760_vm12, %v1304_v39, %v1306_v56  ;;  %v1313_v48 = vsel %vm10760_vm12, %v1306_v56, %v1308_v55  ;;  %v2227_v56 = vsel %vm7777_vm3, %v8353_v2, 0.0  ;;  %v2995_v2 = vld [vmem:[%s7719_s20 + $0x40] sm:$0xf] }
  0xf8   : > { %1320 = vst [vmem:[#allocation2 + $0x48] sm:$0xf] %v1312_v57  ;;  %1321 = vst [vmem:[#allocation2 + $0x50] sm:$0xf] %v1313_v48  ;;  %2895 = vrot.lane.b32.xlu1 %v2889_v54, %s7673_s23  ;;  %2893 = vrot.lane.b32.xlu0 %v8215_v40, %s7673_s23 }
  0xfa   : > { %v1397_v59 = vpop.permute.xlu1 %1396  ;;  %v1310_v60 = vpop.permute.xlu0 %1309 }
  0xfb   : > { %v1314_v61 = vsel %vm10760_vm12, %v1308_v55, %v1310_v60 }
  0xfc   : > { %1322 = vst [vmem:[#allocation2 + $0x58] sm:$0xf] %v1314_v61  ;;  %2899 = vrot.lane.b32.xlu1 %v7553_v58, %s7673_s23  ;;  %2897 = vrot.lane.b32.xlu0 %v8239_v37, %s7673_s23 }
  0xfe   : > { %v1401_v42 = vpop.permute.xlu1 %1400  ;;  %v1399_v63 = vpop.permute.xlu0 %1398 }
  0xff   : > { %v1405_v3 = vsel %vm310_vm9, %v1397_v59, %v1399_v63  ;;  %v1406_v6 = vsel %vm310_vm9, %v1399_v63, %v1401_v42  ;;  %v1459_v29 = vld [vmem:[#allocation2 + $0x48] sm:$0xff]  ;;  %v1460_v47 = vld [vmem:[#allocation2 + $0x50] sm:$0xff] }
 0x100   : > { %1413 = vst [vmem:[#allocation2 + $0x68] sm:$0xf0] %v1405_v3  ;;  %1414 = vst [vmem:[#allocation2 + $0x70] sm:$0xf0] %v1406_v6  ;;  %2891 = vrot.lane.b32.xlu1 %v2888_v62, %s7673_s23  ;;  %2921 = vrot.lane.b32.xlu0 %v8215_v40, %s7672_s22  ;;  %v8404_v63 = vld [vmem:[%s7719_s20 + $0x34] sm:$0xff]  ;;  %v8408_v3 = vld [vmem:[%s7719_s20 + $0x3c] sm:$0xff] }
 0x102   : > { %v1302_v22 = vpop.permute.xlu1 %1301  ;;  %v1403_v11 = vpop.permute.xlu0 %1402 }
 0x103   : > { %v1311_v44 = vsel %vm10760_vm12, %v1302_v22, %v1304_v39  ;;  %v1407_v19 = vsel %vm310_vm9, %v1401_v42, %v1403_v11  ;;  %v1461_v8 = vld [vmem:[#allocation2 + $0x58] sm:$0xff]  ;;  %v3092_v11 = vcombine.low %v8408_v3, %v8408_v3 }
 0x104   : > { %1319 = vst [vmem:[#allocation2 + $0x40] sm:$0xf] %v1311_v44  ;;  %1415 = vst [vmem:[#allocation2 + $0x78] sm:$0xf0] %v1407_v19  ;;  %3035 = vrot.lane.b32.xlu1 %v8239_v37, %s7674_s24  ;;  %3033 = vrot.lane.b32.xlu0 %v8230_v35, %s7674_s24 }
 0x106   : > { %v1427_v28 = vpop.permute.xlu1 %1426  ;;  %v1395_v4 = vpop.permute.xlu0 %1394 }
 0x107   : > { %v1463_v30 = vld [vmem:[#allocation2 + $0x68] sm:$0xff]  ;;  %v1464_v5 = vld [vmem:[#allocation2 + $0x70] sm:$0xff]  ;;  %v1404_v10 = vsel %vm310_vm9, %v1395_v4, %v1397_v59 }
 0x108   : > { %1412 = vst [vmem:[#allocation2 + $0x60] sm:$0xf0] %v1404_v10  ;;  %3039 = vrot.lane.b32.xlu1 %v3025_v20, %s7674_s24  ;;  %3037 = vrot.lane.b32.xlu0 %v8256_v50, %s7674_s24  ;;  %v7394_v32 = vpack.c.bf16 %v1463_v30, %v1459_v29  ;;  %2232 = vst [vmem:[#allocation2 + $0x68] sm:$0xf] %v2228_v23  ;;  %v7404_v55 = vpack.c.bf16 %v1464_v5, %v1460_v47  ;;  %v1684_v20 = vld [vmem:[%s10755_s3 + $0x10] sm:$0x77] }
 0x109   : > { %2233 = vst [vmem:[#allocation2 + $0x70] sm:$0xf] %v2229_v27  ;;  %v7556_v27 = vld [vmem:[%s7719_s20 + $0x44] ss:$0 sps:$4 sm:$0xff]  }
 0x10a   : > { %v1431_v51 = vpop.permute.xlu1 %1430  ;;  %v1429_v34 = vpop.permute.xlu0 %1428  ;;  %7395 = vmatprep.subr.bf16.mxu0 %v7394_v32 }
 0x10b   : > { %v1465_v46 = vld [vmem:[#allocation2 + $0x78] sm:$0xff]  ;;  %v1435_v39 = vsel %vm349_vm5, %v1427_v28, %v1429_v34  ;;  %v1436_v38 = vsel %vm349_vm5, %v1429_v34, %v1431_v51  ;;  %v1458_v58 = vld [vmem:[#allocation2 + $0x40] sm:$0xff] }
 0x10c   : > { %v1443_v49 = vsel %vm7935_vm6, %v1435_v39, 0.0  ;;  %v1444_v54 = vsel %vm7941_vm7, %v1436_v38, 0.0  ;;  %3003 = vrot.lane.b32.xlu1 %v8230_v35, %s7675_s25  ;;  %3031 = vrot.lane.b32.xlu0 %v8215_v40, %s7674_s24  ;;  %v7402_v1 = vpack.c.bf16 %v1465_v46, %v1461_v8  ;;  %2234 = vst [vmem:[#allocation2 + $0x78] sm:$0xf] %v2230_v33  ;;  %v3091_v38 = vcombine.low %v8404_v63, %v8404_v63 }
 0x10d   : > { %1447 = vst [vmem:[#allocation2 + $0x88] sm:$0xf] %v1443_v49  ;;  %1448 = vst [vmem:[#allocation2 + $0x90] sm:$0xf] %v1444_v54  ;;  %v3122_v49 = vcombine.high %v8404_v63, %v8404_v63 }
 0x10e   : > { %v1425_v57 = vpop.permute.xlu1 %1424  ;;  %v1433_v48 = vpop.permute.xlu0 %1432  ;;  %7403 = vmatprep.subr.bf16.mxu1 %v7402_v1 }
 0x10f   : > { %v1462_v35 = vld [vmem:[#allocation2 + $0x60] sm:$0xff]  ;;  %v1434_v59 = vsel %vm349_vm5, %v1425_v57, %v1427_v28  ;;  %v1437_v60 = vsel %vm349_vm5, %v1431_v51, %v1433_v48  ;;  %7405 = vmatpush1.bf16.msra.mxu1 %v7404_v55  ;;  %v1685_v28 = vld [vmem:[%s10755_s3 + $0x18] sm:$0x77]  ;;  %v1732_v51 = vcombine.high %v1684_v20, %v1684_v20  ;;  %v3123_v48 = vcombine.high %v8408_v3, %v8408_v3 }
 0x110   : > { %v1442_v61 = vsel %vm7986_vm10, %v1434_v59, 0.0  ;;  %v1445_v62 = vsel %vm7960_vm8, %v1437_v60, 0.0  ;;  %3007 = vrot.lane.b32.xlu1 %v8256_v50, %s7675_s25  ;;  %3005 = vrot.lane.b32.xlu0 %v8239_v37, %s7675_s25  ;;  %v7396_v42 = vpack.c.bf16 %v1462_v35, %v1458_v58  ;;  %2231 = vst [vmem:[#allocation2 + $0x60] sm:$0xf] %v2227_v56  ;;  %v1733_v46 = vcombine.high %v1685_v28, %v1685_v28  ;;  %v3118_v60 = vld [vmem:[%s7719_s20 + $0x44] sm:$0xf] }
 0x111   : > { %1446 = vst [vmem:[#allocation2 + $0x80] sm:$0xf] %v1442_v61  ;;  %1449 = vst [vmem:[#allocation2 + $0x98] sm:$0xf] %v1445_v62  ;;  %v8491_v61 = vld [vmem:[%s7719_s20 + $0x40] sm:$0xff] }
 0x112   : > { %v2110_v6 = vpop.permute.xlu1 %2109  ;;  %v2108_v7 = vpop.permute.xlu0 %2107  ;;  %7397 = vmatpush1.bf16.msra.mxu0 %v7396_v42 }
 0x113   : > { %v2116_v22 = vsel %vm10758_vm4, %v2108_v7, %v2110_v6 }
 0x114   : > { %v2124_v50 = vsel %vm7753_vm1, %v2116_v22, 0.0  ;;  %3096 = vrot.lane.b32.xlu1 %v8404_v63, %s7673_s23  ;;  %3009 = vrot.lane.b32.xlu0 %v2995_v2, %s7675_s25  ;;  %v1467_v37 = vld [vmem:[#allocation2 + $0x88] sm:$0xf]  ;;  %v1468_v33 = vld [vmem:[#allocation2 + $0x90] sm:$0xf] }
 0x115   : > { %v2132_v16 = vrot.slane %v2124_v50, 4  ;;  %7203 = vmatprep.subr.msk.mxu0 %vm10759_vm13, %v1467_v37 }
 0x116   : > { %v2114_v44 = vpop.permute.xlu1 %2113  ;;  %v2112_v19 = vpop.permute.xlu0 %2111 }
 0x117   : > { %2140 = vst [vmem:[#allocation2 + $0x28] sm:$0xf0] %v2132_v16  ;;  %v2117_v23 = vsel %vm10758_vm4, %v2110_v6, %v2112_v19  ;;  %v2118_v24 = vsel %vm10758_vm4, %v2112_v19, %v2114_v44  ;;  %v3799_v19 = vld [vmem:[%s7719_s20 + $0x50] sm:$0xf] }
 0x118   : > { %v2125_v4 = vsel %vm7747_vm0, %v2117_v23, 0.0  ;;  %v2126_v29 = vsel %vm7765_vm2, %v2118_v24, 0.0  ;;  %3100 = vrot.lane.b32.xlu1 %v8408_v3, %s7673_s23  ;;  %3098 = vrot.lane.b32.xlu0 %v3092_v11, %s7673_s23  ;;  %v1466_v30 = vld [vmem:[#allocation2 + $0x80] sm:$0xf]  ;;  %v1469_v5 = vld [vmem:[#allocation2 + $0x98] sm:$0xf] }
 0x119   : > { %v2133_v10 = vrot.slane %v2125_v4, 4  ;;  %v2134_v32 = vrot.slane %v2126_v29, 4  ;;  %7204 = vmatpush1.msk.msra.mxu0 %vm10759_vm13, %v1466_v30  ;;  %7211 = vmatprep.subr.msk.mxu1 %vm10759_vm13, %v1469_v5 }
 0x11a   : > { %v8437_v34 = vpop.permute.xlu1 %2073  ;;  %v2106_v8 = vpop.permute.xlu0 %2105  ;;  %7212 = vmatpush1.msk.msra.mxu1 %vm10759_vm13, %v1468_v33  ;;  %7205 = vmatmul.mubr.msk.f32.vlgmr.msra.gmra.mrb[16].mxu0 %vm592_vm14, %v8128_v18 }
 0x11b   : > { %2141 = vst [vmem:[#allocation2 + $0x30] sm:$0xf0] %v2133_v10  ;;  %2142 = vst [vmem:[#allocation2 + $0x38] sm:$0xf0] %v2134_v32  ;;  %v2115_v39 = vsel %vm10758_vm4, %v2106_v8, %v2108_v7  ;;  %7213 = vmatmul.mubr.msk.f32.vlgmr.msra.gmra.mrb[16].mxu1 %vm592_vm14, %v8128_v18  ;;  %1552 = vmatprep.mubr.f32.mxu0 %v10762_v43  ;;  %vm10818_vm4 = vcmask 1042432   ;;  %v8511_v7 = vld [vmem:[%s7719_s20 + $0x48] sm:$0xff] }
 0x11c   : > { %v2123_v47 = vsel %vm7777_vm3, %v2115_v39, 0.0  ;;  %3001 = vrot.lane.b32.xlu1 %v8215_v40, %s7675_s25  ;;  %3102 = vrot.lane.b32.xlu0 %v7556_v27, %s7673_s23  ;;  %vm10819_vm13 = vmmov %vm10818_vm4  ;;  %v8529_v44 = vcombine.high %v8511_v7, %v8511_v7 }
 0x11d   : > { %v2131_v54 = vrot.slane %v2123_v47, 4  ;;  %1653 = vmatprep.mubr.f32.mxu1 %v10762_v43  ;;  %7219 = vmatprep.subr.msk.mxu0 %vm10818_vm4, %v1732_v51 }
 0x11e   : > { %v2078_v18 = vpop.permute.xlu1 %2077  ;;  %v2076_v1 = vpop.permute.xlu0 %2075  ;;  %7206 = vmatmul.mubr.msk.f32.gmra.mrb[18].mxu0 %vm592_vm14, %v8161_v15  ;;  %7223 = vmatprep.subr.msk.mxu1 %vm10819_vm13, %v1733_v46  ;;  %vm10820_vm13 = vmmov %vm10818_vm4 }
 0x11f   : > { %2139 = vst [vmem:[#allocation2 + $0x20] sm:$0xf0] %v2131_v54  ;;  %v2082_v40 = vsel %vm349_vm5, %v8437_v34, %v2076_v1  ;;  %v2083_v55 = vsel %vm349_vm5, %v2076_v1, %v2078_v18  ;;  %7214 = vmatmul.mubr.msk.f32.gmra.mrb[18].mxu1 %vm592_vm14, %v8161_v15  ;;  %1558 = vmatprep.mubr.f32.mxu0 %v10762_v43 }
 0x120   : > { %v2090_v56 = vsel %vm7935_vm6, %v2082_v40, 0.0  ;;  %v2091_v57 = vsel %vm7941_vm7, %v2083_v55, 0.0  ;;  %3126 = vrot.lane.b32.xlu1 %v3122_v49, %s7672_s22  ;;  %3094 = vrot.lane.b32.xlu0 %v3091_v38, %s7673_s23 }
 0x121   : > { %2094 = vst [vmem:[#allocation2 + $0x28] sm:$0xf] %v2090_v56  ;;  %2095 = vst [vmem:[#allocation2 + $0x30] sm:$0xf] %v2091_v57  ;;  %1659 = vmatprep.mubr.f32.mxu1 %v10762_v43  ;;  %7220 = vmatpush1.msk.msra.mxu0 %vm10818_vm4, %v1684_v20  ;;  %vm10821_vm4 = vcmask 1043456  }
 0x122   : > { %v2044_v15 = vpop.permute.xlu1 %2043  ;;  %v2080_v58 = vpop.permute.xlu0 %2079  ;;  %7207 = vmatmul.mubr.msk.f32.gmra.mrb[20].mxu0 %vm592_vm14, %v8185_v53  ;;  %7224 = vmatpush1.msk.msra.mxu1 %vm10820_vm13, %v1685_v28  ;;  %vm10822_vm13 = vcmask 523264  }
 0x123   : > { %v2084_v35 = vsel %vm349_vm5, %v2078_v18, %v2080_v58  ;;  %7215 = vmatmul.mubr.msk.f32.gmra.mrb[20].mxu1 %vm592_vm14, %v8185_v53  ;;  %1564 = vmatprep.mubr.f32.mxu0 %v10762_v43  ;;  %v8496_v53 = vld [vmem:[%s7719_s20 + $0x30] sm:$0xff] }
 0x124   : > { %v2092_v59 = vsel %vm7960_vm8, %v2084_v35, 0.0  ;;  %3130 = vrot.lane.b32.xlu1 %v3123_v48, %s7672_s22  ;;  %3128 = vrot.lane.b32.xlu0 %v8408_v3, %s7672_s22  ;;  %v8508_v3 = vcombine.high %v8491_v61, %v8491_v61  ;;  %v2874_v18 = vsel %vm7777_vm3, %v8496_v53, 0.0 }
 0x125   : > { %2096 = vst [vmem:[#allocation2 + $0x38] sm:$0xf] %v2092_v59  ;;  %1665 = vmatprep.mubr.f32.mxu1 %v10762_v43 }
 0x126   : > { %v2048_v62 = vpop.permute.xlu1 %2047  ;;  %v2046_v42 = vpop.permute.xlu0 %2045  ;;  %7208 = vmatmul.mubr.msk.f32.gmra.mrb[22].mxu0 %vm592_vm14, %v8210_v31 }
 0x127   : > { %v2052_v2 = vsel %vm310_vm9, %v2044_v15, %v2046_v42  ;;  %v2053_v6 = vsel %vm310_vm9, %v2046_v42, %v2048_v62  ;;  %7216 = vmatmul.mubr.msk.f32.gmra.mrb[22].mxu1 %vm592_vm14, %v8210_v31  ;;  %1570 = vmatprep.mubr.f32.mxu0 %v10762_v43  ;;  %v2870_v31 = vcombine.high %v8496_v53, %v8496_v53 }
 0x128   : > { %2060 = vst [vmem:[#allocation2 + $0x8] sm:$0xf0] %v2052_v2  ;;  %2061 = vst [vmem:[#allocation2 + $0x10] sm:$0xf0] %v2053_v6  ;;  %3124 = vrot.lane.b32.xlu1 %v8404_v63, %s7672_s22  ;;  %3132 = vrot.lane.b32.xlu0 %v3118_v60, %s7672_s22  ;;  %v2867_v63 = vld [vmem:[%s7719_s20 + $0x38] sm:$0xff]  ;;  %v2305_v29 = vld [vmem:[#allocation2 + $0x28] sm:$0xff] }
 0x129   : > { %1671 = vmatprep.mubr.f32.mxu1 %v10762_v43  ;;  %v2871_v20 = vcombine.high %v2867_v63, %v2867_v63  ;;  %v2876_v23 = vsel %vm7747_vm0, %v2867_v63, 0.0  ;;  %v2306_v47 = vld [vmem:[#allocation2 + $0x30] sm:$0xff] }
 0x12a   : > { %v2072_v22 = vpop.permute.xlu1 %2071  ;;  %v2050_v50 = vpop.permute.xlu0 %2049  ;;  %7209 = vmatmul.mubr.msk.f32.gmra.mrb[24].mxu0 %vm592_vm14, %v8235_v36  ;;  %v7567_v63 = vld [vmem:[%s7719_s20 + $0x50] ss:$0 sps:$4 sm:$0xff]  }
 0x12b   : > { %v2081_v37 = vsel %vm349_vm5, %v2072_v22, %v8437_v34  ;;  %v2054_v11 = vsel %vm310_vm9, %v2048_v62, %v2050_v50  ;;  %7217 = vmatmul.mubr.msk.f32.gmra.mrb[24].mxu1 %vm592_vm14, %v8235_v36  ;;  %1576 = vmatprep.mubr.f32.mxu0 %v10762_v43  ;;  %v2875_v36 = vsel %vm7753_vm1, %v2870_v31, 0.0  ;;  %v2877_v10 = vsel %vm7765_vm2, %v2871_v20, 0.0  ;;  %v3765_v62 = vld [vmem:[%s7719_s20 + $0x50] sm:$0xf] }
 0x12c   : > { %v2089_v16 = vsel %vm7986_vm10, %v2081_v37, 0.0  ;;  %2062 = vst [vmem:[#allocation2 + $0x18] sm:$0xf0] %v2054_v11  ;;  %3809 = vrot.lane.b32.xlu1 %v8511_v7, %s7671_s21  ;;  %3807 = vrot.lane.b32.xlu0 %v8508_v3, %s7671_s21  ;;  %v2307_v8 = vld [vmem:[#allocation2 + $0x38] sm:$0xff] }
 0x12d   : > { %2093 = vst [vmem:[#allocation2 + $0x20] sm:$0xf] %v2089_v16  ;;  %1677 = vmatprep.mubr.f32.mxu1 %v10762_v43  ;;  %v8602_v16 = vld [vmem:[%s7719_s20 + $0x34] sm:$0xff] }
 0x12e   : > { %v2184_v24 = vpop.permute.xlu1 %2183  ;;  %v2042_v27 = vpop.permute.xlu0 %2041  ;;  %7210 = vmatmul.mubr.msk.f32.gmra.mrb[26].mxu0 %vm592_vm14, %v8261_v52  ;;  %v3073_v20 = vcombine.high %v8602_v16, %v8602_v16 }
 0x12f   : > { %v2051_v28 = vsel %vm310_vm9, %v2042_v27, %v2044_v15  ;;  %v2301_v4 = vld [vmem:[#allocation2 + $0x8] sm:$0xff]  ;;  %7218 = vmatmul.mubr.msk.f32.gmra.mrb[26].mxu1 %vm592_vm14, %v8261_v52  ;;  %v2302_v30 = vld [vmem:[#allocation2 + $0x10] sm:$0xff]  ;;  %1806 = vmatprep.mubr.f32.mxu0 %v10762_v43 }
 0x130   : > { %2059 = vst [vmem:[#allocation2] sm:$0xf0] %v2051_v28  ;;  %3813 = vrot.lane.b32.xlu1 %v3799_v19, %s7671_s21  ;;  %3811 = vrot.lane.b32.xlu0 %v8529_v44, %s7671_s21  ;;  %v7406_v5 = vpack.c.bf16 %v2305_v29, %v2301_v4  ;;  %2879 = vst [vmem:[#allocation2 + $0x8] sm:$0xf] %v2875_v36  ;;  %v3738_v36 = vcombine.low %v8491_v61, %v8491_v61  ;;  %v3070_v4 = vld [vmem:[%s7719_s20 + $0x3c] sm:$0xff]  ;;  %v3078_v29 = vsel %vm7753_vm1, %v3073_v20, 0.0 }
 0x131   : > { %2880 = vst [vmem:[#allocation2 + $0x10] sm:$0xf] %v2876_v23  ;;  %1883 = vmatprep.mubr.f32.mxu1 %v10762_v43  ;;  %v2534_v20 = vld [vmem:[%s10755_s3 + $0x20] sm:$0x77] }
 0x132   : > { %v2188_v32 = vpop.permute.xlu1 %2187  ;;  %v2186_v33 = vpop.permute.xlu0 %2185  ;;  %7407 = vmatprep.subr.bf16.mxu0 %v7406_v5  ;;  %7221 = vmatmul.mubr.msk.f32.vlgmr.msra.gmra.mrb[28].mxu0 %vm10761_vm15, %v8284_v41 }
 0x133   : > { %v2192_v52 = vsel %vm462_vm11, %v2184_v24, %v2186_v33  ;;  %v2193_v51 = vsel %vm462_vm11, %v2186_v33, %v2188_v32  ;;  %v2303_v34 = vld [vmem:[#allocation2 + $0x18] sm:$0xff]  ;;  %7225 = vmatmul.mubr.msk.f32.vlgmr.msra.gmra.mrb[28].mxu1 %vm10761_vm15, %v8284_v41  ;;  %1812 = vmatprep.mubr.f32.mxu0 %v10762_v43  ;;  %v7416_v41 = vpack.c.bf16 %v2306_v47, %v2302_v30 }
 0x134   : > { %v2200_v46 = vsel %vm7935_vm6, %v2192_v52, 0.0  ;;  %v2201_v39 = vsel %vm7941_vm7, %v2193_v51, 0.0  ;;  %3773 = vrot.lane.b32.xlu1 %v8508_v3, %s7672_s22  ;;  %3805 = vrot.lane.b32.xlu0 %v8491_v61, %s7671_s21  ;;  %v7414_v38 = vpack.c.bf16 %v2307_v8, %v2303_v34  ;;  %2881 = vst [vmem:[#allocation2 + $0x18] sm:$0xf] %v2877_v10  ;;  %v2304_v48 = vld [vmem:[#allocation2 + $0x20] sm:$0xff]  ;;  %v3074_v30 = vcombine.high %v3070_v4, %v3070_v4 }
 0x135   : > { %v2208_v49 = vrot.slane %v2200_v46, 4  ;;  %v2209_v54 = vrot.slane %v2201_v39, 4  ;;  %1889 = vmatprep.mubr.f32.mxu1 %v10762_v43  ;;  %v3875_v8 = vld [vmem:[%s7719_s20 + $0x50] sm:$0xf]  ;;  %v3079_v39 = vsel %vm7747_vm0, %v3070_v4, 0.0 }
 0x136   : > { %v2182_v1 = vpop.permute.xlu1 %2181  ;;  %v2190_v40 = vpop.permute.xlu0 %2189  ;;  %7415 = vmatprep.subr.bf16.mxu1 %v7414_v38  ;;  %7222 = vmatmul.mubr.msk.f32.gmra.mrb[30].mxu0 %vm10761_vm15, %v8312_v12  ;;  %v3080_v46 = vsel %vm7765_vm2, %v3074_v30, 0.0 }
 0x137   : > { %2216 = vst [vmem:[#allocation2 + $0x48] sm:$0xf0] %v2208_v49  ;;  %2217 = vst [vmem:[#allocation2 + $0x50] sm:$0xf0] %v2209_v54  ;;  %v2191_v55 = vsel %vm462_vm11, %v2182_v1, %v2184_v24  ;;  %v2194_v56 = vsel %vm462_vm11, %v2188_v32, %v2190_v40  ;;  %7417 = vmatpush1.bf16.msra.mxu1 %v7416_v41  ;;  %v2300_v57 = vld [vmem:[#allocation2] sm:$0xff]  ;;  %2396 = vmatprep.mubr.f32.mxu0 %v10762_v43 }
 0x138   : > { %v2199_v15 = vsel %vm7986_vm10, %v2191_v55, 0.0  ;;  %v2202_v58 = vsel %vm7960_vm8, %v2194_v56, 0.0  ;;  %3777 = vrot.lane.b32.xlu1 %v8529_v44, %s7672_s22  ;;  %3775 = vrot.lane.b32.xlu0 %v8511_v7, %s7672_s22  ;;  %v7408_v35 = vpack.c.bf16 %v2304_v48, %v2300_v57  ;;  %2878 = vst [vmem:[#allocation2] sm:$0xf] %v2874_v18  ;;  %v3077_v57 = vsel %vm7777_vm3, %v8602_v16, 0.0 }
 0x139   : > { %v2207_v59 = vrot.slane %v2199_v15, 4  ;;  %v2210_v60 = vrot.slane %v2202_v58, 4  ;;  %7226 = vmatmul.mubr.msk.f32.gmra.mrb[30].mxu1 %vm10761_vm15, %v8312_v12  ;;  %v3739_v12 = vcombine.low %v8511_v7, %v8511_v7  ;;  %vm10825_vm15 = vmmov %vm10822_vm13 }
 0x13a   : > { %v2156_v42 = vpop.permute.xlu1 %2155  ;;  %v2154_v53 = vpop.permute.xlu0 %2153  ;;  %7409 = vmatpush1.bf16.msra.mxu0 %v7408_v35  ;;  %2497 = vmatprep.mubr.f32.mxu1 %v10762_v43 }
 0x13b   : > { %2215 = vst [vmem:[#allocation2 + $0x40] sm:$0xf0] %v2207_v59  ;;  %2218 = vst [vmem:[#allocation2 + $0x58] sm:$0xf0] %v2210_v60  ;;  %v2162_v2 = vsel %vm10760_vm12, %v2154_v53, %v2156_v42 }
 0x13c   : > { %2170 = vst [vmem:[#allocation2 + $0x48] sm:$0xf] %v2162_v2  ;;  %3743 = vrot.lane.b32.xlu1 %v8491_v61, %s7673_s23  ;;  %3779 = vrot.lane.b32.xlu0 %v3765_v62, %s7672_s22  ;;  %v3845_v2 = vld [vmem:[%s7719_s20 + $0x50] sm:$0xf] }
 0x13e   : > { %v2160_v6 = vpop.permute.xlu1 %2159  ;;  %v2158_v31 = vpop.permute.xlu0 %2157 }
 0x13f   : > { %v2163_v22 = vsel %vm10760_vm12, %v2156_v42, %v2158_v31  ;;  %v2164_v50 = vsel %vm10760_vm12, %v2158_v31, %v2160_v6 }
 0x140   : > { %2171 = vst [vmem:[#allocation2 + $0x50] sm:$0xf] %v2163_v22  ;;  %2172 = vst [vmem:[#allocation2 + $0x58] sm:$0xf] %v2164_v50  ;;  %3747 = vrot.lane.b32.xlu1 %v8511_v7, %s7673_s23  ;;  %3745 = vrot.lane.b32.xlu0 %v3739_v12, %s7673_s23  ;;  %v8652_v12 = vld [vmem:[%s7719_s20 + $0x4c] sm:$0xff] }
 0x141   : > { %v3942_v50 = vcombine.low %v8652_v12, %v8652_v12 }
 0x142   : > { %v2249_v37 = vpop.permute.xlu1 %2248  ;;  %v2247_v11 = vpop.permute.xlu0 %2246 }
 0x143   : > { %v2255_v19 = vsel %vm310_vm9, %v2247_v11, %v2249_v37  ;;  %v2309_v52 = vld [vmem:[#allocation2 + $0x48] sm:$0xff] }
 0x144   : > { %2263 = vst [vmem:[#allocation2 + $0x68] sm:$0xf0] %v2255_v19  ;;  %3771 = vrot.lane.b32.xlu1 %v8491_v61, %s7672_s22  ;;  %3749 = vrot.lane.b32.xlu0 %v7567_v63, %s7673_s23  ;;  %v2535_v63 = vld [vmem:[%s10755_s3 + $0x28] sm:$0x77] }
 0x146   : > { %v2253_v23 = vpop.permute.xlu1 %2252  ;;  %v2251_v24 = vpop.permute.xlu0 %2250 }
 0x147   : > { %v2256_v27 = vsel %vm310_vm9, %v2249_v37, %v2251_v24  ;;  %v2257_v28 = vsel %vm310_vm9, %v2251_v24, %v2253_v23  ;;  %v2311_v49 = vld [vmem:[#allocation2 + $0x58] sm:$0xff]  ;;  %v2310_v18 = vld [vmem:[#allocation2 + $0x50] sm:$0xff]  ;;  %v8667_v37 = vld [vmem:[%s7719_s20 + $0x44] sm:$0xff]  ;;  %v2583_v23 = vcombine.high %v2535_v63, %v2535_v63 }
 0x148   : > { %2264 = vst [vmem:[#allocation2 + $0x70] sm:$0xf0] %v2256_v27  ;;  %2265 = vst [vmem:[#allocation2 + $0x78] sm:$0xf0] %v2257_v28  ;;  %3883 = vrot.lane.b32.xlu1 %v8508_v3, %s7674_s24  ;;  %3741 = vrot.lane.b32.xlu0 %v3738_v36, %s7673_s23 }
 0x14a   : > { %v2245_v5 = vpop.permute.xlu1 %2244  ;;  %v2152_v10 = vpop.permute.xlu0 %2151 }
 0x14b   : > { %v2254_v32 = vsel %vm310_vm9, %v2245_v5, %v2247_v11  ;;  %v2161_v33 = vsel %vm10760_vm12, %v2152_v10, %v2154_v53  ;;  %v2313_v51 = vld [vmem:[#allocation2 + $0x68] sm:$0xff]  ;;  %vm10823_vm12 = vmmov %vm10822_vm13 }
 0x14c   : > { %2262 = vst [vmem:[#allocation2 + $0x60] sm:$0xf0] %v2254_v32  ;;  %2169 = vst [vmem:[#allocation2 + $0x40] sm:$0xf] %v2161_v33  ;;  %3887 = vrot.lane.b32.xlu1 %v8529_v44, %s7674_s24  ;;  %3885 = vrot.lane.b32.xlu0 %v8511_v7, %s7674_s24  ;;  %v7410_v34 = vpack.c.bf16 %v2313_v51, %v2309_v52  ;;  %v2582_v32 = vcombine.high %v2534_v20, %v2534_v20  ;;  %v8689_v51 = vld [vmem:[%s10753_s1] sm:$0xff] }
 0x14d   : > { %3082 = vst [vmem:[#allocation2 + $0x68] sm:$0xf] %v3078_v29 }
 0x14e   : > { %v2279_v38 = vpop.permute.xlu1 %2278  ;;  %v2277_v47 = vpop.permute.xlu0 %2276  ;;  %7411 = vmatprep.subr.bf16.mxu0 %v7410_v34  ;;  %v3941_v34 = vcombine.low %v8667_v37, %v8667_v37 }
 0x14f   : > { %v2285_v54 = vsel %vm349_vm5, %v2277_v47, %v2279_v38  ;;  %v2315_v41 = vld [vmem:[#allocation2 + $0x78] sm:$0xff]  ;;  %v2314_v1 = vld [vmem:[#allocation2 + $0x70] sm:$0xff] }
 0x150   : > { %v2293_v40 = vsel %vm7935_vm6, %v2285_v54, 0.0  ;;  %3881 = vrot.lane.b32.xlu1 %v8491_v61, %s7674_s24  ;;  %3889 = vrot.lane.b32.xlu0 %v3875_v8, %s7674_s24  ;;  %v7418_v55 = vpack.c.bf16 %v2315_v41, %v2311_v49  ;;  %v7420_v56 = vpack.c.bf16 %v2314_v1, %v2310_v18  ;;  %3084 = vst [vmem:[#allocation2 + $0x78] sm:$0xf] %v3080_v46  ;;  %3083 = vst [vmem:[#allocation2 + $0x70] sm:$0xf] %v3079_v39  ;;  %v8715_v18 = vld [vmem:[%s10753_s1 + $0x8] sm:$0xff] }
 0x151   : > { %2297 = vst [vmem:[#allocation2 + $0x88] sm:$0xf] %v2293_v40  ;;  %v3972_v40 = vcombine.high %v8667_v37, %v8667_v37 }
 0x152   : > { %v2283_v48 = vpop.permute.xlu1 %2282  ;;  %v2281_v15 = vpop.permute.xlu0 %2280  ;;  %7419 = vmatprep.subr.bf16.mxu1 %v7418_v55 }
 0x153   : > { %v2286_v58 = vsel %vm349_vm5, %v2279_v38, %v2281_v15  ;;  %v2287_v35 = vsel %vm349_vm5, %v2281_v15, %v2283_v48  ;;  %7421 = vmatpush1.bf16.msra.mxu1 %v7420_v56  ;;  %v2308_v59 = vld [vmem:[#allocation2 + $0x40] sm:$0xff]  ;;  %v8737_v48 = vld [vmem:[%s10753_s1 + $0x10] sm:$0xff] }
 0x154   : > { %v2312_v60 = vld [vmem:[#allocation2 + $0x60] sm:$0xff]  ;;  %v2294_v62 = vsel %vm7941_vm7, %v2286_v58, 0.0  ;;  %v2295_v42 = vsel %vm7960_vm8, %v2287_v35, 0.0  ;;  %3855 = vrot.lane.b32.xlu1 %v8511_v7, %s7675_s25  ;;  %3853 = vrot.lane.b32.xlu0 %v8508_v3, %s7675_s25  ;;  %v3973_v35 = vcombine.high %v8652_v12, %v8652_v12 }
 0x155   : > { %v7412_v53 = vpack.c.bf16 %v2312_v60, %v2308_v59  ;;  %3081 = vst [vmem:[#allocation2 + $0x60] sm:$0xf] %v3077_v57  ;;  %2298 = vst [vmem:[#allocation2 + $0x90] sm:$0xf] %v2294_v62  ;;  %v3968_v59 = vld [vmem:[%s7719_s20 + $0x54] sm:$0xf] }
 0x156   : > { %2299 = vst [vmem:[#allocation2 + $0x98] sm:$0xf] %v2295_v42  ;;  %v2958_v6 = vpop.permute.xlu1 %2957  ;;  %v2275_v31 = vpop.permute.xlu0 %2274  ;;  %v8754_v60 = vld [vmem:[%s7719_s20 + $0x50] sm:$0xff] }
 0x157   : > { %7413 = vmatpush1.bf16.msra.mxu0 %v7412_v53  ;;  %v2284_v22 = vsel %vm349_vm5, %v2275_v31, %v2277_v47  ;;  %v8759_v53 = vld [vmem:[%s7719_s20 + $0x40] sm:$0xff]  ;;  %v8778_v31 = vld [vmem:[%s7719_s20 + $0x58] sm:$0xff] }
 0x158   : > { %v2292_v7 = vsel %vm7986_vm10, %v2284_v22, 0.0  ;;  %3859 = vrot.lane.b32.xlu1 %v3845_v2, %s7675_s25  ;;  %3857 = vrot.lane.b32.xlu0 %v8529_v44, %s7675_s25  ;;  %v2317_v3 = vld [vmem:[#allocation2 + $0x88] sm:$0xf]  ;;  %v7572_v44 = vld [vmem:[%s7719_s20 + $0x54] ss:$0 sps:$4 sm:$0xff]   ;;  %v3720_v22 = vcombine.high %v8759_v53, %v8759_v53 }
 0x159   : > { %2296 = vst [vmem:[#allocation2 + $0x80] sm:$0xf] %v2292_v7  ;;  %7227 = vmatprep.subr.msk.mxu0 %vm10821_vm4, %v2317_v3 }
 0x15a   : > { %v2962_v11 = vpop.permute.xlu1 %2961  ;;  %v2960_v16 = vpop.permute.xlu0 %2959 }
 0x15b   : > { %v2966_v19 = vsel %vm10822_vm13, %v2958_v6, %v2960_v16  ;;  %v2967_v36 = vsel %vm10823_vm12, %v2960_v16, %v2962_v11  ;;  %vm10824_vm12 = vmmov %vm10821_vm4  ;;  %v8800_v16 = vcombine.high %v8778_v31, %v8778_v31 }
 0x15c   : > { %v2974_v24 = vsel %vm7753_vm1, %v2966_v19, 0.0  ;;  %v2975_v27 = vsel %vm7747_vm0, %v2967_v36, 0.0  ;;  %3948 = vrot.lane.b32.xlu1 %v3942_v50, %s7673_s23  ;;  %3946 = vrot.lane.b32.xlu0 %v8667_v37, %s7673_s23  ;;  %v2318_v4 = vld [vmem:[#allocation2 + $0x90] sm:$0xf]  ;;  %v3717_v19 = vld [vmem:[%s7719_s20 + $0x48] sm:$0xff]  ;;  %v3725_v36 = vsel %vm7753_vm1, %v3720_v22, 0.0 }
 0x15d   : > { %v2319_v28 = vld [vmem:[#allocation2 + $0x98] sm:$0xf]  ;;  %v2982_v29 = vrot.slane %v2974_v24, 4  ;;  %v2983_v30 = vrot.slane %v2975_v27, 4  ;;  %v8868_v22 = vld [vmem:[%s10754_s2 + $0x8] sm:$0xff] }
 0x15e   : > { %7235 = vmatprep.subr.msk.mxu1 %vm10824_vm12, %v2319_v28  ;;  %v2956_v5 = vpop.permute.xlu1 %2955  ;;  %v2964_v10 = vpop.permute.xlu0 %2963  ;;  %vm10826_vm12 = vcmask 1042432  }
 0x15f   : > { %7236 = vmatpush1.msk.msra.mxu1 %vm10821_vm4, %v2318_v4  ;;  %2990 = vst [vmem:[#allocation2 + $0x28] sm:$0xf0] %v2982_v29  ;;  %2991 = vst [vmem:[#allocation2 + $0x30] sm:$0xf0] %v2983_v30  ;;  %v2965_v33 = vsel %vm10822_vm13, %v2956_v5, %v2958_v6  ;;  %v2968_v52 = vsel %vm10825_vm15, %v2962_v11, %v2964_v10  ;;  %v8774_v6 = vcombine.high %v8754_v60, %v8754_v60  ;;  %v8789_v11 = vld [vmem:[%s10753_s1 + $0x20] sm:$0xff]  ;;  %v8814_v4 = vld [vmem:[%s10753_s1 + $0x28] sm:$0xff] }
 0x160   : > { %7237 = vmatmul.mubr.msk.f32.vlgmr.msra.gmra.mrb[32].mxu1 %vm592_vm14, %v8689_v51  ;;  %7247 = vmatprep.subr.msk.mxu1 %vm10826_vm12, %v2583_v23  ;;  %v2973_v8 = vsel %vm7777_vm3, %v2965_v33, 0.0  ;;  %v2976_v46 = vsel %vm7765_vm2, %v2968_v52, 0.0  ;;  %v2316_v39 = vld [vmem:[#allocation2 + $0x80] sm:$0xf]  ;;  %vm10827_vm15 = vmmov %vm10821_vm4 }
 0x161   : > { %3952 = vrot.lane.b32.xlu1 %v7572_v44, %s7673_s23  ;;  %3950 = vrot.lane.b32.xlu0 %v8652_v12, %s7673_s23  ;;  %v2981_v38 = vrot.slane %v2973_v8, 4  ;;  %v2984_v47 = vrot.slane %v2976_v46, 4  ;;  %vm10828_vm4 = vmmov %vm10826_vm12  ;;  %v3721_v44 = vcombine.high %v3717_v19, %v3717_v19  ;;  %v4649_v5 = vld [vmem:[%s7719_s20 + $0x60] sm:$0xf] }
 0x162   : > { %7228 = vmatpush1.msk.msra.mxu0 %vm10827_vm15, %v2316_v39  ;;  %2503 = vmatprep.mubr.f32.mxu1 %v10762_v43  ;;  %v2926_v49 = vpop.permute.xlu1 %2925  ;;  %v8705_v54 = vpop.permute.xlu0 %2923  ;;  %vm10829_vm13 = vmmov %vm10828_vm4  ;;  %v8837_v39 = vld [vmem:[%s10754_s2] sm:$0xff]  ;;  %vm10831_vm15 = vcmask 23552  }
 0x163   : > { %7229 = vmatmul.mubr.msk.f32.vlgmr.msra.gmra.mrb[32].mxu0 %vm592_vm14, %v8689_v51  ;;  %7243 = vmatprep.subr.msk.mxu0 %vm10828_vm4, %v2582_v32  ;;  %2989 = vst [vmem:[#allocation2 + $0x20] sm:$0xf0] %v2981_v38  ;;  %2992 = vst [vmem:[#allocation2 + $0x38] sm:$0xf0] %v2984_v47  ;;  %v2932_v41 = vsel %vm349_vm5, %v8705_v54, %v2926_v49  ;;  %v3727_v10 = vsel %vm7765_vm2, %v3721_v44, 0.0  ;;  %v3726_v32 = vsel %vm7747_vm0, %v3717_v19, 0.0 }
 0x164   : > { %7238 = vmatmul.mubr.msk.f32.gmra.mrb[34].mxu1 %vm592_vm14, %v8715_v18  ;;  %2402 = vmatprep.mubr.f32.mxu0 %v10762_v43  ;;  %v2940_v1 = vsel %vm7935_vm6, %v2932_v41, 0.0  ;;  %vm10830_vm12 = vmmov %vm10828_vm4  ;;  %v4589_v19 = vcombine.low %v8778_v31, %v8778_v31 }
 0x165   : > { %3944 = vrot.lane.b32.xlu1 %v3941_v34, %s7673_s23  ;;  %3851 = vrot.lane.b32.xlu0 %v8491_v61, %s7675_s25  ;;  %2944 = vst [vmem:[#allocation2 + $0x28] sm:$0xf] %v2940_v1  ;;  %vm10832_vm4 = vmmov %vm10831_vm15 }
 0x166   : > { %2509 = vmatprep.mubr.f32.mxu1 %v10762_v43  ;;  %7244 = vmatpush1.msk.msra.mxu0 %vm10829_vm13, %v2534_v20  ;;  %v2930_v55 = vpop.permute.xlu1 %2929  ;;  %v2928_v56 = vpop.permute.xlu0 %2927  ;;  %vm10833_vm13 = vmmov %vm10832_vm4 }
 0x167   : > { %7230 = vmatmul.mubr.msk.f32.gmra.mrb[34].mxu0 %vm592_vm14, %v8715_v18  ;;  %7248 = vmatpush1.msk.msra.mxu1 %vm10830_vm12, %v2535_v63  ;;  %v2933_v57 = vsel %vm349_vm5, %v2926_v49, %v2928_v56  ;;  %v2934_v61 = vsel %vm349_vm5, %v2928_v56, %v2930_v55  ;;  %vm10834_vm12 = vmmov %vm10832_vm4 }
 0x168   : > { %7239 = vmatmul.mubr.msk.f32.gmra.mrb[36].mxu1 %vm592_vm14, %v8737_v48  ;;  %2408 = vmatprep.mubr.f32.mxu0 %v10762_v43  ;;  %v2941_v15 = vsel %vm7941_vm7, %v2933_v57, 0.0  ;;  %v2942_v58 = vsel %vm7960_vm8, %v2934_v61, 0.0 }
 0x169   : > { %3978 = vrot.lane.b32.xlu1 %v8652_v12, %s7672_s22  ;;  %3976 = vrot.lane.b32.xlu0 %v3972_v40, %s7672_s22  ;;  %2945 = vst [vmem:[#allocation2 + $0x30] sm:$0xf] %v2941_v15  ;;  %2946 = vst [vmem:[#allocation2 + $0x38] sm:$0xf] %v2942_v58  ;;  %v8765_v12 = vld [vmem:[%s10753_s1 + $0x18] sm:$0xff]  ;;  %v3724_v40 = vsel %vm7777_vm3, %v8759_v53, 0.0 }
 0x16a   : > { %2515 = vmatprep.mubr.f32.mxu1 %v10762_v43  ;;  %v2896_v62 = vpop.permute.xlu1 %2895  ;;  %v2894_v42 = vpop.permute.xlu0 %2893 }
 0x16b   : > { %7231 = vmatmul.mubr.msk.f32.gmra.mrb[36].mxu0 %vm592_vm14, %v8737_v48  ;;  %v2902_v2 = vsel %vm310_vm9, %v2894_v42, %v2896_v62 }
 0x16c   : > { %7240 = vmatmul.mubr.msk.f32.gmra.mrb[38].mxu1 %vm592_vm14, %v8765_v12  ;;  %2414 = vmatprep.mubr.f32.mxu0 %v10762_v43  ;;  %2910 = vst [vmem:[#allocation2 + $0x8] sm:$0xf0] %v2902_v2  ;;  %v3155_v28 = vld [vmem:[#allocation2 + $0x28] sm:$0xff]  ;;  %v4615_v2 = vld [vmem:[%s7719_s20 + $0x60] sm:$0xf] }
 0x16d   : > { %3982 = vrot.lane.b32.xlu1 %v3968_v59, %s7672_s22  ;;  %3980 = vrot.lane.b32.xlu0 %v3973_v35, %s7672_s22 }
 0x16e   : > { %2521 = vmatprep.mubr.f32.mxu1 %v10762_v43  ;;  %v2900_v7 = vpop.permute.xlu1 %2899  ;;  %v2898_v3 = vpop.permute.xlu0 %2897 }
 0x16f   : > { %7232 = vmatmul.mubr.msk.f32.gmra.mrb[38].mxu0 %vm592_vm14, %v8765_v12  ;;  %v2903_v50 = vsel %vm310_vm9, %v2896_v62, %v2898_v3  ;;  %v2904_v63 = vsel %vm310_vm9, %v2898_v3, %v2900_v7 }
 0x170   : > { %7241 = vmatmul.mubr.msk.f32.gmra.mrb[40].mxu1 %vm592_vm14, %v8789_v11  ;;  %2420 = vmatprep.mubr.f32.mxu0 %v10762_v43  ;;  %2911 = vst [vmem:[#allocation2 + $0x10] sm:$0xf0] %v2903_v50  ;;  %2912 = vst [vmem:[#allocation2 + $0x18] sm:$0xf0] %v2904_v63  ;;  %v3157_v34 = vld [vmem:[#allocation2 + $0x38] sm:$0xff]  ;;  %v3156_v47 = vld [vmem:[#allocation2 + $0x30] sm:$0xff] }
 0x171   : > { %4657 = vrot.lane.b32.xlu1 %v8774_v6, %s7671_s21  ;;  %3974 = vrot.lane.b32.xlu0 %v8667_v37, %s7672_s22 }
 0x172   : > { %2527 = vmatprep.mubr.f32.mxu1 %v10762_v43  ;;  %v2892_v20 = vpop.permute.xlu1 %2891  ;;  %v2922_v23 = vpop.permute.xlu0 %2921 }
 0x173   : > { %7233 = vmatmul.mubr.msk.f32.gmra.mrb[40].mxu0 %vm592_vm14, %v8789_v11  ;;  %v2901_v24 = vsel %vm310_vm9, %v2892_v20, %v2894_v42  ;;  %v2931_v37 = vsel %vm349_vm5, %v2922_v23, %v8705_v54  ;;  %v3151_v27 = vld [vmem:[#allocation2 + $0x8] sm:$0xff] }
 0x174   : > { %7242 = vmatmul.mubr.msk.f32.gmra.mrb[42].mxu1 %vm592_vm14, %v8814_v4  ;;  %2426 = vmatprep.mubr.f32.mxu0 %v10762_v43  ;;  %2909 = vst [vmem:[#allocation2] sm:$0xf0] %v2901_v24  ;;  %v2939_v29 = vsel %vm7986_vm10, %v2931_v37, 0.0  ;;  %v7422_v30 = vpack.c.bf16 %v3155_v28, %v3151_v27  ;;  %3729 = vst [vmem:[#allocation2 + $0x8] sm:$0xf] %v3725_v36 }
 0x175   : > { %4661 = vrot.lane.b32.xlu1 %v8800_v16, %s7671_s21  ;;  %4659 = vrot.lane.b32.xlu0 %v8778_v31, %s7671_s21  ;;  %2943 = vst [vmem:[#allocation2 + $0x20] sm:$0xf] %v2939_v29  ;;  %v7583_v37 = vld [vmem:[%s7719_s20 + $0x60] ss:$0 sps:$4 sm:$0xff]  }
 0x176   : > { %2733 = vmatprep.mubr.f32.mxu1 %v10762_v43  ;;  %v3036_v33 = vpop.permute.xlu1 %3035  ;;  %v3034_v52 = vpop.permute.xlu0 %3033  ;;  %7423 = vmatprep.subr.bf16.mxu0 %v7422_v30  ;;  %v4588_v30 = vcombine.low %v8754_v60, %v8754_v60 }
 0x177   : > { %7234 = vmatmul.mubr.msk.f32.gmra.mrb[42].mxu0 %vm592_vm14, %v8814_v4  ;;  %v3042_v8 = vsel %vm462_vm11, %v3034_v52, %v3036_v33  ;;  %v3153_v46 = vld [vmem:[#allocation2 + $0x18] sm:$0xff]  ;;  %v3152_v38 = vld [vmem:[#allocation2 + $0x10] sm:$0xff] }
 0x178   : > { %7249 = vmatmul.mubr.msk.f32.vlgmr.msra.gmra.mrb[44].mxu1 %vm10831_vm15, %v8837_v39  ;;  %2656 = vmatprep.mubr.f32.mxu0 %v10762_v43  ;;  %v3050_v49 = vsel %vm7935_vm6, %v3042_v8, 0.0  ;;  %v7430_v54 = vpack.c.bf16 %v3157_v34, %v3153_v46  ;;  %v7432_v41 = vpack.c.bf16 %v3156_v47, %v3152_v38  ;;  %3731 = vst [vmem:[#allocation2 + $0x18] sm:$0xf] %v3727_v10  ;;  %3730 = vst [vmem:[#allocation2 + $0x10] sm:$0xf] %v3726_v32  ;;  %vm10835_vm15 = vcmask 515072  }
 0x179   : > { %4655 = vrot.lane.b32.xlu1 %v8754_v60, %s7671_s21  ;;  %4663 = vrot.lane.b32.xlu0 %v4649_v5, %s7671_s21  ;;  %v3058_v1 = vrot.slane %v3050_v49, 4  ;;  %v8897_v32 = vld [vmem:[%s7719_s20 + $0x44] sm:$0xff]  ;;  %v3920_v38 = vld [vmem:[%s7719_s20 + $0x4c] sm:$0xff] }
 0x17a   : > { %2739 = vmatprep.mubr.f32.mxu1 %v10762_v43  ;;  %v3040_v55 = vpop.permute.xlu1 %3039  ;;  %v3038_v56 = vpop.permute.xlu0 %3037  ;;  %7431 = vmatprep.subr.bf16.mxu1 %v7430_v54  ;;  %v3923_v34 = vcombine.high %v8897_v32, %v8897_v32  ;;  %v4725_v54 = vld [vmem:[%s7719_s20 + $0x60] sm:$0xf] }
 0x17b   : > { %7245 = vmatmul.mubr.msk.f32.vlgmr.msra.gmra.mrb[44].mxu0 %vm10832_vm4, %v8837_v39  ;;  %3066 = vst [vmem:[#allocation2 + $0x48] sm:$0xf0] %v3058_v1  ;;  %v3043_v57 = vsel %vm462_vm11, %v3036_v33, %v3038_v56  ;;  %v3044_v61 = vsel %vm462_vm11, %v3038_v56, %v3040_v55  ;;  %7433 = vmatpush1.bf16.msra.mxu1 %v7432_v41  ;;  %v3150_v15 = vld [vmem:[#allocation2] sm:$0xff]  ;;  %vm10836_vm4 = vmmov %vm10835_vm15 }
 0x17c   : > { %2662 = vmatprep.mubr.f32.mxu0 %v10762_v43  ;;  %v3051_v58 = vsel %vm7941_vm7, %v3043_v57, 0.0  ;;  %v3052_v35 = vsel %vm7960_vm8, %v3044_v61, 0.0  ;;  %v3154_v59 = vld [vmem:[#allocation2 + $0x20] sm:$0xff]  ;;  %3728 = vst [vmem:[#allocation2] sm:$0xf] %v3724_v40  ;;  %7250 = vmatmul.mubr.msk.f32.gmra.mrb[46].mxu1 %vm10833_vm13, %v8868_v22  ;;  %vm10837_vm13 = vmmov %vm10836_vm4  ;;  %v3928_v41 = vsel %vm7753_vm1, %v3923_v34, 0.0  ;;  %v3924_v1 = vcombine.high %v3920_v38, %v3920_v38 }
 0x17d   : > { %4625 = vrot.lane.b32.xlu1 %v8778_v31, %s7672_s22  ;;  %4623 = vrot.lane.b32.xlu0 %v8774_v6, %s7672_s22  ;;  %v3059_v62 = vrot.slane %v3051_v58, 4  ;;  %v3060_v42 = vrot.slane %v3052_v35, 4  ;;  %v7424_v53 = vpack.c.bf16 %v3154_v59, %v3150_v15  ;;  %v3929_v40 = vsel %vm7747_vm0, %v3920_v38, 0.0 }
 0x17e   : > { %v3004_v7 = vpop.permute.xlu1 %3003  ;;  %v3032_v3 = vpop.permute.xlu0 %3031  ;;  %3347 = vmatprep.mubr.f32.mxu1 %v10762_v43  ;;  %v3930_v59 = vsel %vm7765_vm2, %v3924_v1, 0.0 }
 0x17f   : > { %7246 = vmatmul.mubr.msk.f32.gmra.mrb[46].mxu0 %vm10834_vm12, %v8868_v22  ;;  %3067 = vst [vmem:[#allocation2 + $0x50] sm:$0xf0] %v3059_v62  ;;  %3068 = vst [vmem:[#allocation2 + $0x58] sm:$0xf0] %v3060_v42  ;;  %v3041_v50 = vsel %vm462_vm11, %v3032_v3, %v3034_v52 }
 0x180   : > { %7425 = vmatpush1.bf16.msra.mxu0 %v7424_v53  ;;  %3246 = vmatprep.mubr.f32.mxu0 %v10762_v43  ;;  %v3049_v63 = vsel %vm7986_vm10, %v3041_v50, 0.0  ;;  %vm10838_vm12 = vmmov %vm10836_vm4 }
 0x181   : > { %4629 = vrot.lane.b32.xlu1 %v4615_v2, %s7672_s22  ;;  %4627 = vrot.lane.b32.xlu0 %v8800_v16, %s7672_s22  ;;  %v3057_v36 = vrot.slane %v3049_v63, 4 }
 0x182   : > { %v3008_v44 = vpop.permute.xlu1 %3007  ;;  %v3006_v20 = vpop.permute.xlu0 %3005 }
 0x183   : > { %3065 = vst [vmem:[#allocation2 + $0x40] sm:$0xf0] %v3057_v36  ;;  %v3012_v23 = vsel %vm10835_vm15, %v3004_v7, %v3006_v20  ;;  %v3013_v24 = vsel %vm10836_vm4, %v3006_v20, %v3008_v44  ;;  %v3927_v20 = vsel %vm7777_vm3, %v8897_v32, 0.0  ;;  %v8948_v32 = vld [vmem:[%s7719_s20 + $0x54] sm:$0xff]  ;;  %vm10839_vm15 = vcmask 523264  }
 0x184   : > { %3020 = vst [vmem:[#allocation2 + $0x48] sm:$0xf] %v3012_v23  ;;  %3021 = vst [vmem:[#allocation2 + $0x50] sm:$0xf] %v3013_v24  ;;  %vm10840_vm4 = vcmask 1043456  }
 0x185   : > { %4595 = vrot.lane.b32.xlu1 %v4589_v19, %s7673_s23  ;;  %4593 = vrot.lane.b32.xlu0 %v8754_v60, %s7673_s23 }
 0x186   : > { %v3097_v27 = vpop.permute.xlu1 %3096  ;;  %v3010_v28 = vpop.permute.xlu0 %3009 }
 0x187   : > { %v3014_v29 = vsel %vm10837_vm13, %v3008_v44, %v3010_v28  ;;  %vm10841_vm13 = vmmov %vm10839_vm15 }
 0x188   : > { %3022 = vst [vmem:[#allocation2 + $0x58] sm:$0xf] %v3014_v29 }
 0x189   : > { %4599 = vrot.lane.b32.xlu1 %v7583_v37, %s7673_s23  ;;  %4597 = vrot.lane.b32.xlu0 %v8778_v31, %s7673_s23 }
 0x18a   : > { %v3101_v5 = vpop.permute.xlu1 %3100  ;;  %v3099_v10 = vpop.permute.xlu0 %3098 }
 0x18b   : > { %v3105_v33 = vsel %vm310_vm9, %v3097_v27, %v3099_v10  ;;  %v3106_v52 = vsel %vm310_vm9, %v3099_v10, %v3101_v5  ;;  %v3159_v61 = vld [vmem:[#allocation2 + $0x48] sm:$0xff]  ;;  %v3160_v36 = vld [vmem:[#allocation2 + $0x50] sm:$0xff] }
 0x18c   : > { %3113 = vst [vmem:[#allocation2 + $0x68] sm:$0xf0] %v3105_v33  ;;  %3114 = vst [vmem:[#allocation2 + $0x70] sm:$0xf0] %v3106_v52  ;;  %v4695_v33 = vld [vmem:[%s7719_s20 + $0x60] sm:$0xf] }
 0x18d   : > { %4591 = vrot.lane.b32.xlu1 %v4588_v30, %s7673_s23  ;;  %4621 = vrot.lane.b32.xlu0 %v8754_v60, %s7672_s22  ;;  %v8952_v52 = vld [vmem:[%s7719_s20 + $0x5c] sm:$0xff] }
 0x18e   : > { %v3002_v8 = vpop.permute.xlu1 %3001  ;;  %v3103_v46 = vpop.permute.xlu0 %3102 }
 0x18f   : > { %v3011_v47 = vsel %vm10838_vm12, %v3002_v8, %v3004_v7  ;;  %v3107_v49 = vsel %vm310_vm9, %v3101_v5, %v3103_v46  ;;  %v3161_v7 = vld [vmem:[#allocation2 + $0x58] sm:$0xff]  ;;  %vm10842_vm12 = vmmov %vm10841_vm13 }
 0x190   : > { %3019 = vst [vmem:[#allocation2 + $0x40] sm:$0xf] %v3011_v47  ;;  %3115 = vst [vmem:[#allocation2 + $0x78] sm:$0xf0] %v3107_v49  ;;  %v4792_v49 = vcombine.low %v8952_v52, %v8952_v52 }
 0x191   : > { %4735 = vrot.lane.b32.xlu1 %v8778_v31, %s7674_s24  ;;  %4733 = vrot.lane.b32.xlu0 %v8774_v6, %s7674_s24 }
 0x192   : > { %v3127_v55 = vpop.permute.xlu1 %3126  ;;  %v3095_v56 = vpop.permute.xlu0 %3094 }
 0x193   : > { %v3104_v57 = vsel %vm310_vm9, %v3095_v56, %v3097_v27  ;;  %v3163_v15 = vld [vmem:[#allocation2 + $0x68] sm:$0xff]  ;;  %v3164_v58 = vld [vmem:[#allocation2 + $0x70] sm:$0xff] }
 0x194   : > { %3112 = vst [vmem:[#allocation2 + $0x60] sm:$0xf0] %v3104_v57  ;;  %v7426_v35 = vpack.c.bf16 %v3163_v15, %v3159_v61  ;;  %3932 = vst [vmem:[#allocation2 + $0x68] sm:$0xf] %v3928_v41  ;;  %v7436_v44 = vpack.c.bf16 %v3164_v58, %v3160_v36  ;;  %v7588_v57 = vld [vmem:[%s7719_s20 + $0x64] ss:$0 sps:$4 sm:$0xff]  }
 0x195   : > { %4739 = vrot.lane.b32.xlu1 %v4725_v54, %s7674_s24  ;;  %4737 = vrot.lane.b32.xlu0 %v8800_v16, %s7674_s24  ;;  %3933 = vst [vmem:[#allocation2 + $0x70] sm:$0xf] %v3929_v40  ;;  %v3384_v40 = vld [vmem:[%s10755_s3 + $0x30] sm:$0x77]  ;;  %v3385_v61 = vld [vmem:[%s10755_s3 + $0x38] sm:$0x77] }
 0x196   : > { %v3131_v62 = vpop.permute.xlu1 %3130  ;;  %v3129_v42 = vpop.permute.xlu0 %3128  ;;  %7427 = vmatprep.subr.bf16.mxu0 %v7426_v35 }
 0x197   : > { %v3135_v53 = vsel %vm349_vm5, %v3127_v55, %v3129_v42  ;;  %v3136_v2 = vsel %vm349_vm5, %v3129_v42, %v3131_v62  ;;  %v3165_v3 = vld [vmem:[#allocation2 + $0x78] sm:$0xff]  ;;  %v3158_v28 = vld [vmem:[#allocation2 + $0x40] sm:$0xff] }
 0x198   : > { %v3143_v50 = vsel %vm7935_vm6, %v3135_v53, 0.0  ;;  %v3144_v63 = vsel %vm7941_vm7, %v3136_v2, 0.0  ;;  %v7434_v19 = vpack.c.bf16 %v3165_v3, %v3161_v7  ;;  %3934 = vst [vmem:[#allocation2 + $0x78] sm:$0xf] %v3930_v59  ;;  %v3432_v2 = vcombine.high %v3384_v40, %v3384_v40 }
 0x199   : > { %4703 = vrot.lane.b32.xlu1 %v8774_v6, %s7675_s25  ;;  %4731 = vrot.lane.b32.xlu0 %v8754_v60, %s7674_s24  ;;  %3147 = vst [vmem:[#allocation2 + $0x88] sm:$0xf] %v3143_v50  ;;  %3148 = vst [vmem:[#allocation2 + $0x90] sm:$0xf] %v3144_v63  ;;  %v3433_v50 = vcombine.high %v3385_v61, %v3385_v61 }
 0x19a   : > { %v3125_v23 = vpop.permute.xlu1 %3124  ;;  %v3133_v24 = vpop.permute.xlu0 %3132  ;;  %7435 = vmatprep.subr.bf16.mxu1 %v7434_v19  ;;  %v4791_v19 = vcombine.low %v8948_v32, %v8948_v32 }
 0x19b   : > { %v3134_v37 = vsel %vm349_vm5, %v3125_v23, %v3127_v55  ;;  %v3137_v27 = vsel %vm349_vm5, %v3131_v62, %v3133_v24  ;;  %7437 = vmatpush1.bf16.msra.mxu1 %v7436_v44  ;;  %v3162_v29 = vld [vmem:[#allocation2 + $0x60] sm:$0xff]  ;;  %v8999_v44 = vcombine.high %v8948_v32, %v8948_v32 }
 0x19c   : > { %v3142_v30 = vsel %vm7986_vm10, %v3134_v37, 0.0  ;;  %v3145_v5 = vsel %vm7960_vm8, %v3137_v27, 0.0  ;;  %v7428_v10 = vpack.c.bf16 %v3162_v29, %v3158_v28  ;;  %3931 = vst [vmem:[#allocation2 + $0x60] sm:$0xf] %v3927_v20  ;;  %v9021_v29 = vcombine.high %v8952_v52, %v8952_v52 }
 0x19d   : > { %4707 = vrot.lane.b32.xlu1 %v8800_v16, %s7675_s25  ;;  %4705 = vrot.lane.b32.xlu0 %v8778_v31, %s7675_s25  ;;  %3146 = vst [vmem:[#allocation2 + $0x80] sm:$0xf] %v3142_v30  ;;  %3149 = vst [vmem:[#allocation2 + $0x98] sm:$0xf] %v3145_v5 }
 0x19e   : > { %v3810_v34 = vpop.permute.xlu1 %3809  ;;  %v3808_v8 = vpop.permute.xlu0 %3807  ;;  %7429 = vmatpush1.bf16.msra.mxu0 %v7428_v10 }
 0x19f   : > { %v3816_v46 = vsel %vm10839_vm15, %v3808_v8, %v3810_v34  ;;  %vm10843_vm15 = vmmov %vm10840_vm4 }
 0x1a0   : > { %v3824_v38 = vsel %vm7753_vm1, %v3816_v46, 0.0  ;;  %v3167_v47 = vld [vmem:[#allocation2 + $0x88] sm:$0xf]  ;;  %v3168_v53 = vld [vmem:[#allocation2 + $0x90] sm:$0xf] }
 0x1a1   : > { %4796 = vrot.lane.b32.xlu1 %v8948_v32, %s7673_s23  ;;  %4709 = vrot.lane.b32.xlu0 %v4695_v33, %s7675_s25  ;;  %v3832_v54 = vrot.slane %v3824_v38, 4  ;;  %v4818_v33 = vld [vmem:[%s7719_s20 + $0x64] sm:$0xf] }
 0x1a2   : > { %7251 = vmatprep.subr.msk.mxu0 %vm10840_vm4, %v3167_v47  ;;  %v3814_v41 = vpop.permute.xlu1 %3813  ;;  %v3812_v1 = vpop.permute.xlu0 %3811 }
 0x1a3   : > { %3840 = vst [vmem:[#allocation2 + $0x28] sm:$0xf0] %v3832_v54  ;;  %v3817_v55 = vsel %vm10841_vm13, %v3810_v34, %v3812_v1  ;;  %v3818_v56 = vsel %vm10842_vm12, %v3812_v1, %v3814_v41  ;;  %vm10844_vm13 = vmmov %vm10840_vm4  ;;  %v9041_v34 = vld [vmem:[%s7719_s20 + $0x60] sm:$0xff] }
 0x1a4   : > { %v3825_v15 = vsel %vm7747_vm0, %v3817_v55, 0.0  ;;  %v3826_v58 = vsel %vm7765_vm2, %v3818_v56, 0.0  ;;  %v3166_v35 = vld [vmem:[#allocation2 + $0x80] sm:$0xf]  ;;  %v3169_v59 = vld [vmem:[#allocation2 + $0x98] sm:$0xf]  ;;  %v9055_v47 = vcombine.high %v9041_v34, %v9041_v34 }
 0x1a5   : > { %4800 = vrot.lane.b32.xlu1 %v8952_v52, %s7673_s23  ;;  %4798 = vrot.lane.b32.xlu0 %v4792_v49, %s7673_s23  ;;  %v3833_v62 = vrot.slane %v3825_v15, 4  ;;  %v3834_v42 = vrot.slane %v3826_v58, 4  ;;  %v9058_v49 = vld [vmem:[%s7719_s20 + $0x68] sm:$0xff]  ;;  %v5499_v56 = vld [vmem:[%s7719_s20 + $0x70] sm:$0xf] }
 0x1a6   : > { %7252 = vmatpush1.msk.msra.mxu0 %vm10843_vm15, %v3166_v35  ;;  %7259 = vmatprep.subr.msk.mxu1 %vm10840_vm4, %v3169_v59  ;;  %v8981_v7 = vpop.permute.xlu1 %3773  ;;  %v3806_v3 = vpop.permute.xlu0 %3805  ;;  %vm10845_vm15 = vcmask 1042432   ;;  %v9073_v55 = vcombine.high %v9058_v49, %v9058_v49 }
 0x1a7   : > { %7260 = vmatpush1.msk.msra.mxu1 %vm10844_vm13, %v3168_v53  ;;  %7253 = vmatmul.mubr.msk.f32.vlgmr.msra.gmra.mrb[48].mxu0 %vm592_vm14, %v8689_v51  ;;  %3841 = vst [vmem:[#allocation2 + $0x30] sm:$0xf0] %v3833_v62  ;;  %3842 = vst [vmem:[#allocation2 + $0x38] sm:$0xf0] %v3834_v42  ;;  %v3815_v63 = vsel %vm10842_vm12, %v3806_v3, %v3808_v8 }
 0x1a8   : > { %7261 = vmatmul.mubr.msk.f32.vlgmr.msra.gmra.mrb[48].mxu1 %vm592_vm14, %v8689_v51  ;;  %3252 = vmatprep.mubr.f32.mxu0 %v10762_v43  ;;  %v3823_v36 = vsel %vm7777_vm3, %v3815_v63, 0.0  ;;  %vm10846_vm4 = vmmov %vm10845_vm15 }
 0x1a9   : > { %4701 = vrot.lane.b32.xlu1 %v8754_v60, %s7675_s25  ;;  %4802 = vrot.lane.b32.xlu0 %v7588_v57, %s7673_s23  ;;  %v3831_v20 = vrot.slane %v3823_v36, 4  ;;  %vm10847_vm13 = vmmov %vm10846_vm4  ;;  %v4576_v57 = vsel %vm7747_vm0, %v8778_v31, 0.0  ;;  %v4577_v31 = vsel %vm7765_vm2, %v8800_v16, 0.0 }
 0x1aa   : > { %3353 = vmatprep.mubr.f32.mxu1 %v10762_v43  ;;  %7267 = vmatprep.subr.msk.mxu0 %vm10845_vm15, %v3432_v2  ;;  %v3778_v51 = vpop.permute.xlu1 %3777  ;;  %v3776_v23 = vpop.permute.xlu0 %3775  ;;  %vm10848_vm12 = vmmov %vm10846_vm4  ;;  %vm10849_vm15 = vcmask 23552  }
 0x1ab   : > { %7254 = vmatmul.mubr.msk.f32.gmra.mrb[50].mxu0 %vm592_vm14, %v8715_v18  ;;  %7271 = vmatprep.subr.msk.mxu1 %vm10846_vm4, %v3433_v50  ;;  %3839 = vst [vmem:[#allocation2 + $0x20] sm:$0xf0] %v3831_v20  ;;  %v3782_v24 = vsel %vm349_vm5, %v8981_v7, %v3776_v23  ;;  %v3783_v37 = vsel %vm349_vm5, %v3776_v23, %v3778_v51  ;;  %vm10850_vm4 = vmmov %vm10849_vm15 }
 0x1ac   : > { %7262 = vmatmul.mubr.msk.f32.gmra.mrb[50].mxu1 %vm592_vm14, %v8715_v18  ;;  %3258 = vmatprep.mubr.f32.mxu0 %v10762_v43  ;;  %v3790_v27 = vsel %vm7935_vm6, %v3782_v24, 0.0  ;;  %v3791_v28 = vsel %vm7941_vm7, %v3783_v37, 0.0 }
 0x1ad   : > { %4826 = vrot.lane.b32.xlu1 %v8999_v44, %s7672_s22  ;;  %4794 = vrot.lane.b32.xlu0 %v4791_v19, %s7673_s23  ;;  %3794 = vst [vmem:[#allocation2 + $0x28] sm:$0xf] %v3790_v27  ;;  %3795 = vst [vmem:[#allocation2 + $0x30] sm:$0xf] %v3791_v28 }
 0x1ae   : > { %3359 = vmatprep.mubr.f32.mxu1 %v10762_v43  ;;  %7268 = vmatpush1.msk.msra.mxu0 %vm10847_vm13, %v3384_v40  ;;  %v3744_v18 = vpop.permute.xlu1 %3743  ;;  %v3780_v30 = vpop.permute.xlu0 %3779  ;;  %vm10851_vm13 = vmmov %vm10850_vm4 }
 0x1af   : > { %7255 = vmatmul.mubr.msk.f32.gmra.mrb[52].mxu0 %vm592_vm14, %v8737_v48  ;;  %7272 = vmatpush1.msk.msra.mxu1 %vm10848_vm12, %v3385_v61  ;;  %v3784_v5 = vsel %vm349_vm5, %v3778_v51, %v3780_v30  ;;  %v4574_v51 = vsel %vm7777_vm3, %v8754_v60, 0.0  ;;  %vm10852_vm12 = vmmov %vm10850_vm4 }
 0x1b0   : > { %7263 = vmatmul.mubr.msk.f32.gmra.mrb[52].mxu1 %vm592_vm14, %v8737_v48  ;;  %3264 = vmatprep.mubr.f32.mxu0 %v10762_v43  ;;  %v3792_v10 = vsel %vm7960_vm8, %v3784_v5, 0.0 }
 0x1b1   : > { %4830 = vrot.lane.b32.xlu1 %v9021_v29, %s7672_s22  ;;  %4828 = vrot.lane.b32.xlu0 %v8952_v52, %s7672_s22  ;;  %3796 = vst [vmem:[#allocation2 + $0x38] sm:$0xf] %v3792_v10 }
 0x1b2   : > { %3365 = vmatprep.mubr.f32.mxu1 %v10762_v43  ;;  %v3748_v8 = vpop.permute.xlu1 %3747  ;;  %v3746_v48 = vpop.permute.xlu0 %3745 }
 0x1b3   : > { %7256 = vmatmul.mubr.msk.f32.gmra.mrb[54].mxu0 %vm592_vm14, %v8765_v12  ;;  %v3752_v46 = vsel %vm310_vm9, %v3744_v18, %v3746_v48  ;;  %v3753_v38 = vsel %vm310_vm9, %v3746_v48, %v3748_v8 }
 0x1b4   : > { %7264 = vmatmul.mubr.msk.f32.gmra.mrb[54].mxu1 %vm592_vm14, %v8765_v12  ;;  %3270 = vmatprep.mubr.f32.mxu0 %v10762_v43  ;;  %3760 = vst [vmem:[#allocation2 + $0x8] sm:$0xf0] %v3752_v46  ;;  %3761 = vst [vmem:[#allocation2 + $0x10] sm:$0xf0] %v3753_v38  ;;  %v4005_v59 = vld [vmem:[#allocation2 + $0x28] sm:$0xff]  ;;  %v4006_v19 = vld [vmem:[#allocation2 + $0x30] sm:$0xff] }
 0x1b5   : > { %4824 = vrot.lane.b32.xlu1 %v8948_v32, %s7672_s22  ;;  %4832 = vrot.lane.b32.xlu0 %v4818_v33, %s7672_s22 }
 0x1b6   : > { %3371 = vmatprep.mubr.f32.mxu1 %v10762_v43  ;;  %v3772_v54 = vpop.permute.xlu1 %3771  ;;  %v3750_v12 = vpop.permute.xlu0 %3749 }
 0x1b7   : > { %7257 = vmatmul.mubr.msk.f32.gmra.mrb[56].mxu0 %vm592_vm14, %v8789_v11  ;;  %v3781_v41 = vsel %vm349_vm5, %v3772_v54, %v8981_v7  ;;  %v3754_v1 = vsel %vm310_vm9, %v3748_v8, %v3750_v12  ;;  %v5465_v8 = vld [vmem:[%s7719_s20 + $0x70] sm:$0xf]  ;;  %v5439_v54 = vcombine.low %v9058_v49, %v9058_v49 }
 0x1b8   : > { %7265 = vmatmul.mubr.msk.f32.gmra.mrb[56].mxu1 %vm592_vm14, %v8789_v11  ;;  %3276 = vmatprep.mubr.f32.mxu0 %v10762_v43  ;;  %v3789_v40 = vsel %vm7986_vm10, %v3781_v41, 0.0  ;;  %3762 = vst [vmem:[#allocation2 + $0x18] sm:$0xf0] %v3754_v1  ;;  %v4575_v11 = vsel %vm7753_vm1, %v8774_v6, 0.0  ;;  %v4007_v3 = vld [vmem:[#allocation2 + $0x38] sm:$0xff] }
 0x1b9   : > { %5509 = vrot.lane.b32.xlu1 %v9058_v49, %s7671_s21  ;;  %5507 = vrot.lane.b32.xlu0 %v9055_v47, %s7671_s21  ;;  %3793 = vst [vmem:[#allocation2 + $0x20] sm:$0xf] %v3789_v40  ;;  %v7599_v40 = vld [vmem:[%s7719_s20 + $0x70] ss:$0 sps:$4 sm:$0xff]  }
 0x1ba   : > { %3377 = vmatprep.mubr.f32.mxu1 %v10762_v43  ;;  %v3884_v61 = vpop.permute.xlu1 %3883  ;;  %v3742_v15 = vpop.permute.xlu0 %3741 }
 0x1bb   : > { %7258 = vmatmul.mubr.msk.f32.gmra.mrb[58].mxu0 %vm592_vm14, %v8814_v4  ;;  %v3751_v58 = vsel %vm310_vm9, %v3742_v15, %v3744_v18  ;;  %v4001_v35 = vld [vmem:[#allocation2 + $0x8] sm:$0xff]  ;;  %v4002_v62 = vld [vmem:[#allocation2 + $0x10] sm:$0xff] }
 0x1bc   : > { %7266 = vmatmul.mubr.msk.f32.gmra.mrb[58].mxu1 %vm592_vm14, %v8814_v4  ;;  %3506 = vmatprep.mubr.f32.mxu0 %v10762_v43  ;;  %3759 = vst [vmem:[#allocation2] sm:$0xf0] %v3751_v58  ;;  %v7438_v6 = vpack.c.bf16 %v4005_v59, %v4001_v35  ;;  %4579 = vst [vmem:[#allocation2 + $0x8] sm:$0xf] %v4575_v11 }
 0x1bd   : > { %5513 = vrot.lane.b32.xlu1 %v5499_v56, %s7671_s21  ;;  %5511 = vrot.lane.b32.xlu0 %v9073_v55, %s7671_s21  ;;  %4580 = vst [vmem:[#allocation2 + $0x10] sm:$0xf] %v4576_v57 }
 0x1be   : > { %3583 = vmatprep.mubr.f32.mxu1 %v10762_v43  ;;  %v3888_v42 = vpop.permute.xlu1 %3887  ;;  %v3886_v4 = vpop.permute.xlu0 %3885  ;;  %7439 = vmatprep.subr.bf16.mxu0 %v7438_v6 }
 0x1bf   : > { %7269 = vmatmul.mubr.msk.f32.vlgmr.msra.gmra.mrb[60].mxu0 %vm10849_vm15, %v8837_v39  ;;  %v3892_v53 = vsel %vm462_vm11, %v3884_v61, %v3886_v4  ;;  %v3893_v2 = vsel %vm462_vm11, %v3886_v4, %v3888_v42  ;;  %v4003_v7 = vld [vmem:[#allocation2 + $0x18] sm:$0xff]  ;;  %vm10853_vm15 = vcmask 515072  }
 0x1c0   : > { %7273 = vmatmul.mubr.msk.f32.vlgmr.msra.gmra.mrb[60].mxu1 %vm10850_vm4, %v8837_v39  ;;  %3512 = vmatprep.mubr.f32.mxu0 %v10762_v43  ;;  %v3900_v16 = vsel %vm7935_vm6, %v3892_v53, 0.0  ;;  %v3901_v50 = vsel %vm7941_vm7, %v3893_v2, 0.0  ;;  %v7446_v63 = vpack.c.bf16 %v4007_v3, %v4003_v7  ;;  %4581 = vst [vmem:[#allocation2 + $0x18] sm:$0xf] %v4577_v31  ;;  %v7448_v39 = vpack.c.bf16 %v4006_v19, %v4002_v62  ;;  %v4004_v18 = vld [vmem:[#allocation2 + $0x20] sm:$0xff]  ;;  %vm10854_vm4 = vmmov %vm10853_vm15 }
 0x1c1   : > { %5473 = vrot.lane.b32.xlu1 %v9055_v47, %s7672_s22  ;;  %5505 = vrot.lane.b32.xlu0 %v9041_v34, %s7671_s21  ;;  %v3908_v36 = vrot.slane %v3900_v16, 4  ;;  %v3909_v20 = vrot.slane %v3901_v50, 4  ;;  %v4778_v62 = vsel %vm7753_vm1, %v8999_v44, 0.0  ;;  %v5575_v3 = vld [vmem:[%s7719_s20 + $0x70] sm:$0xf]  ;;  %v4780_v44 = vsel %vm7765_vm2, %v9021_v29, 0.0 }
 0x1c2   : > { %3589 = vmatprep.mubr.f32.mxu1 %v10762_v43  ;;  %v3882_v23 = vpop.permute.xlu1 %3881  ;;  %v3890_v24 = vpop.permute.xlu0 %3889  ;;  %7447 = vmatprep.subr.bf16.mxu1 %v7446_v63  ;;  %v4779_v16 = vsel %vm7747_vm0, %v8952_v52, 0.0 }
 0x1c3   : > { %7270 = vmatmul.mubr.msk.f32.gmra.mrb[62].mxu0 %vm10851_vm13, %v8868_v22  ;;  %3916 = vst [vmem:[#allocation2 + $0x48] sm:$0xf0] %v3908_v36  ;;  %3917 = vst [vmem:[#allocation2 + $0x50] sm:$0xf0] %v3909_v20  ;;  %v3891_v37 = vsel %vm462_vm11, %v3882_v23, %v3884_v61  ;;  %v3894_v27 = vsel %vm462_vm11, %v3888_v42, %v3890_v24  ;;  %7449 = vmatpush1.bf16.msra.mxu1 %v7448_v39  ;;  %v4000_v28 = vld [vmem:[#allocation2] sm:$0xff]  ;;  %v4777_v24 = vsel %vm7777_vm3, %v8948_v32, 0.0 }
 0x1c4   : > { %4096 = vmatprep.mubr.f32.mxu0 %v10762_v43  ;;  %v3899_v60 = vsel %vm7986_vm10, %v3891_v37, 0.0  ;;  %v3902_v30 = vsel %vm7960_vm8, %v3894_v27, 0.0  ;;  %v7440_v5 = vpack.c.bf16 %v4004_v18, %v4000_v28  ;;  %4578 = vst [vmem:[#allocation2] sm:$0xf] %v4574_v51  ;;  %7274 = vmatmul.mubr.msk.f32.gmra.mrb[62].mxu1 %vm10852_vm12, %v8868_v22  ;;  %vm10855_vm13 = vmmov %vm10854_vm4  ;;  %v5438_v61 = vcombine.low %v9041_v34, %v9041_v34 }
 0x1c5   : > { %5477 = vrot.lane.b32.xlu1 %v9073_v55, %s7672_s22  ;;  %5475 = vrot.lane.b32.xlu0 %v9058_v49, %s7672_s22  ;;  %v3907_v10 = vrot.slane %v3899_v60, 4  ;;  %v3910_v33 = vrot.slane %v3902_v30, 4  ;;  %vm10856_vm12 = vmmov %vm10854_vm4 }
 0x1c6   : > { %v3856_v48 = vpop.permute.xlu1 %3855  ;;  %v3854_v46 = vpop.permute.xlu0 %3853  ;;  %7441 = vmatpush1.bf16.msra.mxu0 %v7440_v5  ;;  %4197 = vmatprep.mubr.f32.mxu1 %v10762_v43 }
 0x1c7   : > { %3915 = vst [vmem:[#allocation2 + $0x40] sm:$0xf0] %v3907_v10  ;;  %3918 = vst [vmem:[#allocation2 + $0x58] sm:$0xf0] %v3910_v33  ;;  %v3862_v38 = vsel %vm10853_vm15, %v3854_v46, %v3856_v48  ;;  %v5545_v33 = vld [vmem:[%s7719_s20 + $0x70] sm:$0xf] }
 0x1c8   : > { %3870 = vst [vmem:[#allocation2 + $0x48] sm:$0xf] %v3862_v38  ;;  %vm10857_vm15 = vcmask 1043456  }
 0x1c9   : > { %5443 = vrot.lane.b32.xlu1 %v9041_v34, %s7673_s23  ;;  %5479 = vrot.lane.b32.xlu0 %v5465_v8, %s7672_s22  ;;  %v9196_v8 = vld [vmem:[%s7719_s20 + $0x6c] sm:$0xff] }
 0x1ca   : > { %v3860_v22 = vpop.permute.xlu1 %3859  ;;  %v3858_v12 = vpop.permute.xlu0 %3857 }
 0x1cb   : > { %v3863_v41 = vsel %vm10854_vm4, %v3856_v48, %v3858_v12  ;;  %v3864_v1 = vsel %vm10855_vm13, %v3858_v12, %v3860_v22  ;;  %v5642_v12 = vcombine.low %v9196_v8, %v9196_v8  ;;  %vm10858_vm4 = vcmask 523264  }
 0x1cc   : > { %3871 = vst [vmem:[#allocation2 + $0x50] sm:$0xf] %v3863_v41  ;;  %3872 = vst [vmem:[#allocation2 + $0x58] sm:$0xf] %v3864_v1  ;;  %v4235_v41 = vld [vmem:[%s10755_s3 + $0x48] sm:$0x77] }
 0x1cd   : > { %5447 = vrot.lane.b32.xlu1 %v9058_v49, %s7673_s23  ;;  %5445 = vrot.lane.b32.xlu0 %v5439_v54, %s7673_s23  ;;  %v9211_v1 = vld [vmem:[%s7719_s20 + $0x64] sm:$0xff]  ;;  %vm10859_vm13 = vmmov %vm10858_vm4 }
 0x1ce   : > { %v3949_v56 = vpop.permute.xlu1 %3948  ;;  %v3947_v11 = vpop.permute.xlu0 %3946 }
 0x1cf   : > { %v3955_v57 = vsel %vm310_vm9, %v3947_v11, %v3949_v56  ;;  %v4009_v53 = vld [vmem:[#allocation2 + $0x48] sm:$0xff] }
 0x1d0   : > { %3963 = vst [vmem:[#allocation2 + $0x68] sm:$0xf0] %v3955_v57 }
 0x1d1   : > { %5471 = vrot.lane.b32.xlu1 %v9041_v34, %s7672_s22  ;;  %5449 = vrot.lane.b32.xlu0 %v7599_v40, %s7673_s23 }
 0x1d3   : > { %v3953_v15 = vpop.permute.xlu1 %3952  ;;  %v3951_v58 = vpop.permute.xlu0 %3950  ;;  %v4011_v19 = vld [vmem:[#allocation2 + $0x58] sm:$0xff]  ;;  %v4010_v39 = vld [vmem:[#allocation2 + $0x50] sm:$0xff] }
 0x1d4   : > { %v3956_v35 = vsel %vm310_vm9, %v3949_v56, %v3951_v58  ;;  %v3957_v59 = vsel %vm310_vm9, %v3951_v58, %v3953_v15  ;;  %v4234_v15 = vld [vmem:[%s10755_s3 + $0x40] sm:$0x77]  ;;  %v4283_v58 = vcombine.high %v4235_v41, %v4235_v41 }
 0x1d5   : > { %3964 = vst [vmem:[#allocation2 + $0x70] sm:$0xf0] %v3956_v35  ;;  %3965 = vst [vmem:[#allocation2 + $0x78] sm:$0xf0] %v3957_v59  ;;  %5583 = vrot.lane.b32.xlu1 %v9055_v47, %s7674_s24  ;;  %5441 = vrot.lane.b32.xlu0 %v5438_v61, %s7673_s23  ;;  %v7604_v61 = vld [vmem:[%s7719_s20 + $0x74] ss:$0 sps:$4 sm:$0xff]  }
 0x1d7   : > { %v3945_v6 = vpop.permute.xlu1 %3944  ;;  %v3852_v31 = vpop.permute.xlu0 %3851  ;;  %v4013_v2 = vld [vmem:[#allocation2 + $0x68] sm:$0xff] }
 0x1d8   : > { %v3954_v42 = vsel %vm310_vm9, %v3945_v6, %v3947_v11  ;;  %v3861_v4 = vsel %vm10856_vm12, %v3852_v31, %v3854_v46  ;;  %v7442_v7 = vpack.c.bf16 %v4013_v2, %v4009_v53  ;;  %4782 = vst [vmem:[#allocation2 + $0x68] sm:$0xf] %v4778_v62  ;;  %vm10860_vm12 = vmmov %vm10857_vm15  ;;  %v4282_v2 = vcombine.high %v4234_v15, %v4234_v15 }
 0x1d9   : > { %3962 = vst [vmem:[#allocation2 + $0x60] sm:$0xf0] %v3954_v42  ;;  %3869 = vst [vmem:[#allocation2 + $0x40] sm:$0xf] %v3861_v4  ;;  %5587 = vrot.lane.b32.xlu1 %v9073_v55, %s7674_s24  ;;  %5585 = vrot.lane.b32.xlu0 %v9058_v49, %s7674_s24 }
 0x1da   : > { %7443 = vmatprep.subr.bf16.mxu0 %v7442_v7 }
 0x1db   : > { %v3979_v50 = vpop.permute.xlu1 %3978  ;;  %v3977_v63 = vpop.permute.xlu0 %3976 }
 0x1dc   : > { %v3985_v36 = vsel %vm349_vm5, %v3977_v63, %v3979_v50  ;;  %v4015_v20 = vld [vmem:[#allocation2 + $0x78] sm:$0xff]  ;;  %v4014_v51 = vld [vmem:[#allocation2 + $0x70] sm:$0xff] }
 0x1dd   : > { %v3993_v23 = vsel %vm7935_vm6, %v3985_v36, 0.0  ;;  %5581 = vrot.lane.b32.xlu1 %v9041_v34, %s7674_s24  ;;  %5589 = vrot.lane.b32.xlu0 %v5575_v3, %s7674_s24  ;;  %v7450_v29 = vpack.c.bf16 %v4015_v20, %v4011_v19  ;;  %4784 = vst [vmem:[#allocation2 + $0x78] sm:$0xf] %v4780_v44  ;;  %v7452_v52 = vpack.c.bf16 %v4014_v51, %v4010_v39  ;;  %4783 = vst [vmem:[#allocation2 + $0x70] sm:$0xf] %v4779_v16  ;;  %v9233_v44 = vld [vmem:[%s10753_s1] sm:$0xff] }
 0x1de   : > { %3997 = vst [vmem:[#allocation2 + $0x88] sm:$0xf] %v3993_v23  ;;  %v5641_v16 = vcombine.low %v9211_v1, %v9211_v1 }
 0x1df   : > { %v3983_v37 = vpop.permute.xlu1 %3982  ;;  %v3981_v27 = vpop.permute.xlu0 %3980  ;;  %7451 = vmatprep.subr.bf16.mxu1 %v7450_v29  ;;  %v9259_v29 = vld [vmem:[%s10753_s1 + $0x8] sm:$0xff] }
 0x1e0   : > { %v3986_v28 = vsel %vm349_vm5, %v3979_v50, %v3981_v27  ;;  %v3987_v18 = vsel %vm349_vm5, %v3981_v27, %v3983_v37  ;;  %7453 = vmatpush1.bf16.msra.mxu1 %v7452_v52  ;;  %v4008_v60 = vld [vmem:[#allocation2 + $0x40] sm:$0xff] }
 0x1e1   : > { %v4012_v30 = vld [vmem:[#allocation2 + $0x60] sm:$0xff]  ;;  %v3994_v5 = vsel %vm7941_vm7, %v3986_v28, 0.0  ;;  %v3995_v10 = vsel %vm7960_vm8, %v3987_v18, 0.0  ;;  %5555 = vrot.lane.b32.xlu1 %v9058_v49, %s7675_s25  ;;  %5553 = vrot.lane.b32.xlu0 %v9055_v47, %s7675_s25 }
 0x1e2   : > { %v7444_v32 = vpack.c.bf16 %v4012_v30, %v4008_v60  ;;  %4781 = vst [vmem:[#allocation2 + $0x60] sm:$0xf] %v4777_v24  ;;  %3998 = vst [vmem:[#allocation2 + $0x90] sm:$0xf] %v3994_v5  ;;  %v9271_v24 = vcombine.high %v9211_v1, %v9211_v1  ;;  %v9283_v60 = vld [vmem:[%s10753_s1 + $0x10] sm:$0xff] }
 0x1e3   : > { %3999 = vst [vmem:[#allocation2 + $0x98] sm:$0xf] %v3995_v10  ;;  %v4658_v48 = vpop.permute.xlu1 %4657  ;;  %v3975_v46 = vpop.permute.xlu0 %3974  ;;  %v9294_v10 = vcombine.high %v9196_v8, %v9196_v8 }
 0x1e4   : > { %7445 = vmatpush1.bf16.msra.mxu0 %v7444_v32  ;;  %v3984_v38 = vsel %vm349_vm5, %v3975_v46, %v3977_v63  ;;  %v5668_v32 = vld [vmem:[%s7719_s20 + $0x74] sm:$0xf] }
 0x1e5   : > { %v3992_v54 = vsel %vm7986_vm10, %v3984_v38, 0.0  ;;  %5559 = vrot.lane.b32.xlu1 %v5545_v33, %s7675_s25  ;;  %5557 = vrot.lane.b32.xlu0 %v9073_v55, %s7675_s25  ;;  %v4017_v22 = vld [vmem:[#allocation2 + $0x88] sm:$0xf]  ;;  %v9303_v33 = vld [vmem:[%s7719_s20 + $0x70] sm:$0xff] }
 0x1e6   : > { %3996 = vst [vmem:[#allocation2 + $0x80] sm:$0xf] %v3992_v54  ;;  %7275 = vmatprep.subr.msk.mxu0 %vm10857_vm15, %v4017_v22  ;;  %vm10861_vm15 = vmmov %vm10860_vm12  ;;  %v9311_v54 = vld [vmem:[%s10753_s1 + $0x18] sm:$0xff]  ;;  %v9321_v22 = vcombine.high %v9303_v33, %v9303_v33 }
 0x1e7   : > { %v4662_v40 = vpop.permute.xlu1 %4661  ;;  %v4660_v56 = vpop.permute.xlu0 %4659 }
 0x1e8   : > { %v4666_v11 = vsel %vm10858_vm4, %v4658_v48, %v4660_v56  ;;  %v4667_v57 = vsel %vm10859_vm13, %v4660_v56, %v4662_v40  ;;  %vm10862_vm13 = vmmov %vm10858_vm4 }
 0x1e9   : > { %v4674_v35 = vsel %vm7753_vm1, %v4666_v11, 0.0  ;;  %v4675_v59 = vsel %vm7747_vm0, %v4667_v57, 0.0  ;;  %5648 = vrot.lane.b32.xlu1 %v5642_v12, %s7673_s23  ;;  %5646 = vrot.lane.b32.xlu0 %v9211_v1, %s7673_s23  ;;  %v4018_v6 = vld [vmem:[#allocation2 + $0x90] sm:$0xf]  ;;  %v9325_v12 = vld [vmem:[%s7719_s20 + $0x78] sm:$0xff]  ;;  %v9334_v57 = vld [vmem:[%s10753_s1 + $0x20] sm:$0xff] }
 0x1ea   : > { %v4019_v62 = vld [vmem:[#allocation2 + $0x98] sm:$0xf]  ;;  %v4682_v31 = vrot.slane %v4674_v35, 4  ;;  %v4683_v42 = vrot.slane %v4675_v59, 4  ;;  %10867 = vst [vmem:[#allocation7_spill] sm:$0xff] %v9325_v12  ;;  %10868 = vst [vmem:[#allocation8_spill] sm:$0xff] %v9334_v57 }
 0x1eb   : > { %7283 = vmatprep.subr.msk.mxu1 %vm10860_vm12, %v4019_v62  ;;  %v4656_v4 = vpop.permute.xlu1 %4655  ;;  %v4664_v53 = vpop.permute.xlu0 %4663  ;;  %vm10863_vm12 = vcmask 1042432  }
 0x1ec   : > { %7284 = vmatpush1.msk.msra.mxu1 %vm10861_vm15, %v4018_v6  ;;  %4690 = vst [vmem:[#allocation2 + $0x28] sm:$0xf0] %v4682_v31  ;;  %4691 = vst [vmem:[#allocation2 + $0x30] sm:$0xf0] %v4683_v42  ;;  %v4665_v7 = vsel %vm10858_vm4, %v4656_v4, %v4658_v48  ;;  %v4668_v3 = vsel %vm10862_vm13, %v4662_v40, %v4664_v53  ;;  %v9359_v42 = vld [vmem:[%s10753_s1 + $0x28] sm:$0xff] }
 0x1ed   : > { %7285 = vmatmul.mubr.msk.f32.vlgmr.msra.gmra.mrb[64].mxu1 %vm592_vm14, %v9233_v44  ;;  %7295 = vmatprep.subr.msk.mxu1 %vm10863_vm12, %v4283_v58  ;;  %v4673_v50 = vsel %vm7777_vm3, %v4665_v7, 0.0  ;;  %v4676_v63 = vsel %vm7765_vm2, %v4668_v3, 0.0  ;;  %v4016_v19 = vld [vmem:[#allocation2 + $0x80] sm:$0xf]  ;;  %vm10864_vm4 = vmmov %vm10863_vm12  ;;  %10870 = vst [vmem:[#allocation10_spill] sm:$0xff] %v9359_v42  ;;  %v5426_v7 = vsel %vm7747_vm0, %v9058_v49, 0.0 }
 0x1ee   : > { %5652 = vrot.lane.b32.xlu1 %v7604_v61, %s7673_s23  ;;  %5650 = vrot.lane.b32.xlu0 %v9196_v8, %s7673_s23  ;;  %v4681_v36 = vrot.slane %v4673_v50, 4  ;;  %v4684_v20 = vrot.slane %v4676_v63, 4  ;;  %vm10865_vm13 = vmmov %vm10864_vm4  ;;  %v9345_v61 = vcombine.high %v9325_v12, %v9325_v12  ;;  %v6349_v53 = vld [vmem:[%s7719_s20 + $0x80] sm:$0xf] }
 0x1ef   : > { %7276 = vmatpush1.msk.msra.mxu0 %vm10861_vm15, %v4016_v19  ;;  %4203 = vmatprep.mubr.f32.mxu1 %v10762_v43  ;;  %v4626_v39 = vpop.permute.xlu1 %4625  ;;  %v9249_v51 = vpop.permute.xlu0 %4623  ;;  %vm10866_vm12 = vmmov %vm10864_vm4  ;;  %vm10872_vm15 = vcmask 23552  }
 0x1f0   : > { %7277 = vmatmul.mubr.msk.f32.vlgmr.msra.gmra.mrb[64].mxu0 %vm592_vm14, %v9233_v44  ;;  %7291 = vmatprep.subr.msk.mxu0 %vm10864_vm4, %v4282_v2  ;;  %4689 = vst [vmem:[#allocation2 + $0x20] sm:$0xf0] %v4681_v36  ;;  %4692 = vst [vmem:[#allocation2 + $0x38] sm:$0xf0] %v4684_v20  ;;  %v4632_v23 = vsel %vm349_vm5, %v9249_v51, %v4626_v39  ;;  %v5427_v2 = vsel %vm7765_vm2, %v9073_v55, 0.0  ;;  %v9384_v36 = vld [vmem:[%s10754_s2] sm:$0xff] }
 0x1f1   : > { %7286 = vmatmul.mubr.msk.f32.gmra.mrb[66].mxu1 %vm592_vm14, %v9259_v29  ;;  %4102 = vmatprep.mubr.f32.mxu0 %v10762_v43  ;;  %v4640_v52 = vsel %vm7935_vm6, %v4632_v23, 0.0  ;;  %10869 = vst [vmem:[#allocation9_spill] sm:$0xff] %v9345_v61  ;;  %10871 = vst [vmem:[#allocation11_spill] sm:$0xff] %v9384_v36 }
 0x1f2   : > { %5644 = vrot.lane.b32.xlu1 %v5641_v16, %s7673_s23  ;;  %5551 = vrot.lane.b32.xlu0 %v9041_v34, %s7675_s25  ;;  %4644 = vst [vmem:[#allocation2 + $0x28] sm:$0xf] %v4640_v52  ;;  %v5424_v52 = vsel %vm7777_vm3, %v9041_v34, 0.0  ;;  %vm10873_vm4 = vmmov %vm10872_vm15 }
 0x1f3   : > { %4209 = vmatprep.mubr.f32.mxu1 %v10762_v43  ;;  %7292 = vmatpush1.msk.msra.mxu0 %vm10865_vm13, %v4234_v15  ;;  %v4630_v37 = vpop.permute.xlu1 %4629  ;;  %v4628_v27 = vpop.permute.xlu0 %4627  ;;  %v5425_v15 = vsel %vm7753_vm1, %v9055_v47, 0.0  ;;  %vm10875_vm13 = vmmov %vm10873_vm4 }
 0x1f4   : > { %7278 = vmatmul.mubr.msk.f32.gmra.mrb[66].mxu0 %vm592_vm14, %v9259_v29  ;;  %7296 = vmatpush1.msk.msra.mxu1 %vm10866_vm12, %v4235_v41  ;;  %v4633_v28 = vsel %vm349_vm5, %v4626_v39, %v4628_v27  ;;  %v4634_v18 = vsel %vm349_vm5, %v4628_v27, %v4630_v37  ;;  %vm10876_vm12 = vmmov %vm10873_vm4 }
 0x1f5   : > { %7287 = vmatmul.mubr.msk.f32.gmra.mrb[68].mxu1 %vm592_vm14, %v9283_v60  ;;  %4108 = vmatprep.mubr.f32.mxu0 %v10762_v43  ;;  %v4641_v30 = vsel %vm7941_vm7, %v4633_v28, 0.0  ;;  %v4642_v5 = vsel %vm7960_vm8, %v4634_v18, 0.0 }
 0x1f6   : > { %5678 = vrot.lane.b32.xlu1 %v9196_v8, %s7672_s22  ;;  %5676 = vrot.lane.b32.xlu0 %v9271_v24, %s7672_s22  ;;  %4645 = vst [vmem:[#allocation2 + $0x30] sm:$0xf] %v4641_v30  ;;  %4646 = vst [vmem:[#allocation2 + $0x38] sm:$0xf] %v4642_v5 }
 0x1f7   : > { %4215 = vmatprep.mubr.f32.mxu1 %v10762_v43  ;;  %v4596_v48 = vpop.permute.xlu1 %4595  ;;  %v4594_v46 = vpop.permute.xlu0 %4593 }
 0x1f8   : > { %7279 = vmatmul.mubr.msk.f32.gmra.mrb[68].mxu0 %vm592_vm14, %v9283_v60  ;;  %v4602_v38 = vsel %vm310_vm9, %v4594_v46, %v4596_v48 }
 0x1f9   : > { %7288 = vmatmul.mubr.msk.f32.gmra.mrb[70].mxu1 %vm592_vm14, %v9311_v54  ;;  %4114 = vmatprep.mubr.f32.mxu0 %v10762_v43  ;;  %4610 = vst [vmem:[#allocation2 + $0x8] sm:$0xf0] %v4602_v38  ;;  %v4855_v31 = vld [vmem:[#allocation2 + $0x28] sm:$0xff] }
 0x1fa   : > { %5682 = vrot.lane.b32.xlu1 %v5668_v32, %s7672_s22  ;;  %5680 = vrot.lane.b32.xlu0 %v9294_v10, %s7672_s22 }
 0x1fb   : > { %4221 = vmatprep.mubr.f32.mxu1 %v10762_v43  ;;  %v4600_v41 = vpop.permute.xlu1 %4599  ;;  %v4598_v40 = vpop.permute.xlu0 %4597 }
 0x1fc   : > { %7280 = vmatmul.mubr.msk.f32.gmra.mrb[70].mxu0 %vm592_vm14, %v9311_v54  ;;  %v4603_v56 = vsel %vm310_vm9, %v4596_v48, %v4598_v40  ;;  %v4604_v11 = vsel %vm310_vm9, %v4598_v40, %v4600_v41  ;;  %v6315_v41 = vld [vmem:[%s7719_s20 + $0x80] sm:$0xf]  ;;  %v9415_v40 = vld [vmem:[%s10754_s2 + $0x8] sm:$0xff] }
 0x1fd   : > { %7289 = vmatmul.mubr.msk.f32.gmra.mrb[72].mxu1 %vm592_vm14, %v9334_v57  ;;  %4120 = vmatprep.mubr.f32.mxu0 %v10762_v43  ;;  %4611 = vst [vmem:[#allocation2 + $0x10] sm:$0xf0] %v4603_v56  ;;  %4612 = vst [vmem:[#allocation2 + $0x18] sm:$0xf0] %v4604_v11  ;;  %v4857_v50 = vld [vmem:[#allocation2 + $0x38] sm:$0xff]  ;;  %v4856_v49 = vld [vmem:[#allocation2 + $0x30] sm:$0xff] }
 0x1fe   : > { %6357 = vrot.lane.b32.xlu1 %v9321_v22, %s7671_s21  ;;  %5674 = vrot.lane.b32.xlu0 %v9211_v1, %s7672_s22  ;;  %10874 = vst [vmem:[#allocation12_spill] sm:$0xff] %v9415_v40 }
 0x1ff   : > { %4227 = vmatprep.mubr.f32.mxu1 %v10762_v43  ;;  %v4592_v58 = vpop.permute.xlu1 %4591  ;;  %v4622_v35 = vpop.permute.xlu0 %4621 }
 0x200   : > { %7281 = vmatmul.mubr.msk.f32.gmra.mrb[72].mxu0 %vm592_vm14, %v9334_v57  ;;  %v4601_v59 = vsel %vm310_vm9, %v4592_v58, %v4594_v46  ;;  %v4631_v62 = vsel %vm349_vm5, %v4622_v35, %v9249_v51  ;;  %v4851_v6 = vld [vmem:[#allocation2 + $0x8] sm:$0xff]  ;;  %v6289_v35 = vcombine.low %v9325_v12, %v9325_v12 }
 0x201   : > { %7290 = vmatmul.mubr.msk.f32.gmra.mrb[74].mxu1 %vm592_vm14, %v9359_v42  ;;  %4126 = vmatprep.mubr.f32.mxu0 %v10762_v43  ;;  %4609 = vst [vmem:[#allocation2] sm:$0xf0] %v4601_v59  ;;  %v4639_v47 = vsel %vm7986_vm10, %v4631_v62, 0.0  ;;  %v7454_v4 = vpack.c.bf16 %v4855_v31, %v4851_v6  ;;  %5429 = vst [vmem:[#allocation2 + $0x8] sm:$0xf] %v5425_v15 }
 0x202   : > { %6361 = vrot.lane.b32.xlu1 %v9345_v61, %s7671_s21  ;;  %6359 = vrot.lane.b32.xlu0 %v9325_v12, %s7671_s21  ;;  %4643 = vst [vmem:[#allocation2 + $0x20] sm:$0xf] %v4639_v47 }
 0x203   : > { %4433 = vmatprep.mubr.f32.mxu1 %v10762_v43  ;;  %v4736_v3 = vpop.permute.xlu1 %4735  ;;  %v4734_v16 = vpop.permute.xlu0 %4733  ;;  %7455 = vmatprep.subr.bf16.mxu0 %v7454_v4  ;;  %v7613_v4 = vld [vmem:[%s7719_s20 + $0x80] ss:$0 sps:$4 sm:$0xff]  }
 0x204   : > { %7282 = vmatmul.mubr.msk.f32.gmra.mrb[74].mxu0 %vm592_vm14, %v9359_v42  ;;  %v4742_v63 = vsel %vm462_vm11, %v4734_v16, %v4736_v3  ;;  %v4853_v19 = vld [vmem:[#allocation2 + $0x18] sm:$0xff]  ;;  %v4852_v55 = vld [vmem:[#allocation2 + $0x10] sm:$0xff] }
 0x205   : > { %7297 = vmatmul.mubr.msk.f32.vlgmr.msra.gmra.mrb[76].mxu1 %vm10872_vm15, %v9384_v36  ;;  %4356 = vmatprep.mubr.f32.mxu0 %v10762_v43  ;;  %v4750_v20 = vsel %vm7935_vm6, %v4742_v63, 0.0  ;;  %v7462_v39 = vpack.c.bf16 %v4857_v50, %v4853_v19  ;;  %5431 = vst [vmem:[#allocation2 + $0x18] sm:$0xf] %v5427_v2  ;;  %v7464_v51 = vpack.c.bf16 %v4856_v49, %v4852_v55  ;;  %5430 = vst [vmem:[#allocation2 + $0x10] sm:$0xf] %v5426_v7  ;;  %vm10877_vm15 = vcmask 515072  }
 0x206   : > { %6355 = vrot.lane.b32.xlu1 %v9303_v33, %s7671_s21  ;;  %6363 = vrot.lane.b32.xlu0 %v6349_v53, %s7671_s21  ;;  %v4758_v23 = vrot.slane %v4750_v20, 4 }
 0x207   : > { %4439 = vmatprep.mubr.f32.mxu1 %v10762_v43  ;;  %v4740_v37 = vpop.permute.xlu1 %4739  ;;  %v4738_v27 = vpop.permute.xlu0 %4737  ;;  %7463 = vmatprep.subr.bf16.mxu1 %v7462_v39 }
 0x208   : > { %7293 = vmatmul.mubr.msk.f32.vlgmr.msra.gmra.mrb[76].mxu0 %vm10873_vm4, %v9384_v36  ;;  %4766 = vst [vmem:[#allocation2 + $0x48] sm:$0xf0] %v4758_v23  ;;  %v4743_v28 = vsel %vm462_vm11, %v4736_v3, %v4738_v27  ;;  %v4744_v18 = vsel %vm462_vm11, %v4738_v27, %v4740_v37  ;;  %7465 = vmatpush1.bf16.msra.mxu1 %v7464_v51  ;;  %v4850_v30 = vld [vmem:[#allocation2] sm:$0xff]  ;;  %vm10878_vm4 = vmmov %vm10877_vm15  ;;  %v5628_v23 = vsel %vm7753_vm1, %v9271_v24, 0.0 }
 0x209   : > { %4362 = vmatprep.mubr.f32.mxu0 %v10762_v43  ;;  %v4751_v34 = vsel %vm7941_vm7, %v4743_v28, 0.0  ;;  %v4752_v5 = vsel %vm7960_vm8, %v4744_v18, 0.0  ;;  %v4854_v32 = vld [vmem:[#allocation2 + $0x20] sm:$0xff]  ;;  %5428 = vst [vmem:[#allocation2] sm:$0xf] %v5424_v52  ;;  %7298 = vmatmul.mubr.msk.f32.gmra.mrb[78].mxu1 %vm10875_vm13, %v9415_v40  ;;  %vm10879_vm13 = vmmov %vm10878_vm4  ;;  %v6288_v3 = vcombine.low %v9303_v33, %v9303_v33  ;;  %v5629_v52 = vsel %vm7747_vm0, %v9196_v8, 0.0 }
 0x20a   : > { %6325 = vrot.lane.b32.xlu1 %v9325_v12, %s7672_s22  ;;  %6323 = vrot.lane.b32.xlu0 %v9321_v22, %s7672_s22  ;;  %v4759_v48 = vrot.slane %v4751_v34, 4  ;;  %v4760_v46 = vrot.slane %v4752_v5, 4  ;;  %v7456_v38 = vpack.c.bf16 %v4854_v32, %v4850_v30  ;;  %v6425_v51 = vld [vmem:[%s7719_s20 + $0x80] sm:$0xf]  ;;  %v9470_v8 = vpop.f32.mrb[0].mxu0  ;;  %v9473_v32 = vshrl.u32 %v198_v0, 7 }
 0x20b   : > { %v4704_v56 = vpop.permute.xlu1 %4703  ;;  %v4732_v11 = vpop.permute.xlu0 %4731  ;;  %5047 = vmatprep.mubr.f32.mxu1 %v10762_v43  ;;  %v9464_v28 = vld [vmem:[%s7719_s20 + $0x7c] sm:$0xff]  ;;  %v5627_v0 = vsel %vm7777_vm3, %v9211_v1, 0.0 }
 0x20c   : > { %7294 = vmatmul.mubr.msk.f32.gmra.mrb[78].mxu0 %vm10876_vm12, %v9415_v40  ;;  %4767 = vst [vmem:[#allocation2 + $0x50] sm:$0xf0] %v4759_v48  ;;  %4768 = vst [vmem:[#allocation2 + $0x58] sm:$0xf0] %v4760_v46  ;;  %v4741_v15 = vsel %vm462_vm11, %v4732_v11, %v4734_v16  ;;  %v9475_v48 = vpop.f32.mrb[0].mxu1  ;;  %v5630_v46 = vsel %vm7765_vm2, %v9294_v10, 0.0  ;;  %v9509_v1 = vcombine.high %v9464_v28, %v9464_v28 }
 0x20d   : > { %7457 = vmatpush1.bf16.msra.mxu0 %v7456_v38  ;;  %4946 = vmatprep.mubr.f32.mxu0 %v10762_v43  ;;  %v4749_v58 = vsel %vm7986_vm10, %v4741_v15, 0.0  ;;  %vm10880_vm12 = vmmov %vm10878_vm4  ;;  %v9481_v38 = vld [vmem:[%s7719_s20 + $0x74] sm:$0xff]  ;;  %v9487_v11 = vpop.f32.mrb[1].mxu1  ;;  %v9495_v10 = vsub.s32 0, %v9473_v32 }
 0x20e   : > { %6329 = vrot.lane.b32.xlu1 %v6315_v41, %s7672_s22  ;;  %6327 = vrot.lane.b32.xlu0 %v9345_v61, %s7672_s22  ;;  %v4757_v59 = vrot.slane %v4749_v58, 4  ;;  %10881 = vst [vmem:[#allocation13_spill] sm:$0xff] %v9481_v38 }
 0x20f   : > { %v4708_v62 = vpop.permute.xlu1 %4707  ;;  %v4706_v6 = vpop.permute.xlu0 %4705  ;;  %10882 = vst [vmem:[#allocation14_spill] sm:$0xff] %v9495_v10 }
 0x210   : > { %4765 = vst [vmem:[#allocation2 + $0x40] sm:$0xf0] %v4757_v59  ;;  %v4712_v31 = vsel %vm10877_vm15, %v4704_v56, %v4706_v6  ;;  %v4713_v47 = vsel %vm10878_vm4, %v4706_v6, %v4708_v62  ;;  %v9498_v59 = vsub.s32 4, %v9473_v32  ;;  %vm10886_vm15 = vcmask 523264  }
 0x211   : > { %4720 = vst [vmem:[#allocation2 + $0x48] sm:$0xf] %v4712_v31  ;;  %4721 = vst [vmem:[#allocation2 + $0x50] sm:$0xf] %v4713_v47  ;;  %vm10887_vm4 = vcmask 1043456  }
 0x212   : > { %6295 = vrot.lane.b32.xlu1 %v6289_v35, %s7673_s23  ;;  %6293 = vrot.lane.b32.xlu0 %v9303_v33, %s7673_s23  ;;  %10883 = vst [vmem:[#allocation15_spill] sm:$0xff] %v9498_v59 }
 0x213   : > { %v4797_v53 = vpop.permute.xlu1 %4796  ;;  %v4710_v2 = vpop.permute.xlu0 %4709 }
 0x214   : > { %v4714_v7 = vsel %vm10879_vm13, %v4708_v62, %v4710_v2  ;;  %vm10888_vm13 = vmmov %vm10886_vm15 }
 0x215   : > { %4722 = vst [vmem:[#allocation2 + $0x58] sm:$0xf] %v4714_v7  ;;  %v797_v7 = vpop.f32.mrb[2].mxu1 }
 0x216   : > { %6299 = vrot.lane.b32.xlu1 %v7613_v4, %s7673_s23  ;;  %6297 = vrot.lane.b32.xlu0 %v9325_v12, %s7673_s23  ;;  %v9505_v4 = vcombine.high %v9481_v38, %v9481_v38 }
 0x217   : > { %v4801_v16 = vpop.permute.xlu1 %4800  ;;  %v4799_v50 = vpop.permute.xlu0 %4798 }
 0x218   : > { %v4805_v63 = vsel %vm310_vm9, %v4797_v53, %v4799_v50  ;;  %v4806_v19 = vsel %vm310_vm9, %v4799_v50, %v4801_v16  ;;  %v4859_v30 = vld [vmem:[#allocation2 + $0x48] sm:$0xff] }
 0x219   : > { %4813 = vst [vmem:[#allocation2 + $0x68] sm:$0xf0] %v4805_v63  ;;  %4814 = vst [vmem:[#allocation2 + $0x70] sm:$0xf0] %v4806_v19  ;;  %v4860_v63 = vld [vmem:[#allocation2 + $0x50] sm:$0xff] }
 0x21a   : > { %6291 = vrot.lane.b32.xlu1 %v6288_v3, %s7673_s23  ;;  %6321 = vrot.lane.b32.xlu0 %v9303_v33, %s7672_s22  ;;  %v9527_v19 = vld [vmem:[%s10755_s3] sm:$0x77] }
 0x21b   : > { %v4702_v55 = vpop.permute.xlu1 %4701  ;;  %v4803_v49 = vpop.permute.xlu0 %4802 }
 0x21c   : > { %v4711_v20 = vsel %vm10880_vm12, %v4702_v55, %v4704_v56  ;;  %v4807_v39 = vsel %vm310_vm9, %v4801_v16, %v4803_v49  ;;  %v9485_v56 = vpop.f32.mrb[1].mxu0  ;;  %v4861_v31 = vld [vmem:[#allocation2 + $0x58] sm:$0xff]  ;;  %v833_v55 = vrot.slane %v9527_v19, %v9495_v10  ;;  %vm10889_vm12 = vmmov %vm10888_vm13 }
 0x21d   : > { %4719 = vst [vmem:[#allocation2 + $0x40] sm:$0xf] %v4711_v20  ;;  %4815 = vst [vmem:[#allocation2 + $0x78] sm:$0xf0] %v4807_v39  ;;  %v696_v2 = vpop.f32.mrb[2].mxu0  ;;  %v9531_v20 = vpop.f32.mrb[3].mxu1 }
 0x21e   : > { %6435 = vrot.lane.b32.xlu1 %v9325_v12, %s7674_s24  ;;  %6433 = vrot.lane.b32.xlu0 %v9321_v22, %s7674_s24  ;;  %v698_v49 = vpop.f32.mrb[3].mxu0 }
 0x21f   : > { %v9461_v37 = vpop.permute.xlu1 %4826  ;;  %v4795_v27 = vpop.permute.xlu0 %4794 }
 0x220   : > { %v4804_v18 = vsel %vm310_vm9, %v4795_v27, %v4797_v53  ;;  %v4863_v34 = vld [vmem:[#allocation2 + $0x68] sm:$0xff]  ;;  %v4864_v5 = vld [vmem:[#allocation2 + $0x70] sm:$0xff]  ;;  %v837_v27 = vrot.slane %v9527_v19, %v9498_v59 }
 0x221   : > { %4812 = vst [vmem:[#allocation2 + $0x60] sm:$0xf0] %v4804_v18  ;;  %v7458_v24 = vpack.c.bf16 %v4863_v34, %v4859_v30  ;;  %5632 = vst [vmem:[#allocation2 + $0x68] sm:$0xf] %v5628_v23  ;;  %v9514_v53 = vld [vmem:[%s10755_s3 + $0x50] sm:$0x77]  ;;  %v7468_v39 = vpack.c.bf16 %v4864_v5, %v4860_v63 }
 0x222   : > { %6439 = vrot.lane.b32.xlu1 %v6425_v51, %s7674_s24  ;;  %6437 = vrot.lane.b32.xlu0 %v9345_v61, %s7674_s24  ;;  %5633 = vst [vmem:[#allocation2 + $0x70] sm:$0xf] %v5629_v52  ;;  %v9536_v51 = vld [vmem:[%s10755_s3 + $0x58] sm:$0x77]  ;;  %v9541_v23 = vld [vmem:[%s10755_s3 + $0x8] sm:$0x77]  ;;  %v857_v63 = vrot.slane %v837_v27, %v9495_v10 }
 0x223   : > { %v4831_v15 = vpop.permute.xlu1 %4830  ;;  %v4829_v58 = vpop.permute.xlu0 %4828  ;;  %7459 = vmatprep.subr.bf16.mxu0 %v7458_v24  ;;  %v841_v52 = vrot.slane %v9541_v23, %v9495_v10  ;;  %v845_v18 = vrot.slane %v9541_v23, %v9498_v59  ;;  %v6395_v27 = vld [vmem:[%s7719_s20 + $0x80] sm:$0xf]  ;;  %v7616_v59 = vld [vmem:[%s7719_s20 + $0x84] ss:$0 sps:$4 sm:$0xff]  }
 0x224   : > { %v4835_v62 = vsel %vm349_vm5, %v9461_v37, %v4829_v58  ;;  %v4836_v6 = vsel %vm349_vm5, %v4829_v58, %v4831_v15  ;;  %v4865_v47 = vld [vmem:[#allocation2 + $0x78] sm:$0xff]  ;;  %v9549_v30 = vpop.f32.mrb[4].mxu0  ;;  %v9551_v34 = vpop.f32.mrb[4].mxu1  ;;  %v853_v58 = vrot.slane %v833_v55, %v9495_v10  ;;  %v9607_v41 = vmul.f32 %v857_v63, %v698_v49 }
 0x225   : > { %v4843_v3 = vsel %vm7935_vm6, %v4835_v62, 0.0  ;;  %v4844_v16 = vsel %vm7941_vm7, %v4836_v6, 0.0  ;;  %v7466_v50 = vpack.c.bf16 %v4865_v47, %v4861_v31  ;;  %5634 = vst [vmem:[#allocation2 + $0x78] sm:$0xf] %v5630_v46  ;;  %v9557_v62 = vsub.s32 1, %v9473_v32  ;;  %v704_v55 = vpop.f32.mrb[5].mxu0 }
 0x226   : > { %6403 = vrot.lane.b32.xlu1 %v9321_v22, %s7675_s25  ;;  %6431 = vrot.lane.b32.xlu0 %v9303_v33, %s7674_s24  ;;  %4847 = vst [vmem:[#allocation2 + $0x88] sm:$0xf] %v4843_v3  ;;  %4848 = vst [vmem:[#allocation2 + $0x90] sm:$0xf] %v4844_v16  ;;  %v9560_v6 = vsub.s32 5, %v9473_v32  ;;  %v4858_v3 = vld [vmem:[#allocation2 + $0x40] sm:$0xff] }
 0x227   : > { %v4825_v5 = vpop.permute.xlu1 %4824  ;;  %v4833_v24 = vpop.permute.xlu0 %4832  ;;  %7467 = vmatprep.subr.bf16.mxu1 %v7466_v50  ;;  %10884 = vst [vmem:[#allocation16_spill] sm:$0xff] %v9557_v62  ;;  %v861_v50 = vrot.slane %v841_v52, %v9495_v10 }
 0x228   : > { %10885 = vst [vmem:[#allocation17_spill] sm:$0xff] %v9560_v6  ;;  %v4834_v31 = vsel %vm349_vm5, %v4825_v5, %v9461_v37  ;;  %v4837_v47 = vsel %vm349_vm5, %v4831_v15, %v4833_v24  ;;  %7469 = vmatpush1.bf16.msra.mxu1 %v7468_v39  ;;  %v4862_v16 = vld [vmem:[#allocation2 + $0x60] sm:$0xff]  ;;  %v9567_v35 = vpop.f32.mrb[5].mxu1  ;;  %v708_v39 = vpop.f32.mrb[6].mxu0  ;;  %v9581_v5 = vmul.f32 %v853_v58, %v9470_v8 }
 0x229   : > { %v4842_v46 = vsel %vm7986_vm10, %v4834_v31, 0.0  ;;  %v4845_v43 = vsel %vm7960_vm8, %v4837_v47, 0.0  ;;  %v7460_v37 = vpack.c.bf16 %v4862_v16, %v4858_v3  ;;  %5631 = vst [vmem:[#allocation2 + $0x60] sm:$0xf] %v5627_v0  ;;  %v809_v52 = vpop.f32.mrb[6].mxu1  ;;  %v9584_v24 = vmul.f32 %v861_v50, %v9475_v48  ;;  %v710_v0 = vpop.f32.mrb[7].mxu0 }
 0x22a   : > { %6407 = vrot.lane.b32.xlu1 %v9345_v61, %s7675_s25  ;;  %6405 = vrot.lane.b32.xlu0 %v9325_v12, %s7675_s25  ;;  %4846 = vst [vmem:[#allocation2 + $0x80] sm:$0xf] %v4842_v46  ;;  %4849 = vst [vmem:[#allocation2 + $0x98] sm:$0xf] %v4845_v43  ;;  %v9587_v31 = vmul.f32 %v857_v63, %v9485_v56  ;;  %v865_v47 = vrot.slane %v845_v18, %v9495_v10  ;;  %v9590_v3 = vpop.f32.mrb[7].mxu1 }
 0x22b   : > { %v5510_v16 = vpop.permute.xlu1 %5509  ;;  %v9592_v15 = vpop.permute.xlu0 %5507  ;;  %7461 = vmatpush1.bf16.msra.mxu0 %v7460_v37  ;;  %v9594_v43 = vmul.f32 %v853_v58, %v696_v2  ;;  %v9596_v46 = vmul.f32 %v861_v50, %v797_v7  ;;  %v1049_v8 = vrot.slane %v9527_v19, %v9557_v62  ;;  %v1057_v48 = vrot.slane %v9541_v23, %v9557_v62 }
 0x22c   : > { %v5516_v56 = vsel %vm10886_vm15, %v9592_v15, %v5510_v16  ;;  %v9605_v18 = vmul.f32 %v865_v47, %v9487_v11  ;;  %v1053_v2 = vrot.slane %v9527_v19, %v9560_v6  ;;  %v9611_v58 = vpop.f32.mrb[8].mxu0  ;;  %v9613_v7 = vpop.f32.mrb[8].mxu1  ;;  %v1061_v63 = vrot.slane %v9541_v23, %v9560_v6  ;;  %vm10891_vm15 = vmmov %vm10887_vm4 }
 0x22d   : > { %v5524_v50 = vsel %vm7753_vm1, %v5516_v56, 0.0  ;;  %v4867_v37 = vld [vmem:[#allocation2 + $0x88] sm:$0xf]  ;;  %v1069_v11 = vrot.slane %v1049_v8, %v9557_v62  ;;  %v1077_v49 = vrot.slane %v1057_v48, %v9557_v62  ;;  %v9624_v40 = vpop.f32.mrb[9].mxu0  ;;  %v9628_v56 = vmul.f32 %v865_v47, %v9531_v20  ;;  %v9634_v8 = vpop.f32.mrb[9].mxu1 }
 0x22e   : > { %6496 = vrot.lane.b32.xlu1 %v9481_v38, %s7673_s23  ;;  %6409 = vrot.lane.b32.xlu0 %v6395_v27, %s7675_s25  ;;  %v5532_v36 = vrot.slane %v5524_v50, 4  ;;  %v1073_v42 = vrot.slane %v1053_v2, %v9557_v62  ;;  %v9632_v27 = vsub.s32 2, %v9473_v32  ;;  %v9636_v48 = vpop.f32.mrb[10].mxu0  ;;  %v9644_v20 = vsub.s32 6, %v9473_v32  ;;  %v9653_v61 = vpop.f32.mrb[10].mxu1 }
 0x22f   : > { %7299 = vmatprep.subr.msk.mxu0 %vm10887_vm4, %v4867_v37  ;;  %v5514_v45 = vpop.permute.xlu1 %5513  ;;  %v5512_v6 = vpop.permute.xlu0 %5511  ;;  %v1082_v12 = vmul.f32 %v1069_v11, %v9549_v30  ;;  %v9640_v50 = vmul.f32 %v1077_v49, %v9551_v34  ;;  %v1081_v37 = vrot.slane %v1061_v63, %v9557_v62  ;;  %v9651_v10 = vmul.f32 %v1069_v11, %v708_v39  ;;  %v4868_v63 = vld [vmem:[#allocation2 + $0x90] sm:$0xf] }
 0x230   : > { %5540 = vst [vmem:[#allocation2 + $0x28] sm:$0xf0] %v5532_v36  ;;  %v5517_v47 = vsel %vm10888_vm13, %v5510_v16, %v5512_v6  ;;  %v5518_v2 = vsel %vm10889_vm12, %v5512_v6, %v5514_v45  ;;  %v9649_v57 = vmul.f32 %v1073_v42, %v704_v55  ;;  %v9655_v30 = vpop.f32.mrb[11].mxu0  ;;  %v10890_v45 = vcombine.low %v9464_v28, %v9464_v28  ;;  %vm10892_vm13 = vmmov %vm10887_vm4 }
 0x231   : > { %v5525_v34 = vsel %vm7747_vm0, %v5517_v47, 0.0  ;;  %v5526_v32 = vsel %vm7765_vm2, %v5518_v2, 0.0  ;;  %v4866_v36 = vld [vmem:[#allocation2 + $0x80] sm:$0xf]  ;;  %v4869_v6 = vld [vmem:[#allocation2 + $0x98] sm:$0xf]  ;;  %v9668_v55 = vmul.f32 %v1081_v37, %v9567_v35  ;;  %v9670_v39 = vmul.f32 %v1077_v49, %v809_v52 }
 0x232   : > { %6500 = vrot.lane.b32.xlu1 %v9464_v28, %s7673_s23  ;;  %6498 = vrot.lane.b32.xlu0 %v10890_v45, %s7673_s23  ;;  %v5533_v16 = vrot.slane %v5525_v34, 4  ;;  %v5534_v11 = vrot.slane %v5526_v32, 4  ;;  %v9674_v47 = vmul.f32 %v1073_v42, %v710_v0  ;;  %v1101_v2 = vrot.slane %v9527_v19, %v9632_v27  ;;  %v9678_v45 = vpop.f32.mrb[11].mxu1  ;;  %v958_v62 = vpop.f32.mrb[12].mxu0 }
 0x233   : > { %7300 = vmatpush1.msk.msra.mxu0 %vm10891_vm15, %v4866_v36  ;;  %7307 = vmatprep.subr.msk.mxu1 %vm10887_vm4, %v4869_v6  ;;  %v9680_v13 = vpop.permute.xlu1 %5473  ;;  %v5506_v35 = vpop.permute.xlu0 %5505  ;;  %v1109_v52 = vrot.slane %v9541_v23, %v9632_v27  ;;  %v1105_v42 = vrot.slane %v9527_v19, %v9644_v20  ;;  %v1113_v0 = vrot.slane %v9541_v23, %v9644_v20  ;;  %v10893_v34 = vmov 0.0  }
 0x234   : > { %7308 = vmatpush1.msk.msra.mxu1 %vm10892_vm13, %v4868_v63  ;;  %7301 = vmatmul.mubr.msk.f32.vlgmr.msra.gmra.mrb[80].mxu0 %vm592_vm14, %v9233_v44  ;;  %5541 = vst [vmem:[#allocation2 + $0x30] sm:$0xf0] %v5533_v16  ;;  %5542 = vst [vmem:[#allocation2 + $0x38] sm:$0xf0] %v5534_v11  ;;  %v5515_v49 = vsel %vm10889_vm12, %v5506_v35, %v9592_v15  ;;  %v1121_v32 = vrot.slane %v1101_v2, %v9632_v27  ;;  %v1035_v6 = vpop.f32.mrb[12].mxu1  ;;  %v960_v63 = vpop.f32.mrb[13].mxu0 }
 0x235   : > { %7309 = vmatmul.mubr.msk.f32.vlgmr.msra.gmra.mrb[80].mxu1 %vm592_vm14, %v9233_v44  ;;  %4952 = vmatprep.mubr.f32.mxu0 %v10893_v34  ;;  %v959_v36 = vadd.f32 %v958_v62, %v9581_v5  ;;  %v5523_v19 = vsel %vm7777_vm3, %v5515_v49, 0.0  ;;  %v1129_v23 = vrot.slane %v1109_v52, %v9632_v27  ;;  %v1125_v44 = vrot.slane %v1105_v42, %v9632_v27  ;;  %v1037_v16 = vpop.f32.mrb[13].mxu1  ;;  %v964_v11 = vpop.f32.mrb[14].mxu0 }
 0x236   : > { %6401 = vrot.lane.b32.xlu1 %v9303_v33, %s7675_s25  ;;  %6502 = vrot.lane.b32.xlu0 %v7616_v59, %s7673_s23  ;;  %v9706_v15 = vrot.slane %v1113_v0, %v9632_v27  ;;  %v5531_v62 = vrot.slane %v5523_v19, 4  ;;  %v10894_v5 = vcombine.high %v9514_v53, %v9514_v53  ;;  %vm10895_vm15 = vcmask 1042432   ;;  %v1041_v52 = vpop.f32.mrb[14].mxu1  ;;  %v966_v42 = vpop.f32.mrb[15].mxu0  ;;  %s7373_s25 = sshll.u32 %s10969_s16, 9 }
 0x237   : > { %5053 = vmatprep.mubr.f32.mxu1 %v10893_v34  ;;  %v9714_v2 = vmul.f32 %v1081_v37, %v9590_v3  ;;  %v1134_v59 = vmul.f32 %v1121_v32, %v9611_v58  ;;  %v1090_v35 = vadd.f32 %v1082_v12, %v959_v36  ;;  %v5478_v0 = vpop.permute.xlu1 %5477  ;;  %v5476_v49 = vpop.permute.xlu0 %5475  ;;  %v10896_v19 = vcombine.high %v9536_v51, %v9536_v51  ;;  %vm10897_vm4 = vmmov %vm10895_vm15  ;;  %s9763_s28 = scalar_lea.vmem %s10756_s4, %s7373_s25 }
 0x238   : > { %7315 = vmatprep.subr.msk.mxu0 %vm10895_vm15, %v10894_v5  ;;  %7302 = vmatmul.mubr.msk.f32.gmra.mrb[82].mxu0 %vm592_vm14, %v9259_v29  ;;  %v1136_v5 = vmul.f32 %v1129_v23, %v9613_v7  ;;  %v1135_v3 = vmul.f32 %v1125_v44, %v9624_v40  ;;  %v1138_v58 = vmul.f32 %v1121_v32, %v9636_v48  ;;  %v1043_v7 = vpop.f32.mrb[15].mxu1  ;;  %vm10899_vm13 = vmmov %vm10897_vm4  ;;  %vm10913_vm15 = vcmask 23552  }
 0x239   : > { %7319 = vmatprep.subr.msk.mxu1 %vm10897_vm4, %v10896_v19  ;;  %5539 = vst [vmem:[#allocation2 + $0x20] sm:$0xf0] %v5531_v62  ;;  %v5482_v12 = vsel %vm349_vm5, %v9680_v13, %v5476_v49  ;;  %v5483_v37 = vsel %vm349_vm5, %v5476_v49, %v5478_v0  ;;  %7310 = vmatmul.mubr.msk.f32.gmra.mrb[82].mxu1 %vm592_vm14, %v9259_v29  ;;  %vm10900_vm12 = vmmov %vm10897_vm4 }
 0x23a   : > { %4958 = vmatprep.mubr.f32.mxu0 %v10893_v34  ;;  %v1137_v36 = vmul.f32 %v9706_v15, %v9634_v8  ;;  %v5490_v40 = vsel %vm7935_vm6, %v5482_v12, 0.0  ;;  %v5491_v48 = vsel %vm7941_vm7, %v5483_v37, 0.0  ;;  %6526 = vrot.lane.b32.xlu1 %v9505_v4, %s7672_s22  ;;  %v10898_v29 = vcombine.low %v9481_v38, %v9481_v38  ;;  %vm10914_vm4 = vmmov %vm10913_vm15 }
 0x23b   : > { %v1140_v32 = vmul.f32 %v1129_v23, %v9653_v61  ;;  %v9747_v8 = vmul.f32 %v1125_v44, %v9655_v30  ;;  %5494 = vst [vmem:[#allocation2 + $0x28] sm:$0xf] %v5490_v40  ;;  %5495 = vst [vmem:[#allocation2 + $0x30] sm:$0xf] %v5491_v48  ;;  %5059 = vmatprep.mubr.f32.mxu1 %v10893_v34  ;;  %7316 = vmatpush1.msk.msra.mxu0 %vm10899_vm13, %v9514_v53  ;;  %v9754_v12 = vpop.permute.xlu1 %5443  ;;  %v5480_v37 = vpop.permute.xlu0 %5479 }
 0x23c   : > { %6494 = vrot.lane.b32.xlu0 %v10898_v29, %s7673_s23  ;;  %v1142_v62 = vadd.f32 %v1134_v59, %v1090_v35  ;;  %v1036_v49 = vadd.f32 %v1035_v6, %v9584_v24  ;;  %v961_v19 = vadd.f32 %v960_v63, %v9587_v31  ;;  %7303 = vmatmul.mubr.msk.f32.gmra.mrb[84].mxu0 %vm592_vm14, %v9283_v60  ;;  %v6518_v63 = vld [vmem:[%s7719_s20 + $0x84] sm:$0xf]  ;;  %v1649_v48 = vpop.f32.mrb[16].mxu1  ;;  %vm10916_vm13 = vmmov %vm10914_vm4 }
 0x23d   : > { %7320 = vmatpush1.msk.msra.mxu1 %vm10900_vm12, %v9536_v51  ;;  %v1038_v61 = vadd.f32 %v1037_v16, %v9605_v18  ;;  %v965_v53 = vadd.f32 %v964_v11, %v9594_v43  ;;  %v1042_v24 = vadd.f32 %v1041_v52, %v9596_v46  ;;  %v5484_v31 = vsel %vm349_vm5, %v5478_v0, %v5480_v37  ;;  %vm10918_vm12 = vmmov %vm10914_vm4 }
 0x23e   : > { %7311 = vmatmul.mubr.msk.f32.gmra.mrb[84].mxu1 %vm592_vm14, %v9283_v60  ;;  %4964 = vmatprep.mubr.f32.mxu0 %v10893_v34  ;;  %v1150_v51 = vmax.f32 %v1142_v62, 0.0  ;;  %v1092_v30 = vadd.f32 %v9640_v50, %v1036_v49  ;;  %v1091_v6 = vadd.f32 %v9649_v57, %v961_v19  ;;  %v5492_v18 = vsel %vm7960_vm8, %v5484_v31, 0.0  ;;  %v10903_v62 = vld [vmem:[#allocation8_spill] sm:$0xff]  ;;  %v9824_v49 = vld [vmem:[%s10755_s3 + $0x60] sm:$0x77] }
 0x23f   : > { %6530 = vrot.lane.b32.xlu1 %v9509_v1, %s7672_s22  ;;  %v1093_v43 = vadd.f32 %v9668_v55, %v1038_v61  ;;  %v1094_v60 = vadd.f32 %v9651_v10, %v965_v53  ;;  %v1096_v46 = vadd.f32 %v9670_v39, %v1042_v24  ;;  %5496 = vst [vmem:[#allocation2 + $0x38] sm:$0xf] %v5492_v18  ;;  %v5448_v16 = vpop.permute.xlu1 %5447  ;;  %v5446_v11 = vpop.permute.xlu0 %5445  ;;  %v9833_v19 = vld [vmem:[%s10755_s3 + $0x18] sm:$0x77]  ;;  %v10905_v61 = vld [vmem:[#allocation15_spill] sm:$0xff] }
 0x240   : > { %6528 = vrot.lane.b32.xlu0 %v9464_v28, %s7672_s22  ;;  %5065 = vmatprep.mubr.f32.mxu1 %v10893_v34  ;;  %1158 = vst [vmem:[%s9763_s28] sm:$0xff] %v1150_v51  ;;  %v1144_v57 = vadd.f32 %v1136_v5, %v1092_v30  ;;  %v1143_v50 = vadd.f32 %v1135_v3, %v1091_v6  ;;  %v10901_v5 = vld [vmem:[#allocation9_spill] sm:$0xff] }
 0x241   : > { %v967_v23 = vadd.f32 %v966_v42, %v9607_v41  ;;  %v1044_v44 = vadd.f32 %v1043_v7, %v9628_v56  ;;  %7304 = vmatmul.mubr.msk.f32.gmra.mrb[86].mxu0 %vm592_vm14, %v9311_v54  ;;  %v1141_v10 = vmul.f32 %v9706_v15, %v9678_v45  ;;  %v1145_v55 = vadd.f32 %v1137_v36, %v1093_v43  ;;  %v1548_v36 = vpop.f32.mrb[16].mxu0  ;;  %v10902_v7 = vld [vmem:[#allocation14_spill] sm:$0xff] }
 0x242   : > { %v1146_v39 = vadd.f32 %v1138_v58, %v1094_v60  ;;  %v1148_v59 = vadd.f32 %v1140_v32, %v1096_v46  ;;  %v5452_v35 = vsel %vm310_vm9, %v9754_v12, %v5446_v11  ;;  %v5453_v52 = vsel %vm310_vm9, %v5446_v11, %v5448_v16  ;;  %7312 = vmatmul.mubr.msk.f32.gmra.mrb[86].mxu1 %vm592_vm14, %v9311_v54  ;;  %v1550_v43 = vpop.f32.mrb[17].mxu0  ;;  %v1651_v60 = vpop.f32.mrb[17].mxu1 }
 0x243   : > { %4970 = vmatprep.mubr.f32.mxu0 %v10893_v34  ;;  %v1152_v41 = vmax.f32 %v1144_v57, 0.0  ;;  %v1151_v56 = vmax.f32 %v1143_v50, 0.0  ;;  %5460 = vst [vmem:[#allocation2 + $0x8] sm:$0xf0] %v5452_v35  ;;  %5461 = vst [vmem:[#allocation2 + $0x10] sm:$0xf0] %v5453_v52  ;;  %6524 = vrot.lane.b32.xlu1 %v9481_v38, %s7672_s22  ;;  %v1095_v0 = vadd.f32 %v9674_v47, %v967_v23  ;;  %v5472_v29 = vpop.permute.xlu1 %5471  ;;  %v5450_v32 = vpop.permute.xlu0 %5449 }
 0x244   : > { %6532 = vrot.lane.b32.xlu0 %v6518_v63, %s7672_s22  ;;  %v1153_v45 = vmax.f32 %v1145_v55, 0.0  ;;  %v1154_v15 = vmax.f32 %v1146_v39, 0.0  ;;  %v1156_v42 = vmax.f32 %v1148_v59, 0.0  ;;  %5071 = vmatprep.mubr.f32.mxu1 %v10893_v34  ;;  %v6275_v54 = vsel %vm7753_vm1, %v9321_v22, 0.0  ;;  %v9815_v47 = vld [vmem:[%s10755_s3 + $0x10] sm:$0x77] }
 0x245   : > { %v6277_v3 = vsel %vm7765_vm2, %v10901_v5, 0.0  ;;  %1160 = vst [vmem:[%s9763_s28 + $0x10] sm:$0xff] %v1152_v41  ;;  %1159 = vst [vmem:[%s9763_s28 + $0x8] sm:$0xff] %v1151_v56  ;;  %v1097_v58 = vadd.f32 %v9714_v2, %v1044_v44  ;;  %v1691_v40 = vrot.slane %v9815_v47, %v10902_v7  ;;  %7305 = vmatmul.mubr.msk.f32.gmra.mrb[88].mxu0 %vm592_vm14, %v10903_v62  ;;  %v1554_v23 = vpop.f32.mrb[18].mxu0  ;;  %v1655_v44 = vpop.f32.mrb[18].mxu1  ;;  %v5705_v41 = vld [vmem:[#allocation2 + $0x28] sm:$0xff] }
 0x246   : > { %10904 = vst [vmem:[#allocation9_spill] sm:$0xff] %v9824_v49  ;;  %1161 = vst [vmem:[%s9763_s28 + $0x18] sm:$0xff] %v1153_v45  ;;  %v1147_v2 = vadd.f32 %v9747_v8, %v1095_v0  ;;  %v1699_v37 = vrot.slane %v9833_v19, %v10902_v7  ;;  %v1695_v53 = vrot.slane %v9815_v47, %v10905_v61  ;;  %7313 = vmatmul.mubr.msk.f32.gmra.mrb[88].mxu1 %vm592_vm14, %v10903_v62  ;;  %v10906_v8 = vld [vmem:[#allocation7_spill] sm:$0xff]  ;;  %v1556_v39 = vpop.f32.mrb[19].mxu0  ;;  %v1657_v59 = vpop.f32.mrb[19].mxu1  ;;  %v10909_v56 = vld [vmem:[#allocation10_spill] sm:$0xff] }
 0x247   : > { %1162 = vst [vmem:[%s9763_s28 + $0x100] sm:$0xff] %v1154_v15  ;;  %1164 = vst [vmem:[%s9763_s28 + $0x110] sm:$0xff] %v1156_v42  ;;  %v1703_v24 = vrot.slane %v9833_v19, %v10905_v61  ;;  %v5481_v31 = vsel %vm349_vm5, %v5472_v29, %v9680_v13  ;;  %v5454_v51 = vsel %vm310_vm9, %v5448_v16, %v5450_v32  ;;  %4976 = vmatprep.mubr.f32.mxu0 %v10893_v34  ;;  %v9859_v35 = vpop.permute.xlu1 %5583  ;;  %v5442_v52 = vpop.permute.xlu0 %5441  ;;  %v10910_v0 = vld [vmem:[#allocation16_spill] sm:$0xff]  ;;  %v9878_v62 = vld [vmem:[#allocation2 + $0x30] sm:$0xff] }
 0x248   : > { %v6276_v6 = vsel %vm7747_vm0, %v10906_v8, 0.0  ;;  %v1149_v18 = vadd.f32 %v1141_v10, %v1097_v58  ;;  %v5489_v63 = vsel %vm7986_vm10, %v5481_v31, 0.0  ;;  %5462 = vst [vmem:[#allocation2 + $0x18] sm:$0xf0] %v5454_v51  ;;  %5077 = vmatprep.mubr.f32.mxu1 %v10893_v34  ;;  %v1155_v13 = vmax.f32 %v1147_v2, 0.0 }
 0x249   : > { %v1711_v57 = vrot.slane %v1691_v40, %v10902_v7  ;;  %v1719_v50 = vrot.slane %v1699_v37, %v10902_v7  ;;  %5493 = vst [vmem:[#allocation2 + $0x20] sm:$0xf] %v5489_v63  ;;  %v1715_v10 = vrot.slane %v1695_v53, %v10902_v7  ;;  %v1723_v55 = vrot.slane %v1703_v24, %v10902_v7  ;;  %v1661_v37 = vpop.f32.mrb[20].mxu1 }
 0x24a   : > { %v1157_v11 = vmax.f32 %v1149_v18, 0.0  ;;  %7306 = vmatmul.mubr.msk.f32.gmra.mrb[90].mxu0 %vm592_vm14, %v10909_v56  ;;  %1163 = vst [vmem:[%s9763_s28 + $0x108] sm:$0xff] %v1155_v13  ;;  %v1899_v58 = vrot.slane %v9815_v47, %v10910_v0  ;;  %v5451_v40 = vsel %vm310_vm9, %v5442_v52, %v9754_v12  ;;  %v5701_v29 = vld [vmem:[#allocation2 + $0x8] sm:$0xff]  ;;  %7314 = vmatmul.mubr.msk.f32.gmra.mrb[90].mxu1 %vm592_vm14, %v10909_v56  ;;  %v9876_v32 = vld [vmem:[#allocation2 + $0x10] sm:$0xff]  ;;  %v1560_v12 = vpop.f32.mrb[20].mxu0  ;;  %v9902_v18 = vpop.f32.mrb[21].mxu1 }
 0x24b   : > { %v9864_v45 = vmul.f32 %v1711_v57, %v1548_v36  ;;  %v9866_v15 = vmul.f32 %v1719_v50, %v1649_v48  ;;  %v9868_v42 = vmul.f32 %v1711_v57, %v1554_v23  ;;  %5206 = vmatprep.mubr.f32.mxu0 %v10893_v34  ;;  %v9885_v48 = vmul.f32 %v1715_v10, %v1550_v43  ;;  %v9900_v8 = vpop.f32.mrb[21].mxu0  ;;  %v5588_v57 = vpop.permute.xlu1 %5587  ;;  %v10912_v23 = vld [vmem:[#allocation11_spill] sm:$0xff] }
 0x24c   : > { %1165 = vst [vmem:[%s9763_s28 + $0x118] sm:$0xff] %v1157_v11  ;;  %v9887_v2 = vmul.f32 %v1719_v50, %v1655_v44  ;;  %5459 = vst [vmem:[#allocation2] sm:$0xf0] %v5451_v40  ;;  %v7470_v53 = vpack.c.bf16 %v5705_v41, %v5701_v29  ;;  %5283 = vmatprep.mubr.f32.mxu1 %v10893_v34  ;;  %v7480_v24 = vpack.c.bf16 %v9878_v62, %v9876_v32  ;;  %v5586_v50 = vpop.permute.xlu0 %5585  ;;  %v5707_v41 = vld [vmem:[#allocation2 + $0x38] sm:$0xff] }
 0x24d   : > { %6279 = vst [vmem:[#allocation2 + $0x8] sm:$0xf] %v6275_v54  ;;  %6280 = vst [vmem:[#allocation2 + $0x10] sm:$0xf] %v6276_v6  ;;  %v9896_v31 = vmul.f32 %v1723_v55, %v1651_v60  ;;  %v9898_v51 = vmul.f32 %v1715_v10, %v1556_v39  ;;  %v9904_v43 = vmul.f32 %v1723_v55, %v1657_v59  ;;  %v10911_v54 = vld [vmem:[#allocation17_spill] sm:$0xff]  ;;  %v1566_v6 = vpop.f32.mrb[22].mxu0 }
 0x24e   : > { %v1907_v22 = vrot.slane %v9833_v19, %v10910_v0  ;;  %v1903_v63 = vrot.slane %v9815_v47, %v10911_v54  ;;  %v1911_v13 = vrot.slane %v9833_v19, %v10911_v54  ;;  %v1667_v60 = vpop.f32.mrb[22].mxu1  ;;  %7471 = vmatprep.subr.bf16.mxu0 %v7470_v53  ;;  %7317 = vmatmul.mubr.msk.f32.vlgmr.msra.gmra.mrb[92].mxu0 %vm10913_vm15, %v10912_v23  ;;  %vm10921_vm15 = vcmask 515072  }
 0x24f   : > { %v1919_v11 = vrot.slane %v1899_v58, %v10910_v0  ;;  %v5592_v39 = vsel %vm462_vm11, %v9859_v35, %v5586_v50  ;;  %v5593_v59 = vsel %vm462_vm11, %v5586_v50, %v5588_v57  ;;  %v5703_v52 = vld [vmem:[#allocation2 + $0x18] sm:$0xff]  ;;  %7321 = vmatmul.mubr.msk.f32.vlgmr.msra.gmra.mrb[92].mxu1 %vm10914_vm4, %v10912_v23  ;;  %5212 = vmatprep.mubr.f32.mxu0 %v10893_v34  ;;  %v1568_v58 = vpop.f32.mrb[23].mxu0  ;;  %v1669_v40 = vpop.f32.mrb[23].mxu1  ;;  %vm10922_vm4 = vmmov %vm10921_vm15 }
 0x250   : > { %v1955_v29 = vrot.slane %v9815_v47, %v9644_v20  ;;  %v5600_v32 = vsel %vm7935_vm6, %v5592_v39, 0.0  ;;  %v5601_v62 = vsel %vm7941_vm7, %v5593_v59, 0.0  ;;  %v7478_v53 = vpack.c.bf16 %v5707_v41, %v5703_v52  ;;  %6281 = vst [vmem:[#allocation2 + $0x18] sm:$0xf] %v6277_v3  ;;  %5289 = vmatprep.mubr.f32.mxu1 %v10893_v34  ;;  %v1572_v23 = vpop.f32.mrb[24].mxu0  ;;  %v1673_v16 = vpop.f32.mrb[24].mxu1 }
 0x251   : > { %v1927_v50 = vrot.slane %v1907_v22, %v10910_v0  ;;  %v5608_v56 = vrot.slane %v5600_v32, 4  ;;  %v5609_v44 = vrot.slane %v5601_v62, 4  ;;  %v1923_v55 = vrot.slane %v1903_v63, %v10910_v0  ;;  %v1574_v10 = vpop.f32.mrb[25].mxu0  ;;  %v9945_v59 = vpop.f32.mrb[25].mxu1  ;;  %v10915_v3 = vld [vmem:[#allocation12_spill] sm:$0xff]  ;;  %v5704_v36 = vld [vmem:[#allocation2 + $0x20] sm:$0xff] }
 0x252   : > { %v1931_v39 = vrot.slane %v1911_v13, %v10910_v0  ;;  %v5582_v52 = vpop.permute.xlu1 %5581  ;;  %v5590_v41 = vpop.permute.xlu0 %5589  ;;  %7479 = vmatprep.subr.bf16.mxu1 %v7478_v53  ;;  %7318 = vmatmul.mubr.msk.f32.gmra.mrb[94].mxu0 %vm10916_vm13, %v10915_v3  ;;  %v1932_v22 = vmul.f32 %v1919_v11, %v1560_v12  ;;  %v9952_v62 = vmul.f32 %v1919_v11, %v1566_v6  ;;  %vm10923_vm13 = vmmov %vm10922_vm4 }
 0x253   : > { %v1934_v32 = vmul.f32 %v1927_v50, %v1661_v37  ;;  %5616 = vst [vmem:[#allocation2 + $0x48] sm:$0xf0] %v5608_v56  ;;  %5617 = vst [vmem:[#allocation2 + $0x50] sm:$0xf0] %v5609_v44  ;;  %v5591_v63 = vsel %vm462_vm11, %v5582_v52, %v9859_v35  ;;  %v5594_v13 = vsel %vm462_vm11, %v5588_v57, %v5590_v41  ;;  %7481 = vmatpush1.bf16.msra.mxu1 %v7480_v24  ;;  %v5700_v53 = vld [vmem:[#allocation2] sm:$0xff]  ;;  %v1578_v37 = vpop.f32.mrb[26].mxu0 }
 0x254   : > { %5796 = vmatprep.mubr.f32.mxu0 %v10893_v34  ;;  %v9961_v12 = vmul.f32 %v1927_v50, %v1667_v60  ;;  %v1679_v6 = vpop.f32.mrb[26].mxu1  ;;  %v5599_v44 = vsel %vm7986_vm10, %v5591_v63, 0.0  ;;  %v5602_v35 = vsel %vm7960_vm8, %v5594_v13, 0.0  ;;  %v7472_v57 = vpack.c.bf16 %v5704_v36, %v5700_v53  ;;  %7322 = vmatmul.mubr.msk.f32.gmra.mrb[94].mxu1 %vm10918_vm12, %v10915_v3  ;;  %v1580_v11 = vpop.f32.mrb[27].mxu0  ;;  %vm10924_vm12 = vmmov %vm10922_vm4 }
 0x255   : > { %v10917_v24 = vsel %vm7777_vm3, %v9303_v33, 0.0  ;;  %v1933_v60 = vmul.f32 %v1923_v55, %v9900_v8  ;;  %v1681_v56 = vpop.f32.mrb[27].mxu1  ;;  %v5607_v50 = vrot.slane %v5599_v44, 4  ;;  %v5610_v52 = vrot.slane %v5602_v35, 4  ;;  %5897 = vmatprep.mubr.f32.mxu1 %v10893_v34  ;;  %v1808_v36 = vpop.f32.mrb[28].mxu0 }
 0x256   : > { %6278 = vst [vmem:[#allocation2] sm:$0xf] %v10917_v24  ;;  %v1935_v41 = vmul.f32 %v1931_v39, %v9902_v18  ;;  %v1937_v63 = vmul.f32 %v1923_v55, %v1568_v58  ;;  %v1885_v13 = vpop.f32.mrb[28].mxu1  ;;  %v5556_v53 = vpop.permute.xlu1 %5555  ;;  %7473 = vmatpush1.bf16.msra.mxu0 %v7472_v57  ;;  %v10919_v33 = vrot.slane %v9815_v47, %v9632_v27 }
 0x257   : > { %v9976_v5 = vpop.permute.xlu0 %5553  ;;  %v10920_v3 = vrot.slane %v9833_v19, %v9632_v27  ;;  %v1975_v35 = vrot.slane %v1955_v29, %v9632_v27  ;;  %v1963_v18 = vrot.slane %v9833_v19, %v9644_v20  ;;  %5615 = vst [vmem:[#allocation2 + $0x40] sm:$0xf0] %v5607_v50  ;;  %5618 = vst [vmem:[#allocation2 + $0x58] sm:$0xf0] %v5610_v52  ;;  %v1810_v24 = vpop.f32.mrb[29].mxu0 }
 0x258   : > { %v1971_v8 = vrot.slane %v10919_v33, %v9632_v27  ;;  %v5562_v55 = vsel %vm10921_vm15, %v9976_v5, %v5556_v53  ;;  %v1939_v58 = vmul.f32 %v1931_v39, %v1669_v40  ;;  %v1809_v57 = vadd.f32 %v1808_v36, %v9864_v45  ;;  %v1887_v33 = vpop.f32.mrb[29].mxu1  ;;  %v1814_v46 = vpop.f32.mrb[30].mxu0 }
 0x259   : > { %v1979_v44 = vrot.slane %v10920_v3, %v9632_v27  ;;  %v1886_v47 = vadd.f32 %v1885_v13, %v9866_v15  ;;  %5570 = vst [vmem:[#allocation2 + $0x48] sm:$0xf] %v5562_v55  ;;  %v1985_v34 = vmul.f32 %v1975_v35, %v1574_v10  ;;  %v1983_v29 = vrot.slane %v1963_v18, %v9632_v27  ;;  %v1891_v19 = vpop.f32.mrb[30].mxu1  ;;  %v1816_v9 = vpop.f32.mrb[31].mxu0 }
 0x25a   : > { %v1984_v49 = vmul.f32 %v1971_v8, %v1572_v23  ;;  %v1988_v50 = vmul.f32 %v1971_v8, %v1578_v37  ;;  %v1989_v38 = vmul.f32 %v1975_v35, %v1580_v11  ;;  %v1940_v21 = vadd.f32 %v1932_v22, %v1809_v57  ;;  %v1893_v40 = vpop.f32.mrb[31].mxu1  ;;  %v5560_v39 = vpop.permute.xlu1 %5559 }
 0x25b   : > { %v1986_v3 = vmul.f32 %v1979_v44, %v1673_v16  ;;  %v1990_v52 = vmul.f32 %v1979_v44, %v1679_v6  ;;  %v5558_v45 = vpop.permute.xlu0 %5557  ;;  %v1987_v15 = vmul.f32 %v1983_v29, %v9945_v59  ;;  %v1991_v36 = vmul.f32 %v1983_v29, %v1681_v56 }
 0x25c   : > { %v1942_v13 = vadd.f32 %v1934_v32, %v1886_v47  ;;  %v1811_v23 = vadd.f32 %v1810_v24, %v9885_v48  ;;  %v5563_v16 = vsel %vm10922_vm4, %v5556_v53, %v5558_v45  ;;  %v5564_v10 = vsel %vm10923_vm13, %v5558_v45, %v5560_v39 }
 0x25d   : > { %v1992_v18 = vadd.f32 %v1984_v49, %v1940_v21  ;;  %v1888_v37 = vadd.f32 %v1887_v33, %v9896_v31  ;;  %5571 = vst [vmem:[#allocation2 + $0x50] sm:$0xf] %v5563_v16  ;;  %5572 = vst [vmem:[#allocation2 + $0x58] sm:$0xf] %v5564_v10  ;;  %v1815_v11 = vadd.f32 %v1814_v46, %v9868_v42  ;;  %v10026_v33 = vld [vmem:[%s10755_s3 + $0x28] sm:$0x77] }
 0x25e   : > { %v1994_v22 = vadd.f32 %v1986_v3, %v1942_v13  ;;  %v1941_v6 = vadd.f32 %v1933_v60, %v1811_v23  ;;  %v1892_v59 = vadd.f32 %v1891_v19, %v9887_v2  ;;  %v1817_v48 = vadd.f32 %v1816_v9, %v9898_v51  ;;  %v5649_v8 = vpop.permute.xlu1 %5648  ;;  %v2398_v9 = vpop.f32.mrb[32].mxu0 }
 0x25f   : > { %v2000_v56 = vmax.f32 %v1992_v18, 0.0  ;;  %v1943_v32 = vadd.f32 %v1935_v41, %v1888_v37  ;;  %v1894_v53 = vadd.f32 %v1893_v40, %v9904_v43  ;;  %v10003_v21 = vpop.permute.xlu0 %5646  ;;  %v1944_v44 = vadd.f32 %v9952_v62, %v1815_v11  ;;  %v2499_v51 = vpop.f32.mrb[32].mxu1 }
 0x260   : > { %v2002_v49 = vmax.f32 %v1994_v22, 0.0  ;;  %v1993_v31 = vadd.f32 %v1985_v34, %v1941_v6  ;;  %v1946_v60 = vadd.f32 %v9961_v12, %v1892_v59  ;;  %v5655_v46 = vsel %vm310_vm9, %v10003_v21, %v5649_v8  ;;  %v10014_v34 = vld [vmem:[%s10755_s3 + $0x20] sm:$0x77]  ;;  %v2400_v12 = vpop.f32.mrb[33].mxu0  ;;  %v2501_v57 = vpop.f32.mrb[33].mxu1 }
 0x261   : > { %2008 = vst [vmem:[%s9763_s28 + $0x20] sm:$0xff] %v2000_v56  ;;  %v1995_v42 = vadd.f32 %v1987_v15, %v1943_v32  ;;  %v1945_v2 = vadd.f32 %v1937_v63, %v1817_v48  ;;  %v1947_v41 = vadd.f32 %v1939_v58, %v1894_v53  ;;  %5663 = vst [vmem:[#allocation2 + $0x68] sm:$0xf0] %v5655_v46  ;;  %v10021_v63 = vld [vmem:[%s10755_s3 + $0x68] sm:$0x77]  ;;  %v2404_v29 = vpop.f32.mrb[34].mxu0 }
 0x262   : > { %2010 = vst [vmem:[%s9763_s28 + $0x30] sm:$0xff] %v2002_v49  ;;  %v2001_v43 = vmax.f32 %v1993_v31, 0.0  ;;  %v1996_v35 = vadd.f32 %v1988_v50, %v1944_v44  ;;  %v1998_v55 = vadd.f32 %v1990_v52, %v1946_v60  ;;  %v2541_v62 = vrot.slane %v10014_v34, %v10902_v7  ;;  %v2505_v19 = vpop.f32.mrb[34].mxu1  ;;  %v5653_v50 = vpop.permute.xlu1 %5652 }
 0x263   : > { %v2003_v58 = vmax.f32 %v1995_v42, 0.0  ;;  %v1997_v47 = vadd.f32 %v1989_v38, %v1945_v2  ;;  %v1999_v24 = vadd.f32 %v1991_v36, %v1947_v41  ;;  %v2549_v3 = vrot.slane %v10026_v33, %v10902_v7  ;;  %v5651_v52 = vpop.permute.xlu0 %5650  ;;  %v2406_v16 = vpop.f32.mrb[35].mxu0 }
 0x264   : > { %2009 = vst [vmem:[%s9763_s28 + $0x28] sm:$0xff] %v2001_v43  ;;  %v2004_v40 = vmax.f32 %v1996_v35, 0.0  ;;  %v2006_v39 = vmax.f32 %v1998_v55, 0.0  ;;  %v2561_v38 = vrot.slane %v2541_v62, %v10902_v7  ;;  %v2545_v45 = vrot.slane %v10014_v34, %v10905_v61  ;;  %v2507_v10 = vpop.f32.mrb[35].mxu1  ;;  %v2410_v11 = vpop.f32.mrb[36].mxu0  ;;  %v5709_v43 = vld [vmem:[#allocation2 + $0x48] sm:$0xff] }
 0x265   : > { %v5656_v15 = vsel %vm310_vm9, %v5649_v8, %v5651_v52  ;;  %v5657_v36 = vsel %vm310_vm9, %v5651_v52, %v5653_v50  ;;  %2011 = vst [vmem:[%s9763_s28 + $0x38] sm:$0xff] %v2003_v58  ;;  %v2005_v13 = vmax.f32 %v1997_v47, 0.0  ;;  %v2007_v23 = vmax.f32 %v1999_v24, 0.0  ;;  %v2511_v59 = vpop.f32.mrb[36].mxu1  ;;  %v2412_v53 = vpop.f32.mrb[37].mxu0 }
 0x266   : > { %5664 = vst [vmem:[#allocation2 + $0x70] sm:$0xf0] %v5656_v15  ;;  %5665 = vst [vmem:[#allocation2 + $0x78] sm:$0xf0] %v5657_v36  ;;  %v5983_v18 = vcombine.high %v10021_v63, %v10021_v63  ;;  %v2569_v37 = vrot.slane %v2549_v3, %v10902_v7  ;;  %v2565_v22 = vrot.slane %v2545_v45, %v10902_v7  ;;  %v2513_v49 = vpop.f32.mrb[37].mxu1  ;;  %v5645_v31 = vpop.permute.xlu1 %5644  ;;  %v10925_v47 = vsel %vm7753_vm1, %v9505_v4, 0.0 }
 0x267   : > { %2012 = vst [vmem:[%s9763_s28 + $0x120] sm:$0xff] %v2004_v40  ;;  %2014 = vst [vmem:[%s9763_s28 + $0x130] sm:$0xff] %v2006_v39  ;;  %v2553_v6 = vrot.slane %v10026_v33, %v10905_v61  ;;  %v10047_v56 = vmul.f32 %v2561_v38, %v2398_v9  ;;  %v2749_v32 = vrot.slane %v10014_v34, %v10910_v0  ;;  %v5552_v44 = vpop.permute.xlu0 %5551  ;;  %v2517_v58 = vpop.f32.mrb[38].mxu1  ;;  %v5711_v45 = vld [vmem:[#allocation2 + $0x58] sm:$0xff]  ;;  %vm10933_vm15 = vcmask 1043456  }
 0x268   : > { %2013 = vst [vmem:[%s9763_s28 + $0x128] sm:$0xff] %v2005_v13  ;;  %2015 = vst [vmem:[%s9763_s28 + $0x138] sm:$0xff] %v2007_v23  ;;  %v2757_v48 = vrot.slane %v10026_v33, %v10910_v0  ;;  %v2753_v8 = vrot.slane %v10014_v34, %v10911_v54  ;;  %v10055_v60 = vmul.f32 %v2569_v37, %v2499_v51  ;;  %v5713_v35 = vld [vmem:[#allocation2 + $0x68] sm:$0xff]  ;;  %v2416_v51 = vpop.f32.mrb[38].mxu0  ;;  %vm10934_vm4 = vcmask 523264  }
 0x269   : > { %v10057_v46 = vmul.f32 %v2565_v22, %v2400_v12  ;;  %v2573_v42 = vrot.slane %v2553_v6, %v10902_v7  ;;  %v10060_v2 = vmul.f32 %v2561_v38, %v2404_v29  ;;  %v5654_v41 = vsel %vm310_vm9, %v5645_v31, %v10003_v21  ;;  %6482 = vst [vmem:[#allocation2 + $0x68] sm:$0xf] %v10925_v47  ;;  %v2418_v3 = vpop.f32.mrb[39].mxu0  ;;  %v2519_v29 = vpop.f32.mrb[39].mxu1  ;;  %vm10935_vm13 = vmmov %vm10934_vm4 }
 0x26a   : > { %v5561_v9 = vsel %vm10924_vm12, %v5552_v44, %v9976_v5  ;;  %v10066_v55 = vmul.f32 %v2569_v37, %v2505_v19  ;;  %v2769_v62 = vrot.slane %v2749_v32, %v10910_v0  ;;  %5662 = vst [vmem:[#allocation2 + $0x60] sm:$0xf0] %v5654_v41  ;;  %v7474_v12 = vpack.c.bf16 %v5713_v35, %v5709_v43  ;;  %v2422_v39 = vpop.f32.mrb[40].mxu0  ;;  %v2523_v4 = vpop.f32.mrb[40].mxu1  ;;  %v5710_v37 = vld [vmem:[#allocation2 + $0x50] sm:$0xff]  ;;  %vm10936_vm12 = vmmov %vm10933_vm15 }
 0x26b   : > { %5569 = vst [vmem:[#allocation2 + $0x40] sm:$0xf] %v5561_v9  ;;  %v10073_v21 = vmul.f32 %v2573_v42, %v2501_v57  ;;  %v10075_v24 = vmul.f32 %v2565_v22, %v2406_v16  ;;  %v2777_v5 = vrot.slane %v2757_v48, %v10910_v0  ;;  %v10078_v19 = vmul.f32 %v2573_v42, %v2507_v10  ;;  %v5679_v38 = vpop.permute.xlu1 %5678  ;;  %v10085_v57 = vpop.permute.xlu0 %5676 }
 0x26c   : > { %v10080_v50 = vmul.f32 %v2769_v62, %v2410_v11  ;;  %v2773_v52 = vrot.slane %v2753_v8, %v10910_v0  ;;  %v2761_v40 = vrot.slane %v10026_v33, %v10911_v54  ;;  %7475 = vmatprep.subr.bf16.mxu0 %v7474_v12  ;;  %v10089_v36 = vmul.f32 %v2769_v62, %v2416_v51  ;;  %v2424_v32 = vpop.f32.mrb[41].mxu0  ;;  %v2525_v48 = vpop.f32.mrb[41].mxu1 }
 0x26d   : > { %v10087_v15 = vmul.f32 %v2777_v5, %v2511_v59  ;;  %v2801_v13 = vrot.slane %v10014_v34, %v9632_v27  ;;  %v2809_v23 = vrot.slane %v10026_v33, %v9632_v27  ;;  %v5685_v16 = vsel %vm349_vm5, %v10085_v57, %v5679_v38  ;;  %v5715_v10 = vld [vmem:[#allocation2 + $0x78] sm:$0xff]  ;;  %v5714_v22 = vld [vmem:[#allocation2 + $0x70] sm:$0xff]  ;;  %v2428_v9 = vpop.f32.mrb[42].mxu0  ;;  %v2529_v43 = vpop.f32.mrb[42].mxu1 }
 0x26e   : > { %v10097_v6 = vmul.f32 %v2773_v52, %v2412_v53  ;;  %v2781_v11 = vrot.slane %v2761_v40, %v10910_v0  ;;  %v10100_v59 = vmul.f32 %v2777_v5, %v2517_v58  ;;  %v5693_v8 = vsel %vm7935_vm6, %v5685_v16, 0.0  ;;  %v2430_v58 = vpop.f32.mrb[43].mxu0  ;;  %v2531_v12 = vpop.f32.mrb[43].mxu1 }
 0x26f   : > { %v7482_v31 = vpack.c.bf16 %v5715_v10, %v5711_v45  ;;  %v10926_v44 = vsel %vm7765_vm2, %v9509_v1, 0.0  ;;  %v7484_v42 = vpack.c.bf16 %v5714_v22, %v5710_v37  ;;  %v10927_v53 = vsel %vm7747_vm0, %v9464_v28, 0.0  ;;  %5697 = vst [vmem:[#allocation2 + $0x88] sm:$0xf] %v5693_v8  ;;  %v5683_v47 = vpop.permute.xlu1 %5682  ;;  %v5681_v5 = vpop.permute.xlu0 %5680 }
 0x270   : > { %6484 = vst [vmem:[#allocation2 + $0x78] sm:$0xf] %v10926_v44  ;;  %6483 = vst [vmem:[#allocation2 + $0x70] sm:$0xf] %v10927_v53  ;;  %v2821_v41 = vrot.slane %v2801_v13, %v9632_v27  ;;  %v2785_v35 = vmul.f32 %v2781_v11, %v2513_v49  ;;  %v10113_v62 = vmul.f32 %v2773_v52, %v2418_v3  ;;  %v2658_v10 = vpop.f32.mrb[44].mxu0  ;;  %v2735_v37 = vpop.f32.mrb[44].mxu1 }
 0x271   : > { %v2829_v51 = vrot.slane %v2809_v23, %v9632_v27  ;;  %v2805_v1 = vrot.slane %v10014_v34, %v9644_v20  ;;  %7483 = vmatprep.subr.bf16.mxu1 %v7482_v31  ;;  %v10118_v28 = vmul.f32 %v2781_v11, %v2519_v29  ;;  %v2813_v45 = vrot.slane %v10026_v33, %v9644_v20  ;;  %v5712_v34 = vld [vmem:[#allocation2 + $0x60] sm:$0xff]  ;;  %v2660_v44 = vpop.f32.mrb[45].mxu0 }
 0x272   : > { %v2834_v40 = vmul.f32 %v2821_v41, %v2422_v39  ;;  %v10122_v13 = vmul.f32 %v2821_v41, %v2428_v9  ;;  %v5686_v49 = vsel %vm349_vm5, %v5679_v38, %v5681_v5  ;;  %v5687_v3 = vsel %vm349_vm5, %v5681_v5, %v5683_v47  ;;  %7485 = vmatpush1.bf16.msra.mxu1 %v7484_v42  ;;  %v5708_v52 = vld [vmem:[#allocation2 + $0x40] sm:$0xff]  ;;  %v10930_v38 = vld [vmem:[#allocation13_spill] sm:$0xff] }
 0x273   : > { %v2836_v23 = vmul.f32 %v2829_v51, %v2523_v4  ;;  %v2825_v16 = vrot.slane %v2805_v1, %v9632_v27  ;;  %v5694_v29 = vsel %vm7941_vm7, %v5686_v49, 0.0  ;;  %v5695_v33 = vsel %vm7960_vm8, %v5687_v3, 0.0  ;;  %v2737_v4 = vpop.f32.mrb[45].mxu1  ;;  %v2664_v1 = vpop.f32.mrb[46].mxu0 }
 0x274   : > { %v7476_v22 = vpack.c.bf16 %v5712_v34, %v5708_v52  ;;  %v10931_v8 = vsel %vm7777_vm3, %v10930_v38, 0.0  ;;  %v2833_v31 = vrot.slane %v2813_v45, %v9632_v27  ;;  %5698 = vst [vmem:[#allocation2 + $0x90] sm:$0xf] %v5694_v29  ;;  %5699 = vst [vmem:[#allocation2 + $0x98] sm:$0xf] %v5695_v33  ;;  %v2840_v53 = vmul.f32 %v2829_v51, %v2529_v43  ;;  %v2741_v47 = vpop.f32.mrb[46].mxu1  ;;  %v6358_v5 = vpop.permute.xlu1 %6357 }
 0x275   : > { %6481 = vst [vmem:[#allocation2 + $0x60] sm:$0xf] %v10931_v8  ;;  %v2835_v42 = vmul.f32 %v2825_v16, %v2424_v32  ;;  %v10136_v41 = vmul.f32 %v2825_v16, %v2430_v58  ;;  %v2659_v9 = vadd.f32 %v2658_v10, %v10047_v56  ;;  %v5675_v49 = vpop.permute.xlu0 %5674  ;;  %v2736_v45 = vadd.f32 %v2735_v37, %v10055_v60  ;;  %v2666_v58 = vpop.f32.mrb[47].mxu0  ;;  %v10488_v10 = vld [vmem:[%s10755_s3 + $0x78] sm:$0x77] }
 0x276   : > { %7477 = vmatpush1.bf16.msra.mxu0 %v7476_v22  ;;  %v2837_v3 = vmul.f32 %v2833_v31, %v2525_v48  ;;  %v10139_v52 = vmul.f32 %v2833_v31, %v2531_v12  ;;  %v2661_v34 = vadd.f32 %v2660_v44, %v10057_v46  ;;  %v5684_v32 = vsel %vm349_vm5, %v5675_v49, %v10085_v57  ;;  %v2743_v16 = vpop.f32.mrb[47].mxu1  ;;  %v5717_v12 = vld [vmem:[#allocation2 + $0x88] sm:$0xf] }
 0x277   : > { %v2790_v43 = vadd.f32 %v10080_v50, %v2659_v9  ;;  %v2738_v51 = vadd.f32 %v2737_v4, %v10073_v21  ;;  %v2665_v56 = vadd.f32 %v2664_v1, %v10060_v2  ;;  %v5692_v48 = vsel %vm7986_vm10, %v5684_v32, 0.0  ;;  %7323 = vmatprep.subr.msk.mxu0 %vm10933_vm15, %v5717_v12 }
 0x278   : > { %v2792_v29 = vadd.f32 %v10087_v15, %v2736_v45  ;;  %v2791_v60 = vadd.f32 %v10097_v6, %v2661_v34  ;;  %v2742_v46 = vadd.f32 %v2741_v47, %v10066_v55  ;;  %5696 = vst [vmem:[#allocation2 + $0x80] sm:$0xf] %v5692_v48  ;;  %v2667_v2 = vadd.f32 %v2666_v58, %v10075_v24  ;;  %v6362_v37 = vpop.permute.xlu1 %6361  ;;  %v10174_v45 = vld [vmem:[%s10753_s1] sm:$0xff]  ;;  %v10213_v48 = vld [vmem:[%s10753_s1 + $0x8] sm:$0xff] }
 0x279   : > { %v2842_v50 = vadd.f32 %v2834_v40, %v2790_v43  ;;  %v2793_v57 = vadd.f32 %v2785_v35, %v2738_v51  ;;  %v2794_v21 = vadd.f32 %v10089_v36, %v2665_v56  ;;  %v6360_v33 = vpop.permute.xlu0 %6359  ;;  %v2744_v6 = vadd.f32 %v2743_v16, %v10078_v19 }
 0x27a   : > { %v2844_v22 = vadd.f32 %v2836_v23, %v2792_v29  ;;  %v2843_v38 = vadd.f32 %v2835_v42, %v2791_v60  ;;  %v2796_v15 = vadd.f32 %v10100_v59, %v2742_v46  ;;  %v6366_v55 = vsel %vm10934_vm4, %v6358_v5, %v6360_v33  ;;  %v10198_v11 = vpop.f32.mrb[48].mxu0 }
 0x27b   : > { %v6367_v8 = vsel %vm10935_vm13, %v6360_v33, %v6362_v37  ;;  %v2850_v31 = vmax.f32 %v2842_v50, 0.0  ;;  %v2845_v40 = vadd.f32 %v2837_v3, %v2793_v57  ;;  %v6374_v36 = vsel %vm7753_vm1, %v6366_v55, 0.0  ;;  %v5719_v35 = vld [vmem:[#allocation2 + $0x98] sm:$0xf]  ;;  %v5718_v23 = vld [vmem:[#allocation2 + $0x90] sm:$0xf]  ;;  %vm10937_vm1 = vmmov %vm10936_vm12 }
 0x27c   : > { %v6375_v24 = vsel %vm7747_vm0, %v6367_v8, 0.0  ;;  %v2846_v44 = vadd.f32 %v10122_v13, %v2794_v21  ;;  %v2848_v4 = vadd.f32 %v2840_v53, %v2796_v15  ;;  %v6382_v59 = vrot.slane %v6374_v36, 4  ;;  %7331 = vmatprep.subr.msk.mxu1 %vm10936_vm12, %v5719_v35  ;;  %v6356_v1 = vpop.permute.xlu1 %6355  ;;  %vm10938_vm0 = vmmov %vm10934_vm4  ;;  %v3349_v29 = vpop.f32.mrb[48].mxu1  ;;  %v10252_v55 = vld [vmem:[%s10753_s1 + $0x10] sm:$0xff] }
 0x27d   : > { %v6383_v42 = vrot.slane %v6375_v24, 4  ;;  %2858 = vst [vmem:[%s9763_s28 + $0x40] sm:$0xff] %v2850_v31  ;;  %v2852_v19 = vmax.f32 %v2844_v22, 0.0  ;;  %v2851_v9 = vmax.f32 %v2843_v38, 0.0  ;;  %v6364_v14 = vpop.permute.xlu0 %6363  ;;  %7332 = vmatpush1.msk.msra.mxu1 %vm10937_vm1, %v5718_v23  ;;  %v2853_v30 = vmax.f32 %v2845_v40, 0.0  ;;  %vm10939_vm15 = vmmov %vm10938_vm0  ;;  %v10218_v60 = vpop.f32.mrb[49].mxu0 }
 0x27e   : > { %v2854_v47 = vmax.f32 %v2846_v44, 0.0  ;;  %v2856_v49 = vmax.f32 %v2848_v4, 0.0  ;;  %v2795_v3 = vadd.f32 %v10113_v62, %v2667_v2  ;;  %6390 = vst [vmem:[#allocation2 + $0x28] sm:$0xf0] %v6382_v59  ;;  %v6365_v13 = vsel %vm10938_vm0, %v6356_v1, %v6358_v5  ;;  %7333 = vmatmul.mubr.msk.f32.vlgmr.msra.gmra.mrb[96].mxu1 %vm592_vm14, %v10174_v45  ;;  %vm10943_vm12 = vmmov %vm10937_vm1  ;;  %v10226_v50 = vpop.f32.mrb[49].mxu1  ;;  %v10229_v57 = vpop.f32.mrb[50].mxu0 }
 0x27f   : > { %6391 = vst [vmem:[#allocation2 + $0x30] sm:$0xf0] %v6383_v42  ;;  %v6368_v53 = vsel %vm10939_vm15, %v6362_v37, %v6364_v14  ;;  %vm10940_vm4 = vcmask 1042432   ;;  %2860 = vst [vmem:[%s9763_s28 + $0x50] sm:$0xff] %v2852_v19  ;;  %v2797_v62 = vadd.f32 %v10118_v28, %v2744_v6  ;;  %v6373_v5 = vsel %vm7777_vm3, %v6365_v13, 0.0  ;;  %v3355_v31 = vpop.f32.mrb[50].mxu1 }
 0x280   : > { %7343 = vmatprep.subr.msk.mxu1 %vm10940_vm4, %v5983_v18  ;;  %2859 = vst [vmem:[%s9763_s28 + $0x48] sm:$0xff] %v2851_v9  ;;  %v6376_v34 = vsel %vm7765_vm2, %v6368_v53, 0.0  ;;  %v5716_v32 = vld [vmem:[#allocation2 + $0x80] sm:$0xf]  ;;  %v10941_v43 = vmov 0.0   ;;  %vm10942_vm13 = vmmov %vm10940_vm4  ;;  %v2847_v18 = vadd.f32 %v10136_v41, %v2795_v3  ;;  %v6381_v51 = vrot.slane %v6373_v5, 4  ;;  %v6326_v17 = vpop.permute.xlu1 %6325 }
 0x281   : > { %5903 = vmatprep.mubr.f32.mxu1 %v10941_v43  ;;  %7344 = vmatpush1.msk.msra.mxu1 %vm10942_vm13, %v10021_v63  ;;  %2861 = vst [vmem:[%s9763_s28 + $0x58] sm:$0xff] %v2853_v30  ;;  %2862 = vst [vmem:[%s9763_s28 + $0x140] sm:$0xff] %v2854_v47  ;;  %v6384_v56 = vrot.slane %v6376_v34, 4  ;;  %v2849_v28 = vadd.f32 %v10139_v52, %v2797_v62  ;;  %v10200_v58 = vpop.permute.xlu0 %6323  ;;  %v10944_v63 = vld [vmem:[#allocation9_spill] sm:$0xff]  ;;  %v10243_v22 = vld [vmem:[%s10755_s3 + $0x38] sm:$0x77] }
 0x282   : > { %2864 = vst [vmem:[%s9763_s28 + $0x150] sm:$0xff] %v2856_v49  ;;  %7324 = vmatpush1.msk.msra.mxu0 %vm10943_vm12, %v5716_v32  ;;  %v10945_v16 = vcombine.high %v10944_v63, %v10944_v63  ;;  %vm10946_vm2 = vmmov %vm10940_vm4  ;;  %v2855_v41 = vmax.f32 %v2847_v18, 0.0  ;;  %v6332_v52 = vsel %vm349_vm5, %v10200_v58, %v6326_v17  ;;  %7334 = vmatmul.mubr.msk.f32.gmra.mrb[98].mxu1 %vm592_vm14, %v10213_v48  ;;  %v10236_v37 = vld [vmem:[%s10755_s3 + $0x30] sm:$0x77]  ;;  %v3256_v40 = vpop.f32.mrb[51].mxu0  ;;  %v3357_v23 = vpop.f32.mrb[51].mxu1 }
 0x283   : > { %7325 = vmatmul.mubr.msk.f32.vlgmr.msra.gmra.mrb[96].mxu0 %vm592_vm14, %v10174_v45  ;;  %6389 = vst [vmem:[#allocation2 + $0x20] sm:$0xf0] %v6381_v51  ;;  %6392 = vst [vmem:[#allocation2 + $0x38] sm:$0xf0] %v6384_v56  ;;  %v2857_v12 = vmax.f32 %v2849_v28, 0.0  ;;  %v6340_v46 = vsel %vm7935_vm6, %v6332_v52, 0.0  ;;  %5909 = vmatprep.mubr.f32.mxu1 %v10941_v43  ;;  %v3391_v33 = vrot.slane %v10236_v37, %v10902_v7 }
 0x284   : > { %7339 = vmatprep.subr.msk.mxu0 %vm10946_vm2, %v10945_v16  ;;  %5802 = vmatprep.mubr.f32.mxu0 %v10941_v43  ;;  %vm10947_vm3 = vmmov %vm10946_vm2  ;;  %2863 = vst [vmem:[%s9763_s28 + $0x148] sm:$0xff] %v2855_v41  ;;  %v6330_v21 = vpop.permute.xlu1 %6329  ;;  %v3399_v38 = vrot.slane %v10243_v22, %v10902_v7  ;;  %v3395_v8 = vrot.slane %v10236_v37, %v10905_v61  ;;  %v10266_v44 = vpop.f32.mrb[52].mxu0  ;;  %v10278_v14 = vld [vmem:[%s10753_s1 + $0x18] sm:$0xff]  ;;  %v10309_v16 = vld [vmem:[%s10753_s1 + $0x20] sm:$0xff]  ;;  %vm10949_vm1 = vcmask 23552  }
 0x285   : > { %7340 = vmatpush1.msk.msra.mxu0 %vm10947_vm3, %v10944_v63  ;;  %6344 = vst [vmem:[#allocation2 + $0x28] sm:$0xf] %v6340_v46  ;;  %2865 = vst [vmem:[%s9763_s28 + $0x158] sm:$0xff] %v2857_v12  ;;  %v6328_v2 = vpop.permute.xlu0 %6327  ;;  %v3403_v35 = vrot.slane %v10243_v22, %v10905_v61  ;;  %v3411_v42 = vrot.slane %v3391_v33, %v10902_v7  ;;  %v3599_v9 = vrot.slane %v10236_v37, %v10910_v0  ;;  %v3361_v47 = vpop.f32.mrb[52].mxu1 }
 0x286   : > { %v6333_v15 = vsel %vm349_vm5, %v6326_v17, %v6328_v2  ;;  %v6334_v6 = vsel %vm349_vm5, %v6328_v2, %v6330_v21  ;;  %7335 = vmatmul.mubr.msk.f32.gmra.mrb[100].mxu1 %vm592_vm14, %v10252_v55  ;;  %v3419_v19 = vrot.slane %v3399_v38, %v10902_v7  ;;  %v3415_v30 = vrot.slane %v3395_v8, %v10902_v7  ;;  %v3262_v49 = vpop.f32.mrb[53].mxu0  ;;  %v10286_v13 = vpop.f32.mrb[53].mxu1  ;;  %vm10950_vm0 = vmmov %vm10949_vm1 }
 0x287   : > { %7326 = vmatmul.mubr.msk.f32.gmra.mrb[98].mxu0 %vm592_vm14, %v10213_v48  ;;  %v6341_v36 = vsel %vm7941_vm7, %v6333_v15, 0.0  ;;  %v6342_v24 = vsel %vm7960_vm8, %v6334_v6, 0.0  ;;  %5915 = vmatprep.mubr.f32.mxu1 %v10941_v43  ;;  %v3423_v3 = vrot.slane %v3403_v35, %v10902_v7  ;;  %v3607_v53 = vrot.slane %v10243_v22, %v10910_v0  ;;  %v10292_v5 = vpop.f32.mrb[54].mxu0  ;;  %v3367_v41 = vpop.f32.mrb[54].mxu1  ;;  %vm10951_vm15 = vmmov %vm10950_vm0 }
 0x288   : > { %5808 = vmatprep.mubr.f32.mxu0 %v10941_v43  ;;  %6345 = vst [vmem:[#allocation2 + $0x30] sm:$0xf] %v6341_v36  ;;  %6346 = vst [vmem:[#allocation2 + $0x38] sm:$0xf] %v6342_v24  ;;  %v6296_v4 = vpop.permute.xlu1 %6295  ;;  %v3603_v62 = vrot.slane %v10236_v37, %v10911_v54  ;;  %v10297_v18 = vmul.f32 %v3411_v42, %v10198_v11  ;;  %v10299_v51 = vmul.f32 %v3419_v19, %v3349_v29  ;;  %v3268_v52 = vpop.f32.mrb[55].mxu0 }
 0x289   : > { %v6294_v59 = vpop.permute.xlu0 %6293  ;;  %v3619_v56 = vrot.slane %v3599_v9, %v10910_v0  ;;  %v3611_v28 = vrot.slane %v10243_v22, %v10911_v54  ;;  %v10315_v11 = vmul.f32 %v3415_v30, %v10218_v60  ;;  %v10319_v12 = vmul.f32 %v3423_v3, %v10226_v50  ;;  %v3369_v46 = vpop.f32.mrb[55].mxu1  ;;  %v10349_v9 = vld [vmem:[%s10753_s1 + $0x28] sm:$0xff]  ;;  %vm10952_vm4 = vmmov %vm10950_vm0 }
 0x28a   : > { %v6302_v1 = vsel %vm310_vm9, %v6294_v59, %v6296_v4  ;;  %7336 = vmatmul.mubr.msk.f32.gmra.mrb[102].mxu1 %vm592_vm14, %v10278_v14  ;;  %v10322_v29 = vmul.f32 %v3411_v42, %v10229_v57  ;;  %v3651_v21 = vrot.slane %v10236_v37, %v9632_v27  ;;  %v3659_v60 = vrot.slane %v10243_v22, %v9632_v27  ;;  %v3272_v38 = vpop.f32.mrb[56].mxu0 }
 0x28b   : > { %7327 = vmatmul.mubr.msk.f32.gmra.mrb[100].mxu0 %vm592_vm14, %v10252_v55  ;;  %6310 = vst [vmem:[#allocation2 + $0x8] sm:$0xf0] %v6302_v1  ;;  %5921 = vmatprep.mubr.f32.mxu1 %v10941_v43  ;;  %v3627_v2 = vrot.slane %v3607_v53, %v10910_v0  ;;  %v3623_v33 = vrot.slane %v3603_v62, %v10910_v0  ;;  %10948 = vst [vmem:[#allocation14_spill] sm:$0xff] %v10349_v9 }
 0x28c   : > { %5814 = vmatprep.mubr.f32.mxu0 %v10941_v43  ;;  %v6300_v34 = vpop.permute.xlu1 %6299  ;;  %v3655_v15 = vrot.slane %v10236_v37, %v9644_v20  ;;  %v3663_v50 = vrot.slane %v10243_v22, %v9644_v20  ;;  %v10336_v8 = vmul.f32 %v3419_v19, %v3355_v31  ;;  %v10338_v36 = vmul.f32 %v3415_v30, %v3256_v40  ;;  %v6555_v22 = vld [vmem:[#allocation2 + $0x28] sm:$0xff]  ;;  %v3373_v40 = vpop.f32.mrb[56].mxu1 }
 0x28d   : > { %v6298_v32 = vpop.permute.xlu0 %6297  ;;  %v10340_v24 = vmul.f32 %v3423_v3, %v3357_v23  ;;  %v3631_v35 = vrot.slane %v3611_v28, %v10910_v0  ;;  %v10355_v31 = vmul.f32 %v3619_v56, %v10266_v44  ;;  %v3274_v23 = vpop.f32.mrb[57].mxu0  ;;  %v3671_v19 = vrot.slane %v3651_v21, %v9632_v27 }
 0x28e   : > { %v6303_v17 = vsel %vm310_vm9, %v6296_v4, %v6298_v32  ;;  %v6304_v63 = vsel %vm310_vm9, %v6298_v32, %v6300_v34  ;;  %7337 = vmatmul.mubr.msk.f32.gmra.mrb[104].mxu1 %vm592_vm14, %v10309_v16  ;;  %v3679_v1 = vrot.slane %v3659_v60, %v9632_v27  ;;  %v3375_v30 = vpop.f32.mrb[57].mxu1  ;;  %v10362_v3 = vmul.f32 %v3627_v2, %v3361_v47  ;;  %v3278_v34 = vpop.f32.mrb[58].mxu0 }
 0x28f   : > { %7328 = vmatmul.mubr.msk.f32.gmra.mrb[102].mxu0 %vm592_vm14, %v10278_v14  ;;  %6311 = vst [vmem:[#allocation2 + $0x10] sm:$0xf0] %v6303_v17  ;;  %6312 = vst [vmem:[#allocation2 + $0x18] sm:$0xf0] %v6304_v63  ;;  %5927 = vmatprep.mubr.f32.mxu1 %v10941_v43  ;;  %v10364_v53 = vmul.f32 %v3623_v33, %v3262_v49  ;;  %v3675_v44 = vrot.slane %v3655_v15, %v9632_v27  ;;  %v6557_v17 = vld [vmem:[#allocation2 + $0x38] sm:$0xff]  ;;  %v10387_v15 = vld [vmem:[%s10754_s2] sm:$0xff] }
 0x290   : > { %5820 = vmatprep.mubr.f32.mxu0 %v10941_v43  ;;  %v6292_v57 = vpop.permute.xlu1 %6291  ;;  %v10368_v62 = vrot.slane %v3663_v50, %v9632_v27  ;;  %v10375_v63 = vmul.f32 %v3631_v35, %v10286_v13  ;;  %v10378_v47 = vmul.f32 %v3619_v56, %v10292_v5  ;;  %v10380_v49 = vmul.f32 %v3627_v2, %v3367_v41  ;;  %v6556_v13 = vld [vmem:[#allocation2 + $0x30] sm:$0xff]  ;;  %v3379_v41 = vpop.f32.mrb[58].mxu1 }
 0x291   : > { %v6322_v6 = vpop.permute.xlu0 %6321  ;;  %v6301_v4 = vsel %vm310_vm9, %v6292_v57, %v6294_v59  ;;  %v10392_v5 = vmul.f32 %v3623_v33, %v3268_v52  ;;  %v10394_v56 = vmul.f32 %v3631_v35, %v3369_v46  ;;  %v3280_v2 = vpop.f32.mrb[59].mxu0  ;;  %v3688_v35 = vmul.f32 %v3671_v19, %v3278_v34  ;;  %v10417_v34 = vld [vmem:[%s10754_s2 + $0x8] sm:$0xff] }
 0x292   : > { %v6331_v37 = vsel %vm349_vm5, %v6322_v6, %v10200_v58  ;;  %v6551_v42 = vld [vmem:[#allocation2 + $0x8] sm:$0xff]  ;;  %7338 = vmatmul.mubr.msk.f32.gmra.mrb[106].mxu1 %vm592_vm14, %v10349_v9  ;;  %6309 = vst [vmem:[#allocation2] sm:$0xf0] %v6301_v4  ;;  %v3508_v52 = vpop.f32.mrb[60].mxu0 }
 0x293   : > { %7329 = vmatmul.mubr.msk.f32.gmra.mrb[104].mxu0 %vm592_vm14, %v10309_v16  ;;  %v6339_v58 = vsel %vm7986_vm10, %v6331_v37, 0.0  ;;  %v7486_v59 = vpack.c.bf16 %v6555_v22, %v6551_v42  ;;  %6133 = vmatprep.mubr.f32.mxu1 %v10941_v43  ;;  %v3684_v37 = vmul.f32 %v3671_v19, %v3272_v38  ;;  %v3381_v42 = vpop.f32.mrb[59].mxu1 }
 0x294   : > { %5826 = vmatprep.mubr.f32.mxu0 %v10941_v43  ;;  %6343 = vst [vmem:[#allocation2 + $0x20] sm:$0xf] %v6339_v58  ;;  %v6436_v32 = vpop.permute.xlu1 %6435  ;;  %v3686_v58 = vmul.f32 %v3679_v1, %v3373_v40 }
 0x295   : > { %v10370_v28 = vpop.permute.xlu0 %6433  ;;  %7487 = vmatprep.subr.bf16.mxu0 %v7486_v59  ;;  %v3685_v59 = vmul.f32 %v3675_v44, %v3274_v23 }
 0x296   : > { %v6442_v21 = vsel %vm462_vm11, %v10370_v28, %v6436_v32  ;;  %v6553_v60 = vld [vmem:[#allocation2 + $0x18] sm:$0xff]  ;;  %7345 = vmatmul.mubr.msk.f32.vlgmr.msra.gmra.mrb[108].mxu1 %vm10949_vm1, %v10387_v15  ;;  %v6552_v50 = vld [vmem:[#allocation2 + $0x10] sm:$0xff]  ;;  %vm10963_vm1 = vmmov %vm10947_vm3 }
 0x297   : > { %7330 = vmatmul.mubr.msk.f32.gmra.mrb[106].mxu0 %vm592_vm14, %v10349_v9  ;;  %v6450_v57 = vsel %vm7935_vm6, %v6442_v21, 0.0  ;;  %v7494_v6 = vpack.c.bf16 %v6557_v17, %v6553_v60  ;;  %v7496_v4 = vpack.c.bf16 %v6556_v13, %v6552_v50  ;;  %6139 = vmatprep.mubr.f32.mxu1 %v10941_v43  ;;  %v3687_v9 = vmul.f32 %v10368_v62, %v3375_v30  ;;  %v3585_v60 = vpop.f32.mrb[60].mxu1  ;;  %v3510_v50 = vpop.f32.mrb[61].mxu0 }
 0x298   : > { %6056 = vmatprep.mubr.f32.mxu0 %v10941_v43  ;;  %v6458_v22 = vrot.slane %v6450_v57, 4  ;;  %v6440_v33 = vpop.permute.xlu1 %6439  ;;  %v10402_v21 = vmul.f32 %v3679_v1, %v3379_v41  ;;  %v3509_v17 = vadd.f32 %v3508_v52, %v10297_v18  ;;  %v10408_v30 = vmul.f32 %v3675_v44, %v3280_v2  ;;  %v3587_v13 = vpop.f32.mrb[61].mxu1 }
 0x299   : > { %v6438_v46 = vpop.permute.xlu0 %6437  ;;  %7495 = vmatprep.subr.bf16.mxu1 %v7494_v6  ;;  %v6550_v23 = vld [vmem:[#allocation2] sm:$0xff]  ;;  %v3511_v6 = vadd.f32 %v3510_v50, %v10315_v11  ;;  %v3691_v11 = vmul.f32 %v10368_v62, %v3381_v42 }
 0x29a   : > { %6466 = vst [vmem:[#allocation2 + $0x48] sm:$0xf0] %v6458_v22  ;;  %v6443_v38 = vsel %vm462_vm11, %v6436_v32, %v6438_v46  ;;  %v6444_v40 = vsel %vm462_vm11, %v6438_v46, %v6440_v33  ;;  %7497 = vmatpush1.bf16.msra.mxu1 %v7496_v4  ;;  %v3640_v44 = vadd.f32 %v10355_v31, %v3509_v17  ;;  %v3514_v4 = vpop.f32.mrb[62].mxu0 }
 0x29b   : > { %7341 = vmatmul.mubr.msk.f32.vlgmr.msra.gmra.mrb[108].mxu0 %vm10950_vm0, %v10387_v15  ;;  %v6451_v19 = vsel %vm7941_vm7, %v6443_v38, 0.0  ;;  %v6452_v1 = vsel %vm7960_vm8, %v6444_v40, 0.0  ;;  %v6554_v18 = vld [vmem:[#allocation2 + $0x20] sm:$0xff]  ;;  %7346 = vmatmul.mubr.msk.f32.gmra.mrb[110].mxu1 %vm10951_vm15, %v10417_v34  ;;  %v3586_v32 = vadd.f32 %v3585_v60, %v10299_v51  ;;  %v3588_v51 = vadd.f32 %v3587_v13, %v10319_v12  ;;  %vm10966_vm15 = vmmov %vm10950_vm0 }
 0x29c   : > { %6062 = vmatprep.mubr.f32.mxu0 %v10941_v43  ;;  %v6459_v41 = vrot.slane %v6451_v19, 4  ;;  %v6460_v2 = vrot.slane %v6452_v1, 4  ;;  %v7488_v57 = vpack.c.bf16 %v6554_v18, %v6550_v23  ;;  %6747 = vmatprep.mubr.f32.mxu1 %v10941_v43  ;;  %v10425_v22 = vpop.permute.xlu1 %6403  ;;  %v3692_v33 = vadd.f32 %v3684_v37, %v3640_v44  ;;  %v3516_v37 = vpop.f32.mrb[63].mxu0 }
 0x29d   : > { %v6432_v52 = vpop.permute.xlu0 %6431  ;;  %v3642_v31 = vadd.f32 %v10362_v3, %v3586_v32  ;;  %v3515_v46 = vadd.f32 %v3514_v4, %v10322_v29  ;;  %v3641_v38 = vadd.f32 %v10364_v53, %v3511_v6  ;;  %v3643_v29 = vadd.f32 %v10375_v63, %v3588_v51  ;;  %v3591_v23 = vpop.f32.mrb[62].mxu1 }
 0x29e   : > { %6467 = vst [vmem:[#allocation2 + $0x50] sm:$0xf0] %v6459_v41  ;;  %6468 = vst [vmem:[#allocation2 + $0x58] sm:$0xf0] %v6460_v2  ;;  %v6441_v17 = vsel %vm462_vm11, %v6432_v52, %v10370_v28  ;;  %7489 = vmatpush1.bf16.msra.mxu0 %v7488_v57  ;;  %v3700_v12 = vmax.f32 %v3692_v33, 0.0  ;;  %v3592_v19 = vadd.f32 %v3591_v23, %v10336_v8  ;;  %v3593_v1 = vpop.f32.mrb[63].mxu1 }
 0x29f   : > { %7342 = vmatmul.mubr.msk.f32.gmra.mrb[110].mxu0 %vm10952_vm4, %v10417_v34  ;;  %v6449_v3 = vsel %vm7986_vm10, %v6441_v17, 0.0  ;;  %v3694_v40 = vadd.f32 %v3686_v58, %v3642_v31  ;;  %v3693_v50 = vadd.f32 %v3685_v59, %v3641_v38  ;;  %v3644_v28 = vadd.f32 %v10378_v47, %v3515_v46  ;;  %vm10967_vm4 = vmmov %vm10950_vm0 }
 0x2a0   : > { %6646 = vmatprep.mubr.f32.mxu0 %v10941_v43  ;;  %v6457_v60 = vrot.slane %v6449_v3, 4  ;;  %v6408_v62 = vpop.permute.xlu1 %6407  ;;  %3708 = vst [vmem:[%s9763_s28 + $0x60] sm:$0xff] %v3700_v12  ;;  %v3695_v18 = vadd.f32 %v3687_v9, %v3643_v29  ;;  %v3517_v44 = vadd.f32 %v3516_v37, %v10338_v36  ;;  %v3594_v58 = vadd.f32 %v3593_v1, %v10340_v24 }
 0x2a1   : > { %v6406_v42 = vpop.permute.xlu0 %6405  ;;  %v3702_v53 = vmax.f32 %v3694_v40, 0.0  ;;  %vm10953_vm11 = vcmask 515072   ;;  %v3701_v8 = vmax.f32 %v3693_v50, 0.0  ;;  %v3696_v59 = vadd.f32 %v3688_v35, %v3644_v28 }
 0x2a2   : > { %6465 = vst [vmem:[#allocation2 + $0x40] sm:$0xf0] %v6457_v60  ;;  %v6412_v63 = vsel %vm10953_vm11, %v10425_v22, %v6406_v42  ;;  %vm10954_vm13 = vmmov %vm10953_vm11  ;;  %v3703_v32 = vmax.f32 %v3695_v18, 0.0  ;;  %v3646_v9 = vadd.f32 %v10380_v49, %v3592_v19  ;;  %v3645_v36 = vadd.f32 %v10392_v5, %v3517_v44 }
 0x2a3   : > { %v6413_v47 = vsel %vm10954_vm13, %v6406_v42, %v6408_v62  ;;  %6420 = vst [vmem:[#allocation2 + $0x48] sm:$0xf] %v6412_v63  ;;  %3710 = vst [vmem:[%s9763_s28 + $0x70] sm:$0xff] %v3702_v53  ;;  %v3647_v24 = vadd.f32 %v10394_v56, %v3594_v58  ;;  %v3704_v13 = vmax.f32 %v3696_v59, 0.0 }
 0x2a4   : > { %6421 = vst [vmem:[#allocation2 + $0x50] sm:$0xf] %v6413_v47  ;;  %3709 = vst [vmem:[%s9763_s28 + $0x68] sm:$0xff] %v3701_v8  ;;  %v6497_v41 = vpop.permute.xlu1 %6496  ;;  %v3698_v35 = vadd.f32 %v10402_v21, %v3646_v9  ;;  %v3697_v57 = vadd.f32 %v10408_v30, %v3645_v36  ;;  %v10482_v36 = vld [vmem:[%s10755_s3 + $0x70] sm:$0x77] }
 0x2a5   : > { %v6410_v2 = vpop.permute.xlu0 %6409  ;;  %3711 = vst [vmem:[%s9763_s28 + $0x78] sm:$0xff] %v3703_v32  ;;  %v3699_v6 = vadd.f32 %v3691_v11, %v3647_v24  ;;  %vm10955_vm12 = vmmov %vm10953_vm11  ;;  %v6832_v39 = vcombine.high %v10482_v36, %v10482_v36 }
 0x2a6   : > { %v6414_v4 = vsel %vm10955_vm12, %v6408_v62, %v6410_v2  ;;  %3712 = vst [vmem:[%s9763_s28 + $0x160] sm:$0xff] %v3704_v13  ;;  %v3706_v49 = vmax.f32 %v3698_v35, 0.0  ;;  %v3705_v5 = vmax.f32 %v3697_v57, 0.0  ;;  %vm10956_vm2 = vmmov %vm10953_vm11 }
 0x2a7   : > { %6422 = vst [vmem:[#allocation2 + $0x58] sm:$0xf] %v6414_v4  ;;  %v3707_v56 = vmax.f32 %v3699_v6, 0.0 }
 0x2a8   : > { %v6501_v52 = vpop.permute.xlu1 %6500  ;;  %3714 = vst [vmem:[%s9763_s28 + $0x170] sm:$0xff] %v3706_v49  ;;  %3713 = vst [vmem:[%s9763_s28 + $0x168] sm:$0xff] %v3705_v5 }
 0x2a9   : > { %v6499_v33 = vpop.permute.xlu0 %6498  ;;  %3715 = vst [vmem:[%s9763_s28 + $0x178] sm:$0xff] %v3707_v56 }
 0x2aa   : > { %v6505_v31 = vsel %vm310_vm9, %v6497_v41, %v6499_v33  ;;  %v6506_v51 = vsel %vm310_vm9, %v6499_v33, %v6501_v52  ;;  %v6559_v3 = vld [vmem:[#allocation2 + $0x48] sm:$0xff] }
 0x2ab   : > { %6513 = vst [vmem:[#allocation2 + $0x68] sm:$0xf0] %v6505_v31  ;;  %6514 = vst [vmem:[#allocation2 + $0x70] sm:$0xf0] %v6506_v51  ;;  %v6560_v53 = vld [vmem:[#allocation2 + $0x50] sm:$0xff] }
 0x2ac   : > { %v6402_v21 = vpop.permute.xlu1 %6401 }
 0x2ad   : > { %v6503_v30 = vpop.permute.xlu0 %6502  ;;  %v6411_v46 = vsel %vm10956_vm2, %v6402_v21, %v10425_v22 }
 0x2ae   : > { %v6507_v17 = vsel %vm310_vm9, %v6501_v52, %v6503_v30  ;;  %6419 = vst [vmem:[#allocation2 + $0x40] sm:$0xf] %v6411_v46  ;;  %v6561_v28 = vld [vmem:[#allocation2 + $0x58] sm:$0xff] }
 0x2af   : > { %6515 = vst [vmem:[#allocation2 + $0x78] sm:$0xf0] %v6507_v17  ;;  %v7658_v17 = vld [vmem:[%s10755_s3 + $0x40] sm:$0x77] }
 0x2b0   : > { %v6527_v11 = vpop.permute.xlu1 %6526 }
 0x2b1   : > { %v6495_v38 = vpop.permute.xlu0 %6494 }
 0x2b2   : > { %v6504_v37 = vsel %vm310_vm9, %v6495_v38, %v6497_v41  ;;  %v6563_v12 = vld [vmem:[#allocation2 + $0x68] sm:$0xff]  ;;  %v6564_v60 = vld [vmem:[#allocation2 + $0x70] sm:$0xff]  ;;  %v6833_v41 = vcombine.high %v10488_v10, %v10488_v10  ;;  %vm10961_vm9 = vmmov %vm10947_vm3 }
 0x2b3   : > { %6512 = vst [vmem:[#allocation2 + $0x60] sm:$0xf0] %v6504_v37  ;;  %v7490_v40 = vpack.c.bf16 %v6563_v12, %v6559_v3  ;;  %v7500_v18 = vpack.c.bf16 %v6564_v60, %v6560_v53  ;;  %v4245_v37 = vrot.slane %v7658_v17, %v10905_v61  ;;  %v4505_v53 = vrot.slane %v7658_v17, %v9644_v20 }
 0x2b4   : > { %v6531_v29 = vpop.permute.xlu1 %6530 }
 0x2b5   : > { %v6529_v23 = vpop.permute.xlu0 %6528  ;;  %7491 = vmatprep.subr.bf16.mxu0 %v7490_v40  ;;  %v6558_v8 = vld [vmem:[#allocation2 + $0x40] sm:$0xff] }
 0x2b6   : > { %v6535_v50 = vsel %vm349_vm5, %v6527_v11, %v6529_v23  ;;  %v6536_v22 = vsel %vm349_vm5, %v6529_v23, %v6531_v29  ;;  %v6565_v19 = vld [vmem:[#allocation2 + $0x78] sm:$0xff] }
 0x2b7   : > { %v6543_v1 = vsel %vm7935_vm6, %v6535_v50, 0.0  ;;  %v6544_v62 = vsel %vm7941_vm7, %v6536_v22, 0.0  ;;  %v7498_v42 = vpack.c.bf16 %v6565_v19, %v6561_v28  ;;  %v4449_v22 = vrot.slane %v7658_v17, %v10910_v0 }
 0x2b8   : > { %6547 = vst [vmem:[#allocation2 + $0x88] sm:$0xf] %v6543_v1  ;;  %6548 = vst [vmem:[#allocation2 + $0x90] sm:$0xf] %v6544_v62  ;;  %v6525_v44 = vpop.permute.xlu1 %6524  ;;  %v4453_v28 = vrot.slane %v7658_v17, %v10911_v54 }
 0x2b9   : > { %v6533_v58 = vpop.permute.xlu0 %6532  ;;  %7499 = vmatprep.subr.bf16.mxu1 %v7498_v42  ;;  %v6534_v63 = vsel %vm349_vm5, %v6525_v44, %v6527_v11  ;;  %v4501_v42 = vrot.slane %v7658_v17, %v9632_v27  ;;  %v4265_v44 = vrot.slane %v4245_v37, %v10902_v7 }
 0x2ba   : > { %v6537_v47 = vsel %vm349_vm5, %v6531_v29, %v6533_v58  ;;  %7501 = vmatpush1.bf16.msra.mxu1 %v7500_v18  ;;  %v6562_v59 = vld [vmem:[#allocation2 + $0x60] sm:$0xff]  ;;  %v6542_v25 = vsel %vm7986_vm10, %v6534_v63, 0.0  ;;  %vm10957_vm5 = vcmask 1043456   ;;  %vm10962_vm10 = vmmov %vm10947_vm3  ;;  %v10964_v18 = vld [vmem:[#allocation14_spill] sm:$0xff] }
 0x2bb   : > { %v6545_v26 = vsel %vm7960_vm8, %v6537_v47, 0.0  ;;  %v7492_v32 = vpack.c.bf16 %v6562_v59, %v6558_v8  ;;  %6546 = vst [vmem:[#allocation2 + $0x80] sm:$0xf] %v6542_v25  ;;  %vm10958_vm6 = vmmov %vm10957_vm5 }
 0x2bc   : > { %6549 = vst [vmem:[#allocation2 + $0x98] sm:$0xf] %v6545_v26  ;;  %vm10959_vm7 = vmmov %vm10957_vm5 }
 0x2bd   : > { %7493 = vmatpush1.bf16.msra.mxu0 %v7492_v32  ;;  %vm10960_vm8 = vmmov %vm10957_vm5  ;;  %v4469_v32 = vrot.slane %v4449_v22, %v10910_v0 }
 0x2bf   : > { %v6567_v9 = vld [vmem:[#allocation2 + $0x88] sm:$0xf]  ;;  %v6568_v2 = vld [vmem:[#allocation2 + $0x90] sm:$0xf] }
 0x2c0   : > { %7347 = vmatprep.subr.msk.mxu0 %vm10957_vm5, %v6567_v9  ;;  %v10499_v35 = vpop.f32.mrb[64].mxu1  ;;  %v4473_v9 = vrot.slane %v4453_v28, %v10910_v0 }
 0x2c1   : > { %v10504_v57 = vpop.f32.mrb[65].mxu1 }
 0x2c2   : > { %v6566_v24 = vld [vmem:[#allocation2 + $0x80] sm:$0xf] }
 0x2c3   : > { %v6569_v13 = vld [vmem:[#allocation2 + $0x98] sm:$0xf]  ;;  %7348 = vmatpush1.msk.msra.mxu0 %vm10958_vm6, %v6566_v24  ;;  %v10512_v6 = vpop.f32.mrb[64].mxu0 }
 0x2c4   : > { %7355 = vmatprep.subr.msk.mxu1 %vm10959_vm7, %v6569_v13  ;;  %7349 = vmatmul.mubr.msk.f32.vlgmr.msra.gmra.mrb[112].mxu0 %vm592_vm14, %v10174_v45  ;;  %v10519_v4 = vpop.f32.mrb[66].mxu1 }
 0x2c5   : > { %7356 = vmatpush1.msk.msra.mxu1 %vm10960_vm8, %v6568_v2  ;;  %7363 = vmatprep.subr.msk.mxu0 %vm10961_vm9, %v6832_v39  ;;  %v10524_v49 = vpop.f32.mrb[67].mxu1  ;;  %v4525_v2 = vrot.slane %v4505_v53, %v9632_v27 }
 0x2c6   : > { %7357 = vmatmul.mubr.msk.f32.vlgmr.msra.gmra.mrb[112].mxu1 %vm592_vm14, %v10174_v45  ;;  %7367 = vmatprep.subr.msk.mxu1 %vm10962_vm10, %v6833_v41  ;;  %v10517_v45 = vpop.f32.mrb[65].mxu0  ;;  %v4521_v41 = vrot.slane %v4501_v42, %v9632_v27 }
 0x2c7   : > { %7364 = vmatpush1.msk.msra.mxu0 %vm10947_vm3, %v10482_v36  ;;  %7368 = vmatpush1.msk.msra.mxu1 %vm10963_vm1, %v10488_v10  ;;  %v10527_v5 = vpop.f32.mrb[66].mxu0 }
 0x2c8   : > { %6652 = vmatprep.mubr.f32.mxu0 %v10941_v43  ;;  %6753 = vmatprep.mubr.f32.mxu1 %v10941_v43  ;;  %v10531_v56 = vpop.f32.mrb[67].mxu0  ;;  %v4211_v52 = vpop.f32.mrb[68].mxu1 }
 0x2c9   : > { %7350 = vmatmul.mubr.msk.f32.gmra.mrb[114].mxu0 %vm592_vm14, %v10213_v48 }
 0x2ca   : > { %7358 = vmatmul.mubr.msk.f32.gmra.mrb[114].mxu1 %vm592_vm14, %v10213_v48  ;;  %6658 = vmatprep.mubr.f32.mxu0 %v10941_v43  ;;  %v4213_v48 = vpop.f32.mrb[69].mxu1 }
 0x2cb   : > { %6759 = vmatprep.mubr.f32.mxu1 %v10941_v43  ;;  %v10537_v33 = vpop.f32.mrb[68].mxu0 }
 0x2cc   : > { %v10541_v31 = vpop.f32.mrb[69].mxu0  ;;  %v10543_v51 = vpop.f32.mrb[70].mxu1 }
 0x2cd   : > { %7351 = vmatmul.mubr.msk.f32.gmra.mrb[116].mxu0 %vm592_vm14, %v10252_v55  ;;  %v10552_v30 = vpop.f32.mrb[71].mxu1 }
 0x2ce   : > { %7359 = vmatmul.mubr.msk.f32.gmra.mrb[116].mxu1 %vm592_vm14, %v10252_v55  ;;  %6664 = vmatprep.mubr.f32.mxu0 %v10941_v43  ;;  %v7657_v55 = vld [vmem:[%s10755_s3 + $0x48] sm:$0x77] }
 0x2cf   : > { %6765 = vmatprep.mubr.f32.mxu1 %v10941_v43  ;;  %v4249_v21 = vrot.slane %v7657_v55, %v10902_v7  ;;  %v4253_v46 = vrot.slane %v7657_v55, %v10905_v61  ;;  %v4457_v11 = vrot.slane %v7657_v55, %v10910_v0  ;;  %v10561_v38 = vpop.f32.mrb[70].mxu0  ;;  %v4461_v3 = vrot.slane %v7657_v55, %v10911_v54 }
 0x2d0   : > { %v10567_v12 = vpop.f32.mrb[71].mxu0  ;;  %v4223_v40 = vpop.f32.mrb[72].mxu1  ;;  %v4509_v23 = vrot.slane %v7657_v55, %v9632_v27  ;;  %v4513_v19 = vrot.slane %v7657_v55, %v9644_v20  ;;  %v4275_v55 = vmul.f32 %v4265_v44, %v10517_v45  ;;  %v4279_v45 = vmul.f32 %v4265_v44, %v10531_v56 }
 0x2d1   : > { %7352 = vmatmul.mubr.msk.f32.gmra.mrb[118].mxu0 %vm592_vm14, %v10278_v14  ;;  %v4269_v29 = vrot.slane %v4249_v21, %v10902_v7  ;;  %v4225_v60 = vpop.f32.mrb[73].mxu1  ;;  %v4273_v50 = vrot.slane %v4253_v46, %v10902_v7  ;;  %v4481_v58 = vrot.slane %v4461_v3, %v10910_v0  ;;  %v4483_v3 = vmul.f32 %v4473_v9, %v10541_v31 }
 0x2d2   : > { %7360 = vmatmul.mubr.msk.f32.gmra.mrb[118].mxu1 %vm592_vm14, %v10278_v14  ;;  %6670 = vmatprep.mubr.f32.mxu0 %v10941_v43  ;;  %v4241_v14 = vrot.slane %v7658_v17, %v10902_v7  ;;  %v4529_v59 = vrot.slane %v4509_v23, %v9632_v27  ;;  %v4533_v39 = vrot.slane %v4513_v19, %v9632_v27 }
 0x2d3   : > { %6771 = vmatprep.mubr.f32.mxu1 %v10941_v43  ;;  %v4122_v62 = vpop.f32.mrb[72].mxu0  ;;  %v4276_v8 = vmul.f32 %v4269_v29, %v10499_v35  ;;  %v4277_v26 = vmul.f32 %v4273_v50, %v10504_v57  ;;  %v4280_v57 = vmul.f32 %v4269_v29, %v10519_v4  ;;  %v4281_v21 = vmul.f32 %v4273_v50, %v10524_v49 }
 0x2d4   : > { %v4261_v1 = vrot.slane %v4241_v14, %v10902_v7  ;;  %v4124_v63 = vpop.f32.mrb[73].mxu0  ;;  %v4229_v47 = vpop.f32.mrb[74].mxu1  ;;  %v4485_v46 = vmul.f32 %v4481_v58, %v4213_v48  ;;  %v4482_v4 = vmul.f32 %v4469_v32, %v10537_v33  ;;  %v4537_v49 = vmul.f32 %v4533_v39, %v4225_v60 }
 0x2d5   : > { %7353 = vmatmul.mubr.msk.f32.gmra.mrb[120].mxu0 %vm592_vm14, %v10309_v16  ;;  %v4231_v25 = vpop.f32.mrb[75].mxu1  ;;  %v4487_v33 = vmul.f32 %v4473_v9, %v10567_v12  ;;  %v4535_v31 = vmul.f32 %v4525_v2, %v4124_v63 }
 0x2d6   : > { %7361 = vmatmul.mubr.msk.f32.gmra.mrb[120].mxu1 %vm592_vm14, %v10309_v16  ;;  %6676 = vmatprep.mubr.f32.mxu0 %v10941_v43  ;;  %v4477_v16 = vrot.slane %v4457_v11, %v10910_v0  ;;  %v4274_v24 = vmul.f32 %v4261_v1, %v10512_v6  ;;  %v4278_v6 = vmul.f32 %v4261_v1, %v10527_v5 }
 0x2d7   : > { %6777 = vmatprep.mubr.f32.mxu1 %v10941_v43  ;;  %v4128_v35 = vpop.f32.mrb[74].mxu0  ;;  %v4486_v5 = vmul.f32 %v4469_v32, %v10561_v38  ;;  %v4541_v28 = vmul.f32 %v4533_v39, %v4231_v25 }
 0x2d8   : > { %v4484_v13 = vmul.f32 %v4477_v16, %v4211_v52  ;;  %v4130_v17 = vpop.f32.mrb[75].mxu0  ;;  %v4435_v14 = vpop.f32.mrb[76].mxu1  ;;  %v4536_v52 = vmul.f32 %v4529_v59, %v4223_v40  ;;  %v4488_v29 = vmul.f32 %v4477_v16, %v10543_v51  ;;  %v4538_v42 = vmul.f32 %v4521_v41, %v4128_v35 }
 0x2d9   : > { %7354 = vmatmul.mubr.msk.f32.gmra.mrb[122].mxu0 %vm592_vm14, %v10964_v18  ;;  %v4436_v11 = vadd.f32 %v4435_v14, %v4276_v8  ;;  %v4437_v37 = vpop.f32.mrb[77].mxu1 }
 0x2da   : > { %7362 = vmatmul.mubr.msk.f32.gmra.mrb[122].mxu1 %vm592_vm14, %v10964_v18  ;;  %6906 = vmatprep.mubr.f32.mxu0 %v10941_v43  ;;  %vm10965_vm14 = vmmov %vm10950_vm0  ;;  %v4438_v48 = vadd.f32 %v4437_v37, %v4277_v26 }
 0x2db   : > { %6983 = vmatprep.mubr.f32.mxu1 %v10941_v43  ;;  %v4358_v23 = vpop.f32.mrb[76].mxu0  ;;  %v4492_v50 = vadd.f32 %v4484_v13, %v4436_v11 }
 0x2dc   : > { %v4359_v40 = vadd.f32 %v4358_v23, %v4274_v24  ;;  %v4360_v56 = vpop.f32.mrb[77].mxu0  ;;  %v4493_v22 = vadd.f32 %v4485_v46, %v4438_v48  ;;  %v4441_v16 = vpop.f32.mrb[78].mxu1 }
 0x2dd   : > { %7365 = vmatmul.mubr.msk.f32.vlgmr.msra.gmra.mrb[124].mxu0 %vm10965_vm14, %v10387_v15  ;;  %v4544_v51 = vadd.f32 %v4536_v52, %v4492_v50  ;;  %v4361_v60 = vadd.f32 %v4360_v56, %v4275_v55  ;;  %v4442_v18 = vadd.f32 %v4441_v16, %v4280_v57  ;;  %v4443_v44 = vpop.f32.mrb[79].mxu1  ;;  %v7659_v50 = vld [vmem:[%s10755_s3 + $0x50] sm:$0x77]  ;;  %v7660_v56 = vld [vmem:[%s10755_s3 + $0x58] sm:$0x77] }
 0x2de   : > { %7369 = vmatmul.mubr.msk.f32.vlgmr.msra.gmra.mrb[124].mxu1 %vm10950_vm0, %v10387_v15  ;;  %6912 = vmatprep.mubr.f32.mxu0 %v10941_v43  ;;  %v4489_v15 = vmul.f32 %v4481_v58, %v10552_v30  ;;  %v4540_v30 = vmul.f32 %v4529_v59, %v4229_v47  ;;  %v4490_v19 = vadd.f32 %v4482_v4, %v4359_v40 }
 0x2df   : > { %6989 = vmatprep.mubr.f32.mxu1 %v10941_v43  ;;  %v4534_v43 = vmul.f32 %v4521_v41, %v4122_v62  ;;  %v4545_v1 = vadd.f32 %v4537_v49, %v4493_v22  ;;  %v4552_v38 = vmax.f32 %v4544_v51, 0.0  ;;  %v4491_v62 = vadd.f32 %v4483_v3, %v4361_v60  ;;  %v4364_v53 = vpop.f32.mrb[78].mxu0 }
 0x2e0   : > { %v4365_v12 = vadd.f32 %v4364_v53, %v4278_v6  ;;  %v4366_v63 = vpop.f32.mrb[79].mxu0  ;;  %v4444_v8 = vadd.f32 %v4443_v44, %v4281_v21  ;;  %v4539_v47 = vmul.f32 %v4525_v2, %v4130_v17  ;;  %v4496_v25 = vadd.f32 %v4488_v29, %v4442_v18 }
 0x2e1   : > { %7366 = vmatmul.mubr.msk.f32.gmra.mrb[126].mxu0 %vm10966_vm15, %v10417_v34  ;;  %v4542_v58 = vadd.f32 %v4534_v43, %v4490_v19  ;;  %4560 = vst [vmem:[%s9763_s28 + $0x90] sm:$0xff] %v4552_v38  ;;  %v4543_v59 = vadd.f32 %v4535_v31, %v4491_v62  ;;  %v4367_v26 = vadd.f32 %v4366_v63, %v4279_v45 }
 0x2e2   : > { %7370 = vmatmul.mubr.msk.f32.gmra.mrb[126].mxu1 %vm10967_vm4, %v10417_v34  ;;  %v4553_v34 = vmax.f32 %v4545_v1, 0.0  ;;  %v4494_v9 = vadd.f32 %v4486_v5, %v4365_v12  ;;  %v4497_v39 = vadd.f32 %v4489_v15, %v4444_v8  ;;  %v4548_v13 = vadd.f32 %v4540_v30, %v4496_v25 }
 0x2e3   : > { %v4550_v32 = vmax.f32 %v4542_v58, 0.0  ;;  %v4551_v24 = vmax.f32 %v4543_v59, 0.0  ;;  %v4495_v41 = vadd.f32 %v4487_v33, %v4367_v26  ;;  %v5091_v5 = vrot.slane %v7659_v50, %v10902_v7 }
 0x2e4   : > { %4561 = vst [vmem:[%s9763_s28 + $0x98] sm:$0xff] %v4553_v34  ;;  %v4546_v35 = vadd.f32 %v4538_v42, %v4494_v9  ;;  %v4549_v55 = vadd.f32 %v4541_v28, %v4497_v39  ;;  %v4556_v2 = vmax.f32 %v4548_v13, 0.0  ;;  %v5099_v22 = vrot.slane %v7660_v56, %v10902_v7 }
 0x2e5   : > { %4558 = vst [vmem:[%s9763_s28 + $0x80] sm:$0xff] %v4550_v32  ;;  %4559 = vst [vmem:[%s9763_s28 + $0x88] sm:$0xff] %v4551_v24  ;;  %v4547_v57 = vadd.f32 %v4539_v47, %v4495_v41  ;;  %v5095_v33 = vrot.slane %v7659_v50, %v10905_v61  ;;  %v5103_v31 = vrot.slane %v7660_v56, %v10905_v61 }
 0x2e6   : > { %v4554_v21 = vmax.f32 %v4546_v35, 0.0  ;;  %v4557_v46 = vmax.f32 %v4549_v55, 0.0  ;;  %4564 = vst [vmem:[%s9763_s28 + $0x190] sm:$0xff] %v4556_v2  ;;  %v5299_v60 = vrot.slane %v7659_v50, %v10910_v0  ;;  %v5307_v30 = vrot.slane %v7660_v56, %v10910_v0 }
 0x2e7   : > { %v4555_v17 = vmax.f32 %v4547_v57, 0.0  ;;  %v5303_v28 = vrot.slane %v7659_v50, %v10911_v54  ;;  %v5311_v19 = vrot.slane %v7660_v56, %v10911_v54  ;;  %v5351_v16 = vrot.slane %v7659_v50, %v9632_v27 }
 0x2e8   : > { %4562 = vst [vmem:[%s9763_s28 + $0x180] sm:$0xff] %v4554_v21  ;;  %4565 = vst [vmem:[%s9763_s28 + $0x198] sm:$0xff] %v4557_v46  ;;  %v5111_v42 = vrot.slane %v5091_v5, %v10902_v7  ;;  %v5359_v62 = vrot.slane %v7660_v56, %v9632_v27  ;;  %v5355_v18 = vrot.slane %v7659_v50, %v9644_v20 }
 0x2e9   : > { %4563 = vst [vmem:[%s9763_s28 + $0x188] sm:$0xff] %v4555_v17  ;;  %v5363_v44 = vrot.slane %v7660_v56, %v9644_v20  ;;  %v5119_v58 = vrot.slane %v5099_v22, %v10902_v7  ;;  %v5115_v34 = vrot.slane %v5095_v33, %v10902_v7  ;;  %v5123_v12 = vrot.slane %v5103_v31, %v10902_v7 }
 0x2ea   : > { %v5319_v8 = vrot.slane %v5299_v60, %v10910_v0  ;;  %v5327_v47 = vrot.slane %v5307_v30, %v10910_v0  ;;  %v5323_v59 = vrot.slane %v5303_v28, %v10910_v0  ;;  %v5331_v25 = vrot.slane %v5311_v19, %v10910_v0 }
 0x2eb   : > { %v5371_v26 = vrot.slane %v5351_v16, %v9632_v27  ;;  %v5379_v39 = vrot.slane %v5359_v62, %v9632_v27  ;;  %v5375_v24 = vrot.slane %v5355_v18, %v9632_v27  ;;  %v5383_v13 = vrot.slane %v5363_v44, %v9632_v27 }
 0x307   : > { %v4948_v14 = vpop.f32.mrb[80].mxu0 }
 0x308   : > { %v5049_v6 = vpop.f32.mrb[80].mxu1  ;;  %v4950_v52 = vpop.f32.mrb[81].mxu0  ;;  %v5124_v9 = vmul.f32 %v5111_v42, %v4948_v14 }
 0x309   : > { %v5051_v11 = vpop.f32.mrb[81].mxu1  ;;  %v5126_v55 = vmul.f32 %v5119_v58, %v5049_v6  ;;  %v5125_v2 = vmul.f32 %v5115_v34, %v4950_v52 }
 0x30a   : > { %v5127_v57 = vmul.f32 %v5123_v12, %v5051_v11 }
 0x30b   : > { %v4954_v37 = vpop.f32.mrb[82].mxu0 }
 0x30c   : > { %v5055_v45 = vpop.f32.mrb[82].mxu1  ;;  %v4956_v4 = vpop.f32.mrb[83].mxu0  ;;  %v5128_v21 = vmul.f32 %v5111_v42, %v4954_v37 }
 0x30d   : > { %v5057_v49 = vpop.f32.mrb[83].mxu1  ;;  %v5130_v17 = vmul.f32 %v5119_v58, %v5055_v45  ;;  %v5129_v50 = vmul.f32 %v5115_v34, %v4956_v4 }
 0x30e   : > { %v5131_v5 = vmul.f32 %v5123_v12, %v5057_v49 }
 0x30f   : > { %v4960_v48 = vpop.f32.mrb[84].mxu0 }
 0x310   : > { %v4962_v29 = vpop.f32.mrb[85].mxu0  ;;  %v5332_v56 = vmul.f32 %v5319_v8, %v4960_v48 }
 0x311   : > { %v5061_v3 = vpop.f32.mrb[84].mxu1  ;;  %v5333_v33 = vmul.f32 %v5323_v59, %v4962_v29 }
 0x312   : > { %v5063_v15 = vpop.f32.mrb[85].mxu1  ;;  %v5334_v22 = vmul.f32 %v5327_v47, %v5061_v3 }
 0x313   : > { %v5335_v14 = vmul.f32 %v5331_v25, %v5063_v15 }
 0x314   : > { %v4966_v23 = vpop.f32.mrb[86].mxu0 }
 0x315   : > { %v5067_v43 = vpop.f32.mrb[86].mxu1  ;;  %v4968_v40 = vpop.f32.mrb[87].mxu0  ;;  %v5336_v31 = vmul.f32 %v5319_v8, %v4966_v23 }
 0x316   : > { %v5069_v51 = vpop.f32.mrb[87].mxu1  ;;  %v5338_v30 = vmul.f32 %v5327_v47, %v5067_v43  ;;  %v5337_v28 = vmul.f32 %v5323_v59, %v4968_v40 }
 0x317   : > { %v5339_v45 = vmul.f32 %v5331_v25, %v5069_v51 }
 0x318   : > { %v4972_v1 = vpop.f32.mrb[88].mxu0 }
 0x319   : > { %v5073_v38 = vpop.f32.mrb[88].mxu1  ;;  %v4974_v53 = vpop.f32.mrb[89].mxu0  ;;  %v5384_v19 = vmul.f32 %v5371_v26, %v4972_v1 }
 0x31a   : > { %v5075_v63 = vpop.f32.mrb[89].mxu1  ;;  %v5386_v6 = vmul.f32 %v5379_v39, %v5073_v38  ;;  %v5385_v52 = vmul.f32 %v5375_v24, %v4974_v53 }
 0x31b   : > { %v5387_v4 = vmul.f32 %v5383_v13, %v5075_v63 }
 0x31d   : > { %v4978_v32 = vpop.f32.mrb[90].mxu0  ;;  %v5079_v41 = vpop.f32.mrb[90].mxu1 }
 0x31e   : > { %v4980_v35 = vpop.f32.mrb[91].mxu0  ;;  %v5081_v46 = vpop.f32.mrb[91].mxu1  ;;  %v5388_v3 = vmul.f32 %v5371_v26, %v4978_v32  ;;  %v5390_v29 = vmul.f32 %v5379_v39, %v5079_v41 }
 0x31f   : > { %v5389_v43 = vmul.f32 %v5375_v24, %v4980_v35  ;;  %v5391_v38 = vmul.f32 %v5383_v13, %v5081_v46 }
 0x321   : > { %v5208_v60 = vpop.f32.mrb[92].mxu0 }
 0x322   : > { %v5209_v16 = vadd.f32 %v5208_v60, %v5124_v9  ;;  %v5285_v62 = vpop.f32.mrb[92].mxu1  ;;  %v5210_v18 = vpop.f32.mrb[93].mxu0 }
 0x323   : > { %v5286_v11 = vadd.f32 %v5285_v62, %v5126_v55  ;;  %v5211_v37 = vadd.f32 %v5210_v18, %v5125_v2  ;;  %v5287_v42 = vpop.f32.mrb[93].mxu1 }
 0x324   : > { %v5340_v49 = vadd.f32 %v5332_v56, %v5209_v16  ;;  %v5288_v48 = vadd.f32 %v5287_v42, %v5127_v57 }
 0x325   : > { %v5342_v15 = vadd.f32 %v5334_v22, %v5286_v11  ;;  %v5341_v23 = vadd.f32 %v5333_v33, %v5211_v37  ;;  %v5214_v44 = vpop.f32.mrb[94].mxu0 }
 0x326   : > { %v5392_v40 = vadd.f32 %v5384_v19, %v5340_v49  ;;  %v5343_v1 = vadd.f32 %v5335_v14, %v5288_v48  ;;  %v5215_v58 = vadd.f32 %v5214_v44, %v5128_v21  ;;  %v5216_v34 = vpop.f32.mrb[95].mxu0 }
 0x327   : > { %v5394_v53 = vadd.f32 %v5386_v6, %v5342_v15  ;;  %v5393_v12 = vadd.f32 %v5385_v52, %v5341_v23  ;;  %v5291_v8 = vpop.f32.mrb[94].mxu1  ;;  %v5217_v51 = vadd.f32 %v5216_v34, %v5129_v50  ;;  %v7661_v52 = vld [vmem:[%s10755_s3 + $0x68] sm:$0x77] }
 0x328   : > { %v5400_v63 = vmax.f32 %v5392_v40, 0.0  ;;  %v5395_v47 = vadd.f32 %v5387_v4, %v5343_v1  ;;  %v5344_v59 = vadd.f32 %v5336_v31, %v5215_v58  ;;  %v5292_v25 = vadd.f32 %v5291_v8, %v5130_v17  ;;  %v5293_v26 = vpop.f32.mrb[95].mxu1 }
 0x329   : > { %v5402_v32 = vmax.f32 %v5394_v53, 0.0  ;;  %v5401_v9 = vmax.f32 %v5393_v12, 0.0  ;;  %v5345_v39 = vadd.f32 %v5337_v28, %v5217_v51  ;;  %v5294_v24 = vadd.f32 %v5293_v26, %v5131_v5 }
 0x32a   : > { %5408 = vst [vmem:[%s9763_s28 + $0xa0] sm:$0xff] %v5400_v63  ;;  %v5403_v13 = vmax.f32 %v5395_v47, 0.0  ;;  %v5396_v41 = vadd.f32 %v5388_v3, %v5344_v59  ;;  %v5346_v35 = vadd.f32 %v5338_v30, %v5292_v25  ;;  %v5949_v11 = vrot.slane %v7661_v52, %v10902_v7 }
 0x32b   : > { %5410 = vst [vmem:[%s9763_s28 + $0xb0] sm:$0xff] %v5402_v32  ;;  %5409 = vst [vmem:[%s9763_s28 + $0xa8] sm:$0xff] %v5401_v9  ;;  %v5397_v55 = vadd.f32 %v5389_v43, %v5345_v39  ;;  %v5347_v2 = vadd.f32 %v5339_v45, %v5294_v24  ;;  %v5953_v42 = vrot.slane %v7661_v52, %v10905_v61  ;;  %v7662_v45 = vld [vmem:[%s10755_s3 + $0x60] sm:$0x77] }
 0x32c   : > { %5411 = vst [vmem:[%s9763_s28 + $0xb8] sm:$0xff] %v5403_v13  ;;  %v5404_v57 = vmax.f32 %v5396_v41, 0.0  ;;  %v5398_v21 = vadd.f32 %v5390_v29, %v5346_v35  ;;  %v5941_v4 = vrot.slane %v7662_v45, %v10902_v7  ;;  %v6157_v49 = vrot.slane %v7661_v52, %v10910_v0 }
 0x32d   : > { %v5405_v46 = vmax.f32 %v5397_v55, 0.0  ;;  %v5399_v17 = vadd.f32 %v5391_v38, %v5347_v2  ;;  %v5945_v3 = vrot.slane %v7662_v45, %v10905_v61  ;;  %v6161_v29 = vrot.slane %v7661_v52, %v10911_v54 }
 0x32e   : > { %5412 = vst [vmem:[%s9763_s28 + $0x1a0] sm:$0xff] %v5404_v57  ;;  %v5406_v50 = vmax.f32 %v5398_v21, 0.0  ;;  %v5969_v44 = vrot.slane %v5949_v11, %v10902_v7  ;;  %v6209_v43 = vrot.slane %v7661_v52, %v9632_v27  ;;  %v5973_v1 = vrot.slane %v5953_v42, %v10902_v7 }
 0x32f   : > { %5413 = vst [vmem:[%s9763_s28 + $0x1a8] sm:$0xff] %v5405_v46  ;;  %v5407_v5 = vmax.f32 %v5399_v17, 0.0  ;;  %v6149_v58 = vrot.slane %v7662_v45, %v10910_v0  ;;  %v6153_v34 = vrot.slane %v7662_v45, %v10911_v54  ;;  %v6213_v38 = vrot.slane %v7661_v52, %v9644_v20 }
 0x330   : > { %5414 = vst [vmem:[%s9763_s28 + $0x1b0] sm:$0xff] %v5406_v50  ;;  %v5961_v53 = vrot.slane %v5941_v4, %v10902_v7  ;;  %v6177_v12 = vrot.slane %v6157_v49, %v10910_v0  ;;  %v6201_v51 = vrot.slane %v7662_v45, %v9632_v27  ;;  %v6205_v63 = vrot.slane %v7662_v45, %v9644_v20 }
 0x331   : > { %5415 = vst [vmem:[%s9763_s28 + $0x1b8] sm:$0xff] %v5407_v5  ;;  %v5965_v47 = vrot.slane %v5945_v3, %v10902_v7  ;;  %v6181_v59 = vrot.slane %v6161_v29, %v10910_v0  ;;  %v6229_v9 = vrot.slane %v6209_v43, %v9632_v27  ;;  %v6169_v13 = vrot.slane %v6149_v58, %v10910_v0 }
 0x332   : > { %v6173_v41 = vrot.slane %v6153_v34, %v10910_v0  ;;  %v6233_v35 = vrot.slane %v6213_v38, %v9632_v27  ;;  %v6221_v57 = vrot.slane %v6201_v51, %v9632_v27  ;;  %v6225_v21 = vrot.slane %v6205_v63, %v9632_v27 }
 0x351   : > { %v5899_v56 = vpop.f32.mrb[96].mxu1 }
 0x352   : > { %v5901_v22 = vpop.f32.mrb[97].mxu1  ;;  %v5976_v32 = vmul.f32 %v5969_v44, %v5899_v56 }
 0x353   : > { %v5977_v24 = vmul.f32 %v5973_v1, %v5901_v22 }
 0x355   : > { %v5905_v31 = vpop.f32.mrb[98].mxu1 }
 0x356   : > { %v5798_v33 = vpop.f32.mrb[96].mxu0  ;;  %v5907_v60 = vpop.f32.mrb[99].mxu1  ;;  %v5980_v50 = vmul.f32 %v5969_v44, %v5905_v31 }
 0x357   : > { %v5800_v14 = vpop.f32.mrb[97].mxu0  ;;  %v5974_v55 = vmul.f32 %v5961_v53, %v5798_v33  ;;  %v5981_v5 = vmul.f32 %v5973_v1, %v5907_v60 }
 0x358   : > { %v5975_v17 = vmul.f32 %v5965_v47, %v5800_v14 }
 0x359   : > { %v5911_v19 = vpop.f32.mrb[100].mxu1 }
 0x35a   : > { %v5804_v30 = vpop.f32.mrb[98].mxu0  ;;  %v5913_v16 = vpop.f32.mrb[101].mxu1  ;;  %v6184_v2 = vmul.f32 %v6177_v12, %v5911_v19 }
 0x35b   : > { %v5806_v28 = vpop.f32.mrb[99].mxu0  ;;  %v6185_v56 = vmul.f32 %v6181_v59, %v5913_v16  ;;  %v5978_v22 = vmul.f32 %v5961_v53, %v5804_v30 }
 0x35c   : > { %v5979_v42 = vmul.f32 %v5965_v47, %v5806_v28 }
 0x35d   : > { %v5917_v6 = vpop.f32.mrb[102].mxu1 }
 0x35e   : > { %v5810_v62 = vpop.f32.mrb[100].mxu0  ;;  %v5919_v37 = vpop.f32.mrb[103].mxu1  ;;  %v6188_v58 = vmul.f32 %v6177_v12, %v5917_v6 }
 0x35f   : > { %v5812_v18 = vpop.f32.mrb[101].mxu0  ;;  %v6182_v3 = vmul.f32 %v6169_v13, %v5810_v62  ;;  %v6189_v34 = vmul.f32 %v6181_v59, %v5919_v37 }
 0x360   : > { %v6183_v29 = vmul.f32 %v6173_v41, %v5812_v18 }
 0x361   : > { %v5923_v23 = vpop.f32.mrb[104].mxu1 }
 0x362   : > { %v5816_v48 = vpop.f32.mrb[102].mxu0  ;;  %v5925_v40 = vpop.f32.mrb[105].mxu1  ;;  %v6236_v45 = vmul.f32 %v6229_v9, %v5923_v23 }
 0x363   : > { %v5818_v15 = vpop.f32.mrb[103].mxu0  ;;  %v6237_v33 = vmul.f32 %v6233_v35, %v5925_v40  ;;  %v6186_v43 = vmul.f32 %v6169_v13, %v5816_v48 }
 0x364   : > { %v6187_v14 = vmul.f32 %v6173_v41, %v5818_v15 }
 0x365   : > { %v5929_v26 = vpop.f32.mrb[106].mxu1 }
 0x366   : > { %v5822_v8 = vpop.f32.mrb[104].mxu0  ;;  %v5931_v39 = vpop.f32.mrb[107].mxu1  ;;  %v6240_v30 = vmul.f32 %v6229_v9, %v5929_v26 }
 0x367   : > { %v5824_v25 = vpop.f32.mrb[105].mxu0  ;;  %v6234_v31 = vmul.f32 %v6221_v57, %v5822_v8  ;;  %v6241_v63 = vmul.f32 %v6233_v35, %v5931_v39 }
 0x368   : > { %v6235_v1 = vmul.f32 %v6225_v21, %v5824_v25 }
 0x369   : > { %v6135_v11 = vpop.f32.mrb[108].mxu1 }
 0x36a   : > { %v5828_v46 = vpop.f32.mrb[106].mxu0  ;;  %v6136_v4 = vadd.f32 %v6135_v11, %v5976_v32  ;;  %v6137_v49 = vpop.f32.mrb[109].mxu1 }
 0x36b   : > { %v5830_v52 = vpop.f32.mrb[107].mxu0  ;;  %v6138_v19 = vadd.f32 %v6137_v49, %v5977_v24  ;;  %v6238_v6 = vmul.f32 %v6221_v57, %v5828_v46 }
 0x36c   : > { %v6192_v51 = vadd.f32 %v6184_v2, %v6136_v4  ;;  %v6239_v9 = vmul.f32 %v6225_v21, %v5830_v52 }
 0x36d   : > { %v6193_v44 = vadd.f32 %v6185_v56, %v6138_v19 }
 0x36e   : > { %v6058_v38 = vpop.f32.mrb[108].mxu0  ;;  %v6244_v28 = vadd.f32 %v6236_v45, %v6192_v51  ;;  %v6141_v53 = vpop.f32.mrb[110].mxu1 }
 0x36f   : > { %v6059_v60 = vadd.f32 %v6058_v38, %v5974_v55  ;;  %v6060_v16 = vpop.f32.mrb[109].mxu0  ;;  %v6245_v18 = vadd.f32 %v6237_v33, %v6193_v44  ;;  %v6142_v40 = vadd.f32 %v6141_v53, %v5980_v50  ;;  %v6143_v48 = vpop.f32.mrb[111].mxu1  ;;  %v6791_v38 = vrot.slane %v10482_v36, %v10902_v7 }
 0x370   : > { %v6061_v23 = vadd.f32 %v6060_v16, %v5975_v17  ;;  %v6252_v37 = vmax.f32 %v6244_v28, 0.0  ;;  %v6144_v8 = vadd.f32 %v6143_v48, %v5981_v5  ;;  %v6803_v16 = vrot.slane %v10488_v10, %v10905_v61 }
 0x371   : > { %v6190_v62 = vadd.f32 %v6182_v3, %v6059_v60  ;;  %v6253_v59 = vmax.f32 %v6245_v18, 0.0  ;;  %v6196_v26 = vadd.f32 %v6188_v58, %v6142_v40  ;;  %v6795_v60 = vrot.slane %v10482_v36, %v10905_v61 }
 0x372   : > { %v6191_v12 = vadd.f32 %v6183_v29, %v6061_v23  ;;  %v6064_v15 = vpop.f32.mrb[110].mxu0  ;;  %6260 = vst [vmem:[%s9763_s28 + $0xd0] sm:$0xff] %v6252_v37  ;;  %v6197_v13 = vadd.f32 %v6189_v34, %v6144_v8  ;;  %v7003_v28 = vrot.slane %v10482_v36, %v10911_v54  ;;  %v7011_v23 = vrot.slane %v10488_v10, %v10911_v54 }
 0x373   : > { %v6242_v47 = vadd.f32 %v6234_v31, %v6190_v62  ;;  %v6065_v25 = vadd.f32 %v6064_v15, %v5978_v22  ;;  %v6066_v32 = vpop.f32.mrb[111].mxu0  ;;  %6261 = vst [vmem:[%s9763_s28 + $0xd8] sm:$0xff] %v6253_v59  ;;  %v6248_v55 = vadd.f32 %v6240_v30, %v6196_v26  ;;  %v6799_v31 = vrot.slane %v10488_v10, %v10902_v7 }
 0x374   : > { %v6243_v39 = vadd.f32 %v6235_v1, %v6191_v12  ;;  %v6067_v24 = vadd.f32 %v6066_v32, %v5979_v42  ;;  %v6249_v46 = vadd.f32 %v6241_v63, %v6197_v13  ;;  %v6999_v1 = vrot.slane %v10482_v36, %v10910_v0 }
 0x375   : > { %v6250_v41 = vmax.f32 %v6242_v47, 0.0  ;;  %v6194_v35 = vadd.f32 %v6186_v43, %v6065_v25  ;;  %v6256_v50 = vmax.f32 %v6248_v55, 0.0  ;;  %v7007_v30 = vrot.slane %v10488_v10, %v10910_v0 }
 0x376   : > { %v6251_v2 = vmax.f32 %v6243_v39, 0.0  ;;  %v6195_v57 = vadd.f32 %v6187_v14, %v6067_v24  ;;  %v6257_v5 = vmax.f32 %v6249_v46, 0.0  ;;  %v7051_v63 = vrot.slane %v10482_v36, %v9632_v27 }
 0x377   : > { %6258 = vst [vmem:[%s9763_s28 + $0xc0] sm:$0xff] %v6250_v41  ;;  %v6246_v17 = vadd.f32 %v6238_v6, %v6194_v35  ;;  %6264 = vst [vmem:[%s9763_s28 + $0x1d0] sm:$0xff] %v6256_v50  ;;  %v6811_v62 = vrot.slane %v6791_v38, %v10902_v7  ;;  %v7059_v18 = vrot.slane %v10488_v10, %v9632_v27 }
 0x378   : > { %6259 = vst [vmem:[%s9763_s28 + $0xc8] sm:$0xff] %v6251_v2  ;;  %v6247_v21 = vadd.f32 %v6239_v9, %v6195_v57  ;;  %6265 = vst [vmem:[%s9763_s28 + $0x1d8] sm:$0xff] %v6257_v5  ;;  %v7055_v48 = vrot.slane %v10482_v36, %v9644_v20  ;;  %v7063_v6 = vrot.slane %v10488_v10, %v9644_v20 }
 0x379   : > { %v6254_v56 = vmax.f32 %v6246_v17, 0.0  ;;  %v6819_v37 = vrot.slane %v6799_v31, %v10902_v7  ;;  %v6815_v54 = vrot.slane %v6795_v60, %v10902_v7  ;;  %v6823_v12 = vrot.slane %v6803_v16, %v10902_v7 }
 0x37a   : > { %v6255_v52 = vmax.f32 %v6247_v21, 0.0  ;;  %v7019_v8 = vrot.slane %v6999_v1, %v10910_v0  ;;  %v7027_v47 = vrot.slane %v7007_v30, %v10910_v0  ;;  %v7023_v59 = vrot.slane %v7003_v28, %v10910_v0 }
 0x37b   : > { %6262 = vst [vmem:[%s9763_s28 + $0x1c0] sm:$0xff] %v6254_v56  ;;  %v7031_v25 = vrot.slane %v7011_v23, %v10910_v0  ;;  %v7071_v36 = vrot.slane %v7051_v63, %v9632_v27  ;;  %v7079_v20 = vrot.slane %v7059_v18, %v9632_v27  ;;  %v7075_v10 = vrot.slane %v7055_v48, %v9632_v27 }
 0x37c   : > { %6263 = vst [vmem:[%s9763_s28 + $0x1c8] sm:$0xff] %v6255_v52  ;;  %v7083_v9 = vrot.slane %v7063_v6, %v9632_v27 }
 0x397   : > { %v6648_v11 = vpop.f32.mrb[112].mxu0 }
 0x398   : > { %v6650_v42 = vpop.f32.mrb[113].mxu0  ;;  %v6824_v32 = vmul.f32 %v6811_v62, %v6648_v11 }
 0x399   : > { %v6749_v22 = vpop.f32.mrb[112].mxu1  ;;  %v6825_v13 = vmul.f32 %v6815_v54, %v6650_v42 }
 0x39a   : > { %v6751_v45 = vpop.f32.mrb[113].mxu1  ;;  %v6826_v24 = vmul.f32 %v6819_v37, %v6749_v22 }
 0x39b   : > { %v6827_v41 = vmul.f32 %v6823_v12, %v6751_v45 }
 0x39c   : > { %v6654_v4 = vpop.f32.mrb[114].mxu0 }
 0x39d   : > { %v6755_v49 = vpop.f32.mrb[114].mxu1  ;;  %v6656_v3 = vpop.f32.mrb[115].mxu0  ;;  %v6828_v35 = vmul.f32 %v6811_v62, %v6654_v4 }
 0x39e   : > { %v6757_v29 = vpop.f32.mrb[115].mxu1  ;;  %v6830_v2 = vmul.f32 %v6819_v37, %v6755_v49  ;;  %v6829_v57 = vmul.f32 %v6815_v54, %v6656_v3 }
 0x39f   : > { %v6831_v0 = vmul.f32 %v6823_v12, %v6757_v29 }
 0x3a0   : > { %v6660_v33 = vpop.f32.mrb[116].mxu0 }
 0x3a1   : > { %v6761_v19 = vpop.f32.mrb[116].mxu1  ;;  %v6662_v43 = vpop.f32.mrb[117].mxu0  ;;  %v7032_v46 = vmul.f32 %v7019_v8, %v6660_v33 }
 0x3a2   : > { %v6763_v58 = vpop.f32.mrb[117].mxu1  ;;  %v7034_v17 = vmul.f32 %v7027_v47, %v6761_v19  ;;  %v7033_v50 = vmul.f32 %v7023_v59, %v6662_v43 }
 0x3a3   : > { %v7035_v21 = vmul.f32 %v7031_v25, %v6763_v58 }
 0x3a4   : > { %v6666_v34 = vpop.f32.mrb[118].mxu0 }
 0x3a5   : > { %v6767_v51 = vpop.f32.mrb[118].mxu1  ;;  %v6668_v14 = vpop.f32.mrb[119].mxu0  ;;  %v7036_v5 = vmul.f32 %v7019_v8, %v6666_v34 }
 0x3a6   : > { %v6769_v44 = vpop.f32.mrb[119].mxu1  ;;  %v7038_v52 = vmul.f32 %v7027_v47, %v6767_v51  ;;  %v7037_v11 = vmul.f32 %v7023_v59, %v6668_v14 }
 0x3a7   : > { %v7039_v38 = vmul.f32 %v7031_v25, %v6769_v44 }
 0x3a8   : > { %v6672_v53 = vpop.f32.mrb[120].mxu0 }
 0x3a9   : > { %v6773_v61 = vpop.f32.mrb[120].mxu1  ;;  %v6674_v40 = vpop.f32.mrb[121].mxu0  ;;  %v7084_v22 = vmul.f32 %v7071_v36, %v6672_v53 }
 0x3aa   : > { %v6775_v15 = vpop.f32.mrb[121].mxu1  ;;  %v7086_v42 = vmul.f32 %v7079_v20, %v6773_v61  ;;  %v7085_v49 = vmul.f32 %v7075_v10, %v6674_v40 }
 0x3ab   : > { %v7087_v3 = vmul.f32 %v7083_v9, %v6775_v15 }
 0x3ac   : > { %v6678_v26 = vpop.f32.mrb[122].mxu0 }
 0x3ad   : > { %v6779_v7 = vpop.f32.mrb[122].mxu1  ;;  %v6680_v39 = vpop.f32.mrb[123].mxu0  ;;  %v7088_v19 = vmul.f32 %v7071_v36, %v6678_v26 }
 0x3ae   : > { %v6781_v55 = vpop.f32.mrb[123].mxu1  ;;  %v7090_v43 = vmul.f32 %v7079_v20, %v6779_v7  ;;  %v7089_v51 = vmul.f32 %v7075_v10, %v6680_v39 }
 0x3af   : > { %v7091_v47 = vmul.f32 %v7083_v9, %v6781_v55 }
 0x3b0   : > { %v6908_v56 = vpop.f32.mrb[124].mxu0 }
 0x3b1   : > { %v6909_v27 = vadd.f32 %v6908_v56, %v6824_v32  ;;  %v6910_v31 = vpop.f32.mrb[125].mxu0  ;;  %v6985_v60 = vpop.f32.mrb[124].mxu1 }
 0x3b2   : > { %v6911_v45 = vadd.f32 %v6910_v31, %v6825_v13  ;;  %v6986_v4 = vadd.f32 %v6985_v60, %v6826_v24  ;;  %v6987_v16 = vpop.f32.mrb[125].mxu1 }
 0x3b3   : > { %v7040_v29 = vadd.f32 %v7032_v46, %v6909_v27  ;;  %v6988_v33 = vadd.f32 %v6987_v16, %v6827_v41 }
 0x3b4   : > { %v7041_v58 = vadd.f32 %v7033_v50, %v6911_v45  ;;  %v7042_v34 = vadd.f32 %v7034_v17, %v6986_v4  ;;  %v6914_v1 = vpop.f32.mrb[126].mxu0 }
 0x3b5   : > { %v7092_v14 = vadd.f32 %v7084_v22, %v7040_v29  ;;  %v7043_v44 = vadd.f32 %v7035_v21, %v6988_v33  ;;  %v6915_v30 = vadd.f32 %v6914_v1, %v6828_v35  ;;  %v6916_v28 = vpop.f32.mrb[127].mxu0  ;;  %v6991_v23 = vpop.f32.mrb[126].mxu1 }
 0x3b6   : > { %v7093_v53 = vadd.f32 %v7085_v49, %v7041_v58  ;;  %v7094_v63 = vadd.f32 %v7086_v42, %v7042_v34  ;;  %v6917_v62 = vadd.f32 %v6916_v28, %v6829_v57  ;;  %v6992_v61 = vadd.f32 %v6991_v23, %v6830_v2  ;;  %v6993_v18 = vpop.f32.mrb[127].mxu1 }
 0x3b7   : > { %v7100_v40 = vmax.f32 %v7092_v14, 0.0  ;;  %v7095_v48 = vadd.f32 %v7087_v3, %v7043_v44  ;;  %v7044_v6 = vadd.f32 %v7036_v5, %v6915_v30  ;;  %v6994_v37 = vadd.f32 %v6993_v18, %v6831_v0 }
 0x3b8   : > { %v7101_v54 = vmax.f32 %v7093_v53, 0.0  ;;  %v7102_v12 = vmax.f32 %v7094_v63, 0.0  ;;  %v7045_v15 = vadd.f32 %v7037_v11, %v6917_v62  ;;  %v7046_v8 = vadd.f32 %v7038_v52, %v6992_v61 }
 0x3b9   : > { %7108 = vst [vmem:[%s9763_s28 + $0xe0] sm:$0xff] %v7100_v40  ;;  %v7103_v59 = vmax.f32 %v7095_v48, 0.0  ;;  %v7096_v25 = vadd.f32 %v7088_v19, %v7044_v6  ;;  %v7047_v36 = vadd.f32 %v7039_v38, %v6994_v37 }
 0x3ba   : > { %7109 = vst [vmem:[%s9763_s28 + $0xe8] sm:$0xff] %v7101_v54  ;;  %7110 = vst [vmem:[%s9763_s28 + $0xf0] sm:$0xff] %v7102_v12  ;;  %v7097_v26 = vadd.f32 %v7089_v51, %v7045_v15  ;;  %v7098_v32 = vadd.f32 %v7090_v43, %v7046_v8 }
 0x3bb   : > { %7111 = vst [vmem:[%s9763_s28 + $0xf8] sm:$0xff] %v7103_v59  ;;  %v7104_v20 = vmax.f32 %v7096_v25, 0.0  ;;  %v7099_v10 = vadd.f32 %v7091_v47, %v7047_v36 }
 0x3bc   : > { %v7105_v7 = vmax.f32 %v7097_v26, 0.0  ;;  %v7106_v39 = vmax.f32 %v7098_v32, 0.0 }
 0x3bd   : > { %7112 = vst [vmem:[%s9763_s28 + $0x1e0] sm:$0xff] %v7104_v20  ;;  %v7107_v24 = vmax.f32 %v7099_v10, 0.0 }
 0x3be   : > { %7113 = vst [vmem:[%s9763_s28 + $0x1e8] sm:$0xff] %v7105_v7  ;;  %7114 = vst [vmem:[%s9763_s28 + $0x1f0] sm:$0xff] %v7106_v39 }
 0x3bf   : > { %7115 = vst [vmem:[%s9763_s28 + $0x1f8] sm:$0xff] %v7107_v24 }
 0x3c0 PF: > { %s14_s15 = sadd.s32 1, %s7669_s15  }
 0x3c1   : > { %p11_p4 = scmp.ge.s32.totalorder %s14_s15, 4  }
 0x3c3   :  { %13 = sbr.rel (!%p11_p4) target bundleno = 1 (0x1), region = 66 }

</bundles_post_ra>
